<compile_context>
chip_gen: v6e
topology: v6e:2x2x1
jax: 0.10.0
libtpu: 0.0.40
codegen_flags: <defaults>
</compile_context>

<pallas_src>
import functools

import jax
import jax.numpy as jnp
from jax.experimental import pallas as pl
from jax.experimental.pallas import tpu as pltpu

EPS = 1e-5
NEG_SLOPE = 0.2
KSIZE = 4          # all convs in the UNet are 4x4
LANES = 128


def _round_up(x, m):
    return (x + m - 1) // m * m


def _pick_tile(total, cap):
    """Largest multiple of 128 that divides `total` and is <= cap."""
    t = min(cap, total)
    while total % t:
        t -= LANES
    return t


def _pad_to(a, rows, cols, dtype):
    out = jnp.zeros((rows, cols), dtype)
    return out.at[:a.shape[0], :a.shape[1]].set(a.astype(dtype))


# ---------------------------------------------------------------------------
# Pallas kernels
# ---------------------------------------------------------------------------
def _gemm_kernel(p_ref, w_ref, b_ref, o_ref, acc_ref, *, in_act, out_act):
    """Tiled GEMM with fused input activation and bias/tanh epilogue.

    p_ref : [tm, tk]  bf16 im2col patches (pre-activation values)
    w_ref : [tk, 128] bf16 weights (Cout zero-padded to 128 lanes)
    b_ref : [1, 128]  f32 bias (zeros when layer has no bias)
    o_ref : [tm, 128] f32 output
    acc_ref: [tm, 128] f32 VMEM accumulator
    """
    kk = pl.program_id(1)

    @pl.when(kk == 0)
    def _():
        acc_ref[...] = jnp.zeros_like(acc_ref)

    p = p_ref[...]
    if in_act == "lrelu":
        pf = p.astype(jnp.float32)
        p = jnp.where(pf > 0, pf, NEG_SLOPE * pf).astype(jnp.bfloat16)
    elif in_act == "relu":
        p = jnp.where(p > 0, p, jnp.zeros_like(p))     # compare+select only

    acc_ref[...] += jnp.dot(p, w_ref[...], preferred_element_type=jnp.float32)

    @pl.when(kk == pl.num_programs(1) - 1)
    def _():
        y = acc_ref[...] + b_ref[...]
        if out_act == "tanh":
            y = jnp.tanh(y)
        o_ref[...] = y.astype(o_ref.dtype)


def _bn_stats_kernel(y_ref, sum_ref, ssq_ref):
    """Accumulate per-channel sum / sum-of-squares across M tiles."""
    @pl.when(pl.program_id(0) == 0)
    def _():
        sum_ref[...] = jnp.zeros_like(sum_ref)
        ssq_ref[...] = jnp.zeros_like(ssq_ref)

    y = y_ref[...]
    sum_ref[...] += jnp.sum(y, axis=0, keepdims=True)
    ssq_ref[...] += jnp.sum(y * y, axis=0, keepdims=True)


def _bn_apply_kernel(y_ref, sum_ref, ssq_ref, g_ref, b_ref, o_ref, *, inv_m):
    mean = sum_ref[...] * inv_m
    var = ssq_ref[...] * inv_m - mean * mean
    scale = g_ref[...] * jax.lax.rsqrt(var + EPS)
    shift = b_ref[...] - mean * scale
    o_ref[...] = (y_ref[...] * scale + shift).astype(o_ref.dtype)


# ---------------------------------------------------------------------------
# Kernel wrappers
# ---------------------------------------------------------------------------
def _pallas_gemm(patches, wmat, bias, *, in_act, out_act):
    """patches [M, K] @ wmat [K, Cout] (+bias, +act). Returns padded [Mp, 128]."""
    m, k = patches.shape
    cout = wmat.shape[1]
    kp = _round_up(k, LANES)
    cp = _round_up(cout, LANES)
    tm = min(512, _round_up(m, 8))
    mp = _round_up(m, tm)
    tk = _pick_tile(kp, 512)

    p = _pad_to(patches, mp, kp, jnp.bfloat16)
    wq = _pad_to(wmat, kp, cp, jnp.bfloat16)
    bq = _pad_to(bias.reshape(1, -1), 1, cp, jnp.float32)

    flops = 2 * mp * kp * cp
    bytes_accessed = mp * kp * 2 + kp * cp * 2 + mp * cp * 4

    return pl.pallas_call(
        functools.partial(_gemm_kernel, in_act=in_act, out_act=out_act),
        out_shape=jax.ShapeDtypeStruct((mp, cp), jnp.float32),
        grid=(mp // tm, kp // tk),
        in_specs=[
            pl.BlockSpec((tm, tk), lambda i, kk: (i, kk)),
            pl.BlockSpec((tk, cp), lambda i, kk: (kk, 0)),
            pl.BlockSpec((1, cp), lambda i, kk: (0, 0)),
        ],
        out_specs=pl.BlockSpec((tm, cp), lambda i, kk: (i, 0)),
        scratch_shapes=[pltpu.VMEM((tm, cp), jnp.float32)],
        compiler_params=pltpu.CompilerParams(
            dimension_semantics=("parallel", "arbitrary"),
            vmem_limit_bytes=32 * 1024 * 1024),
        cost_estimate=pl.CostEstimate(flops=flops, transcendentals=0,
                                      bytes_accessed=bytes_accessed),
    )(p, wq, bq)


def _pallas_batchnorm(y_pad, m_true, cout, gamma, beta):
    """Training-mode BatchNorm over the first `m_true` rows of y_pad [Mp,128].

    Padded rows are exact zeros (no bias on BN layers) so they contribute
    nothing to sum / sum-of-squares; stats divide by the true M.
    """
    mp, cp = y_pad.shape
    tb = min(512, mp)

    s, sq = pl.pallas_call(
        _bn_stats_kernel,
        out_shape=(jax.ShapeDtypeStruct((1, cp), jnp.float32),
                   jax.ShapeDtypeStruct((1, cp), jnp.float32)),
        grid=(mp // tb,),
        in_specs=[pl.BlockSpec((tb, cp), lambda i: (i, 0))],
        out_specs=(pl.BlockSpec((1, cp), lambda i: (0, 0)),
                   pl.BlockSpec((1, cp), lambda i: (0, 0))),
        compiler_params=pltpu.CompilerParams(
            dimension_semantics=("arbitrary",)),
    )(y_pad)

    g = _pad_to(gamma.reshape(1, -1), 1, cp, jnp.float32)
    b = _pad_to(beta.reshape(1, -1), 1, cp, jnp.float32)

    return pl.pallas_call(
        functools.partial(_bn_apply_kernel, inv_m=1.0 / float(m_true)),
        out_shape=jax.ShapeDtypeStruct((mp, cp), jnp.float32),
        grid=(mp // tb,),
        in_specs=[
            pl.BlockSpec((tb, cp), lambda i: (i, 0)),
            pl.BlockSpec((1, cp), lambda i: (0, 0)),
            pl.BlockSpec((1, cp), lambda i: (0, 0)),
            pl.BlockSpec((1, cp), lambda i: (0, 0)),
            pl.BlockSpec((1, cp), lambda i: (0, 0)),
        ],
        out_specs=pl.BlockSpec((tb, cp), lambda i: (i, 0)),
        compiler_params=pltpu.CompilerParams(
            dimension_semantics=("parallel",)),
    )(y_pad, s, sq, g, b)


# ---------------------------------------------------------------------------
# Conv lowering glue (channels-last)
# ---------------------------------------------------------------------------
def _im2col_nhwc(x, stride, pad):
    """x: [N, H, W, C] -> patches [N*OH*OW, K*K*C] ordered (kh, kw, c)."""
    n, h, w, c = x.shape
    xp = jnp.pad(x, ((0, 0), (pad, pad), (pad, pad), (0, 0)))
    oh = (h + 2 * pad - KSIZE) // stride + 1
    ow = (w + 2 * pad - KSIZE) // stride + 1
    cols = []
    for i in range(KSIZE):
        for j in range(KSIZE):
            cols.append(xp[:, i:i + stride * oh:stride,
                           j:j + stride * ow:stride, :])
    patches = jnp.stack(cols, axis=3)                 # [N, OH, OW, K*K, C]
    return patches.reshape(n * oh * ow, KSIZE * KSIZE * c), oh, ow


def _zero_stuff2x(x):
    """Insert zeros between pixels (stride-2 transposed-conv upsampling)."""
    n, h, w, c = x.shape
    y = jnp.zeros((n, 2 * h - 1, 2 * w - 1, c), x.dtype)
    return y.at[:, ::2, ::2, :].set(x)


def conv_block(x, w, b, *, transpose, in_act, out_act, bn):
    """activation -> Conv2d/ConvTranspose2d -> [BatchNorm].   x: [N,H,W,Cin] f32.

    w : Conv2d           -> [Cout, Cin, 4, 4]
        ConvTranspose2d  -> [Cin, Cout, 4, 4]
    """
    n, _, _, cin = x.shape
    if transpose:
        cout = w.shape[1]
        x = _zero_stuff2x(x)
        # convT(k4,s2,p1) == conv(k4,s1,p2) on zero-stuffed input, flipped kernel
        wmat = jnp.transpose(w[:, :, ::-1, ::-1], (2, 3, 0, 1))
        stride, pad = 1, KSIZE - 1 - 1
    else:
        cout = w.shape[0]
        wmat = jnp.transpose(w, (2, 3, 1, 0))          # [KH, KW, Cin, Cout]
        stride, pad = 2, 1
    wmat = wmat.reshape(KSIZE * KSIZE * cin, cout)

    patches, oh, ow = _im2col_nhwc(x, stride, pad)
    m = patches.shape[0]

    y_pad = _pallas_gemm(patches, wmat, b, in_act=in_act, out_act=out_act)
    if bn is not None:
        y_pad = _pallas_batchnorm(y_pad, m, cout, bn[0], bn[1])
    return y_pad[:m, :cout].reshape(n, oh, ow, cout)


# ---------------------------------------------------------------------------
# UnetGenerator (params + forward)
# ---------------------------------------------------------------------------
def make_unet_params(input_nc=4, output_nc=4, ngf=8, num_downs=5, seed=0):
    assert input_nc == output_nc
    key = jax.random.PRNGKey(seed)

    def nkey():
        nonlocal key
        key, sub = jax.random.split(key)
        return sub

    # (outer_nc, inner_nc) per block, outermost -> innermost
    cfg = [(output_nc, ngf), (ngf, 2 * ngf), (2 * ngf, 4 * ngf),
           (4 * ngf, 8 * ngf)] + [(8 * ngf, 8 * ngf)] * (num_downs - 4)
    nd = len(cfg)

    down, up = [], []
    for i, (o, c) in enumerate(cfg):
        # down: Conv2d(outer -> inner, k4 s2 p1, bias=False)
        w_d = 0.05 * jax.random.normal(nkey(), (c, o, KSIZE, KSIZE), jnp.float32)
        bn_d = None
        if 0 < i < nd - 1:                     # not outermost / not innermost
            bn_d = (jnp.ones((c,), jnp.float32), jnp.zeros((c,), jnp.float32))
        down.append(dict(w=w_d, b=jnp.zeros((c,), jnp.float32), bn=bn_d))

        # up: ConvTranspose2d(inner[*2] -> outer, k4 s2 p1)
        cin_u = c if i == nd - 1 else 2 * c
        w_u = 0.05 * jax.random.normal(nkey(), (cin_u, o, KSIZE, KSIZE),
                                       jnp.float32)
        if i == 0:                             # outermost: bias=True, Tanh, no BN
            b_u = 0.01 * jax.random.normal(nkey(), (o,), jnp.float32)
            bn_u = None
        else:
            b_u = jnp.zeros((o,), jnp.float32)
            bn_u = (jnp.ones((o,), jnp.float32), jnp.zeros((o,), jnp.float32))
        up.append(dict(w=w_u, b=b_u, bn=bn_u))
    return dict(down=down, up=up)


def unet_forward(x_nhwc, params):
    down, up = params["down"], params["up"]
    nd = len(down)
    skips = []
    h = x_nhwc
    # encoder
    for i, pd in enumerate(down):
        skips.append(h)                        # block input, used for skip concat
        h = conv_block(h, pd["w"], pd["b"], transpose=False,
                       in_act=("none" if i == 0 else "lrelu"),
                       out_act="none", bn=pd["bn"])
    # decoder
    for i in range(nd - 1, -1, -1):
        pu = up[i]
        h = conv_block(h, pu["w"], pu["b"], transpose=True,
                       in_act="relu",
                       out_act=("tanh" if i == 0 else "none"),
                       bn=pu["bn"])
        if i > 0:                              # UnetSkipConnectionBlock concat
            h = jnp.concatenate([h, skips[i]], axis=-1)
    return h


if __name__ == "__main__":
    # num_downs=5 requires spatial >= 2^5 = 32 (innermost reaches 1x1).
    key = jax.random.PRNGKey(0)
    x = jax.random.normal(key, (2, 4, 32, 32), jnp.float32)    # NCHW like PyTorch

    params = make_unet_params(input_nc=4, output_nc=4, ngf=8, num_downs=5, seed=0)

    @jax.jit
    def fwd(inp):
        h = jnp.transpose(inp, (0, 2, 3, 1))     # NCHW -> NHWC (channels on lanes)
        out = unet_forward(h, params)
        return jnp.transpose(out, (0, 3, 1, 2))  # back to NCHW

    out = fwd(x)
    jax.block_until_ready(out)

    assert out.shape == (2, 4, 32, 32), out.shape
    assert out.dtype == jnp.float32
    assert bool(jnp.all(jnp.isfinite(out)))
    assert bool(jnp.all(jnp.abs(out) <= 1.0 + 1e-6))   # Tanh output range
    print("KERNEL_OK")
</pallas_src>

<mosaic_0001>
module attributes {stable_mosaic.version = 11 : i64} {
  func.func @_gemm_kernel(%arg0: i32, %arg1: i32, %arg2: memref<512x128xbf16, #tpu.memory_space<vmem>>, %arg3: memref<128x128xbf16, #tpu.memory_space<vmem>>, %arg4: memref<1x128xf32, #tpu.memory_space<vmem>>, %arg5: memref<512x128xf32, #tpu.memory_space<vmem>>, %arg6: memref<512x128xf32, #tpu.memory_space<vmem>>) attributes {dimension_semantics = [#tpu.dimension_semantics<parallel>, #tpu.dimension_semantics<arbitrary>], iteration_bounds = array<i64: 1, 1>, scalar_prefetch = 0 : i64, scratch_operands = 1 : i64, tpu.core_type = #tpu.core_type<tc>, window_params = [{transform_indices = @transform_0, window_bounds = array<i64: 512, 128>}, {transform_indices = @transform_1, window_bounds = array<i64: 128, 128>}, {pipeline_mode = #tpu.pipeline_mode<synchronous>, transform_indices = @transform_2, window_bounds = array<i64: 1, 128>}, {transform_indices = @transform_3, window_bounds = array<i64: 512, 128>}]} {
    %c0_i32 = arith.constant 0 : i32
    %0 = arith.cmpi eq, %arg1, %c0_i32 : i32
    %1 = arith.extui %0 : i1 to i32
    %c0_i32_0 = arith.constant 0 : i32
    %2 = arith.cmpi ne, %1, %c0_i32_0 : i32
    scf.if %2 {
      %cst_10 = arith.constant 0.000000e+00 : f32
      %12 = vector.broadcast %cst_10 : f32 to vector<512x128xf32>
      %c0_11 = arith.constant 0 : index
      %c0_12 = arith.constant 0 : index
      %13 = vector.load %arg6[%c0_11, %c0_12] : memref<512x128xf32, #tpu.memory_space<vmem>>, vector<512x128xf32>
      tpu.vector_store %arg6[%c0_11, %c0_12], %12 {strides = array<i32>} : memref<512x128xf32, #tpu.memory_space<vmem>>, vector<512x128xf32>,
    } else {
    }
    %c0 = arith.constant 0 : index
    %c0_1 = arith.constant 0 : index
    %3 = vector.load %arg2[%c0, %c0_1] : memref<512x128xbf16, #tpu.memory_space<vmem>>, vector<512x128xbf16>
    %c0_2 = arith.constant 0 : index
    %c0_3 = arith.constant 0 : index
    %4 = vector.load %arg6[%c0_2, %c0_3] : memref<512x128xf32, #tpu.memory_space<vmem>>, vector<512x128xf32>
    %c0_4 = arith.constant 0 : index
    %c0_5 = arith.constant 0 : index
    %5 = vector.load %arg3[%c0_4, %c0_5] : memref<128x128xbf16, #tpu.memory_space<vmem>>, vector<128x128xbf16>
    %cst = arith.constant dense<0.000000e+00> : vector<512x128xf32>
    %6 = tpu.matmul %3, %5, %cst {dimension_numbers = #tpu.dot_dimension_numbers<[1], [0], [0], [1], [0, 0, 1, 1], [], []>} : vector<512x128xbf16>, vector<128x128xbf16>, vector<512x128xf32> -> vector<512x128xf32>
    %7 = arith.addf %4, %6 : vector<512x128xf32>
    %c0_6 = arith.constant 0 : index
    %c0_7 = arith.constant 0 : index
    %8 = vector.load %arg6[%c0_6, %c0_7] : memref<512x128xf32, #tpu.memory_space<vmem>>, vector<512x128xf32>
    tpu.vector_store %arg6[%c0_6, %c0_7], %7 {strides = array<i32>} : memref<512x128xf32, #tpu.memory_space<vmem>>, vector<512x128xf32>,
    %c0_i32_8 = arith.constant 0 : i32
    %9 = arith.cmpi eq, %arg1, %c0_i32_8 : i32
    %10 = arith.extui %9 : i1 to i32
    %c0_i32_9 = arith.constant 0 : i32
    %11 = arith.cmpi ne, %10, %c0_i32_9 : i32
    scf.if %11 {
      %c0_10 = arith.constant 0 : index
      %c0_11 = arith.constant 0 : index
      %12 = vector.load %arg6[%c0_10, %c0_11] : memref<512x128xf32, #tpu.memory_space<vmem>>, vector<512x128xf32>
      %c0_12 = arith.constant 0 : index
      %c0_13 = arith.constant 0 : index
      %13 = vector.load %arg4[%c0_12, %c0_13] : memref<1x128xf32, #tpu.memory_space<vmem>>, vector<1x128xf32>
      %14 = vector.broadcast %13 : vector<1x128xf32> to vector<512x128xf32>
      %15 = arith.addf %12, %14 : vector<512x128xf32>
      %c0_14 = arith.constant 0 : index
      %c0_15 = arith.constant 0 : index
      %16 = vector.load %arg5[%c0_14, %c0_15] : memref<512x128xf32, #tpu.memory_space<vmem>>, vector<512x128xf32>
      tpu.vector_store %arg5[%c0_14, %c0_15], %15 {strides = array<i32>} : memref<512x128xf32, #tpu.memory_space<vmem>>, vector<512x128xf32>,
    } else {
    }
    return
  }
  func.func @transform_0(%arg0: i32, %arg1: i32) -> (i32, i32) {
    %c0_i32 = arith.constant 0 : i32
    return %arg0, %arg1 : i32, i32
  }
  func.func @transform_1(%arg0: i32, %arg1: i32) -> (i32, i32) {
    %c0_i32 = arith.constant 0 : i32
    %c0_i32_0 = arith.constant 0 : i32
    return %arg1, %c0_i32 : i32, i32
  }
  func.func @transform_2(%arg0: i32, %arg1: i32) -> (i32, i32) {
    %c0_i32 = arith.constant 0 : i32
    %c0_i32_0 = arith.constant 0 : i32
    %c0_i32_1 = arith.constant 0 : i32
    return %c0_i32, %c0_i32_0 : i32, i32
  }
  func.func @transform_3(%arg0: i32, %arg1: i32) -> (i32, i32) {
    %c0_i32 = arith.constant 0 : i32
    %c0_i32_0 = arith.constant 0 : i32
    return %arg0, %c0_i32 : i32, i32
  }
}

module attributes {stable_mosaic.version = 11 : i64} {
  func.func @_gemm_kernel(%arg0: i32, %arg1: i32, %arg2: memref<128x128xbf16, #tpu.memory_space<vmem>>, %arg3: memref<128x128xbf16, #tpu.memory_space<vmem>>, %arg4: memref<1x128xf32, #tpu.memory_space<vmem>>, %arg5: memref<128x128xf32, #tpu.memory_space<vmem>>, %arg6: memref<128x128xf32, #tpu.memory_space<vmem>>) attributes {dimension_semantics = [#tpu.dimension_semantics<parallel>, #tpu.dimension_semantics<arbitrary>], iteration_bounds = array<i64: 1, 1>, scalar_prefetch = 0 : i64, scratch_operands = 1 : i64, tpu.core_type = #tpu.core_type<tc>, window_params = [{transform_indices = @transform_0, window_bounds = array<i64: 128, 128>}, {transform_indices = @transform_1, window_bounds = array<i64: 128, 128>}, {pipeline_mode = #tpu.pipeline_mode<synchronous>, transform_indices = @transform_2, window_bounds = array<i64: 1, 128>}, {transform_indices = @transform_3, window_bounds = array<i64: 128, 128>}]} {
    %c0_i32 = arith.constant 0 : i32
    %0 = arith.cmpi eq, %arg1, %c0_i32 : i32
    %1 = arith.extui %0 : i1 to i32
    %c0_i32_0 = arith.constant 0 : i32
    %2 = arith.cmpi ne, %1, %c0_i32_0 : i32
    scf.if %2 {
      %cst_12 = arith.constant 0.000000e+00 : f32
      %19 = vector.broadcast %cst_12 : f32 to vector<128x128xf32>
      %c0_13 = arith.constant 0 : index
      %c0_14 = arith.constant 0 : index
      %20 = vector.load %arg6[%c0_13, %c0_14] : memref<128x128xf32, #tpu.memory_space<vmem>>, vector<128x128xf32>
      tpu.vector_store %arg6[%c0_13, %c0_14], %19 {strides = array<i32>} : memref<128x128xf32, #tpu.memory_space<vmem>>, vector<128x128xf32>,
    } else {
    }
    %c0 = arith.constant 0 : index
    %c0_1 = arith.constant 0 : index
    %3 = vector.load %arg2[%c0, %c0_1] : memref<128x128xbf16, #tpu.memory_space<vmem>>, vector<128x128xbf16>
    %4 = arith.extf %3 : vector<128x128xbf16> to vector<128x128xf32>
    %cst = arith.constant 0.000000e+00 : f32
    %5 = vector.broadcast %cst : f32 to vector<128x128xf32>
    %6 = arith.cmpf ogt, %4, %5 : vector<128x128xf32>
    %cst_2 = arith.constant 2.000000e-01 : f32
    %7 = vector.broadcast %cst_2 : f32 to vector<128x128xf32>
    %8 = arith.mulf %7, %4 : vector<128x128xf32>
    %9 = arith.select %6, %4, %8 : vector<128x128xi1>, vector<128x128xf32>
    %10 = arith.truncf %9 : vector<128x128xf32> to vector<128x128xbf16>
    %c0_3 = arith.constant 0 : index
    %c0_4 = arith.constant 0 : index
    %11 = vector.load %arg6[%c0_3, %c0_4] : memref<128x128xf32, #tpu.memory_space<vmem>>, vector<128x128xf32>
    %c0_5 = arith.constant 0 : index
    %c0_6 = arith.constant 0 : index
    %12 = vector.load %arg3[%c0_5, %c0_6] : memref<128x128xbf16, #tpu.memory_space<vmem>>, vector<128x128xbf16>
    %cst_7 = arith.constant dense<0.000000e+00> : vector<128x128xf32>
    %13 = tpu.matmul %10, %12, %cst_7 {dimension_numbers = #tpu.dot_dimension_numbers<[1], [0], [0], [1], [0, 0, 1, 1], [], []>} : vector<128x128xbf16>, vector<128x128xbf16>, vector<128x128xf32> -> vector<128x128xf32>
    %14 = arith.addf %11, %13 : vector<128x128xf32>
    %c0_8 = arith.constant 0 : index
    %c0_9 = arith.constant 0 : index
    %15 = vector.load %arg6[%c0_8, %c0_9] : memref<128x128xf32, #tpu.memory_space<vmem>>, vector<128x128xf32>
    tpu.vector_store %arg6[%c0_8, %c0_9], %14 {strides = array<i32>} : memref<128x128xf32, #tpu.memory_space<vmem>>, vector<128x128xf32>,
    %c0_i32_10 = arith.constant 0 : i32
    %16 = arith.cmpi eq, %arg1, %c0_i32_10 : i32
    %17 = arith.extui %16 : i1 to i32
    %c0_i32_11 = arith.constant 0 : i32
    %18 = arith.cmpi ne, %17, %c0_i32_11 : i32
    scf.if %18 {
      %c0_12 = arith.constant 0 : index
      %c0_13 = arith.constant 0 : index
      %19 = vector.load %arg6[%c0_12, %c0_13] : memref<128x128xf32, #tpu.memory_space<vmem>>, vector<128x128xf32>
      %c0_14 = arith.constant 0 : index
      %c0_15 = arith.constant 0 : index
      %20 = vector.load %arg4[%c0_14, %c0_15] : memref<1x128xf32, #tpu.memory_space<vmem>>, vector<1x128xf32>
      %21 = vector.broadcast %20 : vector<1x128xf32> to vector<128x128xf32>
      %22 = arith.addf %19, %21 : vector<128x128xf32>
      %c0_16 = arith.constant 0 : index
      %c0_17 = arith.constant 0 : index
      %23 = vector.load %arg5[%c0_16, %c0_17] : memref<128x128xf32, #tpu.memory_space<vmem>>, vector<128x128xf32>
      tpu.vector_store %arg5[%c0_16, %c0_17], %22 {strides = array<i32>} : memref<128x128xf32, #tpu.memory_space<vmem>>, vector<128x128xf32>,
    } else {
    }
    return
  }
  func.func @transform_0(%arg0: i32, %arg1: i32) -> (i32, i32) {
    %c0_i32 = arith.constant 0 : i32
    return %arg0, %arg1 : i32, i32
  }
  func.func @transform_1(%arg0: i32, %arg1: i32) -> (i32, i32) {
    %c0_i32 = arith.constant 0 : i32
    %c0_i32_0 = arith.constant 0 : i32
    return %arg1, %c0_i32 : i32, i32
  }
  func.func @transform_2(%arg0: i32, %arg1: i32) -> (i32, i32) {
    %c0_i32 = arith.constant 0 : i32
    %c0_i32_0 = arith.constant 0 : i32
    %c0_i32_1 = arith.constant 0 : i32
    return %c0_i32, %c0_i32_0 : i32, i32
  }
  func.func @transform_3(%arg0: i32, %arg1: i32) -> (i32, i32) {
    %c0_i32 = arith.constant 0 : i32
    %c0_i32_0 = arith.constant 0 : i32
    return %arg0, %c0_i32 : i32, i32
  }
}

module attributes {stable_mosaic.version = 11 : i64} {
  func.func @_bn_stats_kernel(%arg0: i32, %arg1: memref<128x128xf32, #tpu.memory_space<vmem>>, %arg2: memref<1x128xf32, #tpu.memory_space<vmem>>, %arg3: memref<1x128xf32, #tpu.memory_space<vmem>>) attributes {dimension_semantics = [#tpu.dimension_semantics<arbitrary>], iteration_bounds = array<i64: 1>, scalar_prefetch = 0 : i64, scratch_operands = 0 : i64, tpu.core_type = #tpu.core_type<tc>, window_params = [{transform_indices = @transform_0, window_bounds = array<i64: 128, 128>}, {pipeline_mode = #tpu.pipeline_mode<synchronous>, transform_indices = @transform_1, window_bounds = array<i64: 1, 128>}, {pipeline_mode = #tpu.pipeline_mode<synchronous>, transform_indices = @transform_2, window_bounds = array<i64: 1, 128>}]} {
    %c0_i32 = arith.constant 0 : i32
    %0 = arith.cmpi eq, %arg0, %c0_i32 : i32
    %1 = arith.extui %0 : i1 to i32
    %c0_i32_0 = arith.constant 0 : i32
    %2 = arith.cmpi ne, %1, %c0_i32_0 : i32
    scf.if %2 {
      %cst_11 = arith.constant 0.000000e+00 : f32
      %15 = vector.broadcast %cst_11 : f32 to vector<1x128xf32>
      %c0_12 = arith.constant 0 : index
      %c0_13 = arith.constant 0 : index
      %16 = vector.load %arg2[%c0_12, %c0_13] : memref<1x128xf32, #tpu.memory_space<vmem>>, vector<1x128xf32>
      tpu.vector_store %arg2[%c0_12, %c0_13], %15 {strides = array<i32>} : memref<1x128xf32, #tpu.memory_space<vmem>>, vector<1x128xf32>,
      %cst_14 = arith.constant 0.000000e+00 : f32
      %17 = vector.broadcast %cst_14 : f32 to vector<1x128xf32>
      %c0_15 = arith.constant 0 : index
      %c0_16 = arith.constant 0 : index
      %18 = vector.load %arg3[%c0_15, %c0_16] : memref<1x128xf32, #tpu.memory_space<vmem>>, vector<1x128xf32>
      tpu.vector_store %arg3[%c0_15, %c0_16], %17 {strides = array<i32>} : memref<1x128xf32, #tpu.memory_space<vmem>>, vector<1x128xf32>,
    } else {
    }
    %c0 = arith.constant 0 : index
    %c0_1 = arith.constant 0 : index
    %3 = vector.load %arg1[%c0, %c0_1] : memref<128x128xf32, #tpu.memory_space<vmem>>, vector<128x128xf32>
    %c0_2 = arith.constant 0 : index
    %c0_3 = arith.constant 0 : index
    %4 = vector.load %arg2[%c0_2, %c0_3] : memref<1x128xf32, #tpu.memory_space<vmem>>, vector<1x128xf32>
    %cst = arith.constant dense<0.000000e+00> : vector<128xf32>
    %5 = vector.multi_reduction <add>, %3, %cst [0] : vector<128x128xf32> to vector<128xf32>
    %6 = vector.shape_cast %5 : vector<128xf32> to vector<1x128xf32>
    %7 = arith.addf %4, %6 : vector<1x128xf32>
    %c0_4 = arith.constant 0 : index
    %c0_5 = arith.constant 0 : index
    %8 = vector.load %arg2[%c0_4, %c0_5] : memref<1x128xf32, #tpu.memory_space<vmem>>, vector<1x128xf32>
    tpu.vector_store %arg2[%c0_4, %c0_5], %7 {strides = array<i32>} : memref<1x128xf32, #tpu.memory_space<vmem>>, vector<1x128xf32>,
    %c0_6 = arith.constant 0 : index
    %c0_7 = arith.constant 0 : index
    %9 = vector.load %arg3[%c0_6, %c0_7] : memref<1x128xf32, #tpu.memory_space<vmem>>, vector<1x128xf32>
    %10 = arith.mulf %3, %3 : vector<128x128xf32>
    %cst_8 = arith.constant dense<0.000000e+00> : vector<128xf32>
    %11 = vector.multi_reduction <add>, %10, %cst_8 [0] : vector<128x128xf32> to vector<128xf32>
    %12 = vector.shape_cast %11 : vector<128xf32> to vector<1x128xf32>
    %13 = arith.addf %9, %12 : vector<1x128xf32>
    %c0_9 = arith.constant 0 : index
    %c0_10 = arith.constant 0 : index
    %14 = vector.load %arg3[%c0_9, %c0_10] : memref<1x128xf32, #tpu.memory_space<vmem>>, vector<1x128xf32>
    tpu.vector_store %arg3[%c0_9, %c0_10], %13 {strides = array<i32>} : memref<1x128xf32, #tpu.memory_space<vmem>>, vector<1x128xf32>,
    return
  }
  func.func @transform_0(%arg0: i32) -> (i32, i32) {
    %c0_i32 = arith.constant 0 : i32
    %c0_i32_0 = arith.constant 0 : i32
    return %arg0, %c0_i32 : i32, i32
  }
  func.func @transform_1(%arg0: i32) -> (i32, i32) {
    %c0_i32 = arith.constant 0 : i32
    %c0_i32_0 = arith.constant 0 : i32
    %c0_i32_1 = arith.constant 0 : i32
    return %c0_i32, %c0_i32_0 : i32, i32
  }
  func.func @transform_2(%arg0: i32) -> (i32, i32) {
    %c0_i32 = arith.constant 0 : i32
    %c0_i32_0 = arith.constant 0 : i32
    %c0_i32_1 = arith.constant 0 : i32
    return %c0_i32, %c0_i32_0 : i32, i32
  }
}

module attributes {stable_mosaic.version = 11 : i64} {
  func.func @_bn_apply_kernel(%arg0: i32, %arg1: memref<128x128xf32, #tpu.memory_space<vmem>>, %arg2: memref<1x128xf32, #tpu.memory_space<vmem>>, %arg3: memref<1x128xf32, #tpu.memory_space<vmem>>, %arg4: memref<1x128xf32, #tpu.memory_space<vmem>>, %arg5: memref<1x128xf32, #tpu.memory_space<vmem>>, %arg6: memref<128x128xf32, #tpu.memory_space<vmem>>) attributes {dimension_semantics = [#tpu.dimension_semantics<parallel>], iteration_bounds = array<i64: 1>, scalar_prefetch = 0 : i64, scratch_operands = 0 : i64, tpu.core_type = #tpu.core_type<tc>, window_params = [{transform_indices = @transform_0, window_bounds = array<i64: 128, 128>}, {pipeline_mode = #tpu.pipeline_mode<synchronous>, transform_indices = @transform_1, window_bounds = array<i64: 1, 128>}, {pipeline_mode = #tpu.pipeline_mode<synchronous>, transform_indices = @transform_2, window_bounds = array<i64: 1, 128>}, {pipeline_mode = #tpu.pipeline_mode<synchronous>, transform_indices = @transform_3, window_bounds = array<i64: 1, 128>}, {pipeline_mode = #tpu.pipeline_mode<synchronous>, transform_indices = @transform_4, window_bounds = array<i64: 1, 128>}, {transform_indices = @transform_5, window_bounds = array<i64: 128, 128>}]} {
    %c0 = arith.constant 0 : index
    %c0_0 = arith.constant 0 : index
    %0 = vector.load %arg2[%c0, %c0_0] : memref<1x128xf32, #tpu.memory_space<vmem>>, vector<1x128xf32>
    %cst = arith.constant 7.812500e-03 : f32
    %1 = vector.broadcast %cst : f32 to vector<1x128xf32>
    %2 = arith.mulf %0, %1 : vector<1x128xf32>
    %c0_1 = arith.constant 0 : index
    %c0_2 = arith.constant 0 : index
    %3 = vector.load %arg3[%c0_1, %c0_2] : memref<1x128xf32, #tpu.memory_space<vmem>>, vector<1x128xf32>
    %cst_3 = arith.constant 7.812500e-03 : f32
    %4 = vector.broadcast %cst_3 : f32 to vector<1x128xf32>
    %5 = arith.mulf %3, %4 : vector<1x128xf32>
    %6 = arith.mulf %2, %2 : vector<1x128xf32>
    %7 = arith.subf %5, %6 : vector<1x128xf32>
    %c0_4 = arith.constant 0 : index
    %c0_5 = arith.constant 0 : index
    %8 = vector.load %arg4[%c0_4, %c0_5] : memref<1x128xf32, #tpu.memory_space<vmem>>, vector<1x128xf32>
    %cst_6 = arith.constant 9.99999974E-6 : f32
    %9 = vector.broadcast %cst_6 : f32 to vector<1x128xf32>
    %10 = arith.addf %7, %9 : vector<1x128xf32>
    %11 = math.rsqrt %10 : vector<1x128xf32>
    %12 = arith.mulf %8, %11 : vector<1x128xf32>
    %c0_7 = arith.constant 0 : index
    %c0_8 = arith.constant 0 : index
    %13 = vector.load %arg5[%c0_7, %c0_8] : memref<1x128xf32, #tpu.memory_space<vmem>>, vector<1x128xf32>
    %14 = arith.mulf %2, %12 : vector<1x128xf32>
    %15 = arith.subf %13, %14 : vector<1x128xf32>
    %c0_9 = arith.constant 0 : index
    %c0_10 = arith.constant 0 : index
    %16 = vector.load %arg1[%c0_9, %c0_10] : memref<128x128xf32, #tpu.memory_space<vmem>>, vector<128x128xf32>
    %17 = vector.broadcast %12 : vector<1x128xf32> to vector<128x128xf32>
    %18 = arith.mulf %16, %17 : vector<128x128xf32>
    %19 = vector.broadcast %15 : vector<1x128xf32> to vector<128x128xf32>
    %20 = arith.addf %18, %19 : vector<128x128xf32>
    %c0_11 = arith.constant 0 : index
    %c0_12 = arith.constant 0 : index
    %21 = vector.load %arg6[%c0_11, %c0_12] : memref<128x128xf32, #tpu.memory_space<vmem>>, vector<128x128xf32>
    tpu.vector_store %arg6[%c0_11, %c0_12], %20 {strides = array<i32>} : memref<128x128xf32, #tpu.memory_space<vmem>>, vector<128x128xf32>,
    return
  }
  func.func @transform_0(%arg0: i32) -> (i32, i32) {
    %c0_i32 = arith.constant 0 : i32
    %c0_i32_0 = arith.constant 0 : i32
    return %arg0, %c0_i32 : i32, i32
  }
  func.func @transform_1(%arg0: i32) -> (i32, i32) {
    %c0_i32 = arith.constant 0 : i32
    %c0_i32_0 = arith.constant 0 : i32
    %c0_i32_1 = arith.constant 0 : i32
    return %c0_i32, %c0_i32_0 : i32, i32
  }
  func.func @transform_2(%arg0: i32) -> (i32, i32) {
    %c0_i32 = arith.constant 0 : i32
    %c0_i32_0 = arith.constant 0 : i32
    %c0_i32_1 = arith.constant 0 : i32
    return %c0_i32, %c0_i32_0 : i32, i32
  }
  func.func @transform_3(%arg0: i32) -> (i32, i32) {
    %c0_i32 = arith.constant 0 : i32
    %c0_i32_0 = arith.constant 0 : i32
    %c0_i32_1 = arith.constant 0 : i32
    return %c0_i32, %c0_i32_0 : i32, i32
  }
  func.func @transform_4(%arg0: i32) -> (i32, i32) {
    %c0_i32 = arith.constant 0 : i32
    %c0_i32_0 = arith.constant 0 : i32
    %c0_i32_1 = arith.constant 0 : i32
    return %c0_i32, %c0_i32_0 : i32, i32
  }
  func.func @transform_5(%arg0: i32) -> (i32, i32) {
    %c0_i32 = arith.constant 0 : i32
    %c0_i32_0 = arith.constant 0 : i32
    return %arg0, %c0_i32 : i32, i32
  }
}

module attributes {stable_mosaic.version = 11 : i64} {
  func.func @_bn_apply_kernel(%arg0: i32, %arg1: memref<32x128xf32, #tpu.memory_space<vmem>>, %arg2: memref<1x128xf32, #tpu.memory_space<vmem>>, %arg3: memref<1x128xf32, #tpu.memory_space<vmem>>, %arg4: memref<1x128xf32, #tpu.memory_space<vmem>>, %arg5: memref<1x128xf32, #tpu.memory_space<vmem>>, %arg6: memref<32x128xf32, #tpu.memory_space<vmem>>) attributes {dimension_semantics = [#tpu.dimension_semantics<parallel>], iteration_bounds = array<i64: 1>, scalar_prefetch = 0 : i64, scratch_operands = 0 : i64, tpu.core_type = #tpu.core_type<tc>, window_params = [{transform_indices = @transform_0, window_bounds = array<i64: 32, 128>}, {pipeline_mode = #tpu.pipeline_mode<synchronous>, transform_indices = @transform_1, window_bounds = array<i64: 1, 128>}, {pipeline_mode = #tpu.pipeline_mode<synchronous>, transform_indices = @transform_2, window_bounds = array<i64: 1, 128>}, {pipeline_mode = #tpu.pipeline_mode<synchronous>, transform_indices = @transform_3, window_bounds = array<i64: 1, 128>}, {pipeline_mode = #tpu.pipeline_mode<synchronous>, transform_indices = @transform_4, window_bounds = array<i64: 1, 128>}, {transform_indices = @transform_5, window_bounds = array<i64: 32, 128>}]} {
    %c0 = arith.constant 0 : index
    %c0_0 = arith.constant 0 : index
    %0 = vector.load %arg2[%c0, %c0_0] : memref<1x128xf32, #tpu.memory_space<vmem>>, vector<1x128xf32>
    %cst = arith.constant 3.125000e-02 : f32
    %1 = vector.broadcast %cst : f32 to vector<1x128xf32>
    %2 = arith.mulf %0, %1 : vector<1x128xf32>
    %c0_1 = arith.constant 0 : index
    %c0_2 = arith.constant 0 : index
    %3 = vector.load %arg3[%c0_1, %c0_2] : memref<1x128xf32, #tpu.memory_space<vmem>>, vector<1x128xf32>
    %cst_3 = arith.constant 3.125000e-02 : f32
    %4 = vector.broadcast %cst_3 : f32 to vector<1x128xf32>
    %5 = arith.mulf %3, %4 : vector<1x128xf32>
    %6 = arith.mulf %2, %2 : vector<1x128xf32>
    %7 = arith.subf %5, %6 : vector<1x128xf32>
    %c0_4 = arith.constant 0 : index
    %c0_5 = arith.constant 0 : index
    %8 = vector.load %arg4[%c0_4, %c0_5] : memref<1x128xf32, #tpu.memory_space<vmem>>, vector<1x128xf32>
    %cst_6 = arith.constant 9.99999974E-6 : f32
    %9 = vector.broadcast %cst_6 : f32 to vector<1x128xf32>
    %10 = arith.addf %7, %9 : vector<1x128xf32>
    %11 = math.rsqrt %10 : vector<1x128xf32>
    %12 = arith.mulf %8, %11 : vector<1x128xf32>
    %c0_7 = arith.constant 0 : index
    %c0_8 = arith.constant 0 : index
    %13 = vector.load %arg5[%c0_7, %c0_8] : memref<1x128xf32, #tpu.memory_space<vmem>>, vector<1x128xf32>
    %14 = arith.mulf %2, %12 : vector<1x128xf32>
    %15 = arith.subf %13, %14 : vector<1x128xf32>
    %c0_9 = arith.constant 0 : index
    %c0_10 = arith.constant 0 : index
    %16 = vector.load %arg1[%c0_9, %c0_10] : memref<32x128xf32, #tpu.memory_space<vmem>>, vector<32x128xf32>
    %17 = vector.broadcast %12 : vector<1x128xf32> to vector<32x128xf32>
    %18 = arith.mulf %16, %17 : vector<32x128xf32>
    %19 = vector.broadcast %15 : vector<1x128xf32> to vector<32x128xf32>
    %20 = arith.addf %18, %19 : vector<32x128xf32>
    %c0_11 = arith.constant 0 : index
    %c0_12 = arith.constant 0 : index
    %21 = vector.load %arg6[%c0_11, %c0_12] : memref<32x128xf32, #tpu.memory_space<vmem>>, vector<32x128xf32>
    tpu.vector_store %arg6[%c0_11, %c0_12], %20 {strides = array<i32>} : memref<32x128xf32, #tpu.memory_space<vmem>>, vector<32x128xf32>,
    return
  }
  func.func @transform_0(%arg0: i32) -> (i32, i32) {
    %c0_i32 = arith.constant 0 : i32
    %c0_i32_0 = arith.constant 0 : i32
    return %arg0, %c0_i32 : i32, i32
  }
  func.func @transform_1(%arg0: i32) -> (i32, i32) {
    %c0_i32 = arith.constant 0 : i32
    %c0_i32_0 = arith.constant 0 : i32
    %c0_i32_1 = arith.constant 0 : i32
    return %c0_i32, %c0_i32_0 : i32, i32
  }
  func.func @transform_2(%arg0: i32) -> (i32, i32) {
    %c0_i32 = arith.constant 0 : i32
    %c0_i32_0 = arith.constant 0 : i32
    %c0_i32_1 = arith.constant 0 : i32
    return %c0_i32, %c0_i32_0 : i32, i32
  }
  func.func @transform_3(%arg0: i32) -> (i32, i32) {
    %c0_i32 = arith.constant 0 : i32
    %c0_i32_0 = arith.constant 0 : i32
    %c0_i32_1 = arith.constant 0 : i32
    return %c0_i32, %c0_i32_0 : i32, i32
  }
  func.func @transform_4(%arg0: i32) -> (i32, i32) {
    %c0_i32 = arith.constant 0 : i32
    %c0_i32_0 = arith.constant 0 : i32
    %c0_i32_1 = arith.constant 0 : i32
    return %c0_i32, %c0_i32_0 : i32, i32
  }
  func.func @transform_5(%arg0: i32) -> (i32, i32) {
    %c0_i32 = arith.constant 0 : i32
    %c0_i32_0 = arith.constant 0 : i32
    return %arg0, %c0_i32 : i32, i32
  }
}

module attributes {stable_mosaic.version = 11 : i64} {
  func.func @_gemm_kernel(%arg0: i32, %arg1: i32, %arg2: memref<32x256xbf16, #tpu.memory_space<vmem>>, %arg3: memref<256x128xbf16, #tpu.memory_space<vmem>>, %arg4: memref<1x128xf32, #tpu.memory_space<vmem>>, %arg5: memref<32x128xf32, #tpu.memory_space<vmem>>, %arg6: memref<32x128xf32, #tpu.memory_space<vmem>>) attributes {dimension_semantics = [#tpu.dimension_semantics<parallel>, #tpu.dimension_semantics<arbitrary>], iteration_bounds = array<i64: 1, 1>, scalar_prefetch = 0 : i64, scratch_operands = 1 : i64, tpu.core_type = #tpu.core_type<tc>, window_params = [{transform_indices = @transform_0, window_bounds = array<i64: 32, 256>}, {transform_indices = @transform_1, window_bounds = array<i64: 256, 128>}, {pipeline_mode = #tpu.pipeline_mode<synchronous>, transform_indices = @transform_2, window_bounds = array<i64: 1, 128>}, {transform_indices = @transform_3, window_bounds = array<i64: 32, 128>}]} {
    %c0_i32 = arith.constant 0 : i32
    %0 = arith.cmpi eq, %arg1, %c0_i32 : i32
    %1 = arith.extui %0 : i1 to i32
    %c0_i32_0 = arith.constant 0 : i32
    %2 = arith.cmpi ne, %1, %c0_i32_0 : i32
    scf.if %2 {
      %cst_12 = arith.constant 0.000000e+00 : f32
      %19 = vector.broadcast %cst_12 : f32 to vector<32x128xf32>
      %c0_13 = arith.constant 0 : index
      %c0_14 = arith.constant 0 : index
      %20 = vector.load %arg6[%c0_13, %c0_14] : memref<32x128xf32, #tpu.memory_space<vmem>>, vector<32x128xf32>
      tpu.vector_store %arg6[%c0_13, %c0_14], %19 {strides = array<i32>} : memref<32x128xf32, #tpu.memory_space<vmem>>, vector<32x128xf32>,
    } else {
    }
    %c0 = arith.constant 0 : index
    %c0_1 = arith.constant 0 : index
    %3 = vector.load %arg2[%c0, %c0_1] : memref<32x256xbf16, #tpu.memory_space<vmem>>, vector<32x256xbf16>
    %4 = arith.extf %3 : vector<32x256xbf16> to vector<32x256xf32>
    %cst = arith.constant 0.000000e+00 : f32
    %5 = vector.broadcast %cst : f32 to vector<32x256xf32>
    %6 = arith.cmpf ogt, %4, %5 : vector<32x256xf32>
    %cst_2 = arith.constant 2.000000e-01 : f32
    %7 = vector.broadcast %cst_2 : f32 to vector<32x256xf32>
    %8 = arith.mulf %7, %4 : vector<32x256xf32>
    %9 = arith.select %6, %4, %8 : vector<32x256xi1>, vector<32x256xf32>
    %10 = arith.truncf %9 : vector<32x256xf32> to vector<32x256xbf16>
    %c0_3 = arith.constant 0 : index
    %c0_4 = arith.constant 0 : index
    %11 = vector.load %arg6[%c0_3, %c0_4] : memref<32x128xf32, #tpu.memory_space<vmem>>, vector<32x128xf32>
    %c0_5 = arith.constant 0 : index
    %c0_6 = arith.constant 0 : index
    %12 = vector.load %arg3[%c0_5, %c0_6] : memref<256x128xbf16, #tpu.memory_space<vmem>>, vector<256x128xbf16>
    %cst_7 = arith.constant dense<0.000000e+00> : vector<32x128xf32>
    %13 = tpu.matmul %10, %12, %cst_7 {dimension_numbers = #tpu.dot_dimension_numbers<[1], [0], [0], [1], [0, 0, 1, 1], [], []>} : vector<32x256xbf16>, vector<256x128xbf16>, vector<32x128xf32> -> vector<32x128xf32>
    %14 = arith.addf %11, %13 : vector<32x128xf32>
    %c0_8 = arith.constant 0 : index
    %c0_9 = arith.constant 0 : index
    %15 = vector.load %arg6[%c0_8, %c0_9] : memref<32x128xf32, #tpu.memory_space<vmem>>, vector<32x128xf32>
    tpu.vector_store %arg6[%c0_8, %c0_9], %14 {strides = array<i32>} : memref<32x128xf32, #tpu.memory_space<vmem>>, vector<32x128xf32>,
    %c0_i32_10 = arith.constant 0 : i32
    %16 = arith.cmpi eq, %arg1, %c0_i32_10 : i32
    %17 = arith.extui %16 : i1 to i32
    %c0_i32_11 = arith.constant 0 : i32
    %18 = arith.cmpi ne, %17, %c0_i32_11 : i32
    scf.if %18 {
      %c0_12 = arith.constant 0 : index
      %c0_13 = arith.constant 0 : index
      %19 = vector.load %arg6[%c0_12, %c0_13] : memref<32x128xf32, #tpu.memory_space<vmem>>, vector<32x128xf32>
      %c0_14 = arith.constant 0 : index
      %c0_15 = arith.constant 0 : index
      %20 = vector.load %arg4[%c0_14, %c0_15] : memref<1x128xf32, #tpu.memory_space<vmem>>, vector<1x128xf32>
      %21 = vector.broadcast %20 : vector<1x128xf32> to vector<32x128xf32>
      %22 = arith.addf %19, %21 : vector<32x128xf32>
      %c0_16 = arith.constant 0 : index
      %c0_17 = arith.constant 0 : index
      %23 = vector.load %arg5[%c0_16, %c0_17] : memref<32x128xf32, #tpu.memory_space<vmem>>, vector<32x128xf32>
      tpu.vector_store %arg5[%c0_16, %c0_17], %22 {strides = array<i32>} : memref<32x128xf32, #tpu.memory_space<vmem>>, vector<32x128xf32>,
    } else {
    }
    return
  }
  func.func @transform_0(%arg0: i32, %arg1: i32) -> (i32, i32) {
    %c0_i32 = arith.constant 0 : i32
    return %arg0, %arg1 : i32, i32
  }
  func.func @transform_1(%arg0: i32, %arg1: i32) -> (i32, i32) {
    %c0_i32 = arith.constant 0 : i32
    %c0_i32_0 = arith.constant 0 : i32
    return %arg1, %c0_i32 : i32, i32
  }
  func.func @transform_2(%arg0: i32, %arg1: i32) -> (i32, i32) {
    %c0_i32 = arith.constant 0 : i32
    %c0_i32_0 = arith.constant 0 : i32
    %c0_i32_1 = arith.constant 0 : i32
    return %c0_i32, %c0_i32_0 : i32, i32
  }
  func.func @transform_3(%arg0: i32, %arg1: i32) -> (i32, i32) {
    %c0_i32 = arith.constant 0 : i32
    %c0_i32_0 = arith.constant 0 : i32
    return %arg0, %c0_i32 : i32, i32
  }
}

module attributes {stable_mosaic.version = 11 : i64} {
  func.func @_bn_stats_kernel(%arg0: i32, %arg1: memref<32x128xf32, #tpu.memory_space<vmem>>, %arg2: memref<1x128xf32, #tpu.memory_space<vmem>>, %arg3: memref<1x128xf32, #tpu.memory_space<vmem>>) attributes {dimension_semantics = [#tpu.dimension_semantics<arbitrary>], iteration_bounds = array<i64: 1>, scalar_prefetch = 0 : i64, scratch_operands = 0 : i64, tpu.core_type = #tpu.core_type<tc>, window_params = [{transform_indices = @transform_0, window_bounds = array<i64: 32, 128>}, {pipeline_mode = #tpu.pipeline_mode<synchronous>, transform_indices = @transform_1, window_bounds = array<i64: 1, 128>}, {pipeline_mode = #tpu.pipeline_mode<synchronous>, transform_indices = @transform_2, window_bounds = array<i64: 1, 128>}]} {
    %c0_i32 = arith.constant 0 : i32
    %0 = arith.cmpi eq, %arg0, %c0_i32 : i32
    %1 = arith.extui %0 : i1 to i32
    %c0_i32_0 = arith.constant 0 : i32
    %2 = arith.cmpi ne, %1, %c0_i32_0 : i32
    scf.if %2 {
      %cst_11 = arith.constant 0.000000e+00 : f32
      %15 = vector.broadcast %cst_11 : f32 to vector<1x128xf32>
      %c0_12 = arith.constant 0 : index
      %c0_13 = arith.constant 0 : index
      %16 = vector.load %arg2[%c0_12, %c0_13] : memref<1x128xf32, #tpu.memory_space<vmem>>, vector<1x128xf32>
      tpu.vector_store %arg2[%c0_12, %c0_13], %15 {strides = array<i32>} : memref<1x128xf32, #tpu.memory_space<vmem>>, vector<1x128xf32>,
      %cst_14 = arith.constant 0.000000e+00 : f32
      %17 = vector.broadcast %cst_14 : f32 to vector<1x128xf32>
      %c0_15 = arith.constant 0 : index
      %c0_16 = arith.constant 0 : index
      %18 = vector.load %arg3[%c0_15, %c0_16] : memref<1x128xf32, #tpu.memory_space<vmem>>, vector<1x128xf32>
      tpu.vector_store %arg3[%c0_15, %c0_16], %17 {strides = array<i32>} : memref<1x128xf32, #tpu.memory_space<vmem>>, vector<1x128xf32>,
    } else {
    }
    %c0 = arith.constant 0 : index
    %c0_1 = arith.constant 0 : index
    %3 = vector.load %arg1[%c0, %c0_1] : memref<32x128xf32, #tpu.memory_space<vmem>>, vector<32x128xf32>
    %c0_2 = arith.constant 0 : index
    %c0_3 = arith.constant 0 : index
    %4 = vector.load %arg2[%c0_2, %c0_3] : memref<1x128xf32, #tpu.memory_space<vmem>>, vector<1x128xf32>
    %cst = arith.constant dense<0.000000e+00> : vector<128xf32>
    %5 = vector.multi_reduction <add>, %3, %cst [0] : vector<32x128xf32> to vector<128xf32>
    %6 = vector.shape_cast %5 : vector<128xf32> to vector<1x128xf32>
    %7 = arith.addf %4, %6 : vector<1x128xf32>
    %c0_4 = arith.constant 0 : index
    %c0_5 = arith.constant 0 : index
    %8 = vector.load %arg2[%c0_4, %c0_5] : memref<1x128xf32, #tpu.memory_space<vmem>>, vector<1x128xf32>
    tpu.vector_store %arg2[%c0_4, %c0_5], %7 {strides = array<i32>} : memref<1x128xf32, #tpu.memory_space<vmem>>, vector<1x128xf32>,
    %c0_6 = arith.constant 0 : index
    %c0_7 = arith.constant 0 : index
    %9 = vector.load %arg3[%c0_6, %c0_7] : memref<1x128xf32, #tpu.memory_space<vmem>>, vector<1x128xf32>
    %10 = arith.mulf %3, %3 : vector<32x128xf32>
    %cst_8 = arith.constant dense<0.000000e+00> : vector<128xf32>
    %11 = vector.multi_reduction <add>, %10, %cst_8 [0] : vector<32x128xf32> to vector<128xf32>
    %12 = vector.shape_cast %11 : vector<128xf32> to vector<1x128xf32>
    %13 = arith.addf %9, %12 : vector<1x128xf32>
    %c0_9 = arith.constant 0 : index
    %c0_10 = arith.constant 0 : index
    %14 = vector.load %arg3[%c0_9, %c0_10] : memref<1x128xf32, #tpu.memory_space<vmem>>, vector<1x128xf32>
    tpu.vector_store %arg3[%c0_9, %c0_10], %13 {strides = array<i32>} : memref<1x128xf32, #tpu.memory_space<vmem>>, vector<1x128xf32>,
    return
  }
  func.func @transform_0(%arg0: i32) -> (i32, i32) {
    %c0_i32 = arith.constant 0 : i32
    %c0_i32_0 = arith.constant 0 : i32
    return %arg0, %c0_i32 : i32, i32
  }
  func.func @transform_1(%arg0: i32) -> (i32, i32) {
    %c0_i32 = arith.constant 0 : i32
    %c0_i32_0 = arith.constant 0 : i32
    %c0_i32_1 = arith.constant 0 : i32
    return %c0_i32, %c0_i32_0 : i32, i32
  }
  func.func @transform_2(%arg0: i32) -> (i32, i32) {
    %c0_i32 = arith.constant 0 : i32
    %c0_i32_0 = arith.constant 0 : i32
    %c0_i32_1 = arith.constant 0 : i32
    return %c0_i32, %c0_i32_0 : i32, i32
  }
}

module attributes {stable_mosaic.version = 11 : i64} {
  func.func @_bn_stats_kernel(%arg0: i32, %arg1: memref<8x128xf32, #tpu.memory_space<vmem>>, %arg2: memref<1x128xf32, #tpu.memory_space<vmem>>, %arg3: memref<1x128xf32, #tpu.memory_space<vmem>>) attributes {dimension_semantics = [#tpu.dimension_semantics<arbitrary>], iteration_bounds = array<i64: 1>, scalar_prefetch = 0 : i64, scratch_operands = 0 : i64, tpu.core_type = #tpu.core_type<tc>, window_params = [{transform_indices = @transform_0, window_bounds = array<i64: 8, 128>}, {pipeline_mode = #tpu.pipeline_mode<synchronous>, transform_indices = @transform_1, window_bounds = array<i64: 1, 128>}, {pipeline_mode = #tpu.pipeline_mode<synchronous>, transform_indices = @transform_2, window_bounds = array<i64: 1, 128>}]} {
    %c0_i32 = arith.constant 0 : i32
    %0 = arith.cmpi eq, %arg0, %c0_i32 : i32
    %1 = arith.extui %0 : i1 to i32
    %c0_i32_0 = arith.constant 0 : i32
    %2 = arith.cmpi ne, %1, %c0_i32_0 : i32
    scf.if %2 {
      %cst_11 = arith.constant 0.000000e+00 : f32
      %15 = vector.broadcast %cst_11 : f32 to vector<1x128xf32>
      %c0_12 = arith.constant 0 : index
      %c0_13 = arith.constant 0 : index
      %16 = vector.load %arg2[%c0_12, %c0_13] : memref<1x128xf32, #tpu.memory_space<vmem>>, vector<1x128xf32>
      tpu.vector_store %arg2[%c0_12, %c0_13], %15 {strides = array<i32>} : memref<1x128xf32, #tpu.memory_space<vmem>>, vector<1x128xf32>,
      %cst_14 = arith.constant 0.000000e+00 : f32
      %17 = vector.broadcast %cst_14 : f32 to vector<1x128xf32>
      %c0_15 = arith.constant 0 : index
      %c0_16 = arith.constant 0 : index
      %18 = vector.load %arg3[%c0_15, %c0_16] : memref<1x128xf32, #tpu.memory_space<vmem>>, vector<1x128xf32>
      tpu.vector_store %arg3[%c0_15, %c0_16], %17 {strides = array<i32>} : memref<1x128xf32, #tpu.memory_space<vmem>>, vector<1x128xf32>,
    } else {
    }
    %c0 = arith.constant 0 : index
    %c0_1 = arith.constant 0 : index
    %3 = vector.load %arg1[%c0, %c0_1] : memref<8x128xf32, #tpu.memory_space<vmem>>, vector<8x128xf32>
    %c0_2 = arith.constant 0 : index
    %c0_3 = arith.constant 0 : index
    %4 = vector.load %arg2[%c0_2, %c0_3] : memref<1x128xf32, #tpu.memory_space<vmem>>, vector<1x128xf32>
    %cst = arith.constant dense<0.000000e+00> : vector<128xf32>
    %5 = vector.multi_reduction <add>, %3, %cst [0] : vector<8x128xf32> to vector<128xf32>
    %6 = vector.shape_cast %5 : vector<128xf32> to vector<1x128xf32>
    %7 = arith.addf %4, %6 : vector<1x128xf32>
    %c0_4 = arith.constant 0 : index
    %c0_5 = arith.constant 0 : index
    %8 = vector.load %arg2[%c0_4, %c0_5] : memref<1x128xf32, #tpu.memory_space<vmem>>, vector<1x128xf32>
    tpu.vector_store %arg2[%c0_4, %c0_5], %7 {strides = array<i32>} : memref<1x128xf32, #tpu.memory_space<vmem>>, vector<1x128xf32>,
    %c0_6 = arith.constant 0 : index
    %c0_7 = arith.constant 0 : index
    %9 = vector.load %arg3[%c0_6, %c0_7] : memref<1x128xf32, #tpu.memory_space<vmem>>, vector<1x128xf32>
    %10 = arith.mulf %3, %3 : vector<8x128xf32>
    %cst_8 = arith.constant dense<0.000000e+00> : vector<128xf32>
    %11 = vector.multi_reduction <add>, %10, %cst_8 [0] : vector<8x128xf32> to vector<128xf32>
    %12 = vector.shape_cast %11 : vector<128xf32> to vector<1x128xf32>
    %13 = arith.addf %9, %12 : vector<1x128xf32>
    %c0_9 = arith.constant 0 : index
    %c0_10 = arith.constant 0 : index
    %14 = vector.load %arg3[%c0_9, %c0_10] : memref<1x128xf32, #tpu.memory_space<vmem>>, vector<1x128xf32>
    tpu.vector_store %arg3[%c0_9, %c0_10], %13 {strides = array<i32>} : memref<1x128xf32, #tpu.memory_space<vmem>>, vector<1x128xf32>,
    return
  }
  func.func @transform_0(%arg0: i32) -> (i32, i32) {
    %c0_i32 = arith.constant 0 : i32
    %c0_i32_0 = arith.constant 0 : i32
    return %arg0, %c0_i32 : i32, i32
  }
  func.func @transform_1(%arg0: i32) -> (i32, i32) {
    %c0_i32 = arith.constant 0 : i32
    %c0_i32_0 = arith.constant 0 : i32
    %c0_i32_1 = arith.constant 0 : i32
    return %c0_i32, %c0_i32_0 : i32, i32
  }
  func.func @transform_2(%arg0: i32) -> (i32, i32) {
    %c0_i32 = arith.constant 0 : i32
    %c0_i32_0 = arith.constant 0 : i32
    %c0_i32_1 = arith.constant 0 : i32
    return %c0_i32, %c0_i32_0 : i32, i32
  }
}

module attributes {stable_mosaic.version = 11 : i64} {
  func.func @_bn_apply_kernel(%arg0: i32, %arg1: memref<8x128xf32, #tpu.memory_space<vmem>>, %arg2: memref<1x128xf32, #tpu.memory_space<vmem>>, %arg3: memref<1x128xf32, #tpu.memory_space<vmem>>, %arg4: memref<1x128xf32, #tpu.memory_space<vmem>>, %arg5: memref<1x128xf32, #tpu.memory_space<vmem>>, %arg6: memref<8x128xf32, #tpu.memory_space<vmem>>) attributes {dimension_semantics = [#tpu.dimension_semantics<parallel>], iteration_bounds = array<i64: 1>, scalar_prefetch = 0 : i64, scratch_operands = 0 : i64, tpu.core_type = #tpu.core_type<tc>, window_params = [{transform_indices = @transform_0, window_bounds = array<i64: 8, 128>}, {pipeline_mode = #tpu.pipeline_mode<synchronous>, transform_indices = @transform_1, window_bounds = array<i64: 1, 128>}, {pipeline_mode = #tpu.pipeline_mode<synchronous>, transform_indices = @transform_2, window_bounds = array<i64: 1, 128>}, {pipeline_mode = #tpu.pipeline_mode<synchronous>, transform_indices = @transform_3, window_bounds = array<i64: 1, 128>}, {pipeline_mode = #tpu.pipeline_mode<synchronous>, transform_indices = @transform_4, window_bounds = array<i64: 1, 128>}, {transform_indices = @transform_5, window_bounds = array<i64: 8, 128>}]} {
    %c0 = arith.constant 0 : index
    %c0_0 = arith.constant 0 : index
    %0 = vector.load %arg2[%c0, %c0_0] : memref<1x128xf32, #tpu.memory_space<vmem>>, vector<1x128xf32>
    %cst = arith.constant 1.250000e-01 : f32
    %1 = vector.broadcast %cst : f32 to vector<1x128xf32>
    %2 = arith.mulf %0, %1 : vector<1x128xf32>
    %c0_1 = arith.constant 0 : index
    %c0_2 = arith.constant 0 : index
    %3 = vector.load %arg3[%c0_1, %c0_2] : memref<1x128xf32, #tpu.memory_space<vmem>>, vector<1x128xf32>
    %cst_3 = arith.constant 1.250000e-01 : f32
    %4 = vector.broadcast %cst_3 : f32 to vector<1x128xf32>
    %5 = arith.mulf %3, %4 : vector<1x128xf32>
    %6 = arith.mulf %2, %2 : vector<1x128xf32>
    %7 = arith.subf %5, %6 : vector<1x128xf32>
    %c0_4 = arith.constant 0 : index
    %c0_5 = arith.constant 0 : index
    %8 = vector.load %arg4[%c0_4, %c0_5] : memref<1x128xf32, #tpu.memory_space<vmem>>, vector<1x128xf32>
    %cst_6 = arith.constant 9.99999974E-6 : f32
    %9 = vector.broadcast %cst_6 : f32 to vector<1x128xf32>
    %10 = arith.addf %7, %9 : vector<1x128xf32>
    %11 = math.rsqrt %10 : vector<1x128xf32>
    %12 = arith.mulf %8, %11 : vector<1x128xf32>
    %c0_7 = arith.constant 0 : index
    %c0_8 = arith.constant 0 : index
    %13 = vector.load %arg5[%c0_7, %c0_8] : memref<1x128xf32, #tpu.memory_space<vmem>>, vector<1x128xf32>
    %14 = arith.mulf %2, %12 : vector<1x128xf32>
    %15 = arith.subf %13, %14 : vector<1x128xf32>
    %c0_9 = arith.constant 0 : index
    %c0_10 = arith.constant 0 : index
    %16 = vector.load %arg1[%c0_9, %c0_10] : memref<8x128xf32, #tpu.memory_space<vmem>>, vector<8x128xf32>
    %17 = vector.broadcast %12 : vector<1x128xf32> to vector<8x128xf32>
    %18 = arith.mulf %16, %17 : vector<8x128xf32>
    %19 = vector.broadcast %15 : vector<1x128xf32> to vector<8x128xf32>
    %20 = arith.addf %18, %19 : vector<8x128xf32>
    %c0_11 = arith.constant 0 : index
    %c0_12 = arith.constant 0 : index
    %21 = vector.load %arg6[%c0_11, %c0_12] : memref<8x128xf32, #tpu.memory_space<vmem>>, vector<8x128xf32>
    tpu.vector_store %arg6[%c0_11, %c0_12], %20 {strides = array<i32>} : memref<8x128xf32, #tpu.memory_space<vmem>>, vector<8x128xf32>,
    return
  }
  func.func @transform_0(%arg0: i32) -> (i32, i32) {
    %c0_i32 = arith.constant 0 : i32
    %c0_i32_0 = arith.constant 0 : i32
    return %arg0, %c0_i32 : i32, i32
  }
  func.func @transform_1(%arg0: i32) -> (i32, i32) {
    %c0_i32 = arith.constant 0 : i32
    %c0_i32_0 = arith.constant 0 : i32
    %c0_i32_1 = arith.constant 0 : i32
    return %c0_i32, %c0_i32_0 : i32, i32
  }
  func.func @transform_2(%arg0: i32) -> (i32, i32) {
    %c0_i32 = arith.constant 0 : i32
    %c0_i32_0 = arith.constant 0 : i32
    %c0_i32_1 = arith.constant 0 : i32
    return %c0_i32, %c0_i32_0 : i32, i32
  }
  func.func @transform_3(%arg0: i32) -> (i32, i32) {
    %c0_i32 = arith.constant 0 : i32
    %c0_i32_0 = arith.constant 0 : i32
    %c0_i32_1 = arith.constant 0 : i32
    return %c0_i32, %c0_i32_0 : i32, i32
  }
  func.func @transform_4(%arg0: i32) -> (i32, i32) {
    %c0_i32 = arith.constant 0 : i32
    %c0_i32_0 = arith.constant 0 : i32
    %c0_i32_1 = arith.constant 0 : i32
    return %c0_i32, %c0_i32_0 : i32, i32
  }
  func.func @transform_5(%arg0: i32) -> (i32, i32) {
    %c0_i32 = arith.constant 0 : i32
    %c0_i32_0 = arith.constant 0 : i32
    return %arg0, %c0_i32 : i32, i32
  }
}

module attributes {stable_mosaic.version = 11 : i64} {
  func.func @_gemm_kernel(%arg0: i32, %arg1: i32, %arg2: memref<8x512xbf16, #tpu.memory_space<vmem>>, %arg3: memref<512x128xbf16, #tpu.memory_space<vmem>>, %arg4: memref<1x128xf32, #tpu.memory_space<vmem>>, %arg5: memref<8x128xf32, #tpu.memory_space<vmem>>, %arg6: memref<8x128xf32, #tpu.memory_space<vmem>>) attributes {dimension_semantics = [#tpu.dimension_semantics<parallel>, #tpu.dimension_semantics<arbitrary>], iteration_bounds = array<i64: 1, 1>, scalar_prefetch = 0 : i64, scratch_operands = 1 : i64, tpu.core_type = #tpu.core_type<tc>, window_params = [{transform_indices = @transform_0, window_bounds = array<i64: 8, 512>}, {transform_indices = @transform_1, window_bounds = array<i64: 512, 128>}, {pipeline_mode = #tpu.pipeline_mode<synchronous>, transform_indices = @transform_2, window_bounds = array<i64: 1, 128>}, {transform_indices = @transform_3, window_bounds = array<i64: 8, 128>}]} {
    %c0_i32 = arith.constant 0 : i32
    %0 = arith.cmpi eq, %arg1, %c0_i32 : i32
    %1 = arith.extui %0 : i1 to i32
    %c0_i32_0 = arith.constant 0 : i32
    %2 = arith.cmpi ne, %1, %c0_i32_0 : i32
    scf.if %2 {
      %cst_12 = arith.constant 0.000000e+00 : f32
      %19 = vector.broadcast %cst_12 : f32 to vector<8x128xf32>
      %c0_13 = arith.constant 0 : index
      %c0_14 = arith.constant 0 : index
      %20 = vector.load %arg6[%c0_13, %c0_14] : memref<8x128xf32, #tpu.memory_space<vmem>>, vector<8x128xf32>
      tpu.vector_store %arg6[%c0_13, %c0_14], %19 {strides = array<i32>} : memref<8x128xf32, #tpu.memory_space<vmem>>, vector<8x128xf32>,
    } else {
    }
    %c0 = arith.constant 0 : index
    %c0_1 = arith.constant 0 : index
    %3 = vector.load %arg2[%c0, %c0_1] : memref<8x512xbf16, #tpu.memory_space<vmem>>, vector<8x512xbf16>
    %4 = arith.extf %3 : vector<8x512xbf16> to vector<8x512xf32>
    %cst = arith.constant 0.000000e+00 : f32
    %5 = vector.broadcast %cst : f32 to vector<8x512xf32>
    %6 = arith.cmpf ogt, %4, %5 : vector<8x512xf32>
    %cst_2 = arith.constant 2.000000e-01 : f32
    %7 = vector.broadcast %cst_2 : f32 to vector<8x512xf32>
    %8 = arith.mulf %7, %4 : vector<8x512xf32>
    %9 = arith.select %6, %4, %8 : vector<8x512xi1>, vector<8x512xf32>
    %10 = arith.truncf %9 : vector<8x512xf32> to vector<8x512xbf16>
    %c0_3 = arith.constant 0 : index
    %c0_4 = arith.constant 0 : index
    %11 = vector.load %arg6[%c0_3, %c0_4] : memref<8x128xf32, #tpu.memory_space<vmem>>, vector<8x128xf32>
    %c0_5 = arith.constant 0 : index
    %c0_6 = arith.constant 0 : index
    %12 = vector.load %arg3[%c0_5, %c0_6] : memref<512x128xbf16, #tpu.memory_space<vmem>>, vector<512x128xbf16>
    %cst_7 = arith.constant dense<0.000000e+00> : vector<8x128xf32>
    %13 = tpu.matmul %10, %12, %cst_7 {dimension_numbers = #tpu.dot_dimension_numbers<[1], [0], [0], [1], [0, 0, 1, 1], [], []>} : vector<8x512xbf16>, vector<512x128xbf16>, vector<8x128xf32> -> vector<8x128xf32>
    %14 = arith.addf %11, %13 : vector<8x128xf32>
    %c0_8 = arith.constant 0 : index
    %c0_9 = arith.constant 0 : index
    %15 = vector.load %arg6[%c0_8, %c0_9] : memref<8x128xf32, #tpu.memory_space<vmem>>, vector<8x128xf32>
    tpu.vector_store %arg6[%c0_8, %c0_9], %14 {strides = array<i32>} : memref<8x128xf32, #tpu.memory_space<vmem>>, vector<8x128xf32>,
    %c0_i32_10 = arith.constant 0 : i32
    %16 = arith.cmpi eq, %arg1, %c0_i32_10 : i32
    %17 = arith.extui %16 : i1 to i32
    %c0_i32_11 = arith.constant 0 : i32
    %18 = arith.cmpi ne, %17, %c0_i32_11 : i32
    scf.if %18 {
      %c0_12 = arith.constant 0 : index
      %c0_13 = arith.constant 0 : index
      %19 = vector.load %arg6[%c0_12, %c0_13] : memref<8x128xf32, #tpu.memory_space<vmem>>, vector<8x128xf32>
      %c0_14 = arith.constant 0 : index
      %c0_15 = arith.constant 0 : index
      %20 = vector.load %arg4[%c0_14, %c0_15] : memref<1x128xf32, #tpu.memory_space<vmem>>, vector<1x128xf32>
      %21 = vector.broadcast %20 : vector<1x128xf32> to vector<8x128xf32>
      %22 = arith.addf %19, %21 : vector<8x128xf32>
      %c0_16 = arith.constant 0 : index
      %c0_17 = arith.constant 0 : index
      %23 = vector.load %arg5[%c0_16, %c0_17] : memref<8x128xf32, #tpu.memory_space<vmem>>, vector<8x128xf32>
      tpu.vector_store %arg5[%c0_16, %c0_17], %22 {strides = array<i32>} : memref<8x128xf32, #tpu.memory_space<vmem>>, vector<8x128xf32>,
    } else {
    }
    return
  }
  func.func @transform_0(%arg0: i32, %arg1: i32) -> (i32, i32) {
    %c0_i32 = arith.constant 0 : i32
    return %arg0, %arg1 : i32, i32
  }
  func.func @transform_1(%arg0: i32, %arg1: i32) -> (i32, i32) {
    %c0_i32 = arith.constant 0 : i32
    %c0_i32_0 = arith.constant 0 : i32
    return %arg1, %c0_i32 : i32, i32
  }
  func.func @transform_2(%arg0: i32, %arg1: i32) -> (i32, i32) {
    %c0_i32 = arith.constant 0 : i32
    %c0_i32_0 = arith.constant 0 : i32
    %c0_i32_1 = arith.constant 0 : i32
    return %c0_i32, %c0_i32_0 : i32, i32
  }
  func.func @transform_3(%arg0: i32, %arg1: i32) -> (i32, i32) {
    %c0_i32 = arith.constant 0 : i32
    %c0_i32_0 = arith.constant 0 : i32
    return %arg0, %c0_i32 : i32, i32
  }
}

module attributes {stable_mosaic.version = 11 : i64} {
  func.func @_gemm_kernel(%arg0: i32, %arg1: i32, %arg2: memref<8x512xbf16, #tpu.memory_space<vmem>>, %arg3: memref<512x128xbf16, #tpu.memory_space<vmem>>, %arg4: memref<1x128xf32, #tpu.memory_space<vmem>>, %arg5: memref<8x128xf32, #tpu.memory_space<vmem>>, %arg6: memref<8x128xf32, #tpu.memory_space<vmem>>) attributes {dimension_semantics = [#tpu.dimension_semantics<parallel>, #tpu.dimension_semantics<arbitrary>], iteration_bounds = array<i64: 1, 2>, scalar_prefetch = 0 : i64, scratch_operands = 1 : i64, tpu.core_type = #tpu.core_type<tc>, window_params = [{transform_indices = @transform_0, window_bounds = array<i64: 8, 512>}, {transform_indices = @transform_1, window_bounds = array<i64: 512, 128>}, {pipeline_mode = #tpu.pipeline_mode<synchronous>, transform_indices = @transform_2, window_bounds = array<i64: 1, 128>}, {transform_indices = @transform_3, window_bounds = array<i64: 8, 128>}]} {
    %c0_i32 = arith.constant 0 : i32
    %0 = arith.cmpi eq, %arg1, %c0_i32 : i32
    %1 = arith.extui %0 : i1 to i32
    %c0_i32_0 = arith.constant 0 : i32
    %2 = arith.cmpi ne, %1, %c0_i32_0 : i32
    scf.if %2 {
      %cst_11 = arith.constant 0.000000e+00 : f32
      %19 = vector.broadcast %cst_11 : f32 to vector<8x128xf32>
      %c0_12 = arith.constant 0 : index
      %c0_13 = arith.constant 0 : index
      %20 = vector.load %arg6[%c0_12, %c0_13] : memref<8x128xf32, #tpu.memory_space<vmem>>, vector<8x128xf32>
      tpu.vector_store %arg6[%c0_12, %c0_13], %19 {strides = array<i32>} : memref<8x128xf32, #tpu.memory_space<vmem>>, vector<8x128xf32>,
    } else {
    }
    %c0 = arith.constant 0 : index
    %c0_1 = arith.constant 0 : index
    %3 = vector.load %arg2[%c0, %c0_1] : memref<8x512xbf16, #tpu.memory_space<vmem>>, vector<8x512xbf16>
    %4 = arith.extf %3 : vector<8x512xbf16> to vector<8x512xf32>
    %cst = arith.constant 0.000000e+00 : f32
    %5 = vector.broadcast %cst : f32 to vector<8x512xf32>
    %6 = arith.cmpf ogt, %4, %5 : vector<8x512xf32>
    %cst_2 = arith.constant 2.000000e-01 : f32
    %7 = vector.broadcast %cst_2 : f32 to vector<8x512xf32>
    %8 = arith.mulf %7, %4 : vector<8x512xf32>
    %9 = arith.select %6, %4, %8 : vector<8x512xi1>, vector<8x512xf32>
    %10 = arith.truncf %9 : vector<8x512xf32> to vector<8x512xbf16>
    %c0_3 = arith.constant 0 : index
    %c0_4 = arith.constant 0 : index
    %11 = vector.load %arg6[%c0_3, %c0_4] : memref<8x128xf32, #tpu.memory_space<vmem>>, vector<8x128xf32>
    %c0_5 = arith.constant 0 : index
    %c0_6 = arith.constant 0 : index
    %12 = vector.load %arg3[%c0_5, %c0_6] : memref<512x128xbf16, #tpu.memory_space<vmem>>, vector<512x128xbf16>
    %cst_7 = arith.constant dense<0.000000e+00> : vector<8x128xf32>
    %13 = tpu.matmul %10, %12, %cst_7 {dimension_numbers = #tpu.dot_dimension_numbers<[1], [0], [0], [1], [0, 0, 1, 1], [], []>} : vector<8x512xbf16>, vector<512x128xbf16>, vector<8x128xf32> -> vector<8x128xf32>
    %14 = arith.addf %11, %13 : vector<8x128xf32>
    %c0_8 = arith.constant 0 : index
    %c0_9 = arith.constant 0 : index
    %15 = vector.load %arg6[%c0_8, %c0_9] : memref<8x128xf32, #tpu.memory_space<vmem>>, vector<8x128xf32>
    tpu.vector_store %arg6[%c0_8, %c0_9], %14 {strides = array<i32>} : memref<8x128xf32, #tpu.memory_space<vmem>>, vector<8x128xf32>,
    %c1_i32 = arith.constant 1 : i32
    %16 = arith.cmpi eq, %arg1, %c1_i32 : i32
    %17 = arith.extui %16 : i1 to i32
    %c0_i32_10 = arith.constant 0 : i32
    %18 = arith.cmpi ne, %17, %c0_i32_10 : i32
    scf.if %18 {
      %c0_11 = arith.constant 0 : index
      %c0_12 = arith.constant 0 : index
      %19 = vector.load %arg6[%c0_11, %c0_12] : memref<8x128xf32, #tpu.memory_space<vmem>>, vector<8x128xf32>
      %c0_13 = arith.constant 0 : index
      %c0_14 = arith.constant 0 : index
      %20 = vector.load %arg4[%c0_13, %c0_14] : memref<1x128xf32, #tpu.memory_space<vmem>>, vector<1x128xf32>
      %21 = vector.broadcast %20 : vector<1x128xf32> to vector<8x128xf32>
      %22 = arith.addf %19, %21 : vector<8x128xf32>
      %c0_15 = arith.constant 0 : index
      %c0_16 = arith.constant 0 : index
      %23 = vector.load %arg5[%c0_15, %c0_16] : memref<8x128xf32, #tpu.memory_space<vmem>>, vector<8x128xf32>
      tpu.vector_store %arg5[%c0_15, %c0_16], %22 {strides = array<i32>} : memref<8x128xf32, #tpu.memory_space<vmem>>, vector<8x128xf32>,
    } else {
    }
    return
  }
  func.func @transform_0(%arg0: i32, %arg1: i32) -> (i32, i32) {
    %c0_i32 = arith.constant 0 : i32
    return %arg0, %arg1 : i32, i32
  }
  func.func @transform_1(%arg0: i32, %arg1: i32) -> (i32, i32) {
    %c0_i32 = arith.constant 0 : i32
    %c0_i32_0 = arith.constant 0 : i32
    return %arg1, %c0_i32 : i32, i32
  }
  func.func @transform_2(%arg0: i32, %arg1: i32) -> (i32, i32) {
    %c0_i32 = arith.constant 0 : i32
    %c0_i32_0 = arith.constant 0 : i32
    %c0_i32_1 = arith.constant 0 : i32
    return %c0_i32, %c0_i32_0 : i32, i32
  }
  func.func @transform_3(%arg0: i32, %arg1: i32) -> (i32, i32) {
    %c0_i32 = arith.constant 0 : i32
    %c0_i32_0 = arith.constant 0 : i32
    return %arg0, %c0_i32 : i32, i32
  }
}

module attributes {stable_mosaic.version = 11 : i64} {
  func.func @_gemm_kernel(%arg0: i32, %arg1: i32, %arg2: memref<8x512xbf16, #tpu.memory_space<vmem>>, %arg3: memref<512x128xbf16, #tpu.memory_space<vmem>>, %arg4: memref<1x128xf32, #tpu.memory_space<vmem>>, %arg5: memref<8x128xf32, #tpu.memory_space<vmem>>, %arg6: memref<8x128xf32, #tpu.memory_space<vmem>>) attributes {dimension_semantics = [#tpu.dimension_semantics<parallel>, #tpu.dimension_semantics<arbitrary>], iteration_bounds = array<i64: 1, 2>, scalar_prefetch = 0 : i64, scratch_operands = 1 : i64, tpu.core_type = #tpu.core_type<tc>, window_params = [{transform_indices = @transform_0, window_bounds = array<i64: 8, 512>}, {transform_indices = @transform_1, window_bounds = array<i64: 512, 128>}, {pipeline_mode = #tpu.pipeline_mode<synchronous>, transform_indices = @transform_2, window_bounds = array<i64: 1, 128>}, {transform_indices = @transform_3, window_bounds = array<i64: 8, 128>}]} {
    %c0_i32 = arith.constant 0 : i32
    %0 = arith.cmpi eq, %arg1, %c0_i32 : i32
    %1 = arith.extui %0 : i1 to i32
    %c0_i32_0 = arith.constant 0 : i32
    %2 = arith.cmpi ne, %1, %c0_i32_0 : i32
    scf.if %2 {
      %cst_11 = arith.constant 0.000000e+00 : f32
      %16 = vector.broadcast %cst_11 : f32 to vector<8x128xf32>
      %c0_12 = arith.constant 0 : index
      %c0_13 = arith.constant 0 : index
      %17 = vector.load %arg6[%c0_12, %c0_13] : memref<8x128xf32, #tpu.memory_space<vmem>>, vector<8x128xf32>
      tpu.vector_store %arg6[%c0_12, %c0_13], %16 {strides = array<i32>} : memref<8x128xf32, #tpu.memory_space<vmem>>, vector<8x128xf32>,
    } else {
    }
    %c0 = arith.constant 0 : index
    %c0_1 = arith.constant 0 : index
    %3 = vector.load %arg2[%c0, %c0_1] : memref<8x512xbf16, #tpu.memory_space<vmem>>, vector<8x512xbf16>
    %cst = arith.constant 0.000000e+00 : bf16
    %4 = vector.broadcast %cst : bf16 to vector<8x512xbf16>
    %5 = arith.cmpf ogt, %3, %4 : vector<8x512xbf16>
    %cst_2 = arith.constant 0.000000e+00 : bf16
    %6 = vector.broadcast %cst_2 : bf16 to vector<8x512xbf16>
    %7 = arith.select %5, %3, %6 : vector<8x512xi1>, vector<8x512xbf16>
    %c0_3 = arith.constant 0 : index
    %c0_4 = arith.constant 0 : index
    %8 = vector.load %arg6[%c0_3, %c0_4] : memref<8x128xf32, #tpu.memory_space<vmem>>, vector<8x128xf32>
    %c0_5 = arith.constant 0 : index
    %c0_6 = arith.constant 0 : index
    %9 = vector.load %arg3[%c0_5, %c0_6] : memref<512x128xbf16, #tpu.memory_space<vmem>>, vector<512x128xbf16>
    %cst_7 = arith.constant dense<0.000000e+00> : vector<8x128xf32>
    %10 = tpu.matmul %7, %9, %cst_7 {dimension_numbers = #tpu.dot_dimension_numbers<[1], [0], [0], [1], [0, 0, 1, 1], [], []>} : vector<8x512xbf16>, vector<512x128xbf16>, vector<8x128xf32> -> vector<8x128xf32>
    %11 = arith.addf %8, %10 : vector<8x128xf32>
    %c0_8 = arith.constant 0 : index
    %c0_9 = arith.constant 0 : index
    %12 = vector.load %arg6[%c0_8, %c0_9] : memref<8x128xf32, #tpu.memory_space<vmem>>, vector<8x128xf32>
    tpu.vector_store %arg6[%c0_8, %c0_9], %11 {strides = array<i32>} : memref<8x128xf32, #tpu.memory_space<vmem>>, vector<8x128xf32>,
    %c1_i32 = arith.constant 1 : i32
    %13 = arith.cmpi eq, %arg1, %c1_i32 : i32
    %14 = arith.extui %13 : i1 to i32
    %c0_i32_10 = arith.constant 0 : i32
    %15 = arith.cmpi ne, %14, %c0_i32_10 : i32
    scf.if %15 {
      %c0_11 = arith.constant 0 : index
      %c0_12 = arith.constant 0 : index
      %16 = vector.load %arg6[%c0_11, %c0_12] : memref<8x128xf32, #tpu.memory_space<vmem>>, vector<8x128xf32>
      %c0_13 = arith.constant 0 : index
      %c0_14 = arith.constant 0 : index
      %17 = vector.load %arg4[%c0_13, %c0_14] : memref<1x128xf32, #tpu.memory_space<vmem>>, vector<1x128xf32>
      %18 = vector.broadcast %17 : vector<1x128xf32> to vector<8x128xf32>
      %19 = arith.addf %16, %18 : vector<8x128xf32>
      %c0_15 = arith.constant 0 : index
      %c0_16 = arith.constant 0 : index
      %20 = vector.load %arg5[%c0_15, %c0_16] : memref<8x128xf32, #tpu.memory_space<vmem>>, vector<8x128xf32>
      tpu.vector_store %arg5[%c0_15, %c0_16], %19 {strides = array<i32>} : memref<8x128xf32, #tpu.memory_space<vmem>>, vector<8x128xf32>,
    } else {
    }
    return
  }
  func.func @transform_0(%arg0: i32, %arg1: i32) -> (i32, i32) {
    %c0_i32 = arith.constant 0 : i32
    return %arg0, %arg1 : i32, i32
  }
  func.func @transform_1(%arg0: i32, %arg1: i32) -> (i32, i32) {
    %c0_i32 = arith.constant 0 : i32
    %c0_i32_0 = arith.constant 0 : i32
    return %arg1, %c0_i32 : i32, i32
  }
  func.func @transform_2(%arg0: i32, %arg1: i32) -> (i32, i32) {
    %c0_i32 = arith.constant 0 : i32
    %c0_i32_0 = arith.constant 0 : i32
    %c0_i32_1 = arith.constant 0 : i32
    return %c0_i32, %c0_i32_0 : i32, i32
  }
  func.func @transform_3(%arg0: i32, %arg1: i32) -> (i32, i32) {
    %c0_i32 = arith.constant 0 : i32
    %c0_i32_0 = arith.constant 0 : i32
    return %arg0, %c0_i32 : i32, i32
  }
}

module attributes {stable_mosaic.version = 11 : i64} {
  func.func @_gemm_kernel(%arg0: i32, %arg1: i32, %arg2: memref<32x512xbf16, #tpu.memory_space<vmem>>, %arg3: memref<512x128xbf16, #tpu.memory_space<vmem>>, %arg4: memref<1x128xf32, #tpu.memory_space<vmem>>, %arg5: memref<32x128xf32, #tpu.memory_space<vmem>>, %arg6: memref<32x128xf32, #tpu.memory_space<vmem>>) attributes {dimension_semantics = [#tpu.dimension_semantics<parallel>, #tpu.dimension_semantics<arbitrary>], iteration_bounds = array<i64: 1, 4>, scalar_prefetch = 0 : i64, scratch_operands = 1 : i64, tpu.core_type = #tpu.core_type<tc>, window_params = [{transform_indices = @transform_0, window_bounds = array<i64: 32, 512>}, {transform_indices = @transform_1, window_bounds = array<i64: 512, 128>}, {pipeline_mode = #tpu.pipeline_mode<synchronous>, transform_indices = @transform_2, window_bounds = array<i64: 1, 128>}, {transform_indices = @transform_3, window_bounds = array<i64: 32, 128>}]} {
    %c0_i32 = arith.constant 0 : i32
    %0 = arith.cmpi eq, %arg1, %c0_i32 : i32
    %1 = arith.extui %0 : i1 to i32
    %c0_i32_0 = arith.constant 0 : i32
    %2 = arith.cmpi ne, %1, %c0_i32_0 : i32
    scf.if %2 {
      %cst_11 = arith.constant 0.000000e+00 : f32
      %16 = vector.broadcast %cst_11 : f32 to vector<32x128xf32>
      %c0_12 = arith.constant 0 : index
      %c0_13 = arith.constant 0 : index
      %17 = vector.load %arg6[%c0_12, %c0_13] : memref<32x128xf32, #tpu.memory_space<vmem>>, vector<32x128xf32>
      tpu.vector_store %arg6[%c0_12, %c0_13], %16 {strides = array<i32>} : memref<32x128xf32, #tpu.memory_space<vmem>>, vector<32x128xf32>,
    } else {
    }
    %c0 = arith.constant 0 : index
    %c0_1 = arith.constant 0 : index
    %3 = vector.load %arg2[%c0, %c0_1] : memref<32x512xbf16, #tpu.memory_space<vmem>>, vector<32x512xbf16>
    %cst = arith.constant 0.000000e+00 : bf16
    %4 = vector.broadcast %cst : bf16 to vector<32x512xbf16>
    %5 = arith.cmpf ogt, %3, %4 : vector<32x512xbf16>
    %cst_2 = arith.constant 0.000000e+00 : bf16
    %6 = vector.broadcast %cst_2 : bf16 to vector<32x512xbf16>
    %7 = arith.select %5, %3, %6 : vector<32x512xi1>, vector<32x512xbf16>
    %c0_3 = arith.constant 0 : index
    %c0_4 = arith.constant 0 : index
    %8 = vector.load %arg6[%c0_3, %c0_4] : memref<32x128xf32, #tpu.memory_space<vmem>>, vector<32x128xf32>
    %c0_5 = arith.constant 0 : index
    %c0_6 = arith.constant 0 : index
    %9 = vector.load %arg3[%c0_5, %c0_6] : memref<512x128xbf16, #tpu.memory_space<vmem>>, vector<512x128xbf16>
    %cst_7 = arith.constant dense<0.000000e+00> : vector<32x128xf32>
    %10 = tpu.matmul %7, %9, %cst_7 {dimension_numbers = #tpu.dot_dimension_numbers<[1], [0], [0], [1], [0, 0, 1, 1], [], []>} : vector<32x512xbf16>, vector<512x128xbf16>, vector<32x128xf32> -> vector<32x128xf32>
    %11 = arith.addf %8, %10 : vector<32x128xf32>
    %c0_8 = arith.constant 0 : index
    %c0_9 = arith.constant 0 : index
    %12 = vector.load %arg6[%c0_8, %c0_9] : memref<32x128xf32, #tpu.memory_space<vmem>>, vector<32x128xf32>
    tpu.vector_store %arg6[%c0_8, %c0_9], %11 {strides = array<i32>} : memref<32x128xf32, #tpu.memory_space<vmem>>, vector<32x128xf32>,
    %c3_i32 = arith.constant 3 : i32
    %13 = arith.cmpi eq, %arg1, %c3_i32 : i32
    %14 = arith.extui %13 : i1 to i32
    %c0_i32_10 = arith.constant 0 : i32
    %15 = arith.cmpi ne, %14, %c0_i32_10 : i32
    scf.if %15 {
      %c0_11 = arith.constant 0 : index
      %c0_12 = arith.constant 0 : index
      %16 = vector.load %arg6[%c0_11, %c0_12] : memref<32x128xf32, #tpu.memory_space<vmem>>, vector<32x128xf32>
      %c0_13 = arith.constant 0 : index
      %c0_14 = arith.constant 0 : index
      %17 = vector.load %arg4[%c0_13, %c0_14] : memref<1x128xf32, #tpu.memory_space<vmem>>, vector<1x128xf32>
      %18 = vector.broadcast %17 : vector<1x128xf32> to vector<32x128xf32>
      %19 = arith.addf %16, %18 : vector<32x128xf32>
      %c0_15 = arith.constant 0 : index
      %c0_16 = arith.constant 0 : index
      %20 = vector.load %arg5[%c0_15, %c0_16] : memref<32x128xf32, #tpu.memory_space<vmem>>, vector<32x128xf32>
      tpu.vector_store %arg5[%c0_15, %c0_16], %19 {strides = array<i32>} : memref<32x128xf32, #tpu.memory_space<vmem>>, vector<32x128xf32>,
    } else {
    }
    return
  }
  func.func @transform_0(%arg0: i32, %arg1: i32) -> (i32, i32) {
    %c0_i32 = arith.constant 0 : i32
    return %arg0, %arg1 : i32, i32
  }
  func.func @transform_1(%arg0: i32, %arg1: i32) -> (i32, i32) {
    %c0_i32 = arith.constant 0 : i32
    %c0_i32_0 = arith.constant 0 : i32
    return %arg1, %c0_i32 : i32, i32
  }
  func.func @transform_2(%arg0: i32, %arg1: i32) -> (i32, i32) {
    %c0_i32 = arith.constant 0 : i32
    %c0_i32_0 = arith.constant 0 : i32
    %c0_i32_1 = arith.constant 0 : i32
    return %c0_i32, %c0_i32_0 : i32, i32
  }
  func.func @transform_3(%arg0: i32, %arg1: i32) -> (i32, i32) {
    %c0_i32 = arith.constant 0 : i32
    %c0_i32_0 = arith.constant 0 : i32
    return %arg0, %c0_i32 : i32, i32
  }
}

module attributes {stable_mosaic.version = 11 : i64} {
  func.func @_gemm_kernel(%arg0: i32, %arg1: i32, %arg2: memref<128x512xbf16, #tpu.memory_space<vmem>>, %arg3: memref<512x128xbf16, #tpu.memory_space<vmem>>, %arg4: memref<1x128xf32, #tpu.memory_space<vmem>>, %arg5: memref<128x128xf32, #tpu.memory_space<vmem>>, %arg6: memref<128x128xf32, #tpu.memory_space<vmem>>) attributes {dimension_semantics = [#tpu.dimension_semantics<parallel>, #tpu.dimension_semantics<arbitrary>], iteration_bounds = array<i64: 1, 2>, scalar_prefetch = 0 : i64, scratch_operands = 1 : i64, tpu.core_type = #tpu.core_type<tc>, window_params = [{transform_indices = @transform_0, window_bounds = array<i64: 128, 512>}, {transform_indices = @transform_1, window_bounds = array<i64: 512, 128>}, {pipeline_mode = #tpu.pipeline_mode<synchronous>, transform_indices = @transform_2, window_bounds = array<i64: 1, 128>}, {transform_indices = @transform_3, window_bounds = array<i64: 128, 128>}]} {
    %c0_i32 = arith.constant 0 : i32
    %0 = arith.cmpi eq, %arg1, %c0_i32 : i32
    %1 = arith.extui %0 : i1 to i32
    %c0_i32_0 = arith.constant 0 : i32
    %2 = arith.cmpi ne, %1, %c0_i32_0 : i32
    scf.if %2 {
      %cst_11 = arith.constant 0.000000e+00 : f32
      %16 = vector.broadcast %cst_11 : f32 to vector<128x128xf32>
      %c0_12 = arith.constant 0 : index
      %c0_13 = arith.constant 0 : index
      %17 = vector.load %arg6[%c0_12, %c0_13] : memref<128x128xf32, #tpu.memory_space<vmem>>, vector<128x128xf32>
      tpu.vector_store %arg6[%c0_12, %c0_13], %16 {strides = array<i32>} : memref<128x128xf32, #tpu.memory_space<vmem>>, vector<128x128xf32>,
    } else {
    }
    %c0 = arith.constant 0 : index
    %c0_1 = arith.constant 0 : index
    %3 = vector.load %arg2[%c0, %c0_1] : memref<128x512xbf16, #tpu.memory_space<vmem>>, vector<128x512xbf16>
    %cst = arith.constant 0.000000e+00 : bf16
    %4 = vector.broadcast %cst : bf16 to vector<128x512xbf16>
    %5 = arith.cmpf ogt, %3, %4 : vector<128x512xbf16>
    %cst_2 = arith.constant 0.000000e+00 : bf16
    %6 = vector.broadcast %cst_2 : bf16 to vector<128x512xbf16>
    %7 = arith.select %5, %3, %6 : vector<128x512xi1>, vector<128x512xbf16>
    %c0_3 = arith.constant 0 : index
    %c0_4 = arith.constant 0 : index
    %8 = vector.load %arg6[%c0_3, %c0_4] : memref<128x128xf32, #tpu.memory_space<vmem>>, vector<128x128xf32>
    %c0_5 = arith.constant 0 : index
    %c0_6 = arith.constant 0 : index
    %9 = vector.load %arg3[%c0_5, %c0_6] : memref<512x128xbf16, #tpu.memory_space<vmem>>, vector<512x128xbf16>
    %cst_7 = arith.constant dense<0.000000e+00> : vector<128x128xf32>
    %10 = tpu.matmul %7, %9, %cst_7 {dimension_numbers = #tpu.dot_dimension_numbers<[1], [0], [0], [1], [0, 0, 1, 1], [], []>} : vector<128x512xbf16>, vector<512x128xbf16>, vector<128x128xf32> -> vector<128x128xf32>
    %11 = arith.addf %8, %10 : vector<128x128xf32>
    %c0_8 = arith.constant 0 : index
    %c0_9 = arith.constant 0 : index
    %12 = vector.load %arg6[%c0_8, %c0_9] : memref<128x128xf32, #tpu.memory_space<vmem>>, vector<128x128xf32>
    tpu.vector_store %arg6[%c0_8, %c0_9], %11 {strides = array<i32>} : memref<128x128xf32, #tpu.memory_space<vmem>>, vector<128x128xf32>,
    %c1_i32 = arith.constant 1 : i32
    %13 = arith.cmpi eq, %arg1, %c1_i32 : i32
    %14 = arith.extui %13 : i1 to i32
    %c0_i32_10 = arith.constant 0 : i32
    %15 = arith.cmpi ne, %14, %c0_i32_10 : i32
    scf.if %15 {
      %c0_11 = arith.constant 0 : index
      %c0_12 = arith.constant 0 : index
      %16 = vector.load %arg6[%c0_11, %c0_12] : memref<128x128xf32, #tpu.memory_space<vmem>>, vector<128x128xf32>
      %c0_13 = arith.constant 0 : index
      %c0_14 = arith.constant 0 : index
      %17 = vector.load %arg4[%c0_13, %c0_14] : memref<1x128xf32, #tpu.memory_space<vmem>>, vector<1x128xf32>
      %18 = vector.broadcast %17 : vector<1x128xf32> to vector<128x128xf32>
      %19 = arith.addf %16, %18 : vector<128x128xf32>
      %c0_15 = arith.constant 0 : index
      %c0_16 = arith.constant 0 : index
      %20 = vector.load %arg5[%c0_15, %c0_16] : memref<128x128xf32, #tpu.memory_space<vmem>>, vector<128x128xf32>
      tpu.vector_store %arg5[%c0_15, %c0_16], %19 {strides = array<i32>} : memref<128x128xf32, #tpu.memory_space<vmem>>, vector<128x128xf32>,
    } else {
    }
    return
  }
  func.func @transform_0(%arg0: i32, %arg1: i32) -> (i32, i32) {
    %c0_i32 = arith.constant 0 : i32
    return %arg0, %arg1 : i32, i32
  }
  func.func @transform_1(%arg0: i32, %arg1: i32) -> (i32, i32) {
    %c0_i32 = arith.constant 0 : i32
    %c0_i32_0 = arith.constant 0 : i32
    return %arg1, %c0_i32 : i32, i32
  }
  func.func @transform_2(%arg0: i32, %arg1: i32) -> (i32, i32) {
    %c0_i32 = arith.constant 0 : i32
    %c0_i32_0 = arith.constant 0 : i32
    %c0_i32_1 = arith.constant 0 : i32
    return %c0_i32, %c0_i32_0 : i32, i32
  }
  func.func @transform_3(%arg0: i32, %arg1: i32) -> (i32, i32) {
    %c0_i32 = arith.constant 0 : i32
    %c0_i32_0 = arith.constant 0 : i32
    return %arg0, %c0_i32 : i32, i32
  }
}

module attributes {stable_mosaic.version = 11 : i64} {
  func.func @_gemm_kernel(%arg0: i32, %arg1: i32, %arg2: memref<512x512xbf16, #tpu.memory_space<vmem>>, %arg3: memref<512x128xbf16, #tpu.memory_space<vmem>>, %arg4: memref<1x128xf32, #tpu.memory_space<vmem>>, %arg5: memref<512x128xf32, #tpu.memory_space<vmem>>, %arg6: memref<512x128xf32, #tpu.memory_space<vmem>>) attributes {dimension_semantics = [#tpu.dimension_semantics<parallel>, #tpu.dimension_semantics<arbitrary>], iteration_bounds = array<i64: 1, 1>, scalar_prefetch = 0 : i64, scratch_operands = 1 : i64, tpu.core_type = #tpu.core_type<tc>, window_params = [{transform_indices = @transform_0, window_bounds = array<i64: 512, 512>}, {transform_indices = @transform_1, window_bounds = array<i64: 512, 128>}, {pipeline_mode = #tpu.pipeline_mode<synchronous>, transform_indices = @transform_2, window_bounds = array<i64: 1, 128>}, {transform_indices = @transform_3, window_bounds = array<i64: 512, 128>}]} {
    %c0_i32 = arith.constant 0 : i32
    %0 = arith.cmpi eq, %arg1, %c0_i32 : i32
    %1 = arith.extui %0 : i1 to i32
    %c0_i32_0 = arith.constant 0 : i32
    %2 = arith.cmpi ne, %1, %c0_i32_0 : i32
    scf.if %2 {
      %cst_12 = arith.constant 0.000000e+00 : f32
      %16 = vector.broadcast %cst_12 : f32 to vector<512x128xf32>
      %c0_13 = arith.constant 0 : index
      %c0_14 = arith.constant 0 : index
      %17 = vector.load %arg6[%c0_13, %c0_14] : memref<512x128xf32, #tpu.memory_space<vmem>>, vector<512x128xf32>
      tpu.vector_store %arg6[%c0_13, %c0_14], %16 {strides = array<i32>} : memref<512x128xf32, #tpu.memory_space<vmem>>, vector<512x128xf32>,
    } else {
    }
    %c0 = arith.constant 0 : index
    %c0_1 = arith.constant 0 : index
    %3 = vector.load %arg2[%c0, %c0_1] : memref<512x512xbf16, #tpu.memory_space<vmem>>, vector<512x512xbf16>
    %cst = arith.constant 0.000000e+00 : bf16
    %4 = vector.broadcast %cst : bf16 to vector<512x512xbf16>
    %5 = arith.cmpf ogt, %3, %4 : vector<512x512xbf16>
    %cst_2 = arith.constant 0.000000e+00 : bf16
    %6 = vector.broadcast %cst_2 : bf16 to vector<512x512xbf16>
    %7 = arith.select %5, %3, %6 : vector<512x512xi1>, vector<512x512xbf16>
    %c0_3 = arith.constant 0 : index
    %c0_4 = arith.constant 0 : index
    %8 = vector.load %arg6[%c0_3, %c0_4] : memref<512x128xf32, #tpu.memory_space<vmem>>, vector<512x128xf32>
    %c0_5 = arith.constant 0 : index
    %c0_6 = arith.constant 0 : index
    %9 = vector.load %arg3[%c0_5, %c0_6] : memref<512x128xbf16, #tpu.memory_space<vmem>>, vector<512x128xbf16>
    %cst_7 = arith.constant dense<0.000000e+00> : vector<512x128xf32>
    %10 = tpu.matmul %7, %9, %cst_7 {dimension_numbers = #tpu.dot_dimension_numbers<[1], [0], [0], [1], [0, 0, 1, 1], [], []>} : vector<512x512xbf16>, vector<512x128xbf16>, vector<512x128xf32> -> vector<512x128xf32>
    %11 = arith.addf %8, %10 : vector<512x128xf32>
    %c0_8 = arith.constant 0 : index
    %c0_9 = arith.constant 0 : index
    %12 = vector.load %arg6[%c0_8, %c0_9] : memref<512x128xf32, #tpu.memory_space<vmem>>, vector<512x128xf32>
    tpu.vector_store %arg6[%c0_8, %c0_9], %11 {strides = array<i32>} : memref<512x128xf32, #tpu.memory_space<vmem>>, vector<512x128xf32>,
    %c0_i32_10 = arith.constant 0 : i32
    %13 = arith.cmpi eq, %arg1, %c0_i32_10 : i32
    %14 = arith.extui %13 : i1 to i32
    %c0_i32_11 = arith.constant 0 : i32
    %15 = arith.cmpi ne, %14, %c0_i32_11 : i32
    scf.if %15 {
      %c0_12 = arith.constant 0 : index
      %c0_13 = arith.constant 0 : index
      %16 = vector.load %arg6[%c0_12, %c0_13] : memref<512x128xf32, #tpu.memory_space<vmem>>, vector<512x128xf32>
      %c0_14 = arith.constant 0 : index
      %c0_15 = arith.constant 0 : index
      %17 = vector.load %arg4[%c0_14, %c0_15] : memref<1x128xf32, #tpu.memory_space<vmem>>, vector<1x128xf32>
      %18 = vector.broadcast %17 : vector<1x128xf32> to vector<512x128xf32>
      %19 = arith.addf %16, %18 : vector<512x128xf32>
      %c0_16 = arith.constant 0 : index
      %c0_17 = arith.constant 0 : index
      %20 = vector.load %arg5[%c0_16, %c0_17] : memref<512x128xf32, #tpu.memory_space<vmem>>, vector<512x128xf32>
      tpu.vector_store %arg5[%c0_16, %c0_17], %19 {strides = array<i32>} : memref<512x128xf32, #tpu.memory_space<vmem>>, vector<512x128xf32>,
    } else {
    }
    return
  }
  func.func @transform_0(%arg0: i32, %arg1: i32) -> (i32, i32) {
    %c0_i32 = arith.constant 0 : i32
    return %arg0, %arg1 : i32, i32
  }
  func.func @transform_1(%arg0: i32, %arg1: i32) -> (i32, i32) {
    %c0_i32 = arith.constant 0 : i32
    %c0_i32_0 = arith.constant 0 : i32
    return %arg1, %c0_i32 : i32, i32
  }
  func.func @transform_2(%arg0: i32, %arg1: i32) -> (i32, i32) {
    %c0_i32 = arith.constant 0 : i32
    %c0_i32_0 = arith.constant 0 : i32
    %c0_i32_1 = arith.constant 0 : i32
    return %c0_i32, %c0_i32_0 : i32, i32
  }
  func.func @transform_3(%arg0: i32, %arg1: i32) -> (i32, i32) {
    %c0_i32 = arith.constant 0 : i32
    %c0_i32_0 = arith.constant 0 : i32
    return %arg0, %c0_i32 : i32, i32
  }
}

module attributes {stable_mosaic.version = 11 : i64} {
  func.func @_bn_stats_kernel(%arg0: i32, %arg1: memref<512x128xf32, #tpu.memory_space<vmem>>, %arg2: memref<1x128xf32, #tpu.memory_space<vmem>>, %arg3: memref<1x128xf32, #tpu.memory_space<vmem>>) attributes {dimension_semantics = [#tpu.dimension_semantics<arbitrary>], iteration_bounds = array<i64: 1>, scalar_prefetch = 0 : i64, scratch_operands = 0 : i64, tpu.core_type = #tpu.core_type<tc>, window_params = [{transform_indices = @transform_0, window_bounds = array<i64: 512, 128>}, {pipeline_mode = #tpu.pipeline_mode<synchronous>, transform_indices = @transform_1, window_bounds = array<i64: 1, 128>}, {pipeline_mode = #tpu.pipeline_mode<synchronous>, transform_indices = @transform_2, window_bounds = array<i64: 1, 128>}]} {
    %c0_i32 = arith.constant 0 : i32
    %0 = arith.cmpi eq, %arg0, %c0_i32 : i32
    %1 = arith.extui %0 : i1 to i32
    %c0_i32_0 = arith.constant 0 : i32
    %2 = arith.cmpi ne, %1, %c0_i32_0 : i32
    scf.if %2 {
      %cst_11 = arith.constant 0.000000e+00 : f32
      %15 = vector.broadcast %cst_11 : f32 to vector<1x128xf32>
      %c0_12 = arith.constant 0 : index
      %c0_13 = arith.constant 0 : index
      %16 = vector.load %arg2[%c0_12, %c0_13] : memref<1x128xf32, #tpu.memory_space<vmem>>, vector<1x128xf32>
      tpu.vector_store %arg2[%c0_12, %c0_13], %15 {strides = array<i32>} : memref<1x128xf32, #tpu.memory_space<vmem>>, vector<1x128xf32>,
      %cst_14 = arith.constant 0.000000e+00 : f32
      %17 = vector.broadcast %cst_14 : f32 to vector<1x128xf32>
      %c0_15 = arith.constant 0 : index
      %c0_16 = arith.constant 0 : index
      %18 = vector.load %arg3[%c0_15, %c0_16] : memref<1x128xf32, #tpu.memory_space<vmem>>, vector<1x128xf32>
      tpu.vector_store %arg3[%c0_15, %c0_16], %17 {strides = array<i32>} : memref<1x128xf32, #tpu.memory_space<vmem>>, vector<1x128xf32>,
    } else {
    }
    %c0 = arith.constant 0 : index
    %c0_1 = arith.constant 0 : index
    %3 = vector.load %arg1[%c0, %c0_1] : memref<512x128xf32, #tpu.memory_space<vmem>>, vector<512x128xf32>
    %c0_2 = arith.constant 0 : index
    %c0_3 = arith.constant 0 : index
    %4 = vector.load %arg2[%c0_2, %c0_3] : memref<1x128xf32, #tpu.memory_space<vmem>>, vector<1x128xf32>
    %cst = arith.constant dense<0.000000e+00> : vector<128xf32>
    %5 = vector.multi_reduction <add>, %3, %cst [0] : vector<512x128xf32> to vector<128xf32>
    %6 = vector.shape_cast %5 : vector<128xf32> to vector<1x128xf32>
    %7 = arith.addf %4, %6 : vector<1x128xf32>
    %c0_4 = arith.constant 0 : index
    %c0_5 = arith.constant 0 : index
    %8 = vector.load %arg2[%c0_4, %c0_5] : memref<1x128xf32, #tpu.memory_space<vmem>>, vector<1x128xf32>
    tpu.vector_store %arg2[%c0_4, %c0_5], %7 {strides = array<i32>} : memref<1x128xf32, #tpu.memory_space<vmem>>, vector<1x128xf32>,
    %c0_6 = arith.constant 0 : index
    %c0_7 = arith.constant 0 : index
    %9 = vector.load %arg3[%c0_6, %c0_7] : memref<1x128xf32, #tpu.memory_space<vmem>>, vector<1x128xf32>
    %10 = arith.mulf %3, %3 : vector<512x128xf32>
    %cst_8 = arith.constant dense<0.000000e+00> : vector<128xf32>
    %11 = vector.multi_reduction <add>, %10, %cst_8 [0] : vector<512x128xf32> to vector<128xf32>
    %12 = vector.shape_cast %11 : vector<128xf32> to vector<1x128xf32>
    %13 = arith.addf %9, %12 : vector<1x128xf32>
    %c0_9 = arith.constant 0 : index
    %c0_10 = arith.constant 0 : index
    %14 = vector.load %arg3[%c0_9, %c0_10] : memref<1x128xf32, #tpu.memory_space<vmem>>, vector<1x128xf32>
    tpu.vector_store %arg3[%c0_9, %c0_10], %13 {strides = array<i32>} : memref<1x128xf32, #tpu.memory_space<vmem>>, vector<1x128xf32>,
    return
  }
  func.func @transform_0(%arg0: i32) -> (i32, i32) {
    %c0_i32 = arith.constant 0 : i32
    %c0_i32_0 = arith.constant 0 : i32
    return %arg0, %c0_i32 : i32, i32
  }
  func.func @transform_1(%arg0: i32) -> (i32, i32) {
    %c0_i32 = arith.constant 0 : i32
    %c0_i32_0 = arith.constant 0 : i32
    %c0_i32_1 = arith.constant 0 : i32
    return %c0_i32, %c0_i32_0 : i32, i32
  }
  func.func @transform_2(%arg0: i32) -> (i32, i32) {
    %c0_i32 = arith.constant 0 : i32
    %c0_i32_0 = arith.constant 0 : i32
    %c0_i32_1 = arith.constant 0 : i32
    return %c0_i32, %c0_i32_0 : i32, i32
  }
}

module attributes {stable_mosaic.version = 11 : i64} {
  func.func @_bn_apply_kernel(%arg0: i32, %arg1: memref<512x128xf32, #tpu.memory_space<vmem>>, %arg2: memref<1x128xf32, #tpu.memory_space<vmem>>, %arg3: memref<1x128xf32, #tpu.memory_space<vmem>>, %arg4: memref<1x128xf32, #tpu.memory_space<vmem>>, %arg5: memref<1x128xf32, #tpu.memory_space<vmem>>, %arg6: memref<512x128xf32, #tpu.memory_space<vmem>>) attributes {dimension_semantics = [#tpu.dimension_semantics<parallel>], iteration_bounds = array<i64: 1>, scalar_prefetch = 0 : i64, scratch_operands = 0 : i64, tpu.core_type = #tpu.core_type<tc>, window_params = [{transform_indices = @transform_0, window_bounds = array<i64: 512, 128>}, {pipeline_mode = #tpu.pipeline_mode<synchronous>, transform_indices = @transform_1, window_bounds = array<i64: 1, 128>}, {pipeline_mode = #tpu.pipeline_mode<synchronous>, transform_indices = @transform_2, window_bounds = array<i64: 1, 128>}, {pipeline_mode = #tpu.pipeline_mode<synchronous>, transform_indices = @transform_3, window_bounds = array<i64: 1, 128>}, {pipeline_mode = #tpu.pipeline_mode<synchronous>, transform_indices = @transform_4, window_bounds = array<i64: 1, 128>}, {transform_indices = @transform_5, window_bounds = array<i64: 512, 128>}]} {
    %c0 = arith.constant 0 : index
    %c0_0 = arith.constant 0 : index
    %0 = vector.load %arg2[%c0, %c0_0] : memref<1x128xf32, #tpu.memory_space<vmem>>, vector<1x128xf32>
    %cst = arith.constant 0.001953125 : f32
    %1 = vector.broadcast %cst : f32 to vector<1x128xf32>
    %2 = arith.mulf %0, %1 : vector<1x128xf32>
    %c0_1 = arith.constant 0 : index
    %c0_2 = arith.constant 0 : index
    %3 = vector.load %arg3[%c0_1, %c0_2] : memref<1x128xf32, #tpu.memory_space<vmem>>, vector<1x128xf32>
    %cst_3 = arith.constant 0.001953125 : f32
    %4 = vector.broadcast %cst_3 : f32 to vector<1x128xf32>
    %5 = arith.mulf %3, %4 : vector<1x128xf32>
    %6 = arith.mulf %2, %2 : vector<1x128xf32>
    %7 = arith.subf %5, %6 : vector<1x128xf32>
    %c0_4 = arith.constant 0 : index
    %c0_5 = arith.constant 0 : index
    %8 = vector.load %arg4[%c0_4, %c0_5] : memref<1x128xf32, #tpu.memory_space<vmem>>, vector<1x128xf32>
    %cst_6 = arith.constant 9.99999974E-6 : f32
    %9 = vector.broadcast %cst_6 : f32 to vector<1x128xf32>
    %10 = arith.addf %7, %9 : vector<1x128xf32>
    %11 = math.rsqrt %10 : vector<1x128xf32>
    %12 = arith.mulf %8, %11 : vector<1x128xf32>
    %c0_7 = arith.constant 0 : index
    %c0_8 = arith.constant 0 : index
    %13 = vector.load %arg5[%c0_7, %c0_8] : memref<1x128xf32, #tpu.memory_space<vmem>>, vector<1x128xf32>
    %14 = arith.mulf %2, %12 : vector<1x128xf32>
    %15 = arith.subf %13, %14 : vector<1x128xf32>
    %c0_9 = arith.constant 0 : index
    %c0_10 = arith.constant 0 : index
    %16 = vector.load %arg1[%c0_9, %c0_10] : memref<512x128xf32, #tpu.memory_space<vmem>>, vector<512x128xf32>
    %17 = vector.broadcast %12 : vector<1x128xf32> to vector<512x128xf32>
    %18 = arith.mulf %16, %17 : vector<512x128xf32>
    %19 = vector.broadcast %15 : vector<1x128xf32> to vector<512x128xf32>
    %20 = arith.addf %18, %19 : vector<512x128xf32>
    %c0_11 = arith.constant 0 : index
    %c0_12 = arith.constant 0 : index
    %21 = vector.load %arg6[%c0_11, %c0_12] : memref<512x128xf32, #tpu.memory_space<vmem>>, vector<512x128xf32>
    tpu.vector_store %arg6[%c0_11, %c0_12], %20 {strides = array<i32>} : memref<512x128xf32, #tpu.memory_space<vmem>>, vector<512x128xf32>,
    return
  }
  func.func @transform_0(%arg0: i32) -> (i32, i32) {
    %c0_i32 = arith.constant 0 : i32
    %c0_i32_0 = arith.constant 0 : i32
    return %arg0, %c0_i32 : i32, i32
  }
  func.func @transform_1(%arg0: i32) -> (i32, i32) {
    %c0_i32 = arith.constant 0 : i32
    %c0_i32_0 = arith.constant 0 : i32
    %c0_i32_1 = arith.constant 0 : i32
    return %c0_i32, %c0_i32_0 : i32, i32
  }
  func.func @transform_2(%arg0: i32) -> (i32, i32) {
    %c0_i32 = arith.constant 0 : i32
    %c0_i32_0 = arith.constant 0 : i32
    %c0_i32_1 = arith.constant 0 : i32
    return %c0_i32, %c0_i32_0 : i32, i32
  }
  func.func @transform_3(%arg0: i32) -> (i32, i32) {
    %c0_i32 = arith.constant 0 : i32
    %c0_i32_0 = arith.constant 0 : i32
    %c0_i32_1 = arith.constant 0 : i32
    return %c0_i32, %c0_i32_0 : i32, i32
  }
  func.func @transform_4(%arg0: i32) -> (i32, i32) {
    %c0_i32 = arith.constant 0 : i32
    %c0_i32_0 = arith.constant 0 : i32
    %c0_i32_1 = arith.constant 0 : i32
    return %c0_i32, %c0_i32_0 : i32, i32
  }
  func.func @transform_5(%arg0: i32) -> (i32, i32) {
    %c0_i32 = arith.constant 0 : i32
    %c0_i32_0 = arith.constant 0 : i32
    return %arg0, %c0_i32 : i32, i32
  }
}

module attributes {stable_mosaic.version = 11 : i64} {
  func.func @_gemm_kernel(%arg0: i32, %arg1: i32, %arg2: memref<512x256xbf16, #tpu.memory_space<vmem>>, %arg3: memref<256x128xbf16, #tpu.memory_space<vmem>>, %arg4: memref<1x128xf32, #tpu.memory_space<vmem>>, %arg5: memref<512x128xf32, #tpu.memory_space<vmem>>, %arg6: memref<512x128xf32, #tpu.memory_space<vmem>>) attributes {dimension_semantics = [#tpu.dimension_semantics<parallel>, #tpu.dimension_semantics<arbitrary>], iteration_bounds = array<i64: 4, 1>, scalar_prefetch = 0 : i64, scratch_operands = 1 : i64, tpu.core_type = #tpu.core_type<tc>, window_params = [{transform_indices = @transform_0, window_bounds = array<i64: 512, 256>}, {transform_indices = @transform_1, window_bounds = array<i64: 256, 128>}, {pipeline_mode = #tpu.pipeline_mode<synchronous>, transform_indices = @transform_2, window_bounds = array<i64: 1, 128>}, {transform_indices = @transform_3, window_bounds = array<i64: 512, 128>}]} {
    %c0_i32 = arith.constant 0 : i32
    %0 = arith.cmpi eq, %arg1, %c0_i32 : i32
    %1 = arith.extui %0 : i1 to i32
    %c0_i32_0 = arith.constant 0 : i32
    %2 = arith.cmpi ne, %1, %c0_i32_0 : i32
    scf.if %2 {
      %cst_12 = arith.constant 0.000000e+00 : f32
      %16 = vector.broadcast %cst_12 : f32 to vector<512x128xf32>
      %c0_13 = arith.constant 0 : index
      %c0_14 = arith.constant 0 : index
      %17 = vector.load %arg6[%c0_13, %c0_14] : memref<512x128xf32, #tpu.memory_space<vmem>>, vector<512x128xf32>
      tpu.vector_store %arg6[%c0_13, %c0_14], %16 {strides = array<i32>} : memref<512x128xf32, #tpu.memory_space<vmem>>, vector<512x128xf32>,
    } else {
    }
    %c0 = arith.constant 0 : index
    %c0_1 = arith.constant 0 : index
    %3 = vector.load %arg2[%c0, %c0_1] : memref<512x256xbf16, #tpu.memory_space<vmem>>, vector<512x256xbf16>
    %cst = arith.constant 0.000000e+00 : bf16
    %4 = vector.broadcast %cst : bf16 to vector<512x256xbf16>
    %5 = arith.cmpf ogt, %3, %4 : vector<512x256xbf16>
    %cst_2 = arith.constant 0.000000e+00 : bf16
    %6 = vector.broadcast %cst_2 : bf16 to vector<512x256xbf16>
    %7 = arith.select %5, %3, %6 : vector<512x256xi1>, vector<512x256xbf16>
    %c0_3 = arith.constant 0 : index
    %c0_4 = arith.constant 0 : index
    %8 = vector.load %arg6[%c0_3, %c0_4] : memref<512x128xf32, #tpu.memory_space<vmem>>, vector<512x128xf32>
    %c0_5 = arith.constant 0 : index
    %c0_6 = arith.constant 0 : index
    %9 = vector.load %arg3[%c0_5, %c0_6] : memref<256x128xbf16, #tpu.memory_space<vmem>>, vector<256x128xbf16>
    %cst_7 = arith.constant dense<0.000000e+00> : vector<512x128xf32>
    %10 = tpu.matmul %7, %9, %cst_7 {dimension_numbers = #tpu.dot_dimension_numbers<[1], [0], [0], [1], [0, 0, 1, 1], [], []>} : vector<512x256xbf16>, vector<256x128xbf16>, vector<512x128xf32> -> vector<512x128xf32>
    %11 = arith.addf %8, %10 : vector<512x128xf32>
    %c0_8 = arith.constant 0 : index
    %c0_9 = arith.constant 0 : index
    %12 = vector.load %arg6[%c0_8, %c0_9] : memref<512x128xf32, #tpu.memory_space<vmem>>, vector<512x128xf32>
    tpu.vector_store %arg6[%c0_8, %c0_9], %11 {strides = array<i32>} : memref<512x128xf32, #tpu.memory_space<vmem>>, vector<512x128xf32>,
    %c0_i32_10 = arith.constant 0 : i32
    %13 = arith.cmpi eq, %arg1, %c0_i32_10 : i32
    %14 = arith.extui %13 : i1 to i32
    %c0_i32_11 = arith.constant 0 : i32
    %15 = arith.cmpi ne, %14, %c0_i32_11 : i32
    scf.if %15 {
      %c0_12 = arith.constant 0 : index
      %c0_13 = arith.constant 0 : index
      %16 = vector.load %arg6[%c0_12, %c0_13] : memref<512x128xf32, #tpu.memory_space<vmem>>, vector<512x128xf32>
      %c0_14 = arith.constant 0 : index
      %c0_15 = arith.constant 0 : index
      %17 = vector.load %arg4[%c0_14, %c0_15] : memref<1x128xf32, #tpu.memory_space<vmem>>, vector<1x128xf32>
      %18 = vector.broadcast %17 : vector<1x128xf32> to vector<512x128xf32>
      %19 = arith.addf %16, %18 : vector<512x128xf32>
      %20 = math.tanh %19 : vector<512x128xf32>
      %c0_16 = arith.constant 0 : index
      %c0_17 = arith.constant 0 : index
      %21 = vector.load %arg5[%c0_16, %c0_17] : memref<512x128xf32, #tpu.memory_space<vmem>>, vector<512x128xf32>
      tpu.vector_store %arg5[%c0_16, %c0_17], %20 {strides = array<i32>} : memref<512x128xf32, #tpu.memory_space<vmem>>, vector<512x128xf32>,
    } else {
    }
    return
  }
  func.func @transform_0(%arg0: i32, %arg1: i32) -> (i32, i32) {
    %c0_i32 = arith.constant 0 : i32
    return %arg0, %arg1 : i32, i32
  }
  func.func @transform_1(%arg0: i32, %arg1: i32) -> (i32, i32) {
    %c0_i32 = arith.constant 0 : i32
    %c0_i32_0 = arith.constant 0 : i32
    return %arg1, %c0_i32 : i32, i32
  }
  func.func @transform_2(%arg0: i32, %arg1: i32) -> (i32, i32) {
    %c0_i32 = arith.constant 0 : i32
    %c0_i32_0 = arith.constant 0 : i32
    %c0_i32_1 = arith.constant 0 : i32
    return %c0_i32, %c0_i32_0 : i32, i32
  }
  func.func @transform_3(%arg0: i32, %arg1: i32) -> (i32, i32) {
    %c0_i32 = arith.constant 0 : i32
    %c0_i32_0 = arith.constant 0 : i32
    return %arg0, %c0_i32 : i32, i32
  }
}

</mosaic_0001>

<bundles_post_ra>
// kernel: fwd.24
= control target key start
LH: loop header
LB: loop body
LE: loop exit
PB: predicated region body
PF: predicated region fallthrough
CT: control target
= control target key end

     0   :  { %s1708_s1 = inlined_call_operand.vmem [shape: bf16[128,128], index: 1, kind: input, shape index: {}]   ;;  %s1709_s0 = inlined_call_operand.vmem [shape: bf16[512,128], index: 0, kind: input, shape index: {}]   ;;  %s1710_s2 = inlined_call_operand.vmem [shape: f32[1,128], index: 2, kind: input, shape index: {}]   ;;  %s1711_s3 = inlined_call_operand.vmem [shape: f32[512,128], index: 3, kind: output, shape index: {}]  }
   0x1   :  { %v1267_v0 = vld [vmem:[%s1708_s1 + $0x38] sm:$0xff]   ;;  %v1268_v1 = vld [vmem:[%s1708_s1 + $0x30] sm:$0xff]   ;;  %v1269_v2 = vld [vmem:[%s1708_s1 + $0x28] sm:$0xff]  }
   0x2   :  { %1171 = vmatprep.subr.bf16.mxu0 %v1267_v0  ;;  %1251 = vmatprep.subr.bf16.mxu1 %v1267_v0  ;;  %v1270_v3 = vld [vmem:[%s1708_s1 + $0x20] sm:$0xff]   ;;  %v1271_v6 = vld [vmem:[%s1708_s1 + $0x18] sm:$0xff]   ;;  %v1272_v7 = vld [vmem:[%s1708_s1 + $0x10] sm:$0xff]  }
   0x3   :  { %1172 = vmatpush3.bf16.msra.mxu0 %v1267_v0  ;;  %1259 = vmatpush3.bf16.msra.mxu1 %v1267_v0  ;;  %v1275_v4 = vld [vmem:[%s1709_s0] sm:$0xff]   ;;  %v1273_v8 = vld [vmem:[%s1708_s1 + $0x8] sm:$0xff]   ;;  %v1279_v12 = vld [vmem:[%s1709_s0 + $0x10] sm:$0xff]  }
   0x4   :  { %1173 = vmatprep.subr.bf16.mxu0 %v1268_v1  ;;  %1252 = vmatprep.subr.bf16.mxu1 %v1268_v1  ;;  %v1276_v5 = vld [vmem:[%s1709_s0 + $0x80] sm:$0xff]   ;;  %v1277_v10 = vld [vmem:[%s1709_s0 + $0x8] sm:$0xff]   ;;  %v1280_v13 = vld [vmem:[%s1709_s0 + $0x90] sm:$0xff]  }
   0x5   :  { %1187 = vmatprep.mubr.bf16.mxu0 %v1275_v4  ;;  %1219 = vmatprep.mubr.bf16.mxu1 %v1276_v5  ;;  %v1274_v9 = vld [vmem:[%s1708_s1] sm:$0xff]   ;;  %v1278_v11 = vld [vmem:[%s1709_s0 + $0x88] sm:$0xff]   ;;  %v1281_v14 = vld [vmem:[%s1709_s0 + $0x18] sm:$0xff]  }
   0x6   :  { %v1282_v15 = vld [vmem:[%s1709_s0 + $0x98] sm:$0xff]   ;;  %v1283_v16 = vld [vmem:[%s1709_s0 + $0x20] sm:$0xff]   ;;  %v1285_v18 = vld [vmem:[%s1709_s0 + $0x28] sm:$0xff]  }
   0x7   :  { %1174 = vmatpush3.bf16.msra.mxu0 %v1268_v1  ;;  %1260 = vmatpush3.bf16.msra.mxu1 %v1268_v1  ;;  %v1284_v17 = vld [vmem:[%s1709_s0 + $0xa0] sm:$0xff]   ;;  %v1286_v19 = vld [vmem:[%s1709_s0 + $0xa8] sm:$0xff]   ;;  %v1287_v20 = vld [vmem:[%s1709_s0 + $0x30] sm:$0xff]  }
   0x8   :  { %1175 = vmatprep.subr.bf16.mxu0 %v1269_v2  ;;  %1253 = vmatprep.subr.bf16.mxu1 %v1269_v2  ;;  %v1288_v21 = vld [vmem:[%s1709_s0 + $0xb0] sm:$0xff]   ;;  %v1289_v22 = vld [vmem:[%s1709_s0 + $0x38] sm:$0xff]   ;;  %v1291_v24 = vld [vmem:[%s1709_s0 + $0x40] sm:$0xff]  }
   0x9   :  { %v1290_v23 = vld [vmem:[%s1709_s0 + $0xb8] sm:$0xff]   ;;  %v1292_v25 = vld [vmem:[%s1709_s0 + $0xc0] sm:$0xff]   ;;  %v1293_v26 = vld [vmem:[%s1709_s0 + $0x48] sm:$0xff]  }
   0xa   :  { %v1294_v27 = vld [vmem:[%s1709_s0 + $0xc8] sm:$0xff]   ;;  %v1295_v28 = vld [vmem:[%s1709_s0 + $0x50] sm:$0xff]   ;;  %v1297_v30 = vld [vmem:[%s1709_s0 + $0x58] sm:$0xff]  }
   0xb   :  { %1176 = vmatpush3.bf16.msra.mxu0 %v1269_v2  ;;  %1261 = vmatpush3.bf16.msra.mxu1 %v1269_v2  ;;  %v1296_v29 = vld [vmem:[%s1709_s0 + $0xd0] sm:$0xff]   ;;  %v1298_v31 = vld [vmem:[%s1709_s0 + $0xd8] sm:$0xff]   ;;  %v1299_v32 = vld [vmem:[%s1709_s0 + $0x60] sm:$0xff]  }
   0xc   :  { %1177 = vmatprep.subr.bf16.mxu0 %v1270_v3  ;;  %1254 = vmatprep.subr.bf16.mxu1 %v1270_v3  ;;  %v1300_v33 = vld [vmem:[%s1709_s0 + $0xe0] sm:$0xff]   ;;  %v1301_v34 = vld [vmem:[%s1709_s0 + $0x68] sm:$0xff]   ;;  %v1303_v36 = vld [vmem:[%s1709_s0 + $0x70] sm:$0xff]  }
   0xd   :  { %v1302_v35 = vld [vmem:[%s1709_s0 + $0xe8] sm:$0xff]   ;;  %v1304_v37 = vld [vmem:[%s1709_s0 + $0xf0] sm:$0xff]   ;;  %v1305_v38 = vld [vmem:[%s1709_s0 + $0x78] sm:$0xff]  }
   0xe   :  { %v1306_v39 = vld [vmem:[%s1709_s0 + $0xf8] sm:$0xff]   ;;  %v1450_v40 = vld [vmem:[%s1710_s2] ss:$0 sm:$0xff] }
   0xf   :  { %1178 = vmatpush3.bf16.msra.mxu0 %v1270_v3  ;;  %1262 = vmatpush3.bf16.msra.mxu1 %v1270_v3 }
  0x10   :  { %1179 = vmatprep.subr.bf16.mxu0 %v1271_v6  ;;  %1255 = vmatprep.subr.bf16.mxu1 %v1271_v6 }
  0x13   :  { %1180 = vmatpush3.bf16.msra.mxu0 %v1271_v6  ;;  %1263 = vmatpush3.bf16.msra.mxu1 %v1271_v6 }
  0x14   :  { %1181 = vmatprep.subr.bf16.mxu0 %v1272_v7  ;;  %1256 = vmatprep.subr.bf16.mxu1 %v1272_v7 }
  0x17   :  { %1182 = vmatpush3.bf16.msra.mxu0 %v1272_v7  ;;  %1264 = vmatpush3.bf16.msra.mxu1 %v1272_v7 }
  0x18   :  { %1183 = vmatprep.subr.bf16.mxu0 %v1273_v8  ;;  %1257 = vmatprep.subr.bf16.mxu1 %v1273_v8 }
  0x1b   :  { %1184 = vmatpush3.bf16.msra.mxu0 %v1273_v8  ;;  %1265 = vmatpush3.bf16.msra.mxu1 %v1273_v8 }
  0x1c   :  { %1185 = vmatprep.subr.bf16.mxu0 %v1274_v9  ;;  %1258 = vmatprep.subr.bf16.mxu1 %v1274_v9 }
  0x1f   :  { %1186 = vmatpush3.bf16.msra.mxu0 %v1274_v9  ;;  %1266 = vmatpush3.bf16.msra.mxu1 %v1274_v9 }
  0x22   :  { %1188 = vmatmul.mubr.bf16.vlgmr.msra.gmra.mxu0 %v1277_v10  ;;  %1220 = vmatmul.mubr.bf16.vlgmr.msra.gmra.mxu1 %v1278_v11 }
  0x23   :  { %1191 = vmatprep.mubr.bf16.mxu0 %v1279_v12  ;;  %1223 = vmatprep.mubr.bf16.mxu1 %v1280_v13 }
  0x2a   :  { %1192 = vmatmul.mubr.bf16.gmra.mxu0 %v1281_v14  ;;  %1224 = vmatmul.mubr.bf16.gmra.mxu1 %v1282_v15 }
  0x2b   :  { %1195 = vmatprep.mubr.bf16.mxu0 %v1283_v16  ;;  %1227 = vmatprep.mubr.bf16.mxu1 %v1284_v17 }
  0x32   :  { %1196 = vmatmul.mubr.bf16.gmra.mxu0 %v1285_v18  ;;  %1228 = vmatmul.mubr.bf16.gmra.mxu1 %v1286_v19 }
  0x33   :  { %1199 = vmatprep.mubr.bf16.mxu0 %v1287_v20  ;;  %1231 = vmatprep.mubr.bf16.mxu1 %v1288_v21 }
  0x3a   :  { %1200 = vmatmul.mubr.bf16.gmra.mxu0 %v1289_v22  ;;  %1232 = vmatmul.mubr.bf16.gmra.mxu1 %v1290_v23 }
  0x3b   :  { %1203 = vmatprep.mubr.bf16.mxu0 %v1291_v24  ;;  %1235 = vmatprep.mubr.bf16.mxu1 %v1292_v25 }
  0x42   :  { %1204 = vmatmul.mubr.bf16.gmra.mxu0 %v1293_v26  ;;  %1236 = vmatmul.mubr.bf16.gmra.mxu1 %v1294_v27 }
  0x43   :  { %1207 = vmatprep.mubr.bf16.mxu0 %v1295_v28  ;;  %1239 = vmatprep.mubr.bf16.mxu1 %v1296_v29 }
  0x4a   :  { %1208 = vmatmul.mubr.bf16.gmra.mxu0 %v1297_v30  ;;  %1240 = vmatmul.mubr.bf16.gmra.mxu1 %v1298_v31 }
  0x4b   :  { %1211 = vmatprep.mubr.bf16.mxu0 %v1299_v32  ;;  %1243 = vmatprep.mubr.bf16.mxu1 %v1300_v33 }
  0x52   :  { %1212 = vmatmul.mubr.bf16.gmra.mxu0 %v1301_v34  ;;  %1244 = vmatmul.mubr.bf16.gmra.mxu1 %v1302_v35 }
  0x53   :  { %1215 = vmatprep.mubr.bf16.mxu0 %v1303_v36  ;;  %1247 = vmatprep.mubr.bf16.mxu1 %v1304_v37 }
  0x5a   :  { %1216 = vmatmul.mubr.bf16.gmra.mxu0 %v1305_v38  ;;  %1248 = vmatmul.mubr.bf16.gmra.mxu1 %v1306_v39 }
  0xe2   :  { %v1189_v41 = vpop.f32.mrf.mxu0  ;;  %v1221_v42 = vpop.f32.mrf.mxu1 }
  0xe3   :  { %v960_v43 = vadd.f32 %v1189_v41, %v1450_v40  ;;  %v992_v44 = vadd.f32 %v1221_v42, %v1450_v40 }
  0xe4   :  { %v501_v45 = vpop.f32.mrf.mxu0  ;;  %v629_v46 = vpop.f32.mrf.mxu1 }
  0xe5   :  { %1024 = vst [vmem:[%s1711_s3 + $0x10] sm:$0xff] %v960_v43  ;;  %1056 = vst [vmem:[%s1711_s3 + $0x110] sm:$0xff] %v992_v44  ;;  %v958_v47 = vadd.f32 %v1450_v40, %v501_v45  ;;  %v990_v48 = vadd.f32 %v1450_v40, %v629_v46 }
  0xe6   :  { %v1190_v49 = vpop.f32.mrf.mxu0  ;;  %v1222_v50 = vpop.f32.mrf.mxu1 }
  0xe7   :  { %1022 = vst [vmem:[%s1711_s3] sm:$0xff] %v958_v47  ;;  %1054 = vst [vmem:[%s1711_s3 + $0x100] sm:$0xff] %v990_v48  ;;  %v961_v51 = vadd.f32 %v1190_v49, %v1450_v40  ;;  %v993_v52 = vadd.f32 %v1222_v50, %v1450_v40 }
  0xe8   :  { %v504_v53 = vpop.f32.mrf.mxu0  ;;  %v632_v54 = vpop.f32.mrf.mxu1 }
  0xe9   :  { %1025 = vst [vmem:[%s1711_s3 + $0x18] sm:$0xff] %v961_v51  ;;  %1057 = vst [vmem:[%s1711_s3 + $0x118] sm:$0xff] %v993_v52  ;;  %v959_v55 = vadd.f32 %v1450_v40, %v504_v53  ;;  %v991_v56 = vadd.f32 %v1450_v40, %v632_v54 }
  0xea   :  { %v1193_v57 = vpop.f32.mrf.mxu0  ;;  %v1225_v58 = vpop.f32.mrf.mxu1 }
  0xeb   :  { %1023 = vst [vmem:[%s1711_s3 + $0x8] sm:$0xff] %v959_v55  ;;  %1055 = vst [vmem:[%s1711_s3 + $0x108] sm:$0xff] %v991_v56  ;;  %v964_v59 = vadd.f32 %v1193_v57, %v1450_v40  ;;  %v996_v60 = vadd.f32 %v1225_v58, %v1450_v40 }
  0xec   :  { %v517_v61 = vpop.f32.mrf.mxu0  ;;  %v645_v62 = vpop.f32.mrf.mxu1 }
  0xed   :  { %1028 = vst [vmem:[%s1711_s3 + $0x30] sm:$0xff] %v964_v59  ;;  %1060 = vst [vmem:[%s1711_s3 + $0x130] sm:$0xff] %v996_v60  ;;  %v962_v63 = vadd.f32 %v1450_v40, %v517_v61  ;;  %v994_v0 = vadd.f32 %v1450_v40, %v645_v62 }
  0xee   :  { %v1194_v1 = vpop.f32.mrf.mxu0  ;;  %v1226_v2 = vpop.f32.mrf.mxu1 }
  0xef   :  { %1026 = vst [vmem:[%s1711_s3 + $0x20] sm:$0xff] %v962_v63  ;;  %1058 = vst [vmem:[%s1711_s3 + $0x120] sm:$0xff] %v994_v0  ;;  %v965_v3 = vadd.f32 %v1194_v1, %v1450_v40  ;;  %v997_v4 = vadd.f32 %v1226_v2, %v1450_v40 }
  0xf0   :  { %v520_v5 = vpop.f32.mrf.mxu0  ;;  %v648_v6 = vpop.f32.mrf.mxu1 }
  0xf1   :  { %1029 = vst [vmem:[%s1711_s3 + $0x38] sm:$0xff] %v965_v3  ;;  %1061 = vst [vmem:[%s1711_s3 + $0x138] sm:$0xff] %v997_v4  ;;  %v963_v7 = vadd.f32 %v1450_v40, %v520_v5  ;;  %v995_v8 = vadd.f32 %v1450_v40, %v648_v6 }
  0xf2   :  { %v1197_v9 = vpop.f32.mrf.mxu0  ;;  %v1229_v10 = vpop.f32.mrf.mxu1 }
  0xf3   :  { %1027 = vst [vmem:[%s1711_s3 + $0x28] sm:$0xff] %v963_v7  ;;  %1059 = vst [vmem:[%s1711_s3 + $0x128] sm:$0xff] %v995_v8  ;;  %v968_v11 = vadd.f32 %v1197_v9, %v1450_v40  ;;  %v1000_v12 = vadd.f32 %v1229_v10, %v1450_v40 }
  0xf4   :  { %v533_v13 = vpop.f32.mrf.mxu0  ;;  %v661_v14 = vpop.f32.mrf.mxu1 }
  0xf5   :  { %1032 = vst [vmem:[%s1711_s3 + $0x50] sm:$0xff] %v968_v11  ;;  %1064 = vst [vmem:[%s1711_s3 + $0x150] sm:$0xff] %v1000_v12  ;;  %v966_v15 = vadd.f32 %v1450_v40, %v533_v13  ;;  %v998_v16 = vadd.f32 %v1450_v40, %v661_v14 }
  0xf6   :  { %v1198_v17 = vpop.f32.mrf.mxu0  ;;  %v1230_v18 = vpop.f32.mrf.mxu1 }
  0xf7   :  { %1030 = vst [vmem:[%s1711_s3 + $0x40] sm:$0xff] %v966_v15  ;;  %1062 = vst [vmem:[%s1711_s3 + $0x140] sm:$0xff] %v998_v16  ;;  %v969_v19 = vadd.f32 %v1198_v17, %v1450_v40  ;;  %v1001_v20 = vadd.f32 %v1230_v18, %v1450_v40 }
  0xf8   :  { %v536_v21 = vpop.f32.mrf.mxu0  ;;  %v664_v22 = vpop.f32.mrf.mxu1 }
  0xf9   :  { %1033 = vst [vmem:[%s1711_s3 + $0x58] sm:$0xff] %v969_v19  ;;  %1065 = vst [vmem:[%s1711_s3 + $0x158] sm:$0xff] %v1001_v20  ;;  %v967_v23 = vadd.f32 %v1450_v40, %v536_v21  ;;  %v999_v24 = vadd.f32 %v1450_v40, %v664_v22 }
  0xfa   :  { %v1201_v25 = vpop.f32.mrf.mxu0  ;;  %v1233_v26 = vpop.f32.mrf.mxu1 }
  0xfb   :  { %1031 = vst [vmem:[%s1711_s3 + $0x48] sm:$0xff] %v967_v23  ;;  %1063 = vst [vmem:[%s1711_s3 + $0x148] sm:$0xff] %v999_v24  ;;  %v972_v27 = vadd.f32 %v1201_v25, %v1450_v40  ;;  %v1004_v28 = vadd.f32 %v1233_v26, %v1450_v40 }
  0xfc   :  { %v549_v29 = vpop.f32.mrf.mxu0  ;;  %v677_v30 = vpop.f32.mrf.mxu1 }
  0xfd   :  { %1036 = vst [vmem:[%s1711_s3 + $0x70] sm:$0xff] %v972_v27  ;;  %1068 = vst [vmem:[%s1711_s3 + $0x170] sm:$0xff] %v1004_v28  ;;  %v970_v31 = vadd.f32 %v1450_v40, %v549_v29  ;;  %v1002_v32 = vadd.f32 %v1450_v40, %v677_v30 }
  0xfe   :  { %v1202_v33 = vpop.f32.mrf.mxu0  ;;  %v1234_v34 = vpop.f32.mrf.mxu1 }
  0xff   :  { %1034 = vst [vmem:[%s1711_s3 + $0x60] sm:$0xff] %v970_v31  ;;  %1066 = vst [vmem:[%s1711_s3 + $0x160] sm:$0xff] %v1002_v32  ;;  %v973_v35 = vadd.f32 %v1202_v33, %v1450_v40  ;;  %v1005_v36 = vadd.f32 %v1234_v34, %v1450_v40 }
 0x100   :  { %v552_v37 = vpop.f32.mrf.mxu0  ;;  %v680_v38 = vpop.f32.mrf.mxu1 }
 0x101   :  { %1037 = vst [vmem:[%s1711_s3 + $0x78] sm:$0xff] %v973_v35  ;;  %1069 = vst [vmem:[%s1711_s3 + $0x178] sm:$0xff] %v1005_v36  ;;  %v971_v39 = vadd.f32 %v1450_v40, %v552_v37  ;;  %v1003_v41 = vadd.f32 %v1450_v40, %v680_v38 }
 0x102   :  { %v1205_v42 = vpop.f32.mrf.mxu0  ;;  %v1237_v43 = vpop.f32.mrf.mxu1 }
 0x103   :  { %1035 = vst [vmem:[%s1711_s3 + $0x68] sm:$0xff] %v971_v39  ;;  %1067 = vst [vmem:[%s1711_s3 + $0x168] sm:$0xff] %v1003_v41  ;;  %v976_v44 = vadd.f32 %v1205_v42, %v1450_v40  ;;  %v1008_v45 = vadd.f32 %v1237_v43, %v1450_v40 }
 0x104   :  { %v565_v46 = vpop.f32.mrf.mxu0  ;;  %v693_v47 = vpop.f32.mrf.mxu1 }
 0x105   :  { %1040 = vst [vmem:[%s1711_s3 + $0x90] sm:$0xff] %v976_v44  ;;  %1072 = vst [vmem:[%s1711_s3 + $0x190] sm:$0xff] %v1008_v45  ;;  %v974_v48 = vadd.f32 %v1450_v40, %v565_v46  ;;  %v1006_v49 = vadd.f32 %v1450_v40, %v693_v47 }
 0x106   :  { %v1206_v50 = vpop.f32.mrf.mxu0  ;;  %v1238_v51 = vpop.f32.mrf.mxu1 }
 0x107   :  { %1038 = vst [vmem:[%s1711_s3 + $0x80] sm:$0xff] %v974_v48  ;;  %1070 = vst [vmem:[%s1711_s3 + $0x180] sm:$0xff] %v1006_v49  ;;  %v977_v52 = vadd.f32 %v1206_v50, %v1450_v40  ;;  %v1009_v53 = vadd.f32 %v1238_v51, %v1450_v40 }
 0x108   :  { %v568_v54 = vpop.f32.mrf.mxu0  ;;  %v696_v55 = vpop.f32.mrf.mxu1 }
 0x109   :  { %1041 = vst [vmem:[%s1711_s3 + $0x98] sm:$0xff] %v977_v52  ;;  %1073 = vst [vmem:[%s1711_s3 + $0x198] sm:$0xff] %v1009_v53  ;;  %v975_v56 = vadd.f32 %v1450_v40, %v568_v54  ;;  %v1007_v57 = vadd.f32 %v1450_v40, %v696_v55 }
 0x10a   :  { %v1209_v58 = vpop.f32.mrf.mxu0  ;;  %v1241_v59 = vpop.f32.mrf.mxu1 }
 0x10b   :  { %1039 = vst [vmem:[%s1711_s3 + $0x88] sm:$0xff] %v975_v56  ;;  %1071 = vst [vmem:[%s1711_s3 + $0x188] sm:$0xff] %v1007_v57  ;;  %v980_v60 = vadd.f32 %v1209_v58, %v1450_v40  ;;  %v1012_v61 = vadd.f32 %v1241_v59, %v1450_v40 }
 0x10c   :  { %v581_v62 = vpop.f32.mrf.mxu0  ;;  %v709_v63 = vpop.f32.mrf.mxu1 }
 0x10d   :  { %1044 = vst [vmem:[%s1711_s3 + $0xb0] sm:$0xff] %v980_v60  ;;  %1076 = vst [vmem:[%s1711_s3 + $0x1b0] sm:$0xff] %v1012_v61  ;;  %v978_v0 = vadd.f32 %v1450_v40, %v581_v62  ;;  %v1010_v1 = vadd.f32 %v1450_v40, %v709_v63 }
 0x10e   :  { %v1210_v2 = vpop.f32.mrf.mxu0  ;;  %v1242_v3 = vpop.f32.mrf.mxu1 }
 0x10f   :  { %1042 = vst [vmem:[%s1711_s3 + $0xa0] sm:$0xff] %v978_v0  ;;  %1074 = vst [vmem:[%s1711_s3 + $0x1a0] sm:$0xff] %v1010_v1  ;;  %v981_v4 = vadd.f32 %v1210_v2, %v1450_v40  ;;  %v1013_v5 = vadd.f32 %v1242_v3, %v1450_v40 }
 0x110   :  { %v584_v6 = vpop.f32.mrf.mxu0  ;;  %v712_v7 = vpop.f32.mrf.mxu1 }
 0x111   :  { %1045 = vst [vmem:[%s1711_s3 + $0xb8] sm:$0xff] %v981_v4  ;;  %1077 = vst [vmem:[%s1711_s3 + $0x1b8] sm:$0xff] %v1013_v5  ;;  %v979_v8 = vadd.f32 %v1450_v40, %v584_v6  ;;  %v1011_v9 = vadd.f32 %v1450_v40, %v712_v7 }
 0x112   :  { %v1213_v10 = vpop.f32.mrf.mxu0  ;;  %v1245_v11 = vpop.f32.mrf.mxu1 }
 0x113   :  { %1043 = vst [vmem:[%s1711_s3 + $0xa8] sm:$0xff] %v979_v8  ;;  %1075 = vst [vmem:[%s1711_s3 + $0x1a8] sm:$0xff] %v1011_v9  ;;  %v984_v12 = vadd.f32 %v1213_v10, %v1450_v40  ;;  %v1016_v13 = vadd.f32 %v1245_v11, %v1450_v40 }
 0x114   :  { %v597_v14 = vpop.f32.mrf.mxu0  ;;  %v725_v15 = vpop.f32.mrf.mxu1 }
 0x115   :  { %1048 = vst [vmem:[%s1711_s3 + $0xd0] sm:$0xff] %v984_v12  ;;  %1080 = vst [vmem:[%s1711_s3 + $0x1d0] sm:$0xff] %v1016_v13  ;;  %v982_v16 = vadd.f32 %v1450_v40, %v597_v14  ;;  %v1014_v17 = vadd.f32 %v1450_v40, %v725_v15 }
 0x116   :  { %v1214_v18 = vpop.f32.mrf.mxu0  ;;  %v1246_v19 = vpop.f32.mrf.mxu1 }
 0x117   :  { %1046 = vst [vmem:[%s1711_s3 + $0xc0] sm:$0xff] %v982_v16  ;;  %1078 = vst [vmem:[%s1711_s3 + $0x1c0] sm:$0xff] %v1014_v17  ;;  %v985_v20 = vadd.f32 %v1214_v18, %v1450_v40  ;;  %v1017_v21 = vadd.f32 %v1246_v19, %v1450_v40 }
 0x118   :  { %v600_v22 = vpop.f32.mrf.mxu0  ;;  %v728_v23 = vpop.f32.mrf.mxu1 }
 0x119   :  { %1049 = vst [vmem:[%s1711_s3 + $0xd8] sm:$0xff] %v985_v20  ;;  %1081 = vst [vmem:[%s1711_s3 + $0x1d8] sm:$0xff] %v1017_v21  ;;  %v983_v24 = vadd.f32 %v1450_v40, %v600_v22  ;;  %v1015_v25 = vadd.f32 %v1450_v40, %v728_v23 }
 0x11a   :  { %v1217_v26 = vpop.f32.mrf.mxu0  ;;  %v1249_v27 = vpop.f32.mrf.mxu1 }
 0x11b   :  { %1047 = vst [vmem:[%s1711_s3 + $0xc8] sm:$0xff] %v983_v24  ;;  %1079 = vst [vmem:[%s1711_s3 + $0x1c8] sm:$0xff] %v1015_v25  ;;  %v988_v28 = vadd.f32 %v1217_v26, %v1450_v40  ;;  %v1020_v29 = vadd.f32 %v1249_v27, %v1450_v40 }
 0x11c   :  { %v613_v30 = vpop.f32.mrf.mxu0  ;;  %v741_v31 = vpop.f32.mrf.mxu1 }
 0x11d   :  { %1052 = vst [vmem:[%s1711_s3 + $0xf0] sm:$0xff] %v988_v28  ;;  %1084 = vst [vmem:[%s1711_s3 + $0x1f0] sm:$0xff] %v1020_v29  ;;  %v986_v32 = vadd.f32 %v1450_v40, %v613_v30  ;;  %v1018_v33 = vadd.f32 %v1450_v40, %v741_v31 }
 0x11e   :  { %v1218_v34 = vpop.f32.mrf.mxu0  ;;  %v1250_v35 = vpop.f32.mrf.mxu1 }
 0x11f   :  { %1050 = vst [vmem:[%s1711_s3 + $0xe0] sm:$0xff] %v986_v32  ;;  %1082 = vst [vmem:[%s1711_s3 + $0x1e0] sm:$0xff] %v1018_v33  ;;  %v989_v36 = vadd.f32 %v1218_v34, %v1450_v40  ;;  %v1021_v37 = vadd.f32 %v1250_v35, %v1450_v40 }
 0x120   :  { %v616_v38 = vpop.f32.mrf.mxu0  ;;  %v744_v39 = vpop.f32.mrf.mxu1 }
 0x121   :  { %1053 = vst [vmem:[%s1711_s3 + $0xf8] sm:$0xff] %v989_v36  ;;  %1085 = vst [vmem:[%s1711_s3 + $0x1f8] sm:$0xff] %v1021_v37  ;;  %v987_v41 = vadd.f32 %v1450_v40, %v616_v38  ;;  %v1019_v42 = vadd.f32 %v1450_v40, %v744_v39 }
 0x123   :  { %1051 = vst [vmem:[%s1711_s3 + $0xe8] sm:$0xff] %v987_v41  ;;  %1083 = vst [vmem:[%s1711_s3 + $0x1e8] sm:$0xff] %v1019_v42 }

// kernel: fwd.25
= control target key start
LH: loop header
LB: loop body
LE: loop exit
PB: predicated region body
PF: predicated region fallthrough
CT: control target
= control target key end

     0   :  { %s635_s1 = inlined_call_operand.vmem [shape: bf16[128,128], index: 1, kind: input, shape index: {}]   ;;  %s636_s0 = inlined_call_operand.vmem [shape: bf16[128,128], index: 0, kind: input, shape index: {}]   ;;  %s637_s2 = inlined_call_operand.vmem [shape: f32[1,128], index: 2, kind: input, shape index: {}]   ;;  %s638_s3 = inlined_call_operand.vmem [shape: f32[128,128], index: 3, kind: output, shape index: {}]  }
   0x1   :  { %v506_v0 = vld [vmem:[%s635_s1 + $0x38] sm:$0xff]   ;;  %v507_v1 = vld [vmem:[%s635_s1 + $0x30] sm:$0xff]   ;;  %v508_v2 = vld [vmem:[%s635_s1 + $0x28] sm:$0xff]  }
   0x2   :  { %458 = vmatprep.subr.bf16.mxu0 %v506_v0  ;;  %490 = vmatprep.subr.bf16.mxu1 %v506_v0  ;;  %v509_v3 = vld [vmem:[%s635_s1 + $0x20] sm:$0xff]   ;;  %v510_v10 = vld [vmem:[%s635_s1 + $0x18] sm:$0xff]   ;;  %v435_v20 = vld [vmem:[%s636_s0 + $0x8] sm:$0xff]  }
   0x3   :  { %459 = vmatpush3.bf16.msra.mxu0 %v506_v0  ;;  %498 = vmatpush3.bf16.msra.mxu1 %v506_v0  ;;  %v404_v4 = vld [vmem:[%s636_s0] sm:$0xff]   ;;  %v439_v22 = vld [vmem:[%s636_s0 + $0x28] sm:$0xff]   ;;  %v436_v23 = vld [vmem:[%s636_s0 + $0x10] sm:$0xff]   ;;  %v409_v25 = vunpack.c.l.bf16 %v435_v20  ;;  %v410_v26 = vunpack.c.h.bf16 %v435_v20 }
   0x4   :  { %460 = vmatprep.subr.bf16.mxu0 %v507_v1  ;;  %491 = vmatprep.subr.bf16.mxu1 %v507_v1  ;;  %v438_v5 = vld [vmem:[%s636_s0 + $0x20] sm:$0xff]   ;;  %v405_v6 = vunpack.c.l.bf16 %v404_v4  ;;  %v406_v7 = vunpack.c.h.bf16 %v404_v4  ;;  %v511_v24 = vld [vmem:[%s635_s1 + $0x10] sm:$0xff]   ;;  %v425_v28 = vunpack.c.l.bf16 %v439_v22  ;;  %v426_v29 = vunpack.c.h.bf16 %v439_v22  ;;  %v512_v32 = vld [vmem:[%s635_s1 + $0x8] sm:$0xff]  }
   0x5   :  { %v421_v8 = vunpack.c.l.bf16 %v438_v5  ;;  %v422_v9 = vunpack.c.h.bf16 %v438_v5  ;;  %v440_v27 = vld [vmem:[%s636_s0 + $0x30] sm:$0xff]   ;;  %v413_v30 = vunpack.c.l.bf16 %v436_v23  ;;  %v414_v31 = vunpack.c.h.bf16 %v436_v23  ;;  %v513_v37 = vld [vmem:[%s635_s1] sm:$0xff]   ;;  %v437_v42 = vld [vmem:[%s636_s0 + $0x18] sm:$0xff]  }
   0x6   :  { %vm67_vm0 = vcmp.gt.f32.partialorder %v405_v6, 0.0  ;;  %vm68_vm1 = vcmp.gt.f32.partialorder %v406_v7, 0.0  ;;  %v83_v11 = vmul.f32 0.2, %v405_v6  ;;  %v84_v12 = vmul.f32 0.2, %v406_v7 }
   0x7   :  { %461 = vmatpush3.bf16.msra.mxu0 %v507_v1  ;;  %499 = vmatpush3.bf16.msra.mxu1 %v507_v1  ;;  %vm75_vm2 = vcmp.gt.f32.partialorder %v421_v8, 0.0  ;;  %vm76_vm3 = vcmp.gt.f32.partialorder %v422_v9, 0.0  ;;  %v91_v13 = vmul.f32 0.2, %v421_v8  ;;  %v92_v14 = vmul.f32 0.2, %v422_v9 }
   0x8   :  { %462 = vmatprep.subr.bf16.mxu0 %v508_v2  ;;  %492 = vmatprep.subr.bf16.mxu1 %v508_v2  ;;  %v99_v15 = vsel %vm67_vm0, %v405_v6, %v83_v11  ;;  %v100_v16 = vsel %vm68_vm1, %v406_v7, %v84_v12  ;;  %v429_v33 = vunpack.c.l.bf16 %v440_v27  ;;  %v430_v34 = vunpack.c.h.bf16 %v440_v27  ;;  %v441_v45 = vld [vmem:[%s636_s0 + $0x38] sm:$0xff]  }
   0x9   :  { %v115_v17 = vpack.c.bf16 %v100_v16, %v99_v15  ;;  %v107_v18 = vsel %vm75_vm2, %v421_v8, %v91_v13  ;;  %v108_v19 = vsel %vm76_vm3, %v422_v9, %v92_v14  ;;  %vm69_vm4 = vcmp.gt.f32.partialorder %v409_v25, 0.0  ;;  %v402_v8 = vld [vmem:[%s637_s2] ss:$0 sm:$0xff] }
   0xa   :  { %v119_v21 = vpack.c.bf16 %v108_v19, %v107_v18  ;;  %vm70_vm5 = vcmp.gt.f32.partialorder %v410_v26, 0.0  ;;  %v85_v35 = vmul.f32 0.2, %v409_v25  ;;  %v86_v36 = vmul.f32 0.2, %v410_v26 }
   0xb   :  { %463 = vmatpush3.bf16.msra.mxu0 %v508_v2  ;;  %500 = vmatpush3.bf16.msra.mxu1 %v508_v2  ;;  %v93_v38 = vmul.f32 0.2, %v425_v28  ;;  %v94_v39 = vmul.f32 0.2, %v426_v29  ;;  %v87_v40 = vmul.f32 0.2, %v413_v30  ;;  %v417_v51 = vunpack.c.l.bf16 %v437_v42 }
   0xc   :  { %464 = vmatprep.subr.bf16.mxu0 %v509_v3  ;;  %493 = vmatprep.subr.bf16.mxu1 %v509_v3  ;;  %vm77_vm6 = vcmp.gt.f32.partialorder %v425_v28, 0.0  ;;  %vm78_vm7 = vcmp.gt.f32.partialorder %v426_v29, 0.0  ;;  %vm71_vm8 = vcmp.gt.f32.partialorder %v413_v30, 0.0  ;;  %v88_v41 = vmul.f32 0.2, %v414_v31 }
   0xd   :  { %474 = vmatprep.mubr.bf16.mxu0 %v115_v17  ;;  %482 = vmatprep.mubr.bf16.mxu1 %v119_v21  ;;  %vm72_vm9 = vcmp.gt.f32.partialorder %v414_v31, 0.0  ;;  %v95_v43 = vmul.f32 0.2, %v429_v33  ;;  %v96_v44 = vmul.f32 0.2, %v430_v34  ;;  %v101_v46 = vsel %vm69_vm4, %v409_v25, %v85_v35 }
   0xe   :  { %v102_v47 = vsel %vm70_vm5, %v410_v26, %v86_v36  ;;  %vm79_vm10 = vcmp.gt.f32.partialorder %v429_v33, 0.0  ;;  %vm80_vm11 = vcmp.gt.f32.partialorder %v430_v34, 0.0  ;;  %v109_v48 = vsel %vm77_vm6, %v425_v28, %v93_v38 }
   0xf   :  { %465 = vmatpush3.bf16.msra.mxu0 %v509_v3  ;;  %501 = vmatpush3.bf16.msra.mxu1 %v509_v3  ;;  %v110_v49 = vsel %vm78_vm7, %v426_v29, %v94_v39  ;;  %v103_v50 = vsel %vm71_vm8, %v413_v30, %v87_v40  ;;  %v104_v52 = vsel %vm72_vm9, %v414_v31, %v88_v41  ;;  %v418_v53 = vunpack.c.h.bf16 %v437_v42 }
  0x10   :  { %466 = vmatprep.subr.bf16.mxu0 %v510_v10  ;;  %494 = vmatprep.subr.bf16.mxu1 %v510_v10  ;;  %v433_v54 = vunpack.c.l.bf16 %v441_v45  ;;  %v434_v55 = vunpack.c.h.bf16 %v441_v45  ;;  %v111_v56 = vsel %vm79_vm10, %v429_v33, %v95_v43  ;;  %v112_v57 = vsel %vm80_vm11, %v430_v34, %v96_v44 }
  0x11   :  { %v116_v58 = vpack.c.bf16 %v102_v47, %v101_v46  ;;  %v120_v59 = vpack.c.bf16 %v110_v49, %v109_v48  ;;  %v117_v60 = vpack.c.bf16 %v104_v52, %v103_v50  ;;  %vm73_vm12 = vcmp.gt.f32.partialorder %v417_v51, 0.0 }
  0x12   :  { %v89_v61 = vmul.f32 0.2, %v417_v51  ;;  %v121_v62 = vpack.c.bf16 %v112_v57, %v111_v56  ;;  %v90_v63 = vmul.f32 0.2, %v418_v53  ;;  %v97_v0 = vmul.f32 0.2, %v433_v54 }
  0x13   :  { %467 = vmatpush3.bf16.msra.mxu0 %v510_v10  ;;  %502 = vmatpush3.bf16.msra.mxu1 %v510_v10  ;;  %v98_v1 = vmul.f32 0.2, %v434_v55  ;;  %vm74_vm13 = vcmp.gt.f32.partialorder %v418_v53, 0.0  ;;  %vm81_vm14 = vcmp.gt.f32.partialorder %v433_v54, 0.0  ;;  %vm82_vm15 = vcmp.gt.f32.partialorder %v434_v55, 0.0 }
  0x14   :  { %468 = vmatprep.subr.bf16.mxu0 %v511_v24  ;;  %495 = vmatprep.subr.bf16.mxu1 %v511_v24  ;;  %v105_v2 = vsel %vm73_vm12, %v417_v51, %v89_v61  ;;  %v106_v3 = vsel %vm74_vm13, %v418_v53, %v90_v63  ;;  %v113_v4 = vsel %vm81_vm14, %v433_v54, %v97_v0 }
  0x15   :  { %v114_v5 = vsel %vm82_vm15, %v434_v55, %v98_v1  ;;  %v118_v6 = vpack.c.bf16 %v106_v3, %v105_v2 }
  0x16   :  { %v122_v7 = vpack.c.bf16 %v114_v5, %v113_v4 }
  0x17   :  { %469 = vmatpush3.bf16.msra.mxu0 %v511_v24  ;;  %503 = vmatpush3.bf16.msra.mxu1 %v511_v24 }
  0x18   :  { %470 = vmatprep.subr.bf16.mxu0 %v512_v32  ;;  %496 = vmatprep.subr.bf16.mxu1 %v512_v32 }
  0x1b   :  { %471 = vmatpush3.bf16.msra.mxu0 %v512_v32  ;;  %504 = vmatpush3.bf16.msra.mxu1 %v512_v32 }
  0x1c   :  { %472 = vmatprep.subr.bf16.mxu0 %v513_v37  ;;  %497 = vmatprep.subr.bf16.mxu1 %v513_v37 }
  0x1f   :  { %473 = vmatpush3.bf16.msra.mxu0 %v513_v37  ;;  %505 = vmatpush3.bf16.msra.mxu1 %v513_v37 }
  0x22   :  { %475 = vmatmul.mubr.bf16.vlgmr.msra.gmra.mxu0 %v116_v58  ;;  %483 = vmatmul.mubr.bf16.vlgmr.msra.gmra.mxu1 %v120_v59 }
  0x23   :  { %478 = vmatprep.mubr.bf16.mxu0 %v117_v60  ;;  %486 = vmatprep.mubr.bf16.mxu1 %v121_v62 }
  0x2a   :  { %479 = vmatmul.mubr.bf16.gmra.mxu0 %v118_v6  ;;  %487 = vmatmul.mubr.bf16.gmra.mxu1 %v122_v7 }
  0xe2   :  { %v476_v9 = vpop.f32.mrf.mxu0  ;;  %v484_v10 = vpop.f32.mrf.mxu1 }
  0xe3   :  { %v360_v11 = vadd.f32 %v476_v9, %v402_v8  ;;  %v368_v12 = vadd.f32 %v484_v10, %v402_v8 }
  0xe4   :  { %v237_v13 = vpop.f32.mrf.mxu0  ;;  %v269_v14 = vpop.f32.mrf.mxu1 }
  0xe5   :  { %376 = vst [vmem:[%s638_s3 + $0x10] sm:$0xff] %v360_v11  ;;  %384 = vst [vmem:[%s638_s3 + $0x50] sm:$0xff] %v368_v12  ;;  %v358_v15 = vadd.f32 %v402_v8, %v237_v13  ;;  %v366_v16 = vadd.f32 %v402_v8, %v269_v14 }
  0xe6   :  { %v477_v17 = vpop.f32.mrf.mxu0  ;;  %v485_v18 = vpop.f32.mrf.mxu1 }
  0xe7   :  { %374 = vst [vmem:[%s638_s3] sm:$0xff] %v358_v15  ;;  %382 = vst [vmem:[%s638_s3 + $0x40] sm:$0xff] %v366_v16  ;;  %v361_v19 = vadd.f32 %v477_v17, %v402_v8  ;;  %v369_v20 = vadd.f32 %v485_v18, %v402_v8 }
  0xe8   :  { %v240_v21 = vpop.f32.mrf.mxu0  ;;  %v272_v22 = vpop.f32.mrf.mxu1 }
  0xe9   :  { %377 = vst [vmem:[%s638_s3 + $0x18] sm:$0xff] %v361_v19  ;;  %385 = vst [vmem:[%s638_s3 + $0x58] sm:$0xff] %v369_v20  ;;  %v359_v23 = vadd.f32 %v402_v8, %v240_v21  ;;  %v367_v24 = vadd.f32 %v402_v8, %v272_v22 }
  0xea   :  { %v480_v25 = vpop.f32.mrf.mxu0  ;;  %v488_v26 = vpop.f32.mrf.mxu1 }
  0xeb   :  { %375 = vst [vmem:[%s638_s3 + $0x8] sm:$0xff] %v359_v23  ;;  %383 = vst [vmem:[%s638_s3 + $0x48] sm:$0xff] %v367_v24  ;;  %v364_v27 = vadd.f32 %v480_v25, %v402_v8  ;;  %v372_v28 = vadd.f32 %v488_v26, %v402_v8 }
  0xec   :  { %v253_v29 = vpop.f32.mrf.mxu0  ;;  %v285_v30 = vpop.f32.mrf.mxu1 }
  0xed   :  { %380 = vst [vmem:[%s638_s3 + $0x30] sm:$0xff] %v364_v27  ;;  %388 = vst [vmem:[%s638_s3 + $0x70] sm:$0xff] %v372_v28  ;;  %v362_v31 = vadd.f32 %v402_v8, %v253_v29  ;;  %v370_v32 = vadd.f32 %v402_v8, %v285_v30 }
  0xee   :  { %v481_v33 = vpop.f32.mrf.mxu0  ;;  %v489_v34 = vpop.f32.mrf.mxu1 }
  0xef   :  { %378 = vst [vmem:[%s638_s3 + $0x20] sm:$0xff] %v362_v31  ;;  %386 = vst [vmem:[%s638_s3 + $0x60] sm:$0xff] %v370_v32  ;;  %v365_v35 = vadd.f32 %v481_v33, %v402_v8  ;;  %v373_v36 = vadd.f32 %v489_v34, %v402_v8 }
  0xf0   :  { %v256_v37 = vpop.f32.mrf.mxu0  ;;  %v288_v38 = vpop.f32.mrf.mxu1 }
  0xf1   :  { %381 = vst [vmem:[%s638_s3 + $0x38] sm:$0xff] %v365_v35  ;;  %389 = vst [vmem:[%s638_s3 + $0x78] sm:$0xff] %v373_v36  ;;  %v363_v39 = vadd.f32 %v402_v8, %v256_v37  ;;  %v371_v40 = vadd.f32 %v402_v8, %v288_v38 }
  0xf3   :  { %379 = vst [vmem:[%s638_s3 + $0x28] sm:$0xff] %v363_v39  ;;  %387 = vst [vmem:[%s638_s3 + $0x68] sm:$0xff] %v371_v40 }

// kernel: fwd.26
= control target key start
LH: loop header
LB: loop body
LE: loop exit
PB: predicated region body
PF: predicated region fallthrough
CT: control target
= control target key end

     0   :  { %v105_v0 = vmov 0.0   ;;  %s187_s1 = inlined_call_operand.vmem [shape: f32[1,128], index: 1, kind: output, shape index: {0}]   ;;  %s188_s2 = inlined_call_operand.vmem [shape: f32[1,128], index: 2, kind: output, shape index: {1}]   ;;  %s189_s0 = inlined_call_operand.vmem [shape: f32[128,128], index: 0, kind: input, shape index: {}]  }
   0x1   :  { %14 = vst [vmem:[%s187_s1] sm:$0x1] %v105_v0  ;;  %15 = vst [vmem:[%s188_s2] sm:$0x1] %v105_v0  ;;  %v16_v1 = vld [vmem:[%s189_s0] sm:$0xff]  ;;  %v17_v2 = vld [vmem:[%s189_s0 + $0x8] sm:$0xff] }
   0x2   :  { %v18_v3 = vld [vmem:[%s189_s0 + $0x10] sm:$0xff]  ;;  %v19_v4 = vld [vmem:[%s189_s0 + $0x18] sm:$0xff]  ;;  %v33_v5 = vadd.f32 %v17_v2, %v16_v1  ;;  %v57_v6 = vmul.f32 %v16_v1, %v16_v1  ;;  %v58_v7 = vmul.f32 %v17_v2, %v17_v2  ;;  %v20_v9 = vld [vmem:[%s189_s0 + $0x20] sm:$0xff] }
   0x3   :  { %v59_v8 = vmul.f32 %v18_v3, %v18_v3  ;;  %v60_v11 = vmul.f32 %v19_v4, %v19_v4  ;;  %v21_v13 = vld [vmem:[%s189_s0 + $0x28] sm:$0xff]  ;;  %v61_v15 = vmul.f32 %v20_v9, %v20_v9  ;;  %v22_v17 = vld [vmem:[%s189_s0 + $0x30] sm:$0xff]  ;;  %v23_v21 = vld [vmem:[%s189_s0 + $0x38] sm:$0xff] }
   0x4   :  { %v34_v10 = vadd.f32 %v33_v5, %v18_v3  ;;  %v73_v12 = vadd.f32 %v58_v7, %v57_v6  ;;  %v62_v19 = vmul.f32 %v21_v13, %v21_v13  ;;  %v63_v23 = vmul.f32 %v22_v17, %v22_v17  ;;  %v24_v25 = vld [vmem:[%s189_s0 + $0x40] sm:$0xff]  ;;  %v25_v29 = vld [vmem:[%s189_s0 + $0x48] sm:$0xff]  ;;  %v26_v33 = vld [vmem:[%s189_s0 + $0x50] sm:$0xff] }
   0x5   :  { %v64_v27 = vmul.f32 %v23_v21, %v23_v21  ;;  %v65_v31 = vmul.f32 %v24_v25, %v24_v25  ;;  %v66_v35 = vmul.f32 %v25_v29, %v25_v29  ;;  %v27_v37 = vld [vmem:[%s189_s0 + $0x58] sm:$0xff]  ;;  %v67_v39 = vmul.f32 %v26_v33, %v26_v33  ;;  %v28_v41 = vld [vmem:[%s189_s0 + $0x60] sm:$0xff]  ;;  %v29_v45 = vld [vmem:[%s189_s0 + $0x68] sm:$0xff] }
   0x6   :  { %v35_v14 = vadd.f32 %v34_v10, %v19_v4  ;;  %v74_v16 = vadd.f32 %v73_v12, %v59_v8  ;;  %v68_v43 = vmul.f32 %v27_v37, %v27_v37  ;;  %v69_v47 = vmul.f32 %v28_v41, %v28_v41  ;;  %v30_v49 = vld [vmem:[%s189_s0 + $0x70] sm:$0xff]  ;;  %v31_v53 = vld [vmem:[%s189_s0 + $0x78] sm:$0xff] }
   0x7   :  { %v70_v51 = vmul.f32 %v29_v45, %v29_v45  ;;  %v71_v55 = vmul.f32 %v30_v49, %v30_v49  ;;  %v72_v58 = vmul.f32 %v31_v53, %v31_v53 }
   0x8   :  { %v36_v18 = vadd.f32 %v35_v14, %v20_v9  ;;  %v75_v20 = vadd.f32 %v74_v16, %v60_v11  ;;  %v32_v7 = vld [vmem:[%s187_s1] sm:$0x1] }
   0x9   :  { %v56_v12 = vld [vmem:[%s188_s2] sm:$0x1] }
   0xa   :  { %v37_v22 = vadd.f32 %v36_v18, %v21_v13  ;;  %v76_v24 = vadd.f32 %v75_v20, %v61_v15 }
   0xc   :  { %v38_v26 = vadd.f32 %v37_v22, %v22_v17  ;;  %v77_v28 = vadd.f32 %v76_v24, %v62_v19 }
   0xe   :  { %v39_v30 = vadd.f32 %v38_v26, %v23_v21  ;;  %v78_v32 = vadd.f32 %v77_v28, %v63_v23 }
  0x10   :  { %v40_v34 = vadd.f32 %v39_v30, %v24_v25  ;;  %v79_v36 = vadd.f32 %v78_v32, %v64_v27 }
  0x12   :  { %v41_v38 = vadd.f32 %v40_v34, %v25_v29  ;;  %v80_v40 = vadd.f32 %v79_v36, %v65_v31 }
  0x14   :  { %v42_v42 = vadd.f32 %v41_v38, %v26_v33  ;;  %v81_v44 = vadd.f32 %v80_v40, %v66_v35 }
  0x16   :  { %v43_v46 = vadd.f32 %v42_v42, %v27_v37  ;;  %v82_v48 = vadd.f32 %v81_v44, %v67_v39 }
  0x18   :  { %v44_v50 = vadd.f32 %v43_v46, %v28_v41  ;;  %v83_v52 = vadd.f32 %v82_v48, %v68_v43 }
  0x1a   :  { %v45_v54 = vadd.f32 %v44_v50, %v29_v45  ;;  %v84_v56 = vadd.f32 %v83_v52, %v69_v47 }
  0x1c   :  { %v46_v57 = vadd.f32 %v45_v54, %v30_v49  ;;  %v85_v59 = vadd.f32 %v84_v56, %v70_v51 }
  0x1e   :  { %v47_v60 = vadd.f32 %v46_v57, %v31_v53  ;;  %v86_v61 = vadd.f32 %v85_v59, %v71_v55 }
  0x20   :  { %v48_v62 = vrot.slane %v47_v60, 4  ;;  %v87_v63 = vadd.f32 %v86_v61, %v72_v58 }
  0x22   :  { %v49_v0 = vadd.f32 %v48_v62, %v47_v60  ;;  %v88_v1 = vrot.slane %v87_v63, 4 }
  0x24   :  { %v50_v2 = vrot.slane %v49_v0, 2  ;;  %v89_v3 = vadd.f32 %v88_v1, %v87_v63 }
  0x26   :  { %v51_v4 = vadd.f32 %v50_v2, %v49_v0  ;;  %v90_v5 = vrot.slane %v89_v3, 2 }
  0x28   :  { %v52_v6 = vrot.slane %v51_v4, 1  ;;  %v91_v8 = vadd.f32 %v90_v5, %v89_v3 }
  0x2a   :  { %v53_v9 = vadd.f32 %v52_v6, %v51_v4  ;;  %v92_v10 = vrot.slane %v91_v8, 1 }
  0x2c   :  { %v54_v11 = vadd.f32 %v53_v9, %v32_v7  ;;  %v93_v13 = vadd.f32 %v92_v10, %v91_v8 }
  0x2e   :  { %55 = vst [vmem:[%s187_s1] sm:$0x1] %v54_v11  ;;  %v94_v14 = vadd.f32 %v93_v13, %v56_v12 }
  0x30   :  { %95 = vst [vmem:[%s188_s2] sm:$0x1] %v94_v14 }

// kernel: fwd.27
= control target key start
LH: loop header
LB: loop body
LE: loop exit
PB: predicated region body
PF: predicated region fallthrough
CT: control target
= control target key end

     0   :  { %v50_v7 = vlaneseq  ;;  %s253_s1 = inlined_call_operand.vmem [shape: f32[1,128], index: 1, kind: input, shape index: {}]   ;;  %s254_s2 = inlined_call_operand.vmem [shape: f32[1,128], index: 2, kind: input, shape index: {}]   ;;  %s255_s3 = inlined_call_operand.vmem [shape: f32[1,128], index: 3, kind: input, shape index: {}]   ;;  %s256_s0 = inlined_call_operand.vmem [shape: f32[128,128], index: 0, kind: input, shape index: {}]   ;;  %s257_s4 = inlined_call_operand.vmem [shape: f32[1,128], index: 4, kind: input, shape index: {}]   ;;  %s258_s5 = inlined_call_operand.vmem [shape: f32[128,128], index: 5, kind: output, shape index: {}]  }
   0x1   :  { %v20_v0 = vld [vmem:[%s253_s1] sm:$0x1]  ;;  %v34_v15 = vld [vmem:[%s256_s0 + $0x8] sm:$0xff]  ;;  %v35_v16 = vld [vmem:[%s256_s0 + $0x10] sm:$0xff] }
   0x2   :  { %v22_v1 = vld [vmem:[%s254_s2] sm:$0x1]  ;;  %v21_v2 = vmul.f32 0.0078125, %v20_v0  ;;  %v51_v8 = vshrl.u32 %v50_v7, 7  ;;  %v36_v17 = vld [vmem:[%s256_s0 + $0x18] sm:$0xff]  ;;  %v38_v21 = vld [vmem:[%s256_s0 + $0x28] sm:$0xff] }
   0x3   :  { %v23_v3 = vmul.f32 0.0078125, %v22_v1  ;;  %v26_v9 = vld [vmem:[%s255_s3] sm:$0x1]  ;;  %v39_v22 = vld [vmem:[%s256_s0 + $0x30] sm:$0xff]  ;;  %v40_v23 = vld [vmem:[%s256_s0 + $0x38] sm:$0xff] }
   0x4   :  { %v24_v4 = vmul.f32 %v21_v2, %v21_v2  ;;  %v52_v10 = vsub.s32 0, %v51_v8  ;;  %v30_v13 = vld [vmem:[%s257_s4] sm:$0x1]  ;;  %v42_v25 = vld [vmem:[%s256_s0 + $0x48] sm:$0xff]  ;;  %v43_v26 = vld [vmem:[%s256_s0 + $0x50] sm:$0xff] }
   0x5   :  { %v33_v14 = vld [vmem:[%s256_s0] sm:$0xff]  ;;  %v44_v31 = vld [vmem:[%s256_s0 + $0x58] sm:$0xff]  ;;  %v46_v33 = vld [vmem:[%s256_s0 + $0x68] sm:$0xff] }
   0x6   :  { %v25_v5 = vsub.f32 %v23_v3, %v24_v4  ;;  %v37_v18 = vld [vmem:[%s256_s0 + $0x20] sm:$0xff]  ;;  %v47_v50 = vld [vmem:[%s256_s0 + $0x70] sm:$0xff]  ;;  %v48_v51 = vld [vmem:[%s256_s0 + $0x78] sm:$0xff] }
   0x7   :  { %v41_v24 = vld [vmem:[%s256_s0 + $0x40] sm:$0xff] }
   0x8   :  { %v27_v6 = vadd.f32 1e-05, %v25_v5  ;;  %v45_v32 = vld [vmem:[%s256_s0 + $0x60] sm:$0xff] }
   0xa   :  { %113 = vrsqrt.f32 %v27_v6 }
  0x17   :  { %v114_v11 = vpop.eup %113 }
  0x18   :  { %v29_v12 = vmul.f32 %v114_v11, %v26_v9 }
  0x1a   :  { %v31_v19 = vmul.f32 %v29_v12, %v21_v2  ;;  %v53_v20 = vrot.slane %v29_v12, %v52_v10 }
  0x1c   :  { %v32_v27 = vsub.f32 %v30_v13, %v31_v19  ;;  %v55_v28 = vmul.f32 %v53_v20, %v33_v14  ;;  %v56_v29 = vmul.f32 %v53_v20, %v34_v15  ;;  %v57_v30 = vmul.f32 %v53_v20, %v35_v16 }
  0x1d   :  { %v58_v34 = vmul.f32 %v53_v20, %v36_v17  ;;  %v59_v35 = vmul.f32 %v53_v20, %v37_v18  ;;  %v60_v36 = vmul.f32 %v53_v20, %v38_v21  ;;  %v61_v37 = vmul.f32 %v53_v20, %v39_v22 }
  0x1e   :  { %v75_v38 = vrot.slane %v32_v27, %v52_v10  ;;  %v62_v39 = vmul.f32 %v53_v20, %v40_v23  ;;  %v63_v40 = vmul.f32 %v53_v20, %v41_v24  ;;  %v64_v41 = vmul.f32 %v53_v20, %v42_v25 }
  0x1f   :  { %v65_v42 = vmul.f32 %v53_v20, %v43_v26  ;;  %v66_v43 = vmul.f32 %v53_v20, %v44_v31  ;;  %v67_v44 = vmul.f32 %v53_v20, %v45_v32  ;;  %v68_v45 = vmul.f32 %v53_v20, %v46_v33 }
  0x20   :  { %v77_v46 = vadd.f32 %v75_v38, %v55_v28  ;;  %v78_v47 = vadd.f32 %v75_v38, %v56_v29  ;;  %v79_v48 = vadd.f32 %v75_v38, %v57_v30  ;;  %v80_v49 = vadd.f32 %v75_v38, %v58_v34 }
  0x21   :  { %v81_v52 = vadd.f32 %v75_v38, %v59_v35  ;;  %v82_v53 = vadd.f32 %v75_v38, %v60_v36  ;;  %v83_v54 = vadd.f32 %v75_v38, %v61_v37  ;;  %v84_v55 = vadd.f32 %v75_v38, %v62_v39 }
  0x22   :  { %93 = vst [vmem:[%s258_s5] sm:$0xff] %v77_v46  ;;  %94 = vst [vmem:[%s258_s5 + $0x8] sm:$0xff] %v78_v47  ;;  %v85_v56 = vadd.f32 %v75_v38, %v63_v40  ;;  %v86_v57 = vadd.f32 %v75_v38, %v64_v41  ;;  %v87_v58 = vadd.f32 %v75_v38, %v65_v42 }
  0x23   :  { %95 = vst [vmem:[%s258_s5 + $0x10] sm:$0xff] %v79_v48  ;;  %96 = vst [vmem:[%s258_s5 + $0x18] sm:$0xff] %v80_v49  ;;  %v88_v59 = vadd.f32 %v75_v38, %v66_v43  ;;  %v89_v60 = vadd.f32 %v75_v38, %v67_v44  ;;  %v90_v61 = vadd.f32 %v75_v38, %v68_v45 }
  0x24   :  { %97 = vst [vmem:[%s258_s5 + $0x20] sm:$0xff] %v81_v52  ;;  %98 = vst [vmem:[%s258_s5 + $0x28] sm:$0xff] %v82_v53  ;;  %v69_v62 = vmul.f32 %v53_v20, %v47_v50  ;;  %v70_v63 = vmul.f32 %v53_v20, %v48_v51 }
  0x25   :  { %99 = vst [vmem:[%s258_s5 + $0x30] sm:$0xff] %v83_v54  ;;  %100 = vst [vmem:[%s258_s5 + $0x38] sm:$0xff] %v84_v55 }
  0x26   :  { %101 = vst [vmem:[%s258_s5 + $0x40] sm:$0xff] %v85_v56  ;;  %102 = vst [vmem:[%s258_s5 + $0x48] sm:$0xff] %v86_v57  ;;  %v91_v0 = vadd.f32 %v75_v38, %v69_v62  ;;  %v92_v1 = vadd.f32 %v75_v38, %v70_v63 }
  0x27   :  { %103 = vst [vmem:[%s258_s5 + $0x50] sm:$0xff] %v87_v58  ;;  %104 = vst [vmem:[%s258_s5 + $0x58] sm:$0xff] %v88_v59 }
  0x28   :  { %105 = vst [vmem:[%s258_s5 + $0x60] sm:$0xff] %v89_v60  ;;  %106 = vst [vmem:[%s258_s5 + $0x68] sm:$0xff] %v90_v61 }
  0x29   :  { %107 = vst [vmem:[%s258_s5 + $0x70] sm:$0xff] %v91_v0  ;;  %108 = vst [vmem:[%s258_s5 + $0x78] sm:$0xff] %v92_v1 }

// kernel: fwd.30
= control target key start
LH: loop header
LB: loop body
LE: loop exit
PB: predicated region body
PF: predicated region fallthrough
CT: control target
= control target key end

     0   :  { %v38_v7 = vlaneseq  ;;  %s133_s1 = inlined_call_operand.vmem [shape: f32[1,128], index: 1, kind: input, shape index: {}]   ;;  %s134_s2 = inlined_call_operand.vmem [shape: f32[1,128], index: 2, kind: input, shape index: {}]   ;;  %s135_s3 = inlined_call_operand.vmem [shape: f32[1,128], index: 3, kind: input, shape index: {}]   ;;  %s136_s4 = inlined_call_operand.vmem [shape: f32[1,128], index: 4, kind: input, shape index: {}]   ;;  %s137_s0 = inlined_call_operand.vmem [shape: f32[32,128], index: 0, kind: input, shape index: {}]   ;;  %s138_s5 = inlined_call_operand.vmem [shape: f32[32,128], index: 5, kind: output, shape index: {}]  }
   0x1   :  { %v20_v0 = vld [vmem:[%s133_s1] sm:$0x1]  ;;  %v34_v15 = vld [vmem:[%s137_s0 + $0x8] sm:$0xff]  ;;  %v35_v16 = vld [vmem:[%s137_s0 + $0x10] sm:$0xff] }
   0x2   :  { %v22_v1 = vld [vmem:[%s134_s2] sm:$0x1]  ;;  %v21_v2 = vmul.f32 0.03125, %v20_v0  ;;  %v39_v8 = vshrl.u32 %v38_v7, 7  ;;  %v36_v19 = vld [vmem:[%s137_s0 + $0x18] sm:$0xff] }
   0x3   :  { %v23_v3 = vmul.f32 0.03125, %v22_v1  ;;  %v26_v9 = vld [vmem:[%s135_s3] sm:$0x1] }
   0x4   :  { %v24_v4 = vmul.f32 %v21_v2, %v21_v2  ;;  %v40_v10 = vsub.s32 0, %v39_v8  ;;  %v30_v13 = vld [vmem:[%s136_s4] sm:$0x1] }
   0x5   :  { %v33_v14 = vld [vmem:[%s137_s0] sm:$0xff] }
   0x6   :  { %v25_v5 = vsub.f32 %v23_v3, %v24_v4 }
   0x8   :  { %v27_v6 = vadd.f32 1e-05, %v25_v5 }
   0xa   :  { %65 = vrsqrt.f32 %v27_v6 }
  0x17   :  { %v66_v11 = vpop.eup %65 }
  0x18   :  { %v29_v12 = vmul.f32 %v66_v11, %v26_v9 }
  0x1a   :  { %v31_v17 = vmul.f32 %v29_v12, %v21_v2  ;;  %v41_v18 = vrot.slane %v29_v12, %v40_v10 }
  0x1c   :  { %v32_v20 = vsub.f32 %v30_v13, %v31_v17  ;;  %v43_v21 = vmul.f32 %v41_v18, %v33_v14  ;;  %v44_v22 = vmul.f32 %v41_v18, %v34_v15  ;;  %v45_v23 = vmul.f32 %v41_v18, %v35_v16 }
  0x1d   :  { %v46_v24 = vmul.f32 %v41_v18, %v36_v19 }
  0x1e   :  { %v51_v25 = vrot.slane %v32_v20, %v40_v10 }
  0x20   :  { %v53_v26 = vadd.f32 %v51_v25, %v43_v21  ;;  %v54_v27 = vadd.f32 %v51_v25, %v44_v22  ;;  %v55_v28 = vadd.f32 %v51_v25, %v45_v23  ;;  %v56_v29 = vadd.f32 %v51_v25, %v46_v24 }
  0x22   :  { %57 = vst [vmem:[%s138_s5] sm:$0xff] %v53_v26  ;;  %58 = vst [vmem:[%s138_s5 + $0x8] sm:$0xff] %v54_v27 }
  0x23   :  { %59 = vst [vmem:[%s138_s5 + $0x10] sm:$0xff] %v55_v28  ;;  %60 = vst [vmem:[%s138_s5 + $0x18] sm:$0xff] %v56_v29 }

// kernel: fwd.28
= control target key start
LH: loop header
LB: loop body
LE: loop exit
PB: predicated region body
PF: predicated region fallthrough
CT: control target
= control target key end

     0   :  { %s450_s1 = inlined_call_operand.vmem [shape: bf16[256,128], index: 1, kind: input, shape index: {}]   ;;  %s451_s0 = inlined_call_operand.vmem [shape: bf16[32,256], index: 0, kind: input, shape index: {}]   ;;  %s452_s2 = inlined_call_operand.vmem [shape: f32[1,128], index: 2, kind: input, shape index: {}]   ;;  %s453_s3 = inlined_call_operand.vmem [shape: f32[32,128], index: 3, kind: output, shape index: {}]  }
   0x1   :  { %v339_v0 = vld [vmem:[%s450_s1 + $0x78] sm:$0xff]   ;;  %v341_v2 = vld [vmem:[%s450_s1 + $0x70] sm:$0xff]   ;;  %v343_v4 = vld [vmem:[%s450_s1 + $0x68] sm:$0xff]  }
   0x2   :  { %v340_v1 = vld [vmem:[%s450_s1 + $0x38] sm:$0xff]   ;;  %295 = vmatprep.subr.bf16.mxu0 %v339_v0  ;;  %323 = vmatprep.subr.bf16.mxu1 %v339_v0  ;;  %v342_v3 = vld [vmem:[%s450_s1 + $0x30] sm:$0xff]   ;;  %v344_v5 = vld [vmem:[%s450_s1 + $0x28] sm:$0xff]  }
   0x3   :  { %296 = vmatpush3.bf16.msra.mxu0 %v340_v1  ;;  %331 = vmatpush3.bf16.msra.mxu1 %v340_v1  ;;  %v345_v6 = vld [vmem:[%s450_s1 + $0x60] sm:$0xff]   ;;  %v347_v8 = vld [vmem:[%s450_s1 + $0x58] sm:$0xff]   ;;  %v349_v10 = vld [vmem:[%s450_s1 + $0x50] sm:$0xff]  }
   0x4   :  { %297 = vmatprep.subr.bf16.mxu0 %v341_v2  ;;  %324 = vmatprep.subr.bf16.mxu1 %v341_v2  ;;  %v346_v7 = vld [vmem:[%s450_s1 + $0x20] sm:$0xff]   ;;  %v348_v9 = vld [vmem:[%s450_s1 + $0x18] sm:$0xff]   ;;  %v24_v12 = vld [vmem:[%s451_s0 + $0x8] sm:$0xff] }
   0x5   :  { %v23_v11 = vld [vmem:[%s451_s0] sm:$0xff]  ;;  %v25_v13 = vld [vmem:[%s451_s0 + $0x10] sm:$0xff]  ;;  %v29_v16 = vunpack.c.l.bf16 %v24_v12  ;;  %v30_v17 = vunpack.c.h.bf16 %v24_v12  ;;  %v26_v18 = vld [vmem:[%s451_s0 + $0x18] sm:$0xff] }
   0x6   :  { %v27_v14 = vunpack.c.l.bf16 %v23_v11  ;;  %v28_v15 = vunpack.c.h.bf16 %v23_v11  ;;  %v350_v19 = vld [vmem:[%s450_s1 + $0x10] sm:$0xff]   ;;  %v351_v20 = vld [vmem:[%s450_s1 + $0x48] sm:$0xff]   ;;  %v31_v21 = vunpack.c.l.bf16 %v25_v13  ;;  %v32_v22 = vunpack.c.h.bf16 %v25_v13  ;;  %v353_v36 = vld [vmem:[%s450_s1 + $0x40] sm:$0xff]  }
   0x7   :  { %298 = vmatpush3.bf16.msra.mxu0 %v342_v3  ;;  %332 = vmatpush3.bf16.msra.mxu1 %v342_v3  ;;  %v33_v23 = vunpack.c.l.bf16 %v26_v18  ;;  %v34_v24 = vunpack.c.h.bf16 %v26_v18  ;;  %vm38_vm1 = vcmp.gt.f32.partialorder %v30_v17, 0.0  ;;  %v46_v26 = vmul.f32 0.2, %v30_v17  ;;  %v352_v35 = vld [vmem:[%s450_s1 + $0x8] sm:$0xff]   ;;  %v354_v42 = vld [vmem:[%s450_s1] sm:$0xff]  }
   0x8   :  { %299 = vmatprep.subr.bf16.mxu0 %v343_v4  ;;  %325 = vmatprep.subr.bf16.mxu1 %v343_v4  ;;  %vm36_vm0 = vcmp.gt.f32.partialorder %v28_v15, 0.0  ;;  %v44_v25 = vmul.f32 0.2, %v28_v15  ;;  %vm40_vm2 = vcmp.gt.f32.partialorder %v32_v22, 0.0  ;;  %v48_v27 = vmul.f32 0.2, %v32_v22 }
   0x9   :  { %vm42_vm3 = vcmp.gt.f32.partialorder %v34_v24, 0.0  ;;  %v50_v28 = vmul.f32 0.2, %v34_v24  ;;  %v54_v30 = vsel %vm38_vm1, %v30_v17, %v46_v26  ;;  %v43_v34 = vmul.f32 0.2, %v27_v14 }
   0xa   :  { %v52_v29 = vsel %vm36_vm0, %v28_v15, %v44_v25  ;;  %v56_v32 = vsel %vm40_vm2, %v32_v22, %v48_v27  ;;  %vm35_vm4 = vcmp.gt.f32.partialorder %v27_v14, 0.0  ;;  %vm37_vm5 = vcmp.gt.f32.partialorder %v29_v16, 0.0  ;;  %v294_v51 = vld [vmem:[%s452_s2] ss:$0 sm:$0xff] }
   0xb   :  { %300 = vmatpush3.bf16.msra.mxu0 %v344_v5  ;;  %333 = vmatpush3.bf16.msra.mxu1 %v344_v5  ;;  %v60_v31 = vpack.c.bf16 %v54_v30, %v52_v29  ;;  %v58_v33 = vsel %vm42_vm3, %v34_v24, %v50_v28  ;;  %v45_v38 = vmul.f32 0.2, %v29_v16  ;;  %vm39_vm6 = vcmp.gt.f32.partialorder %v31_v21, 0.0 }
   0xc   :  { %301 = vmatprep.subr.bf16.mxu0 %v345_v6  ;;  %326 = vmatprep.subr.bf16.mxu1 %v345_v6  ;;  %v62_v37 = vpack.c.bf16 %v58_v33, %v56_v32  ;;  %vm41_vm7 = vcmp.gt.f32.partialorder %v33_v23, 0.0  ;;  %v47_v39 = vmul.f32 0.2, %v31_v21  ;;  %v49_v40 = vmul.f32 0.2, %v33_v23 }
   0xd   :  { %227 = vmatprep.mubr.bf16.mxu0 %v60_v31  ;;  %v51_v41 = vsel %vm35_vm4, %v27_v14, %v43_v34  ;;  %v53_v43 = vsel %vm37_vm5, %v29_v16, %v45_v38 }
   0xe   :  { %235 = vmatprep.mubr.bf16.mxu1 %v62_v37  ;;  %v55_v44 = vsel %vm39_vm6, %v31_v21, %v47_v39  ;;  %v57_v45 = vsel %vm41_vm7, %v33_v23, %v49_v40  ;;  %v59_v46 = vpack.c.bf16 %v53_v43, %v51_v41 }
   0xf   :  { %302 = vmatpush3.bf16.msra.mxu0 %v346_v7  ;;  %334 = vmatpush3.bf16.msra.mxu1 %v346_v7  ;;  %v61_v47 = vpack.c.bf16 %v57_v45, %v55_v44 }
  0x10   :  { %303 = vmatprep.subr.bf16.mxu0 %v347_v8  ;;  %327 = vmatprep.subr.bf16.mxu1 %v347_v8 }
  0x13   :  { %304 = vmatpush3.bf16.msra.mxu0 %v348_v9  ;;  %335 = vmatpush3.bf16.msra.mxu1 %v348_v9 }
  0x14   :  { %305 = vmatprep.subr.bf16.mxu0 %v349_v10  ;;  %328 = vmatprep.subr.bf16.mxu1 %v349_v10 }
  0x17   :  { %306 = vmatpush3.bf16.msra.mxu0 %v350_v19  ;;  %336 = vmatpush3.bf16.msra.mxu1 %v350_v19 }
  0x18   :  { %307 = vmatprep.subr.bf16.mxu0 %v351_v20  ;;  %329 = vmatprep.subr.bf16.mxu1 %v351_v20 }
  0x1b   :  { %308 = vmatpush3.bf16.msra.mxu0 %v352_v35  ;;  %337 = vmatpush3.bf16.msra.mxu1 %v352_v35 }
  0x1c   :  { %309 = vmatprep.subr.bf16.mxu0 %v353_v36  ;;  %330 = vmatprep.subr.bf16.mxu1 %v353_v36 }
  0x1f   :  { %310 = vmatpush3.bf16.msra.mxu0 %v354_v42  ;;  %338 = vmatpush3.bf16.msra.mxu1 %v354_v42 }
  0x22   :  { %228 = vmatmul.mubr.bf16.vlgmr.msra.gmra.mxu0 %v59_v46  ;;  %236 = vmatmul.mubr.bf16.vlgmr.msra.gmra.mxu1 %v61_v47 }
  0xe2   :  { %v311_v48 = vpop.f32.mrf.mxu0  ;;  %v317_v49 = vpop.f32.mrf.mxu1 }
  0xe4   :  { %v312_v50 = vpop.f32.mrf.mxu0  ;;  %v318_v52 = vpop.f32.mrf.mxu1 }
  0xe5   :  { %v313_v53 = vadd.f32 %v312_v50, %v311_v48  ;;  %v319_v54 = vadd.f32 %v318_v52, %v317_v49 }
  0xe6   :  { %v314_v55 = vpop.f32.mrf.mxu0  ;;  %v320_v56 = vpop.f32.mrf.mxu1 }
  0xe7   :  { %v266_v57 = vadd.f32 %v313_v53, %v294_v51  ;;  %v268_v58 = vadd.f32 %v319_v54, %v294_v51 }
  0xe8   :  { %v315_v59 = vpop.f32.mrf.mxu0  ;;  %v321_v60 = vpop.f32.mrf.mxu1 }
  0xe9   :  { %270 = vst [vmem:[%s453_s3] sm:$0xff] %v266_v57  ;;  %272 = vst [vmem:[%s453_s3 + $0x10] sm:$0xff] %v268_v58  ;;  %v316_v61 = vadd.f32 %v315_v59, %v314_v55  ;;  %v322_v62 = vadd.f32 %v321_v60, %v320_v56 }
  0xeb   :  { %v267_v63 = vadd.f32 %v316_v61, %v294_v51  ;;  %v269_v0 = vadd.f32 %v322_v62, %v294_v51 }
  0xed   :  { %271 = vst [vmem:[%s453_s3 + $0x8] sm:$0xff] %v267_v63  ;;  %273 = vst [vmem:[%s453_s3 + $0x18] sm:$0xff] %v269_v0 }

// kernel: fwd.29
= control target key start
LH: loop header
LB: loop body
LE: loop exit
PB: predicated region body
PF: predicated region fallthrough
CT: control target
= control target key end

     0   :  { %v57_v0 = vmov 0.0   ;;  %s103_s1 = inlined_call_operand.vmem [shape: f32[1,128], index: 1, kind: output, shape index: {0}]   ;;  %s104_s2 = inlined_call_operand.vmem [shape: f32[1,128], index: 2, kind: output, shape index: {1}]   ;;  %s105_s0 = inlined_call_operand.vmem [shape: f32[32,128], index: 0, kind: input, shape index: {}]  }
   0x1   :  { %14 = vst [vmem:[%s103_s1] sm:$0x1] %v57_v0  ;;  %15 = vst [vmem:[%s104_s2] sm:$0x1] %v57_v0  ;;  %v16_v1 = vld [vmem:[%s105_s0] sm:$0xff]  ;;  %v17_v2 = vld [vmem:[%s105_s0 + $0x8] sm:$0xff] }
   0x2   :  { %v18_v3 = vld [vmem:[%s105_s0 + $0x10] sm:$0xff]  ;;  %v19_v4 = vld [vmem:[%s105_s0 + $0x18] sm:$0xff]  ;;  %v21_v5 = vadd.f32 %v17_v2, %v16_v1  ;;  %v33_v6 = vmul.f32 %v16_v1, %v16_v1  ;;  %v34_v7 = vmul.f32 %v17_v2, %v17_v2 }
   0x3   :  { %v35_v8 = vmul.f32 %v18_v3, %v18_v3  ;;  %v36_v10 = vmul.f32 %v19_v4, %v19_v4 }
   0x4   :  { %v22_v9 = vadd.f32 %v21_v5, %v18_v3  ;;  %v37_v11 = vadd.f32 %v34_v7, %v33_v6 }
   0x6   :  { %v23_v12 = vadd.f32 %v22_v9, %v19_v4  ;;  %v38_v13 = vadd.f32 %v37_v11, %v35_v8 }
   0x8   :  { %v24_v14 = vrot.slane %v23_v12, 4  ;;  %v39_v15 = vadd.f32 %v38_v13, %v36_v10  ;;  %v20_v24 = vld [vmem:[%s103_s1] sm:$0x1] }
   0x9   :  { %v32_v27 = vld [vmem:[%s104_s2] sm:$0x1] }
   0xa   :  { %v25_v16 = vadd.f32 %v24_v14, %v23_v12  ;;  %v40_v17 = vrot.slane %v39_v15, 4 }
   0xc   :  { %v26_v18 = vrot.slane %v25_v16, 2  ;;  %v41_v19 = vadd.f32 %v40_v17, %v39_v15 }
   0xe   :  { %v27_v20 = vadd.f32 %v26_v18, %v25_v16  ;;  %v42_v21 = vrot.slane %v41_v19, 2 }
  0x10   :  { %v28_v22 = vrot.slane %v27_v20, 1  ;;  %v43_v23 = vadd.f32 %v42_v21, %v41_v19 }
  0x12   :  { %v29_v25 = vadd.f32 %v28_v22, %v27_v20  ;;  %v44_v26 = vrot.slane %v43_v23, 1 }
  0x14   :  { %v30_v28 = vadd.f32 %v29_v25, %v20_v24  ;;  %v45_v29 = vadd.f32 %v44_v26, %v43_v23 }
  0x16   :  { %31 = vst [vmem:[%s103_s1] sm:$0x1] %v30_v28  ;;  %v46_v30 = vadd.f32 %v45_v29, %v32_v27 }
  0x18   :  { %47 = vst [vmem:[%s104_s2] sm:$0x1] %v46_v30 }

// kernel: fwd.32
= control target key start
LH: loop header
LB: loop body
LE: loop exit
PB: predicated region body
PF: predicated region fallthrough
CT: control target
= control target key end

     0   :  { %v45_v0 = vmov 0.0   ;;  %s82_s1 = inlined_call_operand.vmem [shape: f32[1,128], index: 1, kind: output, shape index: {0}]   ;;  %s83_s2 = inlined_call_operand.vmem [shape: f32[1,128], index: 2, kind: output, shape index: {1}]   ;;  %s84_s0 = inlined_call_operand.vmem [shape: f32[8,128], index: 0, kind: input, shape index: {}]  }
   0x1   :  { %14 = vst [vmem:[%s82_s1] sm:$0x1] %v45_v0  ;;  %15 = vst [vmem:[%s83_s2] sm:$0x1] %v45_v0  ;;  %v16_v1 = vld [vmem:[%s84_s0] sm:$0xff] }
   0x2   :  { %v18_v2 = vrot.slane %v16_v1, 4  ;;  %v27_v3 = vmul.f32 %v16_v1, %v16_v1 }
   0x4   :  { %v19_v4 = vadd.f32 %v18_v2, %v16_v1  ;;  %v28_v5 = vrot.slane %v27_v3, 4 }
   0x6   :  { %v20_v6 = vrot.slane %v19_v4, 2  ;;  %v29_v7 = vadd.f32 %v28_v5, %v27_v3 }
   0x8   :  { %v21_v8 = vadd.f32 %v20_v6, %v19_v4  ;;  %v30_v9 = vrot.slane %v29_v7, 2  ;;  %v17_v12 = vld [vmem:[%s82_s1] sm:$0x1] }
   0x9   :  { %v26_v15 = vld [vmem:[%s83_s2] sm:$0x1] }
   0xa   :  { %v22_v10 = vrot.slane %v21_v8, 1  ;;  %v31_v11 = vadd.f32 %v30_v9, %v29_v7 }
   0xc   :  { %v23_v13 = vadd.f32 %v22_v10, %v21_v8  ;;  %v32_v14 = vrot.slane %v31_v11, 1 }
   0xe   :  { %v24_v16 = vadd.f32 %v23_v13, %v17_v12  ;;  %v33_v17 = vadd.f32 %v32_v14, %v31_v11 }
  0x10   :  { %25 = vst [vmem:[%s82_s1] sm:$0x1] %v24_v16  ;;  %v34_v18 = vadd.f32 %v33_v17, %v26_v15 }
  0x12   :  { %35 = vst [vmem:[%s83_s2] sm:$0x1] %v34_v18 }

// kernel: fwd.33
= control target key start
LH: loop header
LB: loop body
LE: loop exit
PB: predicated region body
PF: predicated region fallthrough
CT: control target
= control target key end

     0   :  { %v35_v7 = vlaneseq  ;;  %s103_s1 = inlined_call_operand.vmem [shape: f32[1,128], index: 1, kind: input, shape index: {}]   ;;  %s104_s2 = inlined_call_operand.vmem [shape: f32[1,128], index: 2, kind: input, shape index: {}]   ;;  %s105_s3 = inlined_call_operand.vmem [shape: f32[1,128], index: 3, kind: input, shape index: {}]   ;;  %s106_s0 = inlined_call_operand.vmem [shape: f32[8,128], index: 0, kind: input, shape index: {}]   ;;  %s107_s4 = inlined_call_operand.vmem [shape: f32[1,128], index: 4, kind: input, shape index: {}]   ;;  %s108_s5 = inlined_call_operand.vmem [shape: f32[8,128], index: 5, kind: output, shape index: {}]  }
   0x1   :  { %v20_v0 = vld [vmem:[%s103_s1] sm:$0x1] }
   0x2   :  { %v22_v1 = vld [vmem:[%s104_s2] sm:$0x1]  ;;  %v21_v2 = vmul.f32 0.125, %v20_v0  ;;  %v36_v8 = vshrl.u32 %v35_v7, 7 }
   0x3   :  { %v23_v3 = vmul.f32 0.125, %v22_v1  ;;  %v26_v9 = vld [vmem:[%s105_s3] sm:$0x1] }
   0x4   :  { %v24_v4 = vmul.f32 %v21_v2, %v21_v2  ;;  %v37_v10 = vsub.s32 0, %v36_v8  ;;  %v30_v13 = vld [vmem:[%s107_s4] sm:$0x1] }
   0x5   :  { %v33_v14 = vld [vmem:[%s106_s0] sm:$0xff] }
   0x6   :  { %v25_v5 = vsub.f32 %v23_v3, %v24_v4 }
   0x8   :  { %v27_v6 = vadd.f32 1e-05, %v25_v5 }
   0xa   :  { %53 = vrsqrt.f32 %v27_v6 }
  0x17   :  { %v54_v11 = vpop.eup %53 }
  0x18   :  { %v29_v12 = vmul.f32 %v54_v11, %v26_v9 }
  0x1a   :  { %v31_v15 = vmul.f32 %v29_v12, %v21_v2  ;;  %v38_v16 = vrot.slane %v29_v12, %v37_v10 }
  0x1c   :  { %v32_v17 = vsub.f32 %v30_v13, %v31_v15  ;;  %v40_v18 = vmul.f32 %v38_v16, %v33_v14 }
  0x1e   :  { %v45_v19 = vrot.slane %v32_v17, %v37_v10 }
  0x20   :  { %v47_v20 = vadd.f32 %v45_v19, %v40_v18 }
  0x22   :  { %48 = vst [vmem:[%s108_s5] sm:$0xff] %v47_v20 }

// kernel: fwd.31
= control target key start
LH: loop header
LB: loop body
LE: loop exit
PB: predicated region body
PF: predicated region fallthrough
CT: control target
= control target key end

     0   :  { %s635_s1 = inlined_call_operand.vmem [shape: bf16[512,128], index: 1, kind: input, shape index: {}]   ;;  %s636_s0 = inlined_call_operand.vmem [shape: bf16[8,512], index: 0, kind: input, shape index: {}]   ;;  %s637_s2 = inlined_call_operand.vmem [shape: f32[1,128], index: 2, kind: input, shape index: {}]   ;;  %s638_s3 = inlined_call_operand.vmem [shape: f32[8,128], index: 3, kind: output, shape index: {}]  }
   0x1   :  { %v475_v0 = vld [vmem:[%s635_s1 + $0x78] sm:$0xff]   ;;  %v479_v4 = vld [vmem:[%s635_s1 + $0x70] sm:$0xff]   ;;  %v483_v8 = vld [vmem:[%s635_s1 + $0x68] sm:$0xff]  }
   0x2   :  { %v476_v1 = vld [vmem:[%s635_s1 + $0xf8] sm:$0xff]   ;;  %431 = vmatprep.subr.bf16.mxu0 %v475_v0  ;;  %v480_v5 = vld [vmem:[%s635_s1 + $0xf0] sm:$0xff]   ;;  %v484_v9 = vld [vmem:[%s635_s1 + $0xe8] sm:$0xff]  }
   0x3   :  { %v477_v2 = vld [vmem:[%s635_s1 + $0x38] sm:$0xff]   ;;  %453 = vmatprep.subr.bf16.mxu1 %v476_v1  ;;  %v481_v6 = vld [vmem:[%s635_s1 + $0x30] sm:$0xff]   ;;  %v485_v10 = vld [vmem:[%s635_s1 + $0x28] sm:$0xff]  }
   0x4   :  { %v478_v3 = vld [vmem:[%s635_s1 + $0xb8] sm:$0xff]   ;;  %432 = vmatpush3.bf16.msra.mxu0 %v477_v2  ;;  %v482_v7 = vld [vmem:[%s635_s1 + $0xb0] sm:$0xff]   ;;  %v486_v11 = vld [vmem:[%s635_s1 + $0xa8] sm:$0xff]  }
   0x5   :  { %454 = vmatpush3.bf16.msra.mxu1 %v478_v3  ;;  %433 = vmatprep.subr.bf16.mxu0 %v479_v4  ;;  %v487_v12 = vld [vmem:[%s635_s1 + $0x60] sm:$0xff]   ;;  %v491_v16 = vld [vmem:[%s635_s1 + $0x58] sm:$0xff]   ;;  %v495_v20 = vld [vmem:[%s635_s1 + $0x50] sm:$0xff]  }
   0x6   :  { %455 = vmatprep.subr.bf16.mxu1 %v480_v5  ;;  %v488_v13 = vld [vmem:[%s635_s1 + $0xe0] sm:$0xff]   ;;  %v492_v17 = vld [vmem:[%s635_s1 + $0xd8] sm:$0xff]   ;;  %v496_v21 = vld [vmem:[%s635_s1 + $0xd0] sm:$0xff]  }
   0x7   :  { %v489_v14 = vld [vmem:[%s635_s1 + $0x20] sm:$0xff]   ;;  %v493_v18 = vld [vmem:[%s635_s1 + $0x18] sm:$0xff]   ;;  %v497_v22 = vld [vmem:[%s635_s1 + $0x10] sm:$0xff]  }
   0x8   :  { %434 = vmatpush3.bf16.msra.mxu0 %v481_v6  ;;  %v490_v15 = vld [vmem:[%s635_s1 + $0xa0] sm:$0xff]   ;;  %v494_v19 = vld [vmem:[%s635_s1 + $0x98] sm:$0xff]   ;;  %v498_v23 = vld [vmem:[%s635_s1 + $0x90] sm:$0xff]  }
   0x9   :  { %456 = vmatpush3.bf16.msra.mxu1 %v482_v7  ;;  %435 = vmatprep.subr.bf16.mxu0 %v483_v8  ;;  %v499_v24 = vld [vmem:[%s635_s1 + $0x48] sm:$0xff]   ;;  %v503_v28 = vld [vmem:[%s635_s1 + $0x40] sm:$0xff]  }
   0xa   :  { %457 = vmatprep.subr.bf16.mxu1 %v484_v9  ;;  %v500_v25 = vld [vmem:[%s635_s1 + $0xc8] sm:$0xff]   ;;  %v504_v29 = vld [vmem:[%s635_s1 + $0xc0] sm:$0xff]  }
   0xb   :  { %v501_v26 = vld [vmem:[%s635_s1 + $0x8] sm:$0xff]   ;;  %v505_v30 = vld [vmem:[%s635_s1] sm:$0xff]  }
   0xc   :  { %436 = vmatpush3.bf16.msra.mxu0 %v485_v10  ;;  %v502_v27 = vld [vmem:[%s635_s1 + $0x88] sm:$0xff]   ;;  %v506_v31 = vld [vmem:[%s635_s1 + $0x80] sm:$0xff]  }
   0xd   :  { %458 = vmatpush3.bf16.msra.mxu1 %v486_v11  ;;  %437 = vmatprep.subr.bf16.mxu0 %v487_v12  ;;  %v20_v32 = vld [vmem:[%s636_s0] sm:$0xff]  ;;  %v21_v33 = vld [vmem:[%s636_s0 + $0x8] sm:$0xff] }
   0xe   :  { %459 = vmatprep.subr.bf16.mxu1 %v488_v13  ;;  %v22_v34 = vunpack.c.l.bf16 %v20_v32  ;;  %v23_v35 = vunpack.c.h.bf16 %v20_v32  ;;  %v24_v36 = vunpack.c.l.bf16 %v21_v33  ;;  %v25_v37 = vunpack.c.h.bf16 %v21_v33  ;;  %v430_v56 = vld [vmem:[%s637_s2] ss:$0 sm:$0xff] }
  0x10   :  { %438 = vmatpush3.bf16.msra.mxu0 %v489_v14  ;;  %vm27_vm0 = vcmp.gt.f32.partialorder %v23_v35, 0.0  ;;  %v31_v38 = vmul.f32 0.2, %v23_v35  ;;  %vm29_vm1 = vcmp.gt.f32.partialorder %v25_v37, 0.0  ;;  %v33_v39 = vmul.f32 0.2, %v25_v37 }
  0x11   :  { %460 = vmatpush3.bf16.msra.mxu1 %v490_v15  ;;  %439 = vmatprep.subr.bf16.mxu0 %v491_v16  ;;  %vm26_vm2 = vcmp.gt.f32.partialorder %v22_v34, 0.0  ;;  %v30_v40 = vmul.f32 0.2, %v22_v34  ;;  %vm28_vm3 = vcmp.gt.f32.partialorder %v24_v36, 0.0  ;;  %v32_v41 = vmul.f32 0.2, %v24_v36 }
  0x12   :  { %461 = vmatprep.subr.bf16.mxu1 %v492_v17  ;;  %v35_v42 = vsel %vm27_vm0, %v23_v35, %v31_v38  ;;  %v37_v43 = vsel %vm29_vm1, %v25_v37, %v33_v39 }
  0x13   :  { %v39_v44 = vpack.c.bf16 %v35_v42, %v35_v42  ;;  %v41_v45 = vpack.c.bf16 %v37_v43, %v37_v43  ;;  %v34_v46 = vsel %vm26_vm2, %v22_v34, %v30_v40  ;;  %v36_v47 = vsel %vm28_vm3, %v24_v36, %v32_v41 }
  0x14   :  { %440 = vmatpush3.bf16.msra.mxu0 %v493_v18  ;;  %v38_v48 = vpack.c.bf16 %v34_v46, %v34_v46  ;;  %v40_v49 = vpack.c.bf16 %v36_v47, %v36_v47 }
  0x15   :  { %462 = vmatpush3.bf16.msra.mxu1 %v494_v19  ;;  %441 = vmatprep.subr.bf16.mxu0 %v495_v20 }
  0x16   :  { %463 = vmatprep.subr.bf16.mxu1 %v496_v21  ;;  %331 = vmatprep.mubr.bf16.mxu0 %v39_v44 }
  0x17   :  { %371 = vmatprep.mubr.bf16.mxu1 %v41_v45 }
  0x18   :  { %442 = vmatpush3.bf16.msra.mxu0 %v497_v22 }
  0x19   :  { %464 = vmatpush3.bf16.msra.mxu1 %v498_v23  ;;  %443 = vmatprep.subr.bf16.mxu0 %v499_v24 }
  0x1a   :  { %465 = vmatprep.subr.bf16.mxu1 %v500_v25 }
  0x1c   :  { %444 = vmatpush3.bf16.msra.mxu0 %v501_v26 }
  0x1d   :  { %466 = vmatpush3.bf16.msra.mxu1 %v502_v27  ;;  %445 = vmatprep.subr.bf16.mxu0 %v503_v28 }
  0x1e   :  { %467 = vmatprep.subr.bf16.mxu1 %v504_v29 }
  0x20   :  { %446 = vmatpush3.bf16.msra.mxu0 %v505_v30 }
  0x21   :  { %468 = vmatpush3.bf16.msra.mxu1 %v506_v31 }
  0x23   :  { %332 = vmatmul.mubr.bf16.vlgmr.msra.gmra.mxu0 %v38_v48 }
  0x24   :  { %372 = vmatmul.mubr.bf16.vlgmr.msra.gmra.mxu1 %v40_v49 }
  0xe3   :  { %v447_v50 = vpop.f32.mrf.mxu0 }
  0xe4   :  { %v469_v51 = vpop.f32.mrf.mxu1 }
  0xe5   :  { %v448_v52 = vpop.f32.mrf.mxu0 }
  0xe6   :  { %v470_v53 = vpop.f32.mrf.mxu1  ;;  %v449_v54 = vadd.f32 %v448_v52, %v447_v50 }
  0xe7   :  { %v471_v55 = vadd.f32 %v470_v53, %v469_v51  ;;  %v450_v57 = vpop.f32.mrf.mxu0 }
  0xe8   :  { %v472_v58 = vpop.f32.mrf.mxu1 }
  0xe9   :  { %v374_v59 = vadd.f32 %v471_v55, %v449_v54  ;;  %v451_v60 = vpop.f32.mrf.mxu0 }
  0xea   :  { %v473_v61 = vpop.f32.mrf.mxu1 }
  0xeb   :  { %v392_v62 = vadd.f32 %v430_v56, %v374_v59 }
  0xed   :  { %393 = vst [vmem:[%s638_s3] sm:$0xff] %v392_v62 }

// kernel: fwd.34
= control target key start
LH: loop header
LB: loop body
LE: loop exit
PB: predicated region body
PF: predicated region fallthrough
CT: control target
= control target key end

     0   :  { %s869_s12 = smov 0   ;;  %s871_s13 = smov 0   ;;  %s952_s0 = inlined_call_operand.vmem [shape: bf16[8,1024], index: 0, kind: input, shape index: {}]   ;;  %s953_s1 = inlined_call_operand.vmem [shape: bf16[1024,128], index: 1, kind: input, shape index: {}]   ;;  %s954_s2 = inlined_call_operand.vmem [shape: f32[1,128], index: 2, kind: input, shape index: {}]   ;;  %s955_s3 = inlined_call_operand.vmem [shape: f32[8,128], index: 3, kind: output, shape index: {}]  }
   0x1   :  { %s873_s14 = smov 0  }
   0x2 LB: > { %s22_s15 = sadd.s32 1, %s842_s13  ;;  %p680_p0 = scmp.ge.s32.totalorder %s846_s14, 1  ;;  %s846_s14 = sphi %s873_s14, %s13_s14   ;;  %s842_s13 = sphi %s871_s13, %s957_s13   ;;  %s838_s12 = sphi %s869_s12, %s956_s12  }
   0x3   : > { %p23_p1 = scmp.ge.s32.totalorder %s22_s15, 2  ;;  %p167_p2 = scmp.lt.s32.totalorder %s846_s14, 3 }
   0x5   : > { %s959_s15 = smov (%p23_p1, %s22_s15), 0  ;;  %p168_p3 = pnand %p680_p0, %p167_p2 }
   0x6   : > { %s681_s16 = sshll.u32 (!%p168_p3), %s838_s12, 2  ;;  %s683_s17 = sshll.u32 (!%p168_p3), %s838_s12, 6 }
   0x7   : > { %171 = sbr.rel (%p168_p3) target bundleno = 269 (0x10d), region = 32  ;;  %p202_p4 = scmp.lt.s32.totalorder (!%p168_p3), %s681_s16, 7 }
   0x8   : > { %p210_p5 = scmp.lt.s32.totalorder (!%p168_p3), %s683_s17, 127  ;;  %p685_p6 = scmp.ne.s32.totalorder (!%p168_p3), %s838_s12, 0 }
   0xc   : > { %s961_s16 = smov (!%p202_p4, %s681_s16), 7  ;;  %s963_s17 = smov (!%p210_p5, %s683_s17), 127 }
   0xd   : > { %s682_s18 = sshll.u32 %s961_s16, 2  ;;  %s684_s22 = sshll.u32 %s963_s17, 2 }
   0xe   : > { %s894_s21 = scalar_lea.vmem %s952_s0, %s682_s18  ;;  %s899_s25 = scalar_lea.vmem %s953_s1, %s684_s22 }
   0xf   : > { %223 = sbr.rel (%p685_p6) target bundleno = 22 (0x16), region = 36 }
  0x14   : > { %v848_v0 = vmov 0.0  }
  0x15   : > { %224 = vst [vmem:[#allocation2] sm:$0xff] %v848_v0 }
  0x16 PF: > { %v792_v1 = vld [vmem:[%s899_s25 + $0x78] sm:$0xff]   ;;  %v796_v5 = vld [vmem:[%s899_s25 + $0x70] sm:$0xff]   ;;  %v800_v9 = vld [vmem:[%s899_s25 + $0x68] sm:$0xff]   ;;  %p718_p7 = scmp.ne.s32.totalorder %s838_s12, 1 }
  0x17   : > { %v793_v2 = vld [vmem:[%s899_s25 + $0xf8] sm:$0xff]   ;;  %723 = vmatprep.subr.bf16.mxu0 %v792_v1  ;;  %v797_v6 = vld [vmem:[%s899_s25 + $0xf0] sm:$0xff]   ;;  %v801_v10 = vld [vmem:[%s899_s25 + $0xe8] sm:$0xff]  }
  0x18   : > { %v794_v3 = vld [vmem:[%s899_s25 + $0x38] sm:$0xff]   ;;  %745 = vmatprep.subr.bf16.mxu1 %v793_v2  ;;  %v798_v7 = vld [vmem:[%s899_s25 + $0x30] sm:$0xff]   ;;  %v802_v11 = vld [vmem:[%s899_s25 + $0x28] sm:$0xff]  }
  0x19   : > { %v795_v4 = vld [vmem:[%s899_s25 + $0xb8] sm:$0xff]   ;;  %724 = vmatpush3.bf16.msra.mxu0 %v794_v3  ;;  %v799_v8 = vld [vmem:[%s899_s25 + $0xb0] sm:$0xff]   ;;  %v803_v12 = vld [vmem:[%s899_s25 + $0xa8] sm:$0xff]  }
  0x1a   : > { %746 = vmatpush3.bf16.msra.mxu1 %v795_v4  ;;  %725 = vmatprep.subr.bf16.mxu0 %v796_v5  ;;  %v804_v13 = vld [vmem:[%s899_s25 + $0x60] sm:$0xff]   ;;  %v808_v17 = vld [vmem:[%s899_s25 + $0x58] sm:$0xff]   ;;  %v812_v21 = vld [vmem:[%s899_s25 + $0x50] sm:$0xff]  }
  0x1b   : > { %747 = vmatprep.subr.bf16.mxu1 %v797_v6  ;;  %v805_v14 = vld [vmem:[%s899_s25 + $0xe0] sm:$0xff]   ;;  %v809_v18 = vld [vmem:[%s899_s25 + $0xd8] sm:$0xff]   ;;  %v813_v22 = vld [vmem:[%s899_s25 + $0xd0] sm:$0xff]  }
  0x1c   : > { %v806_v15 = vld [vmem:[%s899_s25 + $0x20] sm:$0xff]   ;;  %v810_v19 = vld [vmem:[%s899_s25 + $0x18] sm:$0xff]   ;;  %v814_v23 = vld [vmem:[%s899_s25 + $0x10] sm:$0xff]  }
  0x1d   : > { %726 = vmatpush3.bf16.msra.mxu0 %v798_v7  ;;  %v807_v16 = vld [vmem:[%s899_s25 + $0xa0] sm:$0xff]   ;;  %v811_v20 = vld [vmem:[%s899_s25 + $0x98] sm:$0xff]   ;;  %v815_v24 = vld [vmem:[%s899_s25 + $0x90] sm:$0xff]  }
  0x1e   : > { %748 = vmatpush3.bf16.msra.mxu1 %v799_v8  ;;  %727 = vmatprep.subr.bf16.mxu0 %v800_v9  ;;  %v816_v25 = vld [vmem:[%s899_s25 + $0x48] sm:$0xff]   ;;  %v820_v29 = vld [vmem:[%s899_s25 + $0x40] sm:$0xff]  }
  0x1f   : > { %749 = vmatprep.subr.bf16.mxu1 %v801_v10  ;;  %v817_v26 = vld [vmem:[%s899_s25 + $0xc8] sm:$0xff]   ;;  %v821_v30 = vld [vmem:[%s899_s25 + $0xc0] sm:$0xff]  }
  0x20   : > { %v818_v27 = vld [vmem:[%s899_s25 + $0x8] sm:$0xff]   ;;  %v822_v31 = vld [vmem:[%s899_s25] sm:$0xff]  }
  0x21   : > { %728 = vmatpush3.bf16.msra.mxu0 %v802_v11  ;;  %v819_v28 = vld [vmem:[%s899_s25 + $0x88] sm:$0xff]   ;;  %v823_v32 = vld [vmem:[%s899_s25 + $0x80] sm:$0xff]  }
  0x22   : > { %750 = vmatpush3.bf16.msra.mxu1 %v803_v12  ;;  %729 = vmatprep.subr.bf16.mxu0 %v804_v13  ;;  %v225_v33 = vld [vmem:[%s894_s21] sm:$0xff]  ;;  %v226_v34 = vld [vmem:[%s894_s21 + $0x8] sm:$0xff] }
  0x23   : > { %751 = vmatprep.subr.bf16.mxu1 %v805_v14  ;;  %v227_v35 = vunpack.c.l.bf16 %v225_v33  ;;  %v228_v36 = vunpack.c.h.bf16 %v225_v33  ;;  %v229_v37 = vunpack.c.l.bf16 %v226_v34  ;;  %v230_v38 = vunpack.c.h.bf16 %v226_v34  ;;  %v247_v57 = vld [vmem:[#allocation2] sm:$0xff] }
  0x25   : > { %730 = vmatpush3.bf16.msra.mxu0 %v806_v15  ;;  %vm232_vm0 = vcmp.gt.f32.partialorder %v228_v36, 0.0  ;;  %v236_v39 = vmul.f32 0.2, %v228_v36  ;;  %vm234_vm1 = vcmp.gt.f32.partialorder %v230_v38, 0.0  ;;  %v238_v40 = vmul.f32 0.2, %v230_v38 }
  0x26   : > { %752 = vmatpush3.bf16.msra.mxu1 %v807_v16  ;;  %731 = vmatprep.subr.bf16.mxu0 %v808_v17  ;;  %vm231_vm2 = vcmp.gt.f32.partialorder %v227_v35, 0.0  ;;  %v235_v41 = vmul.f32 0.2, %v227_v35  ;;  %vm233_vm3 = vcmp.gt.f32.partialorder %v229_v37, 0.0  ;;  %v237_v42 = vmul.f32 0.2, %v229_v37 }
  0x27   : > { %753 = vmatprep.subr.bf16.mxu1 %v809_v18  ;;  %v240_v43 = vsel %vm232_vm0, %v228_v36, %v236_v39  ;;  %v242_v44 = vsel %vm234_vm1, %v230_v38, %v238_v40 }
  0x28   : > { %v244_v45 = vpack.c.bf16 %v240_v43, %v240_v43  ;;  %v246_v46 = vpack.c.bf16 %v242_v44, %v242_v44  ;;  %v239_v47 = vsel %vm231_vm2, %v227_v35, %v235_v41  ;;  %v241_v48 = vsel %vm233_vm3, %v229_v37, %v237_v42 }
  0x29   : > { %732 = vmatpush3.bf16.msra.mxu0 %v810_v19  ;;  %v243_v49 = vpack.c.bf16 %v239_v47, %v239_v47  ;;  %v245_v50 = vpack.c.bf16 %v241_v48, %v241_v48 }
  0x2a   : > { %754 = vmatpush3.bf16.msra.mxu1 %v811_v20  ;;  %733 = vmatprep.subr.bf16.mxu0 %v812_v21 }
  0x2b   : > { %755 = vmatprep.subr.bf16.mxu1 %v813_v22  ;;  %536 = vmatprep.mubr.bf16.mxu0 %v244_v45 }
  0x2c   : > { %576 = vmatprep.mubr.bf16.mxu1 %v246_v46 }
  0x2d   : > { %734 = vmatpush3.bf16.msra.mxu0 %v814_v23 }
  0x2e   : > { %756 = vmatpush3.bf16.msra.mxu1 %v815_v24  ;;  %735 = vmatprep.subr.bf16.mxu0 %v816_v25 }
  0x2f   : > { %757 = vmatprep.subr.bf16.mxu1 %v817_v26 }
  0x31   : > { %736 = vmatpush3.bf16.msra.mxu0 %v818_v27 }
  0x32   : > { %758 = vmatpush3.bf16.msra.mxu1 %v819_v28  ;;  %737 = vmatprep.subr.bf16.mxu0 %v820_v29 }
  0x33   : > { %759 = vmatprep.subr.bf16.mxu1 %v821_v30 }
  0x35   : > { %738 = vmatpush3.bf16.msra.mxu0 %v822_v31 }
  0x36   : > { %760 = vmatpush3.bf16.msra.mxu1 %v823_v32 }
  0x38   : > { %537 = vmatmul.mubr.bf16.vlgmr.msra.gmra.mxu0 %v243_v49 }
  0x39   : > { %577 = vmatmul.mubr.bf16.vlgmr.msra.gmra.mxu1 %v245_v50 }
  0xf8   : > { %v739_v51 = vpop.f32.mrf.mxu0 }
  0xf9   : > { %v761_v52 = vpop.f32.mrf.mxu1 }
  0xfa   : > { %v740_v53 = vpop.f32.mrf.mxu0 }
  0xfb   : > { %v762_v54 = vpop.f32.mrf.mxu1  ;;  %v741_v55 = vadd.f32 %v740_v53, %v739_v51 }
  0xfc   : > { %v763_v56 = vadd.f32 %v762_v54, %v761_v52  ;;  %v742_v58 = vpop.f32.mrf.mxu0 }
  0xfd   : > { %v764_v59 = vpop.f32.mrf.mxu1 }
  0xfe   : > { %v579_v60 = vadd.f32 %v763_v56, %v741_v55  ;;  %v743_v61 = vpop.f32.mrf.mxu0  ;;  %589 = sbr.rel (%p718_p7) target bundleno = 269 (0x10d), region = 40 }
  0xff   : > { %v765_v62 = vpop.f32.mrf.mxu1 }
 0x100   : > { %v584_v63 = vadd.f32 %v579_v60, %v247_v57 }
 0x102   : > { %585 = vst [vmem:[#allocation2] sm:$0xff] %v584_v63 }
 0x103   : > { %v719_v1 = vld [vmem:[%s954_s2] ss:$0 sm:$0xff] }
 0x109   : > { %v590_v0 = vld [vmem:[#allocation2] sm:$0xff] }
 0x10a   : > { %v598_v2 = vadd.f32 %v719_v1, %v590_v0 }
 0x10c   : > { %599 = vst [vmem:[%s955_s3] sm:$0xff] %v598_v2 }
 0x10d PF: > { %s13_s14 = sadd.s32 1, %s846_s14   ;;  %s956_s12 = smov %s842_s13 }
 0x10e   : > { %p10_p8 = scmp.ge.s32.totalorder %s13_s14, 4   ;;  %s957_s13 = smov %s959_s15 }
 0x110   :  { %12 = sbr.rel (!%p10_p8) target bundleno = 2 (0x2), region = 73 }

// kernel: fwd.35
= control target key start
LH: loop header
LB: loop body
LE: loop exit
PB: predicated region body
PF: predicated region fallthrough
CT: control target
= control target key end

     0   :  { %s871_s12 = smov 0   ;;  %s873_s13 = smov 0   ;;  %s954_s0 = inlined_call_operand.vmem [shape: bf16[8,1024], index: 0, kind: input, shape index: {}]   ;;  %s955_s1 = inlined_call_operand.vmem [shape: bf16[1024,128], index: 1, kind: input, shape index: {}]   ;;  %s956_s2 = inlined_call_operand.vmem [shape: f32[1,128], index: 2, kind: input, shape index: {}]   ;;  %s957_s3 = inlined_call_operand.vmem [shape: f32[8,128], index: 3, kind: output, shape index: {}]  }
   0x1   :  { %s875_s14 = smov 0  }
   0x2 LB: > { %s22_s15 = sadd.s32 1, %s844_s13  ;;  %p678_p0 = scmp.ge.s32.totalorder %s848_s14, 1  ;;  %s848_s14 = sphi %s875_s14, %s13_s14   ;;  %s844_s13 = sphi %s873_s13, %s959_s13   ;;  %s840_s12 = sphi %s871_s12, %s958_s12  }
   0x3   : > { %p23_p1 = scmp.ge.s32.totalorder %s22_s15, 2  ;;  %p167_p2 = scmp.lt.s32.totalorder %s848_s14, 3 }
   0x5   : > { %s961_s15 = smov (%p23_p1, %s22_s15), 0  ;;  %p168_p3 = pnand %p678_p0, %p167_p2 }
   0x6   : > { %s679_s16 = sshll.u32 (!%p168_p3), %s840_s12, 2  ;;  %s681_s17 = sshll.u32 (!%p168_p3), %s840_s12, 6 }
   0x7   : > { %171 = sbr.rel (%p168_p3) target bundleno = 269 (0x10d), region = 32  ;;  %p202_p4 = scmp.lt.s32.totalorder (!%p168_p3), %s679_s16, 7 }
   0x8   : > { %p210_p5 = scmp.lt.s32.totalorder (!%p168_p3), %s681_s17, 127  ;;  %p683_p6 = scmp.ne.s32.totalorder (!%p168_p3), %s840_s12, 0 }
   0xc   : > { %s963_s16 = smov (!%p202_p4, %s679_s16), 7  ;;  %s965_s17 = smov (!%p210_p5, %s681_s17), 127 }
   0xd   : > { %s680_s18 = sshll.u32 %s963_s16, 2  ;;  %s682_s22 = sshll.u32 %s965_s17, 2 }
   0xe   : > { %s896_s21 = scalar_lea.vmem %s954_s0, %s680_s18  ;;  %s901_s25 = scalar_lea.vmem %s955_s1, %s682_s22 }
   0xf   : > { %223 = sbr.rel (%p683_p6) target bundleno = 22 (0x16), region = 36 }
  0x14   : > { %v850_v0 = vmov 0.0  }
  0x15   : > { %224 = vst [vmem:[#allocation2] sm:$0xff] %v850_v0 }
  0x16 PF: > { %v794_v1 = vld [vmem:[%s901_s25 + $0x78] sm:$0xff]   ;;  %v798_v5 = vld [vmem:[%s901_s25 + $0x70] sm:$0xff]   ;;  %v802_v9 = vld [vmem:[%s901_s25 + $0x68] sm:$0xff]   ;;  %p720_p7 = scmp.ne.s32.totalorder %s840_s12, 1 }
  0x17   : > { %v795_v2 = vld [vmem:[%s901_s25 + $0xf8] sm:$0xff]   ;;  %725 = vmatprep.subr.bf16.mxu0 %v794_v1  ;;  %v799_v6 = vld [vmem:[%s901_s25 + $0xf0] sm:$0xff]   ;;  %v803_v10 = vld [vmem:[%s901_s25 + $0xe8] sm:$0xff]  }
  0x18   : > { %v796_v3 = vld [vmem:[%s901_s25 + $0x38] sm:$0xff]   ;;  %747 = vmatprep.subr.bf16.mxu1 %v795_v2  ;;  %v800_v7 = vld [vmem:[%s901_s25 + $0x30] sm:$0xff]   ;;  %v804_v11 = vld [vmem:[%s901_s25 + $0x28] sm:$0xff]  }
  0x19   : > { %v797_v4 = vld [vmem:[%s901_s25 + $0xb8] sm:$0xff]   ;;  %726 = vmatpush3.bf16.msra.mxu0 %v796_v3  ;;  %v801_v8 = vld [vmem:[%s901_s25 + $0xb0] sm:$0xff]   ;;  %v805_v12 = vld [vmem:[%s901_s25 + $0xa8] sm:$0xff]  }
  0x1a   : > { %748 = vmatpush3.bf16.msra.mxu1 %v797_v4  ;;  %727 = vmatprep.subr.bf16.mxu0 %v798_v5  ;;  %v806_v13 = vld [vmem:[%s901_s25 + $0x60] sm:$0xff]   ;;  %v810_v17 = vld [vmem:[%s901_s25 + $0x58] sm:$0xff]   ;;  %v814_v21 = vld [vmem:[%s901_s25 + $0x50] sm:$0xff]  }
  0x1b   : > { %749 = vmatprep.subr.bf16.mxu1 %v799_v6  ;;  %v807_v14 = vld [vmem:[%s901_s25 + $0xe0] sm:$0xff]   ;;  %v811_v18 = vld [vmem:[%s901_s25 + $0xd8] sm:$0xff]   ;;  %v815_v22 = vld [vmem:[%s901_s25 + $0xd0] sm:$0xff]  }
  0x1c   : > { %v808_v15 = vld [vmem:[%s901_s25 + $0x20] sm:$0xff]   ;;  %v812_v19 = vld [vmem:[%s901_s25 + $0x18] sm:$0xff]   ;;  %v816_v23 = vld [vmem:[%s901_s25 + $0x10] sm:$0xff]  }
  0x1d   : > { %728 = vmatpush3.bf16.msra.mxu0 %v800_v7  ;;  %v809_v16 = vld [vmem:[%s901_s25 + $0xa0] sm:$0xff]   ;;  %v813_v20 = vld [vmem:[%s901_s25 + $0x98] sm:$0xff]   ;;  %v817_v24 = vld [vmem:[%s901_s25 + $0x90] sm:$0xff]  }
  0x1e   : > { %750 = vmatpush3.bf16.msra.mxu1 %v801_v8  ;;  %729 = vmatprep.subr.bf16.mxu0 %v802_v9  ;;  %v818_v25 = vld [vmem:[%s901_s25 + $0x48] sm:$0xff]   ;;  %v822_v29 = vld [vmem:[%s901_s25 + $0x40] sm:$0xff]  }
  0x1f   : > { %751 = vmatprep.subr.bf16.mxu1 %v803_v10  ;;  %v819_v26 = vld [vmem:[%s901_s25 + $0xc8] sm:$0xff]   ;;  %v823_v30 = vld [vmem:[%s901_s25 + $0xc0] sm:$0xff]  }
  0x20   : > { %v820_v27 = vld [vmem:[%s901_s25 + $0x8] sm:$0xff]   ;;  %v824_v31 = vld [vmem:[%s901_s25] sm:$0xff]  }
  0x21   : > { %730 = vmatpush3.bf16.msra.mxu0 %v804_v11  ;;  %v821_v28 = vld [vmem:[%s901_s25 + $0x88] sm:$0xff]   ;;  %v825_v32 = vld [vmem:[%s901_s25 + $0x80] sm:$0xff]  }
  0x22   : > { %752 = vmatpush3.bf16.msra.mxu1 %v805_v12  ;;  %731 = vmatprep.subr.bf16.mxu0 %v806_v13  ;;  %v225_v33 = vld [vmem:[%s896_s21] sm:$0xff]  ;;  %v226_v34 = vld [vmem:[%s896_s21 + $0x8] sm:$0xff] }
  0x23   : > { %753 = vmatprep.subr.bf16.mxu1 %v807_v14  ;;  %vm227_vm0 = vcmp.gt.bf16.partialorder %v225_v33, 0  ;;  %vm228_vm1 = vcmp.gt.bf16.partialorder %v226_v34, 0  ;;  %v231_v47 = vld [vmem:[#allocation2] sm:$0xff] }
  0x24   : > { %v229_v35 = vsel %vm227_vm0, %v225_v33, 0  ;;  %v230_v36 = vsel %vm228_vm1, %v226_v34, 0 }
  0x25   : > { %732 = vmatpush3.bf16.msra.mxu0 %v808_v15  ;;  %v684_v37 = vcombine.low %v229_v35, %v229_v35  ;;  %v685_v38 = vcombine.high %v229_v35, %v229_v35  ;;  %v686_v39 = vcombine.low %v230_v36, %v230_v36  ;;  %v687_v40 = vcombine.high %v230_v36, %v230_v36 }
  0x26   : > { %754 = vmatpush3.bf16.msra.mxu1 %v809_v16  ;;  %733 = vmatprep.subr.bf16.mxu0 %v810_v17 }
  0x27   : > { %755 = vmatprep.subr.bf16.mxu1 %v811_v18  ;;  %534 = vmatprep.mubr.bf16.mxu0 %v685_v38 }
  0x28   : > { %574 = vmatprep.mubr.bf16.mxu1 %v687_v40 }
  0x29   : > { %734 = vmatpush3.bf16.msra.mxu0 %v812_v19 }
  0x2a   : > { %756 = vmatpush3.bf16.msra.mxu1 %v813_v20  ;;  %735 = vmatprep.subr.bf16.mxu0 %v814_v21 }
  0x2b   : > { %757 = vmatprep.subr.bf16.mxu1 %v815_v22 }
  0x2d   : > { %736 = vmatpush3.bf16.msra.mxu0 %v816_v23 }
  0x2e   : > { %758 = vmatpush3.bf16.msra.mxu1 %v817_v24  ;;  %737 = vmatprep.subr.bf16.mxu0 %v818_v25 }
  0x2f   : > { %759 = vmatprep.subr.bf16.mxu1 %v819_v26 }
  0x31   : > { %738 = vmatpush3.bf16.msra.mxu0 %v820_v27 }
  0x32   : > { %760 = vmatpush3.bf16.msra.mxu1 %v821_v28  ;;  %739 = vmatprep.subr.bf16.mxu0 %v822_v29 }
  0x33   : > { %761 = vmatprep.subr.bf16.mxu1 %v823_v30 }
  0x35   : > { %740 = vmatpush3.bf16.msra.mxu0 %v824_v31 }
  0x36   : > { %762 = vmatpush3.bf16.msra.mxu1 %v825_v32 }
  0x38   : > { %535 = vmatmul.mubr.bf16.vlgmr.msra.gmra.mxu0 %v684_v37 }
  0x39   : > { %575 = vmatmul.mubr.bf16.vlgmr.msra.gmra.mxu1 %v686_v39 }
  0xf8   : > { %v741_v41 = vpop.f32.mrf.mxu0 }
  0xf9   : > { %v763_v42 = vpop.f32.mrf.mxu1 }
  0xfa   : > { %v742_v43 = vpop.f32.mrf.mxu0 }
  0xfb   : > { %v764_v44 = vpop.f32.mrf.mxu1  ;;  %v743_v45 = vadd.f32 %v742_v43, %v741_v41 }
  0xfc   : > { %v765_v46 = vadd.f32 %v764_v44, %v763_v42  ;;  %v744_v48 = vpop.f32.mrf.mxu0 }
  0xfd   : > { %v766_v49 = vpop.f32.mrf.mxu1 }
  0xfe   : > { %v577_v50 = vadd.f32 %v765_v46, %v743_v45  ;;  %v745_v51 = vpop.f32.mrf.mxu0  ;;  %587 = sbr.rel (%p720_p7) target bundleno = 269 (0x10d), region = 40 }
  0xff   : > { %v767_v52 = vpop.f32.mrf.mxu1 }
 0x100   : > { %v582_v53 = vadd.f32 %v577_v50, %v231_v47 }
 0x102   : > { %583 = vst [vmem:[#allocation2] sm:$0xff] %v582_v53 }
 0x103   : > { %v721_v55 = vld [vmem:[%s956_s2] ss:$0 sm:$0xff] }
 0x109   : > { %v588_v54 = vld [vmem:[#allocation2] sm:$0xff] }
 0x10a   : > { %v596_v56 = vadd.f32 %v721_v55, %v588_v54 }
 0x10c   : > { %597 = vst [vmem:[%s957_s3] sm:$0xff] %v596_v56 }
 0x10d PF: > { %s13_s14 = sadd.s32 1, %s848_s14   ;;  %s958_s12 = smov %s844_s13 }
 0x10e   : > { %p10_p8 = scmp.ge.s32.totalorder %s13_s14, 4   ;;  %s959_s13 = smov %s961_s15 }
 0x110   :  { %12 = sbr.rel (!%p10_p8) target bundleno = 2 (0x2), region = 73 }

// kernel: fwd.38
= control target key start
LH: loop header
LB: loop body
LE: loop exit
PB: predicated region body
PF: predicated region fallthrough
CT: control target
= control target key end

     0   :  { %s1040_s12 = smov 0   ;;  %s1042_s13 = smov 0   ;;  %s1166_s0 = inlined_call_operand.vmem [shape: bf16[32,2048], index: 0, kind: input, shape index: {}]   ;;  %s1167_s1 = inlined_call_operand.vmem [shape: bf16[2048,128], index: 1, kind: input, shape index: {}]   ;;  %s1168_s2 = inlined_call_operand.vmem [shape: f32[1,128], index: 2, kind: input, shape index: {}]   ;;  %s1169_s3 = inlined_call_operand.vmem [shape: f32[32,128], index: 3, kind: output, shape index: {}]  }
   0x1   :  { %s1044_s14 = smov 0   ;;  %s1046_s15 = smov 0  }
   0x2   :  { %s1048_s16 = smov 0  }
   0x3 LB: > { %s22_s17 = sadd.s32 1, %s1013_s15  ;;  %p41_p1 = scmp.ne.s32.totalorder %s1005_s13, %s1001_s12  ;;  %s1017_s16 = sphi %s1048_s16, %s13_s16   ;;  %s1013_s15 = sphi %s1046_s15, %s1173_s15   ;;  %s1009_s14 = sphi %s1044_s14, %s1172_s14   ;;  %s1005_s13 = sphi %s1042_s13, %s1171_s13   ;;  %s1001_s12 = sphi %s1040_s12, %s1170_s12  }
   0x4   : > { %p23_p0 = scmp.ge.s32.totalorder %s22_s17, 4  ;;  %p42_p2 = scmp.eq.s32.totalorder %s1017_s16, 0 }
   0x5   : > { %s34_s19 = sadd.s32 1, %s1005_s13  ;;  %p794_p5 = scmp.ge.s32.totalorder %s1017_s16, 4 }
   0x6   : > { %s1175_s17 = smov (%p23_p0, %s22_s17), 0  ;;  %p43_p3 = por %p42_p2, %p41_p1 }
   0x7   : > { %s30_s18 = ssub.s32 %s1013_s15, %s1175_s17  ;;  %143 = sbr.rel (%p794_p5) target bundleno = 20 (0x14), region = 20 }
   0x8   : > { %p32_p4 = scmp.eq.s32.totalorder %s30_s18, 0 }
   0xa   : > { %s1075_s20 = scalar_select %p32_p4, %s1005_s13, %s34_s19  }
   0xc   : > { %146 = sbr.rel (!%p43_p3) target bundleno = 20 (0x14), region = 24  ;;  %s148_s21 = sand.u32 (%p43_p3), 1, %s1005_s13  }
   0xd   : > { %s849_s22 = sshll.u32 (%p43_p3), %s1013_s15, 4  ;;  %s795_s23 = sshll.u32 (%p43_p3), %s148_s21, 6 }
   0xe   : > { %s156_s26 = scalar_lea.vmem (%p43_p3), %s1166_s0, %s849_s22  ;;  %s150_s27 = scalar_lea.vmem (%p43_p3), [#allocation3], %s795_s23 }
   0xf   : > { %v169_v0 = vld [vmem:[%s156_s26] sm:$0xff] (%p43_p3)  ;;  %v171_v1 = vld [vmem:[%s156_s26 + $0x8] sm:$0xff] (%p43_p3) }
  0x10   : > { %v173_v2 = vld [vmem:[%s156_s26 + $0x40] sm:$0xff] (%p43_p3)  ;;  %170 = vst [vmem:[%s150_s27] sm:$0xff] (%p43_p3), %v169_v0  ;;  %172 = vst [vmem:[%s150_s27 + $0x8] sm:$0xff] (%p43_p3), %v171_v1  ;;  %v175_v3 = vld [vmem:[%s156_s26 + $0x48] sm:$0xff] (%p43_p3) }
  0x11   : > { %174 = vst [vmem:[%s150_s27 + $0x10] sm:$0xff] %v173_v2  ;;  %v177_v4 = vld [vmem:[%s156_s26 + $0x80] sm:$0xff]  ;;  %v179_v5 = vld [vmem:[%s156_s26 + $0x88] sm:$0xff]  ;;  %176 = vst [vmem:[%s150_s27 + $0x18] sm:$0xff] %v175_v3 }
  0x12   : > { %178 = vst [vmem:[%s150_s27 + $0x20] sm:$0xff] %v177_v4  ;;  %180 = vst [vmem:[%s150_s27 + $0x28] sm:$0xff] %v179_v5  ;;  %v181_v6 = vld [vmem:[%s156_s26 + $0xc0] sm:$0xff]  ;;  %v183_v7 = vld [vmem:[%s156_s26 + $0xc8] sm:$0xff] }
  0x13   : > { %182 = vst [vmem:[%s150_s27 + $0x30] sm:$0xff] %v181_v6  ;;  %184 = vst [vmem:[%s150_s27 + $0x38] sm:$0xff] %v183_v7 }
  0x14 PF: > { %p798_p6 = scmp.ge.s32.totalorder %s1017_s16, 1  ;;  %p198_p7 = scmp.lt.s32.totalorder %s1017_s16, 5 }
  0x16   : > { %p199_p8 = pnand %p798_p6, %p198_p7 }
  0x17   : > { %s205_s28 = sand.u32 (!%p199_p8), 1, %s1001_s12   ;;  %s800_s29 = sshll.u32 (!%p199_p8), %s1009_s14, 6 }
  0x18   : > { %202 = sbr.rel (%p199_p8) target bundleno = 296 (0x128), region = 51  ;;  %s799_s30 = sshll.u32 (!%p199_p8), %s205_s28, 6 }
  0x19   : > { %p236_p9 = scmp.lt.s32.totalorder (!%p199_p8), %s800_s29, 255  ;;  %s1092_s8 = scalar_lea.vmem (!%p199_p8), [#allocation3], %s799_s30 }
  0x1a   : > { %p802_p10 = scmp.ne.s32.totalorder (!%p199_p8), %s1009_s14, 0 }
  0x1d   : > { %s1177_s29 = smov (!%p236_p9, %s800_s29), 255  ;;  %251 = sbr.rel (%p802_p10) target bundleno = 37 (0x25), region = 59 }
  0x1e   : > { %s801_s4 = sshll.u32 %s1177_s29, 2 }
  0x1f   : > { %s1090_s7 = scalar_lea.vmem %s1167_s1, %s801_s4 }
  0x22   : > { %v1019_v8 = vmov 0.0  }
  0x23   : > { %252 = vst [vmem:[#allocation2 + $0x10] sm:$0xff] %v1019_v8  ;;  %253 = vst [vmem:[#allocation2] sm:$0xff] %v1019_v8 }
  0x24   : > { %254 = vst [vmem:[#allocation2 + $0x18] sm:$0xff] %v1019_v8  ;;  %255 = vst [vmem:[#allocation2 + $0x8] sm:$0xff] %v1019_v8 }
  0x25 PF: > { %v947_v9 = vld [vmem:[%s1090_s7 + $0x78] sm:$0xff]   ;;  %v951_v13 = vld [vmem:[%s1090_s7 + $0x70] sm:$0xff]   ;;  %v955_v17 = vld [vmem:[%s1090_s7 + $0x68] sm:$0xff]   ;;  %p843_p11 = scmp.ne.s32.totalorder %s1009_s14, 3 }
  0x26   : > { %v948_v10 = vld [vmem:[%s1090_s7 + $0xf8] sm:$0xff]   ;;  %850 = vmatprep.subr.bf16.mxu0 %v947_v9  ;;  %v952_v14 = vld [vmem:[%s1090_s7 + $0xf0] sm:$0xff]   ;;  %v956_v18 = vld [vmem:[%s1090_s7 + $0xe8] sm:$0xff]  }
  0x27   : > { %v949_v11 = vld [vmem:[%s1090_s7 + $0x38] sm:$0xff]   ;;  %878 = vmatprep.subr.bf16.mxu1 %v948_v10  ;;  %v953_v15 = vld [vmem:[%s1090_s7 + $0x30] sm:$0xff]   ;;  %v957_v19 = vld [vmem:[%s1090_s7 + $0x28] sm:$0xff]  }
  0x28   : > { %v950_v12 = vld [vmem:[%s1090_s7 + $0xb8] sm:$0xff]   ;;  %851 = vmatpush3.bf16.msra.mxu0 %v949_v11  ;;  %v954_v16 = vld [vmem:[%s1090_s7 + $0xb0] sm:$0xff]   ;;  %v958_v20 = vld [vmem:[%s1090_s7 + $0xa8] sm:$0xff]  }
  0x29   : > { %879 = vmatpush3.bf16.msra.mxu1 %v950_v12  ;;  %852 = vmatprep.subr.bf16.mxu0 %v951_v13  ;;  %v959_v21 = vld [vmem:[%s1090_s7 + $0x60] sm:$0xff]   ;;  %v963_v25 = vld [vmem:[%s1090_s7 + $0x58] sm:$0xff]   ;;  %v967_v29 = vld [vmem:[%s1090_s7 + $0x50] sm:$0xff]  }
  0x2a   : > { %880 = vmatprep.subr.bf16.mxu1 %v952_v14  ;;  %v960_v22 = vld [vmem:[%s1090_s7 + $0xe0] sm:$0xff]   ;;  %v964_v26 = vld [vmem:[%s1090_s7 + $0xd8] sm:$0xff]   ;;  %v968_v30 = vld [vmem:[%s1090_s7 + $0xd0] sm:$0xff]  }
  0x2b   : > { %v961_v23 = vld [vmem:[%s1090_s7 + $0x20] sm:$0xff]   ;;  %v965_v27 = vld [vmem:[%s1090_s7 + $0x18] sm:$0xff]   ;;  %v969_v31 = vld [vmem:[%s1090_s7 + $0x10] sm:$0xff]  }
  0x2c   : > { %853 = vmatpush3.bf16.msra.mxu0 %v953_v15  ;;  %v962_v24 = vld [vmem:[%s1090_s7 + $0xa0] sm:$0xff]   ;;  %v966_v28 = vld [vmem:[%s1090_s7 + $0x98] sm:$0xff]   ;;  %v970_v32 = vld [vmem:[%s1090_s7 + $0x90] sm:$0xff]  }
  0x2d   : > { %881 = vmatpush3.bf16.msra.mxu1 %v954_v16  ;;  %854 = vmatprep.subr.bf16.mxu0 %v955_v17  ;;  %v971_v33 = vld [vmem:[%s1090_s7 + $0x48] sm:$0xff]   ;;  %v975_v37 = vld [vmem:[%s1090_s7 + $0x40] sm:$0xff]   ;;  %v258_v42 = vld [vmem:[%s1092_s8 + $0x10] sm:$0xff] }
  0x2e   : > { %882 = vmatprep.subr.bf16.mxu1 %v956_v18  ;;  %v972_v34 = vld [vmem:[%s1090_s7 + $0xc8] sm:$0xff]   ;;  %v976_v38 = vld [vmem:[%s1090_s7 + $0xc0] sm:$0xff]   ;;  %vm266_vm1 = vcmp.gt.bf16.partialorder %v258_v42, 0  ;;  %v259_v44 = vld [vmem:[%s1092_s8 + $0x18] sm:$0xff] }
  0x2f   : > { %v973_v35 = vld [vmem:[%s1090_s7 + $0x8] sm:$0xff]   ;;  %v977_v39 = vld [vmem:[%s1090_s7] sm:$0xff]   ;;  %v262_v46 = vld [vmem:[%s1092_s8 + $0x30] sm:$0xff]  ;;  %v274_v48 = vsel %vm266_vm1, %v258_v42, 0  ;;  %vm267_vm3 = vcmp.gt.bf16.partialorder %v259_v44, 0 }
  0x30   : > { %855 = vmatpush3.bf16.msra.mxu0 %v957_v19  ;;  %v974_v36 = vld [vmem:[%s1090_s7 + $0x88] sm:$0xff]   ;;  %v978_v40 = vld [vmem:[%s1090_s7 + $0x80] sm:$0xff]   ;;  %v263_v51 = vld [vmem:[%s1092_s8 + $0x38] sm:$0xff]  ;;  %v275_v54 = vsel %vm267_vm3, %v259_v44, 0  ;;  %vm270_vm5 = vcmp.gt.bf16.partialorder %v262_v46, 0 }
  0x31   : > { %883 = vmatpush3.bf16.msra.mxu1 %v958_v20  ;;  %856 = vmatprep.subr.bf16.mxu0 %v959_v21  ;;  %v256_v41 = vld [vmem:[%s1092_s8] sm:$0xff]  ;;  %v257_v43 = vld [vmem:[%s1092_s8 + $0x8] sm:$0xff]  ;;  %v278_v58 = vsel %vm270_vm5, %v262_v46, 0  ;;  %vm271_vm7 = vcmp.gt.bf16.partialorder %v263_v51, 0  ;;  %v280_v8 = vld [vmem:[#allocation2 + $0x10] sm:$0xff] }
  0x32   : > { %884 = vmatprep.subr.bf16.mxu1 %v960_v22  ;;  %vm264_vm0 = vcmp.gt.bf16.partialorder %v256_v41, 0  ;;  %vm265_vm2 = vcmp.gt.bf16.partialorder %v257_v43, 0  ;;  %v260_v45 = vld [vmem:[%s1092_s8 + $0x20] sm:$0xff]  ;;  %v261_v50 = vld [vmem:[%s1092_s8 + $0x28] sm:$0xff]  ;;  %v279_v61 = vsel %vm271_vm7, %v263_v51, 0 }
  0x33   : > { %v272_v47 = vsel %vm264_vm0, %v256_v41, 0  ;;  %v273_v49 = vsel %vm265_vm2, %v257_v43, 0  ;;  %vm268_vm4 = vcmp.gt.bf16.partialorder %v260_v45, 0  ;;  %vm269_vm6 = vcmp.gt.bf16.partialorder %v261_v50, 0  ;;  %v281_v17 = vld [vmem:[#allocation2] sm:$0xff] }
  0x34   : > { %857 = vmatpush3.bf16.msra.mxu0 %v961_v23  ;;  %v803_v52 = vcombine.low %v272_v47, %v274_v48  ;;  %v804_v53 = vcombine.high %v272_v47, %v274_v48  ;;  %v805_v55 = vcombine.low %v273_v49, %v275_v54  ;;  %v806_v56 = vcombine.high %v273_v49, %v275_v54 }
  0x35   : > { %885 = vmatpush3.bf16.msra.mxu1 %v962_v24  ;;  %858 = vmatprep.subr.bf16.mxu0 %v963_v25  ;;  %v276_v57 = vsel %vm268_vm4, %v260_v45, 0  ;;  %v277_v60 = vsel %vm269_vm6, %v261_v50, 0 }
  0x36   : > { %886 = vmatprep.subr.bf16.mxu1 %v964_v26  ;;  %612 = vmatprep.mubr.bf16.mxu0 %v804_v53  ;;  %v808_v59 = vcombine.high %v276_v57, %v278_v58  ;;  %v810_v62 = vcombine.high %v277_v60, %v279_v61  ;;  %v807_v63 = vcombine.low %v276_v57, %v278_v58  ;;  %v282_v26 = vld [vmem:[#allocation2 + $0x18] sm:$0xff] }
  0x37   : > { %661 = vmatprep.mubr.bf16.mxu1 %v806_v56  ;;  %v809_v0 = vcombine.low %v277_v60, %v279_v61 }
  0x38   : > { %859 = vmatpush3.bf16.msra.mxu0 %v965_v27 }
  0x39   : > { %887 = vmatpush3.bf16.msra.mxu1 %v966_v28  ;;  %860 = vmatprep.subr.bf16.mxu0 %v967_v29 }
  0x3a   : > { %888 = vmatprep.subr.bf16.mxu1 %v968_v30 }
  0x3c   : > { %861 = vmatpush3.bf16.msra.mxu0 %v969_v31 }
  0x3d   : > { %889 = vmatpush3.bf16.msra.mxu1 %v970_v32  ;;  %862 = vmatprep.subr.bf16.mxu0 %v971_v33 }
  0x3e   : > { %890 = vmatprep.subr.bf16.mxu1 %v972_v34  ;;  %v283_v34 = vld [vmem:[#allocation2 + $0x8] sm:$0xff] }
  0x40   : > { %863 = vmatpush3.bf16.msra.mxu0 %v973_v35 }
  0x41   : > { %891 = vmatpush3.bf16.msra.mxu1 %v974_v36  ;;  %864 = vmatprep.subr.bf16.mxu0 %v975_v37 }
  0x42   : > { %892 = vmatprep.subr.bf16.mxu1 %v976_v38 }
  0x44   : > { %865 = vmatpush3.bf16.msra.mxu0 %v977_v39 }
  0x45   : > { %893 = vmatpush3.bf16.msra.mxu1 %v978_v40 }
  0x47   : > { %613 = vmatmul.mubr.bf16.vlgmr.msra.gmra.mxu0 %v803_v52 }
  0x48   : > { %662 = vmatmul.mubr.bf16.vlgmr.msra.gmra.mxu1 %v805_v55  ;;  %620 = vmatprep.mubr.bf16.mxu0 %v808_v59 }
  0x49   : > { %669 = vmatprep.mubr.bf16.mxu1 %v810_v62 }
  0x4f   : > { %621 = vmatmul.mubr.bf16.gmra.mxu0 %v807_v63 }
  0x50   : > { %670 = vmatmul.mubr.bf16.gmra.mxu1 %v809_v0 }
 0x107   : > { %v866_v1 = vpop.f32.mrf.mxu0 }
 0x108   : > { %v894_v2 = vpop.f32.mrf.mxu1 }
 0x109   : > { %v867_v3 = vpop.f32.mrf.mxu0 }
 0x10a   : > { %v868_v4 = vadd.f32 %v867_v3, %v866_v1  ;;  %v895_v5 = vpop.f32.mrf.mxu1 }
 0x10b   : > { %v896_v6 = vadd.f32 %v895_v5, %v894_v2  ;;  %v869_v7 = vpop.f32.mrf.mxu0 }
 0x10c   : > { %v897_v9 = vpop.f32.mrf.mxu1 }
 0x10d   : > { %v664_v10 = vadd.f32 %v896_v6, %v868_v4  ;;  %v870_v11 = vpop.f32.mrf.mxu0 }
 0x10e   : > { %v871_v12 = vadd.f32 %v870_v11, %v869_v7  ;;  %v898_v13 = vpop.f32.mrf.mxu1 }
 0x10f   : > { %v678_v14 = vadd.f32 %v664_v10, %v280_v8  ;;  %v899_v15 = vadd.f32 %v898_v13, %v897_v9  ;;  %v872_v16 = vpop.f32.mrf.mxu0 }
 0x110   : > { %v900_v18 = vpop.f32.mrf.mxu1 }
 0x111   : > { %682 = vst [vmem:[#allocation2 + $0x10] sm:$0xff] %v678_v14  ;;  %v667_v19 = vadd.f32 %v899_v15, %v871_v12  ;;  %v873_v20 = vpop.f32.mrf.mxu0 }
 0x112   : > { %v874_v21 = vadd.f32 %v873_v20, %v872_v16  ;;  %v901_v22 = vpop.f32.mrf.mxu1 }
 0x113   : > { %v679_v23 = vadd.f32 %v667_v19, %v281_v17  ;;  %v902_v24 = vadd.f32 %v901_v22, %v900_v18  ;;  %v875_v25 = vpop.f32.mrf.mxu0 }
 0x114   : > { %v903_v27 = vpop.f32.mrf.mxu1 }
 0x115   : > { %683 = vst [vmem:[#allocation2] sm:$0xff] %v679_v23  ;;  %v672_v28 = vadd.f32 %v902_v24, %v874_v21  ;;  %v876_v29 = vpop.f32.mrf.mxu0 }
 0x116   : > { %v877_v30 = vadd.f32 %v876_v29, %v875_v25  ;;  %v904_v31 = vpop.f32.mrf.mxu1 }
 0x117   : > { %v680_v32 = vadd.f32 %v672_v28, %v282_v26  ;;  %v905_v33 = vadd.f32 %v904_v31, %v903_v27 }
 0x119   : > { %684 = vst [vmem:[#allocation2 + $0x18] sm:$0xff] %v680_v32  ;;  %v675_v35 = vadd.f32 %v905_v33, %v877_v30  ;;  %689 = sbr.rel (%p843_p11) target bundleno = 296 (0x128), region = 63 }
 0x11b   : > { %v681_v36 = vadd.f32 %v675_v35, %v283_v34 }
 0x11d   : > { %685 = vst [vmem:[#allocation2 + $0x8] sm:$0xff] %v681_v36 }
 0x11e   : > { %v690_v37 = vld [vmem:[#allocation2 + $0x10] sm:$0xff]  ;;  %v844_v38 = vld [vmem:[%s1168_s2] ss:$0 sm:$0xff] }
 0x11f   : > { %v691_v39 = vld [vmem:[#allocation2] sm:$0xff]  ;;  %v701_v40 = vadd.f32 %v844_v38, %v690_v37 }
 0x120   : > { %v702_v41 = vadd.f32 %v844_v38, %v691_v39  ;;  %v692_v42 = vld [vmem:[#allocation2 + $0x18] sm:$0xff] }
 0x121   : > { %v703_v44 = vadd.f32 %v844_v38, %v692_v42  ;;  %705 = vst [vmem:[%s1169_s3] sm:$0xff] %v701_v40 }
 0x122   : > { %706 = vst [vmem:[%s1169_s3 + $0x8] sm:$0xff] %v702_v41 }
 0x123   : > { %707 = vst [vmem:[%s1169_s3 + $0x10] sm:$0xff] %v703_v44 }
 0x124   : > { %v693_v43 = vld [vmem:[#allocation2 + $0x8] sm:$0xff] }
 0x125   : > { %v704_v45 = vadd.f32 %v844_v38, %v693_v43 }
 0x127   : > { %708 = vst [vmem:[%s1169_s3 + $0x18] sm:$0xff] %v704_v45 }
 0x128 PF: > { %s13_s16 = sadd.s32 1, %s1017_s16   ;;  %s1170_s12 = smov %s1005_s13 }
 0x129   : > { %p10_p12 = scmp.ge.s32.totalorder %s13_s16, 6   ;;  %s1171_s13 = smov %s1075_s20 }
 0x12a   : > { %s1172_s14 = smov %s1013_s15  ;;  %s1173_s15 = smov %s1175_s17 }
 0x12b   :  { %12 = sbr.rel (!%p10_p12) target bundleno = 3 (0x3), region = 101 }

// kernel: fwd.41
= control target key start
LH: loop header
LB: loop body
LE: loop exit
PB: predicated region body
PF: predicated region fallthrough
CT: control target
= control target key end

     0   :  { %s1556_s12 = smov 0   ;;  %s1558_s13 = smov 0   ;;  %s1810_s0 = inlined_call_operand.vmem [shape: bf16[128,1024], index: 0, kind: input, shape index: {}]   ;;  %s1811_s1 = inlined_call_operand.vmem [shape: bf16[1024,128], index: 1, kind: input, shape index: {}]   ;;  %s1812_s2 = inlined_call_operand.vmem [shape: f32[1,128], index: 2, kind: input, shape index: {}]   ;;  %s1813_s3 = inlined_call_operand.vmem [shape: f32[128,128], index: 3, kind: output, shape index: {}]  }
   0x1   :  { %s1560_s14 = smov 0   ;;  %s1562_s15 = smov 0  }
   0x2   :  { %s1564_s16 = smov 0  }
   0x3 LB: > { %s22_s17 = sadd.s32 1, %s1529_s15  ;;  %p41_p1 = scmp.ne.s32.totalorder %s1521_s13, %s1517_s12  ;;  %s1533_s16 = sphi %s1564_s16, %s13_s16   ;;  %s1529_s15 = sphi %s1562_s15, %s1817_s15   ;;  %s1525_s14 = sphi %s1560_s14, %s1816_s14   ;;  %s1521_s13 = sphi %s1558_s13, %s1815_s13   ;;  %s1517_s12 = sphi %s1556_s12, %s1814_s12  }
   0x4   : > { %p23_p0 = scmp.ge.s32.totalorder %s22_s17, 2  ;;  %p42_p2 = scmp.eq.s32.totalorder %s1533_s16, 0 }
   0x5   : > { %s34_s19 = sadd.s32 1, %s1521_s13  ;;  %p1214_p5 = scmp.ge.s32.totalorder %s1533_s16, 2 }
   0x6   : > { %s1819_s17 = smov (%p23_p0, %s22_s17), 0  ;;  %p43_p3 = por %p42_p2, %p41_p1 }
   0x7   : > { %s30_s18 = ssub.s32 %s1529_s15, %s1819_s17  ;;  %143 = sbr.rel (%p1214_p5) target bundleno = 32 (0x20), region = 20 }
   0x8   : > { %p32_p4 = scmp.eq.s32.totalorder %s30_s18, 0 }
   0xa   : > { %s1591_s20 = scalar_select %p32_p4, %s1521_s13, %s34_s19  }
   0xc   : > { %146 = sbr.rel (!%p43_p3) target bundleno = 32 (0x20), region = 24  ;;  %s148_s21 = sand.u32 (%p43_p3), 1, %s1521_s13  }
   0xd   : > { %s1293_s22 = sshll.u32 (%p43_p3), %s1529_s15, 4  ;;  %s1215_s23 = sshll.u32 (%p43_p3), %s148_s21, 8 }
   0xe   : > { %s1599_s26 = scalar_lea.vmem (%p43_p3), %s1810_s0, %s1293_s22  ;;  %s1604_s27 = scalar_lea.vmem (%p43_p3), [#allocation3], %s1215_s23 }
   0xf   : > { %v169_v0 = vld [vmem:[%s1599_s26] sm:$0xff] (%p43_p3)  ;;  %v171_v1 = vld [vmem:[%s1599_s26 + $0x8] sm:$0xff] (%p43_p3) }
  0x10   : > { %v173_v2 = vld [vmem:[%s1599_s26 + $0x20] sm:$0xff] (%p43_p3)  ;;  %170 = vst [vmem:[%s1604_s27] sm:$0xff] (%p43_p3), %v169_v0  ;;  %172 = vst [vmem:[%s1604_s27 + $0x8] sm:$0xff] (%p43_p3), %v171_v1  ;;  %v175_v3 = vld [vmem:[%s1599_s26 + $0x28] sm:$0xff] (%p43_p3) }
  0x11   : > { %174 = vst [vmem:[%s1604_s27 + $0x10] sm:$0xff] %v173_v2  ;;  %v177_v4 = vld [vmem:[%s1599_s26 + $0x40] sm:$0xff]  ;;  %v179_v5 = vld [vmem:[%s1599_s26 + $0x48] sm:$0xff]  ;;  %176 = vst [vmem:[%s1604_s27 + $0x18] sm:$0xff] %v175_v3 }
  0x12   : > { %178 = vst [vmem:[%s1604_s27 + $0x20] sm:$0xff] %v177_v4  ;;  %180 = vst [vmem:[%s1604_s27 + $0x28] sm:$0xff] %v179_v5  ;;  %v181_v6 = vld [vmem:[%s1599_s26 + $0x60] sm:$0xff]  ;;  %v183_v7 = vld [vmem:[%s1599_s26 + $0x68] sm:$0xff] }
  0x13   : > { %v185_v8 = vld [vmem:[%s1599_s26 + $0x80] sm:$0xff]  ;;  %182 = vst [vmem:[%s1604_s27 + $0x30] sm:$0xff] %v181_v6  ;;  %184 = vst [vmem:[%s1604_s27 + $0x38] sm:$0xff] %v183_v7  ;;  %v187_v9 = vld [vmem:[%s1599_s26 + $0x88] sm:$0xff] }
  0x14   : > { %186 = vst [vmem:[%s1604_s27 + $0x40] sm:$0xff] %v185_v8  ;;  %v189_v10 = vld [vmem:[%s1599_s26 + $0xa0] sm:$0xff]  ;;  %v191_v11 = vld [vmem:[%s1599_s26 + $0xa8] sm:$0xff]  ;;  %188 = vst [vmem:[%s1604_s27 + $0x48] sm:$0xff] %v187_v9 }
  0x15   : > { %190 = vst [vmem:[%s1604_s27 + $0x50] sm:$0xff] %v189_v10  ;;  %192 = vst [vmem:[%s1604_s27 + $0x58] sm:$0xff] %v191_v11  ;;  %v193_v12 = vld [vmem:[%s1599_s26 + $0xc0] sm:$0xff]  ;;  %v195_v13 = vld [vmem:[%s1599_s26 + $0xc8] sm:$0xff] }
  0x16   : > { %v197_v14 = vld [vmem:[%s1599_s26 + $0xe0] sm:$0xff]  ;;  %194 = vst [vmem:[%s1604_s27 + $0x60] sm:$0xff] %v193_v12  ;;  %196 = vst [vmem:[%s1604_s27 + $0x68] sm:$0xff] %v195_v13  ;;  %v199_v15 = vld [vmem:[%s1599_s26 + $0xe8] sm:$0xff] }
  0x17   : > { %198 = vst [vmem:[%s1604_s27 + $0x70] sm:$0xff] %v197_v14  ;;  %v201_v16 = vld [vmem:[%s1599_s26 + $0x100] sm:$0xff]  ;;  %v203_v17 = vld [vmem:[%s1599_s26 + $0x108] sm:$0xff]  ;;  %200 = vst [vmem:[%s1604_s27 + $0x78] sm:$0xff] %v199_v15 }
  0x18   : > { %202 = vst [vmem:[%s1604_s27 + $0x80] sm:$0xff] %v201_v16  ;;  %204 = vst [vmem:[%s1604_s27 + $0x88] sm:$0xff] %v203_v17  ;;  %v205_v18 = vld [vmem:[%s1599_s26 + $0x120] sm:$0xff]  ;;  %v207_v19 = vld [vmem:[%s1599_s26 + $0x128] sm:$0xff] }
  0x19   : > { %v209_v20 = vld [vmem:[%s1599_s26 + $0x140] sm:$0xff]  ;;  %206 = vst [vmem:[%s1604_s27 + $0x90] sm:$0xff] %v205_v18  ;;  %208 = vst [vmem:[%s1604_s27 + $0x98] sm:$0xff] %v207_v19  ;;  %v211_v21 = vld [vmem:[%s1599_s26 + $0x148] sm:$0xff] }
  0x1a   : > { %210 = vst [vmem:[%s1604_s27 + $0xa0] sm:$0xff] %v209_v20  ;;  %v213_v22 = vld [vmem:[%s1599_s26 + $0x160] sm:$0xff]  ;;  %v215_v23 = vld [vmem:[%s1599_s26 + $0x168] sm:$0xff]  ;;  %212 = vst [vmem:[%s1604_s27 + $0xa8] sm:$0xff] %v211_v21 }
  0x1b   : > { %214 = vst [vmem:[%s1604_s27 + $0xb0] sm:$0xff] %v213_v22  ;;  %216 = vst [vmem:[%s1604_s27 + $0xb8] sm:$0xff] %v215_v23  ;;  %v217_v24 = vld [vmem:[%s1599_s26 + $0x180] sm:$0xff]  ;;  %v219_v25 = vld [vmem:[%s1599_s26 + $0x188] sm:$0xff] }
  0x1c   : > { %v221_v26 = vld [vmem:[%s1599_s26 + $0x1a0] sm:$0xff]  ;;  %218 = vst [vmem:[%s1604_s27 + $0xc0] sm:$0xff] %v217_v24  ;;  %220 = vst [vmem:[%s1604_s27 + $0xc8] sm:$0xff] %v219_v25  ;;  %v223_v27 = vld [vmem:[%s1599_s26 + $0x1a8] sm:$0xff] }
  0x1d   : > { %222 = vst [vmem:[%s1604_s27 + $0xd0] sm:$0xff] %v221_v26  ;;  %v225_v28 = vld [vmem:[%s1599_s26 + $0x1c0] sm:$0xff]  ;;  %v227_v29 = vld [vmem:[%s1599_s26 + $0x1c8] sm:$0xff]  ;;  %224 = vst [vmem:[%s1604_s27 + $0xd8] sm:$0xff] %v223_v27 }
  0x1e   : > { %226 = vst [vmem:[%s1604_s27 + $0xe0] sm:$0xff] %v225_v28  ;;  %228 = vst [vmem:[%s1604_s27 + $0xe8] sm:$0xff] %v227_v29  ;;  %v229_v30 = vld [vmem:[%s1599_s26 + $0x1e0] sm:$0xff]  ;;  %v231_v31 = vld [vmem:[%s1599_s26 + $0x1e8] sm:$0xff] }
  0x1f   : > { %230 = vst [vmem:[%s1604_s27 + $0xf0] sm:$0xff] %v229_v30  ;;  %232 = vst [vmem:[%s1604_s27 + $0xf8] sm:$0xff] %v231_v31 }
  0x20 PF: > { %p1218_p6 = scmp.ge.s32.totalorder %s1533_s16, 1  ;;  %p246_p7 = scmp.lt.s32.totalorder %s1533_s16, 3 }
  0x22   : > { %p247_p8 = pnand %p1218_p6, %p246_p7 }
  0x23   : > { %s253_s28 = sand.u32 (!%p247_p8), 1, %s1517_s12   ;;  %s1220_s29 = sshll.u32 (!%p247_p8), %s1525_s14, 6 }
  0x24   : > { %250 = sbr.rel (%p247_p8) target bundleno = 363 (0x16b), region = 51  ;;  %s1219_s30 = sshll.u32 (!%p247_p8), %s253_s28, 8 }
  0x25   : > { %p284_p9 = scmp.lt.s32.totalorder (!%p247_p8), %s1220_s29, 127  ;;  %s1676_s8 = scalar_lea.vmem (!%p247_p8), [#allocation3], %s1219_s30 }
  0x26   : > { %p1222_p10 = scmp.ne.s32.totalorder (!%p247_p8), %s1525_s14, 0 }
  0x29   : > { %s1821_s29 = smov (!%p284_p9, %s1220_s29), 127  ;;  %299 = sbr.rel (%p1222_p10) target bundleno = 55 (0x37), region = 59 }
  0x2a   : > { %s1221_s4 = sshll.u32 %s1821_s29, 2 }
  0x2b   : > { %s1674_s7 = scalar_lea.vmem %s1811_s1, %s1221_s4 }
  0x2e   : > { %v1535_v32 = vmov 0.0  }
  0x2f   : > { %300 = vst [vmem:[#allocation2 + $0x30] sm:$0xff] %v1535_v32  ;;  %301 = vst [vmem:[#allocation2] sm:$0xff] %v1535_v32 }
  0x30   : > { %302 = vst [vmem:[#allocation2 + $0x58] sm:$0xff] %v1535_v32  ;;  %303 = vst [vmem:[#allocation2 + $0x18] sm:$0xff] %v1535_v32 }
  0x31   : > { %304 = vst [vmem:[#allocation2 + $0x50] sm:$0xff] %v1535_v32  ;;  %305 = vst [vmem:[#allocation2 + $0x68] sm:$0xff] %v1535_v32 }
  0x32   : > { %306 = vst [vmem:[#allocation2 + $0x8] sm:$0xff] %v1535_v32  ;;  %307 = vst [vmem:[#allocation2 + $0x48] sm:$0xff] %v1535_v32 }
  0x33   : > { %308 = vst [vmem:[#allocation2 + $0x40] sm:$0xff] %v1535_v32  ;;  %309 = vst [vmem:[#allocation2 + $0x20] sm:$0xff] %v1535_v32 }
  0x34   : > { %310 = vst [vmem:[#allocation2 + $0x10] sm:$0xff] %v1535_v32  ;;  %311 = vst [vmem:[#allocation2 + $0x38] sm:$0xff] %v1535_v32 }
  0x35   : > { %312 = vst [vmem:[#allocation2 + $0x60] sm:$0xff] %v1535_v32  ;;  %313 = vst [vmem:[#allocation2 + $0x70] sm:$0xff] %v1535_v32 }
  0x36   : > { %314 = vst [vmem:[#allocation2 + $0x78] sm:$0xff] %v1535_v32  ;;  %315 = vst [vmem:[#allocation2 + $0x28] sm:$0xff] %v1535_v32 }
  0x37 PF: > { %v1463_v33 = vld [vmem:[%s1674_s7 + $0x78] sm:$0xff]   ;;  %v1467_v37 = vld [vmem:[%s1674_s7 + $0x70] sm:$0xff]   ;;  %v1471_v41 = vld [vmem:[%s1674_s7 + $0x68] sm:$0xff]   ;;  %p1287_p11 = scmp.ne.s32.totalorder %s1525_s14, 1 }
  0x38   : > { %v1464_v34 = vld [vmem:[%s1674_s7 + $0xf8] sm:$0xff]   ;;  %1294 = vmatprep.subr.bf16.mxu0 %v1463_v33  ;;  %v1468_v38 = vld [vmem:[%s1674_s7 + $0xf0] sm:$0xff]   ;;  %v1472_v42 = vld [vmem:[%s1674_s7 + $0xe8] sm:$0xff]  }
  0x39   : > { %v1465_v35 = vld [vmem:[%s1674_s7 + $0x38] sm:$0xff]   ;;  %1358 = vmatprep.subr.bf16.mxu1 %v1464_v34  ;;  %v1469_v39 = vld [vmem:[%s1674_s7 + $0x30] sm:$0xff]   ;;  %v1473_v43 = vld [vmem:[%s1674_s7 + $0x28] sm:$0xff]  }
  0x3a   : > { %v1466_v36 = vld [vmem:[%s1674_s7 + $0xb8] sm:$0xff]   ;;  %1295 = vmatpush3.bf16.msra.mxu0 %v1465_v35  ;;  %v1470_v40 = vld [vmem:[%s1674_s7 + $0xb0] sm:$0xff]   ;;  %v1474_v44 = vld [vmem:[%s1674_s7 + $0xa8] sm:$0xff]  }
  0x3b   : > { %1359 = vmatpush3.bf16.msra.mxu1 %v1466_v36  ;;  %1296 = vmatprep.subr.bf16.mxu0 %v1467_v37  ;;  %v1475_v45 = vld [vmem:[%s1674_s7 + $0x60] sm:$0xff]   ;;  %v1479_v49 = vld [vmem:[%s1674_s7 + $0x58] sm:$0xff]   ;;  %v1483_v53 = vld [vmem:[%s1674_s7 + $0x50] sm:$0xff]  }
  0x3c   : > { %1360 = vmatprep.subr.bf16.mxu1 %v1468_v38  ;;  %v1476_v46 = vld [vmem:[%s1674_s7 + $0xe0] sm:$0xff]   ;;  %v1480_v50 = vld [vmem:[%s1674_s7 + $0xd8] sm:$0xff]   ;;  %v1484_v54 = vld [vmem:[%s1674_s7 + $0xd0] sm:$0xff]  }
  0x3d   : > { %v1477_v47 = vld [vmem:[%s1674_s7 + $0x20] sm:$0xff]   ;;  %v1481_v51 = vld [vmem:[%s1674_s7 + $0x18] sm:$0xff]   ;;  %v1485_v55 = vld [vmem:[%s1674_s7 + $0x10] sm:$0xff]  }
  0x3e   : > { %1297 = vmatpush3.bf16.msra.mxu0 %v1469_v39  ;;  %v1478_v48 = vld [vmem:[%s1674_s7 + $0xa0] sm:$0xff]   ;;  %v1482_v52 = vld [vmem:[%s1674_s7 + $0x98] sm:$0xff]   ;;  %v1486_v56 = vld [vmem:[%s1674_s7 + $0x90] sm:$0xff]  }
  0x3f   : > { %1361 = vmatpush3.bf16.msra.mxu1 %v1470_v40  ;;  %1298 = vmatprep.subr.bf16.mxu0 %v1471_v41  ;;  %v1487_v57 = vld [vmem:[%s1674_s7 + $0x48] sm:$0xff]   ;;  %v1491_v61 = vld [vmem:[%s1674_s7 + $0x40] sm:$0xff]   ;;  %v318_v2 = vld [vmem:[%s1676_s8 + $0x10] sm:$0xff] }
  0x40   : > { %1362 = vmatprep.subr.bf16.mxu1 %v1472_v42  ;;  %v1488_v58 = vld [vmem:[%s1674_s7 + $0xc8] sm:$0xff]   ;;  %v1492_v62 = vld [vmem:[%s1674_s7 + $0xc0] sm:$0xff]   ;;  %vm350_vm1 = vcmp.gt.bf16.partialorder %v318_v2, 0  ;;  %v319_v4 = vld [vmem:[%s1676_s8 + $0x18] sm:$0xff] }
  0x41   : > { %v1489_v59 = vld [vmem:[%s1674_s7 + $0x8] sm:$0xff]   ;;  %v1493_v63 = vld [vmem:[%s1674_s7] sm:$0xff]   ;;  %v322_v6 = vld [vmem:[%s1676_s8 + $0x30] sm:$0xff]  ;;  %v382_v8 = vsel %vm350_vm1, %v318_v2, 0  ;;  %vm351_vm3 = vcmp.gt.bf16.partialorder %v319_v4, 0 }
  0x42   : > { %1299 = vmatpush3.bf16.msra.mxu0 %v1473_v43  ;;  %v1490_v60 = vld [vmem:[%s1674_s7 + $0x88] sm:$0xff]   ;;  %v1494_v0 = vld [vmem:[%s1674_s7 + $0x80] sm:$0xff]   ;;  %v323_v11 = vld [vmem:[%s1676_s8 + $0x38] sm:$0xff]  ;;  %v383_v14 = vsel %vm351_vm3, %v319_v4, 0  ;;  %vm354_vm5 = vcmp.gt.bf16.partialorder %v322_v6, 0 }
  0x43   : > { %1363 = vmatpush3.bf16.msra.mxu1 %v1474_v44  ;;  %1300 = vmatprep.subr.bf16.mxu0 %v1475_v45  ;;  %v316_v1 = vld [vmem:[%s1676_s8] sm:$0xff]  ;;  %v317_v3 = vld [vmem:[%s1676_s8 + $0x8] sm:$0xff]  ;;  %v326_v19 = vld [vmem:[%s1676_s8 + $0x50] sm:$0xff]  ;;  %v386_v20 = vsel %vm354_vm5, %v322_v6, 0  ;;  %vm355_vm7 = vcmp.gt.bf16.partialorder %v323_v11, 0 }
  0x44   : > { %1364 = vmatprep.subr.bf16.mxu1 %v1476_v46  ;;  %vm348_vm0 = vcmp.gt.bf16.partialorder %v316_v1, 0  ;;  %vm349_vm2 = vcmp.gt.bf16.partialorder %v317_v3, 0  ;;  %v320_v5 = vld [vmem:[%s1676_s8 + $0x20] sm:$0xff]  ;;  %v321_v10 = vld [vmem:[%s1676_s8 + $0x28] sm:$0xff]  ;;  %v327_v22 = vld [vmem:[%s1676_s8 + $0x58] sm:$0xff]  ;;  %v387_v25 = vsel %vm355_vm7, %v323_v11, 0 }
  0x45   : > { %v380_v7 = vsel %vm348_vm0, %v316_v1, 0  ;;  %v381_v9 = vsel %vm349_vm2, %v317_v3, 0  ;;  %vm352_vm4 = vcmp.gt.bf16.partialorder %v320_v5, 0  ;;  %v324_v15 = vld [vmem:[%s1676_s8 + $0x40] sm:$0xff]  ;;  %vm353_vm6 = vcmp.gt.bf16.partialorder %v321_v10, 0  ;;  %v325_v21 = vld [vmem:[%s1676_s8 + $0x48] sm:$0xff] }
  0x46   : > { %1301 = vmatpush3.bf16.msra.mxu0 %v1477_v47  ;;  %v1223_v12 = vcombine.low %v380_v7, %v382_v8  ;;  %v1224_v13 = vcombine.high %v380_v7, %v382_v8  ;;  %v1225_v16 = vcombine.low %v381_v9, %v383_v14  ;;  %v1226_v17 = vcombine.high %v381_v9, %v383_v14  ;;  %v328_v32 = vld [vmem:[%s1676_s8 + $0x60] sm:$0xff]  ;;  %v330_v33 = vld [vmem:[%s1676_s8 + $0x70] sm:$0xff]  ;;  %v329_v36 = vld [vmem:[%s1676_s8 + $0x68] sm:$0xff] }
  0x47   : > { %1365 = vmatpush3.bf16.msra.mxu1 %v1478_v48  ;;  %1302 = vmatprep.subr.bf16.mxu0 %v1479_v49  ;;  %v384_v18 = vsel %vm352_vm4, %v320_v5, 0  ;;  %vm356_vm8 = vcmp.gt.bf16.partialorder %v324_v15, 0  ;;  %v385_v24 = vsel %vm353_vm6, %v321_v10, 0  ;;  %vm358_vm9 = vcmp.gt.bf16.partialorder %v326_v19, 0  ;;  %v331_v37 = vld [vmem:[%s1676_s8 + $0x78] sm:$0xff]  ;;  %v332_v44 = vld [vmem:[%s1676_s8 + $0x80] sm:$0xff] }
  0x48   : > { %1366 = vmatprep.subr.bf16.mxu1 %v1480_v50  ;;  %876 = vmatprep.mubr.bf16.mxu0 %v1224_v13  ;;  %v1228_v23 = vcombine.high %v384_v18, %v386_v20  ;;  %v1230_v26 = vcombine.high %v385_v24, %v387_v25  ;;  %v388_v27 = vsel %vm356_vm8, %v324_v15, 0  ;;  %v390_v28 = vsel %vm358_vm9, %v326_v19, 0  ;;  %v334_v45 = vld [vmem:[%s1676_s8 + $0x90] sm:$0xff]  ;;  %v333_v48 = vld [vmem:[%s1676_s8 + $0x88] sm:$0xff]  ;;  %v335_v49 = vld [vmem:[%s1676_s8 + $0x98] sm:$0xff] }
  0x49   : > { %973 = vmatprep.mubr.bf16.mxu1 %v1226_v17  ;;  %vm357_vm10 = vcmp.gt.bf16.partialorder %v325_v21, 0  ;;  %vm359_vm11 = vcmp.gt.bf16.partialorder %v327_v22, 0  ;;  %v1227_v31 = vcombine.low %v384_v18, %v386_v20  ;;  %v1229_v34 = vcombine.low %v385_v24, %v387_v25  ;;  %v340_v4 = vld [vmem:[%s1676_s8 + $0xc0] sm:$0xff]  ;;  %v342_v5 = vld [vmem:[%s1676_s8 + $0xd0] sm:$0xff]  ;;  %v341_v8 = vld [vmem:[%s1676_s8 + $0xc8] sm:$0xff] }
  0x4a   : > { %1303 = vmatpush3.bf16.msra.mxu0 %v1481_v51  ;;  %v389_v29 = vsel %vm357_vm10, %v325_v21, 0  ;;  %v391_v30 = vsel %vm359_vm11, %v327_v22, 0  ;;  %v1232_v35 = vcombine.high %v388_v27, %v390_v28  ;;  %vm360_vm12 = vcmp.gt.bf16.partialorder %v328_v32, 0  ;;  %v343_v9 = vld [vmem:[%s1676_s8 + $0xd8] sm:$0xff]  ;;  %v346_v17 = vld [vmem:[%s1676_s8 + $0xf0] sm:$0xff]  ;;  %v345_v20 = vld [vmem:[%s1676_s8 + $0xe8] sm:$0xff] }
  0x4b   : > { %1367 = vmatpush3.bf16.msra.mxu1 %v1482_v52  ;;  %1304 = vmatprep.subr.bf16.mxu0 %v1483_v53  ;;  %v1234_v38 = vcombine.high %v389_v29, %v391_v30  ;;  %vm362_vm13 = vcmp.gt.bf16.partialorder %v330_v33, 0  ;;  %vm361_vm14 = vcmp.gt.bf16.partialorder %v329_v36, 0  ;;  %vm363_vm15 = vcmp.gt.bf16.partialorder %v331_v37, 0  ;;  %v347_v21 = vld [vmem:[%s1676_s8 + $0xf8] sm:$0xff] }
  0x4c   : > { %1368 = vmatprep.subr.bf16.mxu1 %v1484_v54  ;;  %v392_v39 = vsel %vm360_vm12, %v328_v32, 0  ;;  %v394_v40 = vsel %vm362_vm13, %v330_v33, 0  ;;  %v393_v41 = vsel %vm361_vm14, %v329_v36, 0  ;;  %v395_v42 = vsel %vm363_vm15, %v331_v37, 0 }
  0x4d   : > { %v1231_v43 = vcombine.low %v388_v27, %v390_v28  ;;  %v1233_v46 = vcombine.low %v389_v29, %v391_v30  ;;  %v1236_v47 = vcombine.high %v392_v39, %v394_v40  ;;  %v1238_v50 = vcombine.high %v393_v41, %v395_v42 }
  0x4e   : > { %1305 = vmatpush3.bf16.msra.mxu0 %v1485_v55  ;;  %vm364_vm0 = vcmp.gt.bf16.partialorder %v332_v44, 0  ;;  %vm366_vm1 = vcmp.gt.bf16.partialorder %v334_v45, 0  ;;  %vm365_vm2 = vcmp.gt.bf16.partialorder %v333_v48, 0  ;;  %vm367_vm3 = vcmp.gt.bf16.partialorder %v335_v49, 0 }
  0x4f   : > { %1369 = vmatpush3.bf16.msra.mxu1 %v1486_v56  ;;  %1306 = vmatprep.subr.bf16.mxu0 %v1487_v57  ;;  %v396_v51 = vsel %vm364_vm0, %v332_v44, 0  ;;  %v398_v52 = vsel %vm366_vm1, %v334_v45, 0  ;;  %v397_v53 = vsel %vm365_vm2, %v333_v48, 0  ;;  %v399_v54 = vsel %vm367_vm3, %v335_v49, 0  ;;  %v336_v56 = vld [vmem:[%s1676_s8 + $0xa0] sm:$0xff]  ;;  %v338_v57 = vld [vmem:[%s1676_s8 + $0xb0] sm:$0xff] }
  0x50   : > { %1370 = vmatprep.subr.bf16.mxu1 %v1488_v58  ;;  %v1235_v55 = vcombine.low %v392_v39, %v394_v40  ;;  %v1237_v58 = vcombine.low %v393_v41, %v395_v42  ;;  %vm368_vm4 = vcmp.gt.bf16.partialorder %v336_v56, 0  ;;  %vm370_vm5 = vcmp.gt.bf16.partialorder %v338_v57, 0  ;;  %v412_v40 = vld [vmem:[#allocation2 + $0x30] sm:$0xff]  ;;  %v413_v49 = vld [vmem:[#allocation2] sm:$0xff] }
  0x51   : > { %v1239_v3 = vcombine.low %v396_v51, %v398_v52  ;;  %v1241_v6 = vcombine.low %v397_v53, %v399_v54  ;;  %vm372_vm8 = vcmp.gt.bf16.partialorder %v340_v4, 0  ;;  %vm374_vm9 = vcmp.gt.bf16.partialorder %v342_v5, 0 }
  0x52   : > { %1307 = vmatpush3.bf16.msra.mxu0 %v1489_v59  ;;  %v1240_v59 = vcombine.high %v396_v51, %v398_v52  ;;  %vm373_vm10 = vcmp.gt.bf16.partialorder %v341_v8, 0  ;;  %vm375_vm11 = vcmp.gt.bf16.partialorder %v343_v9, 0  ;;  %v404_v11 = vsel %vm372_vm8, %v340_v4, 0 }
  0x53   : > { %1371 = vmatpush3.bf16.msra.mxu1 %v1490_v60  ;;  %1308 = vmatprep.subr.bf16.mxu0 %v1491_v61  ;;  %v337_v60 = vld [vmem:[%s1676_s8 + $0xa8] sm:$0xff]  ;;  %v339_v61 = vld [vmem:[%s1676_s8 + $0xb8] sm:$0xff]  ;;  %v405_v13 = vsel %vm373_vm10, %v341_v8, 0  ;;  %v407_v14 = vsel %vm375_vm11, %v343_v9, 0  ;;  %vm378_vm13 = vcmp.gt.bf16.partialorder %v346_v17, 0  ;;  %vm377_vm14 = vcmp.gt.bf16.partialorder %v345_v20, 0 }
  0x54   : > { %1372 = vmatprep.subr.bf16.mxu1 %v1492_v62  ;;  %v1242_v62 = vcombine.high %v397_v53, %v399_v54  ;;  %vm369_vm6 = vcmp.gt.bf16.partialorder %v337_v60, 0  ;;  %vm371_vm7 = vcmp.gt.bf16.partialorder %v339_v61, 0  ;;  %v1250_v22 = vcombine.high %v405_v13, %v407_v14 }
  0x55   : > { %v401_v1 = vsel %vm369_vm6, %v337_v60, 0  ;;  %v403_v2 = vsel %vm371_vm7, %v339_v61, 0  ;;  %vm379_vm15 = vcmp.gt.bf16.partialorder %v347_v21, 0  ;;  %v410_v24 = vsel %vm378_vm13, %v346_v17, 0 }
  0x56   : > { %1309 = vmatpush3.bf16.msra.mxu0 %v1493_v63  ;;  %v400_v63 = vsel %vm368_vm4, %v336_v56, 0  ;;  %v1246_v10 = vcombine.high %v401_v1, %v403_v2  ;;  %v1245_v18 = vcombine.low %v401_v1, %v403_v2  ;;  %v409_v25 = vsel %vm377_vm14, %v345_v20, 0 }
  0x57   : > { %1373 = vmatpush3.bf16.msra.mxu1 %v1494_v0  ;;  %v402_v0 = vsel %vm370_vm5, %v338_v57, 0  ;;  %v1249_v28 = vcombine.low %v405_v13, %v407_v14 }
  0x58   : > { %v1244_v7 = vcombine.high %v400_v63, %v402_v0  ;;  %v1243_v15 = vcombine.low %v400_v63, %v402_v0 }
  0x59   : > { %877 = vmatmul.mubr.bf16.vlgmr.msra.gmra.mxu0 %v1223_v12  ;;  %v406_v12 = vsel %vm374_vm9, %v342_v5, 0 }
  0x5a   : > { %974 = vmatmul.mubr.bf16.vlgmr.msra.gmra.mxu1 %v1225_v16  ;;  %884 = vmatprep.mubr.bf16.mxu0 %v1228_v23  ;;  %v344_v16 = vld [vmem:[%s1676_s8 + $0xe0] sm:$0xff]  ;;  %v1248_v19 = vcombine.high %v404_v11, %v406_v12  ;;  %v1247_v27 = vcombine.low %v404_v11, %v406_v12  ;;  %v416_v12 = vld [vmem:[#allocation2 + $0x50] sm:$0xff] }
  0x5b   : > { %981 = vmatprep.mubr.bf16.mxu1 %v1230_v26  ;;  %vm376_vm12 = vcmp.gt.bf16.partialorder %v344_v16, 0  ;;  %v411_v26 = vsel %vm379_vm15, %v347_v21, 0  ;;  %v417_v21 = vld [vmem:[#allocation2 + $0x68] sm:$0xff] }
  0x5c   : > { %v408_v23 = vsel %vm376_vm12, %v344_v16, 0  ;;  %v1254_v30 = vcombine.high %v409_v25, %v411_v26  ;;  %v1253_v32 = vcombine.low %v409_v25, %v411_v26 }
  0x5d   : > { %v1252_v29 = vcombine.high %v408_v23, %v410_v24 }
  0x61   : > { %885 = vmatmul.mubr.bf16.gmra.mxu0 %v1227_v31  ;;  %v1251_v31 = vcombine.low %v408_v23, %v410_v24 }
  0x62   : > { %982 = vmatmul.mubr.bf16.gmra.mxu1 %v1229_v34  ;;  %892 = vmatprep.mubr.bf16.mxu0 %v1232_v35 }
  0x63   : > { %989 = vmatprep.mubr.bf16.mxu1 %v1234_v38 }
  0x69   : > { %893 = vmatmul.mubr.bf16.gmra.mxu0 %v1231_v43 }
  0x6a   : > { %990 = vmatmul.mubr.bf16.gmra.mxu1 %v1233_v46  ;;  %900 = vmatprep.mubr.bf16.mxu0 %v1236_v47 }
  0x6b   : > { %997 = vmatprep.mubr.bf16.mxu1 %v1238_v50 }
  0x71   : > { %901 = vmatmul.mubr.bf16.gmra.mxu0 %v1235_v55 }
  0x72   : > { %998 = vmatmul.mubr.bf16.gmra.mxu1 %v1237_v58  ;;  %908 = vmatprep.mubr.bf16.mxu0 %v1240_v59  ;;  %v414_v58 = vld [vmem:[#allocation2 + $0x58] sm:$0xff] }
  0x73   : > { %1005 = vmatprep.mubr.bf16.mxu1 %v1242_v62 }
  0x79   : > { %909 = vmatmul.mubr.bf16.gmra.mxu0 %v1239_v3  ;;  %v415_v3 = vld [vmem:[#allocation2 + $0x18] sm:$0xff] }
  0x7a   : > { %1006 = vmatmul.mubr.bf16.gmra.mxu1 %v1241_v6  ;;  %916 = vmatprep.mubr.bf16.mxu0 %v1244_v7 }
  0x7b   : > { %1013 = vmatprep.mubr.bf16.mxu1 %v1246_v10 }
  0x81   : > { %917 = vmatmul.mubr.bf16.gmra.mxu0 %v1243_v15 }
  0x82   : > { %1014 = vmatmul.mubr.bf16.gmra.mxu1 %v1245_v18  ;;  %924 = vmatprep.mubr.bf16.mxu0 %v1248_v19 }
  0x83   : > { %1021 = vmatprep.mubr.bf16.mxu1 %v1250_v22 }
  0x89   : > { %925 = vmatmul.mubr.bf16.gmra.mxu0 %v1247_v27 }
  0x8a   : > { %1022 = vmatmul.mubr.bf16.gmra.mxu1 %v1249_v28  ;;  %932 = vmatprep.mubr.bf16.mxu0 %v1252_v29 }
  0x8b   : > { %1029 = vmatprep.mubr.bf16.mxu1 %v1254_v30  ;;  %v418_v30 = vld [vmem:[#allocation2 + $0x8] sm:$0xff] }
  0x91   : > { %933 = vmatmul.mubr.bf16.gmra.mxu0 %v1251_v31 }
  0x92   : > { %1030 = vmatmul.mubr.bf16.gmra.mxu1 %v1253_v32 }
 0x119   : > { %v1310_v33 = vpop.f32.mrf.mxu0 }
 0x11a   : > { %v1374_v34 = vpop.f32.mrf.mxu1 }
 0x11b   : > { %v1311_v35 = vpop.f32.mrf.mxu0 }
 0x11c   : > { %v1312_v36 = vadd.f32 %v1311_v35, %v1310_v33  ;;  %v1375_v37 = vpop.f32.mrf.mxu1 }
 0x11d   : > { %v1376_v38 = vadd.f32 %v1375_v37, %v1374_v34  ;;  %v1313_v39 = vpop.f32.mrf.mxu0 }
 0x11e   : > { %v1377_v41 = vpop.f32.mrf.mxu1 }
 0x11f   : > { %v976_v42 = vadd.f32 %v1376_v38, %v1312_v36  ;;  %v1314_v43 = vpop.f32.mrf.mxu0 }
 0x120   : > { %v1315_v44 = vadd.f32 %v1314_v43, %v1313_v39  ;;  %v1378_v45 = vpop.f32.mrf.mxu1  ;;  %v419_v39 = vld [vmem:[#allocation2 + $0x48] sm:$0xff] }
 0x121   : > { %v1038_v46 = vadd.f32 %v976_v42, %v412_v40  ;;  %v1379_v47 = vadd.f32 %v1378_v45, %v1377_v41  ;;  %v1316_v48 = vpop.f32.mrf.mxu0 }
 0x122   : > { %v1380_v50 = vpop.f32.mrf.mxu1 }
 0x123   : > { %1054 = vst [vmem:[#allocation2 + $0x30] sm:$0xff] %v1038_v46  ;;  %v979_v51 = vadd.f32 %v1379_v47, %v1315_v44  ;;  %v1317_v52 = vpop.f32.mrf.mxu0 }
 0x124   : > { %v1318_v53 = vadd.f32 %v1317_v52, %v1316_v48  ;;  %v1381_v54 = vpop.f32.mrf.mxu1  ;;  %v420_v48 = vld [vmem:[#allocation2 + $0x40] sm:$0xff] }
 0x125   : > { %v1039_v55 = vadd.f32 %v979_v51, %v413_v49  ;;  %v1382_v56 = vadd.f32 %v1381_v54, %v1380_v50  ;;  %v1319_v57 = vpop.f32.mrf.mxu0 }
 0x126   : > { %v1383_v59 = vpop.f32.mrf.mxu1 }
 0x127   : > { %1055 = vst [vmem:[#allocation2] sm:$0xff] %v1039_v55  ;;  %v984_v60 = vadd.f32 %v1382_v56, %v1318_v53  ;;  %v1320_v61 = vpop.f32.mrf.mxu0 }
 0x128   : > { %v1321_v62 = vadd.f32 %v1320_v61, %v1319_v57  ;;  %v1384_v63 = vpop.f32.mrf.mxu1  ;;  %v421_v57 = vld [vmem:[#allocation2 + $0x20] sm:$0xff] }
 0x129   : > { %v1040_v0 = vadd.f32 %v984_v60, %v414_v58  ;;  %v1385_v1 = vadd.f32 %v1384_v63, %v1383_v59  ;;  %v1322_v2 = vpop.f32.mrf.mxu0 }
 0x12a   : > { %v1386_v4 = vpop.f32.mrf.mxu1 }
 0x12b   : > { %1056 = vst [vmem:[#allocation2 + $0x58] sm:$0xff] %v1040_v0  ;;  %v987_v5 = vadd.f32 %v1385_v1, %v1321_v62  ;;  %v1323_v6 = vpop.f32.mrf.mxu0 }
 0x12c   : > { %v1324_v7 = vadd.f32 %v1323_v6, %v1322_v2  ;;  %v1387_v8 = vpop.f32.mrf.mxu1  ;;  %v422_v2 = vld [vmem:[#allocation2 + $0x10] sm:$0xff] }
 0x12d   : > { %v1041_v9 = vadd.f32 %v987_v5, %v415_v3  ;;  %v1388_v10 = vadd.f32 %v1387_v8, %v1386_v4  ;;  %v1325_v11 = vpop.f32.mrf.mxu0 }
 0x12e   : > { %v1389_v13 = vpop.f32.mrf.mxu1 }
 0x12f   : > { %1057 = vst [vmem:[#allocation2 + $0x18] sm:$0xff] %v1041_v9  ;;  %v992_v14 = vadd.f32 %v1388_v10, %v1324_v7  ;;  %v1326_v15 = vpop.f32.mrf.mxu0 }
 0x130   : > { %v1327_v16 = vadd.f32 %v1326_v15, %v1325_v11  ;;  %v1390_v17 = vpop.f32.mrf.mxu1  ;;  %v423_v11 = vld [vmem:[#allocation2 + $0x38] sm:$0xff] }
 0x131   : > { %v1042_v18 = vadd.f32 %v992_v14, %v416_v12  ;;  %v1391_v19 = vadd.f32 %v1390_v17, %v1389_v13  ;;  %v1328_v20 = vpop.f32.mrf.mxu0 }
 0x132   : > { %v1392_v22 = vpop.f32.mrf.mxu1 }
 0x133   : > { %1058 = vst [vmem:[#allocation2 + $0x50] sm:$0xff] %v1042_v18  ;;  %v995_v23 = vadd.f32 %v1391_v19, %v1327_v16  ;;  %v1329_v24 = vpop.f32.mrf.mxu0 }
 0x134   : > { %v1330_v25 = vadd.f32 %v1329_v24, %v1328_v20  ;;  %v1393_v26 = vpop.f32.mrf.mxu1  ;;  %v424_v20 = vld [vmem:[#allocation2 + $0x60] sm:$0xff] }
 0x135   : > { %v1043_v27 = vadd.f32 %v995_v23, %v417_v21  ;;  %v1394_v28 = vadd.f32 %v1393_v26, %v1392_v22  ;;  %v1331_v29 = vpop.f32.mrf.mxu0 }
 0x136   : > { %v1395_v31 = vpop.f32.mrf.mxu1 }
 0x137   : > { %1059 = vst [vmem:[#allocation2 + $0x68] sm:$0xff] %v1043_v27  ;;  %v1000_v32 = vadd.f32 %v1394_v28, %v1330_v25  ;;  %v1332_v33 = vpop.f32.mrf.mxu0 }
 0x138   : > { %v1333_v34 = vadd.f32 %v1332_v33, %v1331_v29  ;;  %v1396_v35 = vpop.f32.mrf.mxu1  ;;  %v425_v29 = vld [vmem:[#allocation2 + $0x70] sm:$0xff] }
 0x139   : > { %v1044_v36 = vadd.f32 %v1000_v32, %v418_v30  ;;  %v1397_v37 = vadd.f32 %v1396_v35, %v1395_v31  ;;  %v1334_v38 = vpop.f32.mrf.mxu0 }
 0x13a   : > { %v1398_v40 = vpop.f32.mrf.mxu1 }
 0x13b   : > { %1060 = vst [vmem:[#allocation2 + $0x8] sm:$0xff] %v1044_v36  ;;  %v1003_v41 = vadd.f32 %v1397_v37, %v1333_v34  ;;  %v1335_v42 = vpop.f32.mrf.mxu0 }
 0x13c   : > { %v1336_v43 = vadd.f32 %v1335_v42, %v1334_v38  ;;  %v1399_v44 = vpop.f32.mrf.mxu1  ;;  %v426_v38 = vld [vmem:[#allocation2 + $0x78] sm:$0xff] }
 0x13d   : > { %v1045_v45 = vadd.f32 %v1003_v41, %v419_v39  ;;  %v1400_v46 = vadd.f32 %v1399_v44, %v1398_v40  ;;  %v1337_v47 = vpop.f32.mrf.mxu0 }
 0x13e   : > { %v1401_v49 = vpop.f32.mrf.mxu1 }
 0x13f   : > { %1061 = vst [vmem:[#allocation2 + $0x48] sm:$0xff] %v1045_v45  ;;  %v1008_v50 = vadd.f32 %v1400_v46, %v1336_v43  ;;  %v1338_v51 = vpop.f32.mrf.mxu0  ;;  %v427_v46 = vld [vmem:[#allocation2 + $0x28] sm:$0xff] }
 0x140   : > { %v1339_v52 = vadd.f32 %v1338_v51, %v1337_v47  ;;  %v1402_v53 = vpop.f32.mrf.mxu1 }
 0x141   : > { %v1046_v54 = vadd.f32 %v1008_v50, %v420_v48  ;;  %v1403_v55 = vadd.f32 %v1402_v53, %v1401_v49  ;;  %v1340_v56 = vpop.f32.mrf.mxu0 }
 0x142   : > { %v1404_v58 = vpop.f32.mrf.mxu1 }
 0x143   : > { %1062 = vst [vmem:[#allocation2 + $0x40] sm:$0xff] %v1046_v54  ;;  %v1011_v59 = vadd.f32 %v1403_v55, %v1339_v52  ;;  %v1341_v60 = vpop.f32.mrf.mxu0 }
 0x144   : > { %v1342_v61 = vadd.f32 %v1341_v60, %v1340_v56  ;;  %v1405_v62 = vpop.f32.mrf.mxu1 }
 0x145   : > { %v1047_v63 = vadd.f32 %v1011_v59, %v421_v57  ;;  %v1406_v0 = vadd.f32 %v1405_v62, %v1404_v58  ;;  %v1343_v1 = vpop.f32.mrf.mxu0 }
 0x146   : > { %v1407_v3 = vpop.f32.mrf.mxu1 }
 0x147   : > { %1063 = vst [vmem:[#allocation2 + $0x20] sm:$0xff] %v1047_v63  ;;  %v1016_v4 = vadd.f32 %v1406_v0, %v1342_v61  ;;  %v1344_v5 = vpop.f32.mrf.mxu0 }
 0x148   : > { %v1345_v6 = vadd.f32 %v1344_v5, %v1343_v1  ;;  %v1408_v7 = vpop.f32.mrf.mxu1 }
 0x149   : > { %v1048_v8 = vadd.f32 %v1016_v4, %v422_v2  ;;  %v1409_v9 = vadd.f32 %v1408_v7, %v1407_v3  ;;  %v1346_v10 = vpop.f32.mrf.mxu0 }
 0x14a   : > { %v1410_v12 = vpop.f32.mrf.mxu1 }
 0x14b   : > { %1064 = vst [vmem:[#allocation2 + $0x10] sm:$0xff] %v1048_v8  ;;  %v1019_v13 = vadd.f32 %v1409_v9, %v1345_v6  ;;  %v1347_v14 = vpop.f32.mrf.mxu0 }
 0x14c   : > { %v1348_v15 = vadd.f32 %v1347_v14, %v1346_v10  ;;  %v1411_v16 = vpop.f32.mrf.mxu1 }
 0x14d   : > { %v1049_v17 = vadd.f32 %v1019_v13, %v423_v11  ;;  %v1412_v18 = vadd.f32 %v1411_v16, %v1410_v12  ;;  %v1349_v19 = vpop.f32.mrf.mxu0 }
 0x14e   : > { %v1413_v21 = vpop.f32.mrf.mxu1 }
 0x14f   : > { %1065 = vst [vmem:[#allocation2 + $0x38] sm:$0xff] %v1049_v17  ;;  %v1024_v22 = vadd.f32 %v1412_v18, %v1348_v15  ;;  %v1350_v23 = vpop.f32.mrf.mxu0 }
 0x150   : > { %v1351_v24 = vadd.f32 %v1350_v23, %v1349_v19  ;;  %v1414_v25 = vpop.f32.mrf.mxu1 }
 0x151   : > { %v1050_v26 = vadd.f32 %v1024_v22, %v424_v20  ;;  %v1415_v27 = vadd.f32 %v1414_v25, %v1413_v21  ;;  %v1352_v28 = vpop.f32.mrf.mxu0 }
 0x152   : > { %v1416_v30 = vpop.f32.mrf.mxu1 }
 0x153   : > { %1066 = vst [vmem:[#allocation2 + $0x60] sm:$0xff] %v1050_v26  ;;  %v1027_v31 = vadd.f32 %v1415_v27, %v1351_v24  ;;  %v1353_v32 = vpop.f32.mrf.mxu0 }
 0x154   : > { %v1354_v33 = vadd.f32 %v1353_v32, %v1352_v28  ;;  %v1417_v34 = vpop.f32.mrf.mxu1 }
 0x155   : > { %v1051_v35 = vadd.f32 %v1027_v31, %v425_v29  ;;  %v1418_v36 = vadd.f32 %v1417_v34, %v1416_v30  ;;  %v1355_v37 = vpop.f32.mrf.mxu0 }
 0x156   : > { %v1419_v39 = vpop.f32.mrf.mxu1 }
 0x157   : > { %1067 = vst [vmem:[#allocation2 + $0x70] sm:$0xff] %v1051_v35  ;;  %v1032_v40 = vadd.f32 %v1418_v36, %v1354_v33  ;;  %v1356_v41 = vpop.f32.mrf.mxu0 }
 0x158   : > { %v1357_v42 = vadd.f32 %v1356_v41, %v1355_v37  ;;  %v1420_v43 = vpop.f32.mrf.mxu1 }
 0x159   : > { %v1052_v44 = vadd.f32 %v1032_v40, %v426_v38  ;;  %v1421_v45 = vadd.f32 %v1420_v43, %v1419_v39 }
 0x15b   : > { %1068 = vst [vmem:[#allocation2 + $0x78] sm:$0xff] %v1052_v44  ;;  %v1035_v47 = vadd.f32 %v1421_v45, %v1357_v42  ;;  %1073 = sbr.rel (%p1287_p11) target bundleno = 363 (0x16b), region = 63 }
 0x15d   : > { %v1053_v48 = vadd.f32 %v1035_v47, %v427_v46 }
 0x15f   : > { %1069 = vst [vmem:[#allocation2 + $0x28] sm:$0xff] %v1053_v48 }
 0x160   : > { %v1074_v49 = vld [vmem:[#allocation2 + $0x30] sm:$0xff]  ;;  %v1288_v50 = vld [vmem:[%s1812_s2] ss:$0 sm:$0xff]  ;;  %v1076_v54 = vld [vmem:[#allocation2 + $0x58] sm:$0xff] }
 0x161   : > { %v1075_v51 = vld [vmem:[#allocation2] sm:$0xff]  ;;  %v1097_v52 = vadd.f32 %v1288_v50, %v1074_v49  ;;  %v1077_v55 = vld [vmem:[#allocation2 + $0x18] sm:$0xff]  ;;  %v1078_v56 = vld [vmem:[#allocation2 + $0x50] sm:$0xff]  ;;  %v1099_v57 = vadd.f32 %v1288_v50, %v1076_v54 }
 0x162   : > { %v1098_v53 = vadd.f32 %v1288_v50, %v1075_v51  ;;  %v1100_v58 = vadd.f32 %v1288_v50, %v1077_v55  ;;  %v1101_v59 = vadd.f32 %v1288_v50, %v1078_v56  ;;  %v1079_v60 = vld [vmem:[#allocation2 + $0x68] sm:$0xff]  ;;  %v1082_v2 = vld [vmem:[#allocation2 + $0x40] sm:$0xff]  ;;  %v1084_v4 = vld [vmem:[#allocation2 + $0x10] sm:$0xff] }
 0x163   : > { %v1080_v61 = vld [vmem:[#allocation2 + $0x8] sm:$0xff]  ;;  %1113 = vst [vmem:[%s1813_s3] sm:$0xff] %v1097_v52  ;;  %v1102_v63 = vadd.f32 %v1288_v50, %v1079_v60  ;;  %v1083_v3 = vld [vmem:[#allocation2 + $0x20] sm:$0xff]  ;;  %1115 = vst [vmem:[%s1813_s3 + $0x10] sm:$0xff] %v1099_v57  ;;  %v1105_v5 = vadd.f32 %v1288_v50, %v1082_v2  ;;  %v1107_v7 = vadd.f32 %v1288_v50, %v1084_v4 }
 0x164   : > { %v1081_v62 = vld [vmem:[#allocation2 + $0x48] sm:$0xff]  ;;  %1114 = vst [vmem:[%s1813_s3 + $0x8] sm:$0xff] %v1098_v53  ;;  %v1103_v0 = vadd.f32 %v1288_v50, %v1080_v61  ;;  %1116 = vst [vmem:[%s1813_s3 + $0x18] sm:$0xff] %v1100_v58  ;;  %v1106_v6 = vadd.f32 %v1288_v50, %v1083_v3  ;;  %v1085_v8 = vld [vmem:[#allocation2 + $0x38] sm:$0xff] }
 0x165   : > { %v1104_v1 = vadd.f32 %v1288_v50, %v1081_v62  ;;  %1117 = vst [vmem:[%s1813_s3 + $0x20] sm:$0xff] %v1101_v59  ;;  %v1086_v9 = vld [vmem:[#allocation2 + $0x60] sm:$0xff]  ;;  %v1087_v10 = vld [vmem:[#allocation2 + $0x70] sm:$0xff]  ;;  %1118 = vst [vmem:[%s1813_s3 + $0x28] sm:$0xff] %v1102_v63  ;;  %v1108_v11 = vadd.f32 %v1288_v50, %v1085_v8 }
 0x166   : > { %1119 = vst [vmem:[%s1813_s3 + $0x30] sm:$0xff] %v1103_v0  ;;  %v1109_v12 = vadd.f32 %v1288_v50, %v1086_v9  ;;  %v1110_v13 = vadd.f32 %v1288_v50, %v1087_v10  ;;  %v1088_v14 = vld [vmem:[#allocation2 + $0x78] sm:$0xff]  ;;  %v1089_v15 = vld [vmem:[#allocation2 + $0x28] sm:$0xff]  ;;  %1121 = vst [vmem:[%s1813_s3 + $0x40] sm:$0xff] %v1105_v5 }
 0x167   : > { %1120 = vst [vmem:[%s1813_s3 + $0x38] sm:$0xff] %v1104_v1  ;;  %1122 = vst [vmem:[%s1813_s3 + $0x48] sm:$0xff] %v1106_v6  ;;  %v1111_v16 = vadd.f32 %v1288_v50, %v1088_v14  ;;  %v1112_v17 = vadd.f32 %v1288_v50, %v1089_v15 }
 0x168   : > { %1123 = vst [vmem:[%s1813_s3 + $0x50] sm:$0xff] %v1107_v7  ;;  %1124 = vst [vmem:[%s1813_s3 + $0x58] sm:$0xff] %v1108_v11 }
 0x169   : > { %1125 = vst [vmem:[%s1813_s3 + $0x60] sm:$0xff] %v1109_v12  ;;  %1126 = vst [vmem:[%s1813_s3 + $0x68] sm:$0xff] %v1110_v13 }
 0x16a   : > { %1127 = vst [vmem:[%s1813_s3 + $0x70] sm:$0xff] %v1111_v16  ;;  %1128 = vst [vmem:[%s1813_s3 + $0x78] sm:$0xff] %v1112_v17 }
 0x16b PF: > { %s13_s16 = sadd.s32 1, %s1533_s16   ;;  %s1814_s12 = smov %s1521_s13 }
 0x16c   : > { %p10_p12 = scmp.ge.s32.totalorder %s13_s16, 4   ;;  %s1815_s13 = smov %s1591_s20 }
 0x16d   : > { %s1816_s14 = smov %s1529_s15  ;;  %s1817_s15 = smov %s1819_s17 }
 0x16e   :  { %12 = sbr.rel (!%p10_p12) target bundleno = 3 (0x3), region = 101 }

// kernel: fwd.45
= control target key start
LH: loop header
LB: loop body
LE: loop exit
PB: predicated region body
PF: predicated region fallthrough
CT: control target
= control target key end

     0   :  { %v297_v0 = vmov 0.0   ;;  %s523_s0 = inlined_call_operand.vmem [shape: f32[512,128], index: 0, kind: input, shape index: {}]   ;;  %s524_s1 = inlined_call_operand.vmem [shape: f32[1,128], index: 1, kind: output, shape index: {0}]   ;;  %s525_s2 = inlined_call_operand.vmem [shape: f32[1,128], index: 2, kind: output, shape index: {1}]  }
   0x1   :  { %14 = vst [vmem:[%s524_s1] sm:$0x1] %v297_v0  ;;  %15 = vst [vmem:[%s525_s2] sm:$0x1] %v297_v0  ;;  %v16_v1 = vld [vmem:[%s523_s0] sm:$0xff]  ;;  %v17_v2 = vld [vmem:[%s523_s0 + $0x8] sm:$0xff] }
   0x2   :  { %v18_v3 = vld [vmem:[%s523_s0 + $0x10] sm:$0xff]  ;;  %v19_v4 = vld [vmem:[%s523_s0 + $0x18] sm:$0xff]  ;;  %v81_v5 = vadd.f32 %v17_v2, %v16_v1  ;;  %v153_v6 = vmul.f32 %v16_v1, %v16_v1  ;;  %v154_v7 = vmul.f32 %v17_v2, %v17_v2  ;;  %v20_v9 = vld [vmem:[%s523_s0 + $0x20] sm:$0xff] }
   0x3   :  { %v155_v8 = vmul.f32 %v18_v3, %v18_v3  ;;  %v156_v11 = vmul.f32 %v19_v4, %v19_v4  ;;  %v21_v13 = vld [vmem:[%s523_s0 + $0x28] sm:$0xff]  ;;  %v157_v15 = vmul.f32 %v20_v9, %v20_v9  ;;  %v22_v17 = vld [vmem:[%s523_s0 + $0x30] sm:$0xff]  ;;  %v23_v21 = vld [vmem:[%s523_s0 + $0x38] sm:$0xff] }
   0x4   :  { %v82_v10 = vadd.f32 %v81_v5, %v18_v3  ;;  %v217_v12 = vadd.f32 %v154_v7, %v153_v6  ;;  %v158_v19 = vmul.f32 %v21_v13, %v21_v13  ;;  %v159_v23 = vmul.f32 %v22_v17, %v22_v17  ;;  %v24_v25 = vld [vmem:[%s523_s0 + $0x40] sm:$0xff]  ;;  %v25_v29 = vld [vmem:[%s523_s0 + $0x48] sm:$0xff]  ;;  %v26_v33 = vld [vmem:[%s523_s0 + $0x50] sm:$0xff] }
   0x5   :  { %v160_v27 = vmul.f32 %v23_v21, %v23_v21  ;;  %v161_v31 = vmul.f32 %v24_v25, %v24_v25  ;;  %v162_v35 = vmul.f32 %v25_v29, %v25_v29  ;;  %v27_v37 = vld [vmem:[%s523_s0 + $0x58] sm:$0xff]  ;;  %v163_v39 = vmul.f32 %v26_v33, %v26_v33  ;;  %v28_v41 = vld [vmem:[%s523_s0 + $0x60] sm:$0xff]  ;;  %v29_v45 = vld [vmem:[%s523_s0 + $0x68] sm:$0xff] }
   0x6   :  { %v83_v14 = vadd.f32 %v82_v10, %v19_v4  ;;  %v218_v16 = vadd.f32 %v217_v12, %v155_v8  ;;  %v164_v43 = vmul.f32 %v27_v37, %v27_v37  ;;  %v165_v47 = vmul.f32 %v28_v41, %v28_v41  ;;  %v30_v49 = vld [vmem:[%s523_s0 + $0x70] sm:$0xff]  ;;  %v31_v53 = vld [vmem:[%s523_s0 + $0x78] sm:$0xff]  ;;  %v32_v57 = vld [vmem:[%s523_s0 + $0x80] sm:$0xff] }
   0x7   :  { %v166_v51 = vmul.f32 %v29_v45, %v29_v45  ;;  %v167_v55 = vmul.f32 %v30_v49, %v30_v49  ;;  %v168_v59 = vmul.f32 %v31_v53, %v31_v53  ;;  %v33_v61 = vld [vmem:[%s523_s0 + $0x88] sm:$0xff]  ;;  %v169_v63 = vmul.f32 %v32_v57, %v32_v57  ;;  %v34_v1 = vld [vmem:[%s523_s0 + $0x90] sm:$0xff]  ;;  %v35_v5 = vld [vmem:[%s523_s0 + $0x98] sm:$0xff] }
   0x8   :  { %v84_v18 = vadd.f32 %v83_v14, %v20_v9  ;;  %v219_v20 = vadd.f32 %v218_v16, %v156_v11  ;;  %v170_v3 = vmul.f32 %v33_v61, %v33_v61  ;;  %v171_v7 = vmul.f32 %v34_v1, %v34_v1  ;;  %v36_v9 = vld [vmem:[%s523_s0 + $0xa0] sm:$0xff] }
   0x9   :  { %v172_v11 = vmul.f32 %v35_v5, %v35_v5 }
   0xa   :  { %v85_v22 = vadd.f32 %v84_v18, %v21_v13  ;;  %v220_v24 = vadd.f32 %v219_v20, %v157_v15  ;;  %v37_v13 = vld [vmem:[%s523_s0 + $0xa8] sm:$0xff]  ;;  %v173_v15 = vmul.f32 %v36_v9, %v36_v9 }
   0xc   :  { %v86_v26 = vadd.f32 %v85_v22, %v22_v17  ;;  %v221_v28 = vadd.f32 %v220_v24, %v158_v19  ;;  %v38_v17 = vld [vmem:[%s523_s0 + $0xb0] sm:$0xff]  ;;  %v174_v19 = vmul.f32 %v37_v13, %v37_v13 }
   0xe   :  { %v87_v30 = vadd.f32 %v86_v26, %v23_v21  ;;  %v222_v32 = vadd.f32 %v221_v28, %v159_v23  ;;  %v39_v21 = vld [vmem:[%s523_s0 + $0xb8] sm:$0xff]  ;;  %v175_v23 = vmul.f32 %v38_v17, %v38_v17 }
  0x10   :  { %v88_v34 = vadd.f32 %v87_v30, %v24_v25  ;;  %v223_v36 = vadd.f32 %v222_v32, %v160_v27  ;;  %v40_v25 = vld [vmem:[%s523_s0 + $0xc0] sm:$0xff]  ;;  %v176_v27 = vmul.f32 %v39_v21, %v39_v21 }
  0x12   :  { %v89_v38 = vadd.f32 %v88_v34, %v25_v29  ;;  %v224_v40 = vadd.f32 %v223_v36, %v161_v31  ;;  %v41_v29 = vld [vmem:[%s523_s0 + $0xc8] sm:$0xff]  ;;  %v177_v31 = vmul.f32 %v40_v25, %v40_v25 }
  0x14   :  { %v90_v42 = vadd.f32 %v89_v38, %v26_v33  ;;  %v225_v44 = vadd.f32 %v224_v40, %v162_v35  ;;  %v42_v33 = vld [vmem:[%s523_s0 + $0xd0] sm:$0xff]  ;;  %v178_v35 = vmul.f32 %v41_v29, %v41_v29 }
  0x16   :  { %v91_v46 = vadd.f32 %v90_v42, %v27_v37  ;;  %v226_v48 = vadd.f32 %v225_v44, %v163_v39  ;;  %v43_v37 = vld [vmem:[%s523_s0 + $0xd8] sm:$0xff]  ;;  %v179_v39 = vmul.f32 %v42_v33, %v42_v33 }
  0x18   :  { %v92_v50 = vadd.f32 %v91_v46, %v28_v41  ;;  %v227_v52 = vadd.f32 %v226_v48, %v164_v43  ;;  %v44_v41 = vld [vmem:[%s523_s0 + $0xe0] sm:$0xff]  ;;  %v180_v43 = vmul.f32 %v43_v37, %v43_v37 }
  0x1a   :  { %v93_v54 = vadd.f32 %v92_v50, %v29_v45  ;;  %v228_v56 = vadd.f32 %v227_v52, %v165_v47  ;;  %v45_v45 = vld [vmem:[%s523_s0 + $0xe8] sm:$0xff]  ;;  %v181_v47 = vmul.f32 %v44_v41, %v44_v41 }
  0x1c   :  { %v94_v58 = vadd.f32 %v93_v54, %v30_v49  ;;  %v229_v60 = vadd.f32 %v228_v56, %v166_v51  ;;  %v46_v49 = vld [vmem:[%s523_s0 + $0xf0] sm:$0xff]  ;;  %v182_v51 = vmul.f32 %v45_v45, %v45_v45 }
  0x1e   :  { %v95_v62 = vadd.f32 %v94_v58, %v31_v53  ;;  %v230_v0 = vadd.f32 %v229_v60, %v167_v55  ;;  %v47_v53 = vld [vmem:[%s523_s0 + $0xf8] sm:$0xff]  ;;  %v183_v55 = vmul.f32 %v46_v49, %v46_v49 }
  0x20   :  { %v96_v2 = vadd.f32 %v95_v62, %v32_v57  ;;  %v231_v4 = vadd.f32 %v230_v0, %v168_v59  ;;  %v48_v57 = vld [vmem:[%s523_s0 + $0x100] sm:$0xff]  ;;  %v184_v59 = vmul.f32 %v47_v53, %v47_v53 }
  0x22   :  { %v97_v6 = vadd.f32 %v96_v2, %v33_v61  ;;  %v232_v8 = vadd.f32 %v231_v4, %v169_v63  ;;  %v49_v61 = vld [vmem:[%s523_s0 + $0x108] sm:$0xff]  ;;  %v185_v63 = vmul.f32 %v48_v57, %v48_v57 }
  0x24   :  { %v98_v10 = vadd.f32 %v97_v6, %v34_v1  ;;  %v233_v12 = vadd.f32 %v232_v8, %v170_v3  ;;  %v50_v1 = vld [vmem:[%s523_s0 + $0x110] sm:$0xff]  ;;  %v186_v3 = vmul.f32 %v49_v61, %v49_v61 }
  0x26   :  { %v99_v14 = vadd.f32 %v98_v10, %v35_v5  ;;  %v234_v16 = vadd.f32 %v233_v12, %v171_v7  ;;  %v51_v5 = vld [vmem:[%s523_s0 + $0x118] sm:$0xff]  ;;  %v187_v7 = vmul.f32 %v50_v1, %v50_v1 }
  0x28   :  { %v100_v18 = vadd.f32 %v99_v14, %v36_v9  ;;  %v235_v20 = vadd.f32 %v234_v16, %v172_v11  ;;  %v52_v9 = vld [vmem:[%s523_s0 + $0x120] sm:$0xff]  ;;  %v188_v11 = vmul.f32 %v51_v5, %v51_v5 }
  0x2a   :  { %v101_v22 = vadd.f32 %v100_v18, %v37_v13  ;;  %v236_v24 = vadd.f32 %v235_v20, %v173_v15  ;;  %v53_v13 = vld [vmem:[%s523_s0 + $0x128] sm:$0xff]  ;;  %v189_v15 = vmul.f32 %v52_v9, %v52_v9 }
  0x2c   :  { %v102_v26 = vadd.f32 %v101_v22, %v38_v17  ;;  %v237_v28 = vadd.f32 %v236_v24, %v174_v19  ;;  %v54_v17 = vld [vmem:[%s523_s0 + $0x130] sm:$0xff]  ;;  %v190_v19 = vmul.f32 %v53_v13, %v53_v13 }
  0x2e   :  { %v103_v30 = vadd.f32 %v102_v26, %v39_v21  ;;  %v238_v32 = vadd.f32 %v237_v28, %v175_v23  ;;  %v55_v21 = vld [vmem:[%s523_s0 + $0x138] sm:$0xff]  ;;  %v191_v23 = vmul.f32 %v54_v17, %v54_v17 }
  0x30   :  { %v104_v34 = vadd.f32 %v103_v30, %v40_v25  ;;  %v239_v36 = vadd.f32 %v238_v32, %v176_v27  ;;  %v56_v25 = vld [vmem:[%s523_s0 + $0x140] sm:$0xff]  ;;  %v192_v27 = vmul.f32 %v55_v21, %v55_v21 }
  0x32   :  { %v105_v38 = vadd.f32 %v104_v34, %v41_v29  ;;  %v240_v40 = vadd.f32 %v239_v36, %v177_v31  ;;  %v57_v29 = vld [vmem:[%s523_s0 + $0x148] sm:$0xff]  ;;  %v193_v31 = vmul.f32 %v56_v25, %v56_v25 }
  0x34   :  { %v106_v42 = vadd.f32 %v105_v38, %v42_v33  ;;  %v241_v44 = vadd.f32 %v240_v40, %v178_v35  ;;  %v58_v33 = vld [vmem:[%s523_s0 + $0x150] sm:$0xff]  ;;  %v194_v35 = vmul.f32 %v57_v29, %v57_v29 }
  0x36   :  { %v107_v46 = vadd.f32 %v106_v42, %v43_v37  ;;  %v242_v48 = vadd.f32 %v241_v44, %v179_v39  ;;  %v59_v37 = vld [vmem:[%s523_s0 + $0x158] sm:$0xff]  ;;  %v195_v39 = vmul.f32 %v58_v33, %v58_v33 }
  0x38   :  { %v108_v50 = vadd.f32 %v107_v46, %v44_v41  ;;  %v243_v52 = vadd.f32 %v242_v48, %v180_v43  ;;  %v60_v41 = vld [vmem:[%s523_s0 + $0x160] sm:$0xff]  ;;  %v196_v43 = vmul.f32 %v59_v37, %v59_v37 }
  0x3a   :  { %v109_v54 = vadd.f32 %v108_v50, %v45_v45  ;;  %v244_v56 = vadd.f32 %v243_v52, %v181_v47  ;;  %v61_v45 = vld [vmem:[%s523_s0 + $0x168] sm:$0xff]  ;;  %v197_v47 = vmul.f32 %v60_v41, %v60_v41 }
  0x3c   :  { %v110_v58 = vadd.f32 %v109_v54, %v46_v49  ;;  %v245_v60 = vadd.f32 %v244_v56, %v182_v51  ;;  %v62_v49 = vld [vmem:[%s523_s0 + $0x170] sm:$0xff]  ;;  %v198_v51 = vmul.f32 %v61_v45, %v61_v45 }
  0x3e   :  { %v111_v62 = vadd.f32 %v110_v58, %v47_v53  ;;  %v246_v0 = vadd.f32 %v245_v60, %v183_v55  ;;  %v63_v53 = vld [vmem:[%s523_s0 + $0x178] sm:$0xff]  ;;  %v199_v55 = vmul.f32 %v62_v49, %v62_v49 }
  0x40   :  { %v112_v2 = vadd.f32 %v111_v62, %v48_v57  ;;  %v247_v4 = vadd.f32 %v246_v0, %v184_v59  ;;  %v64_v57 = vld [vmem:[%s523_s0 + $0x180] sm:$0xff]  ;;  %v200_v59 = vmul.f32 %v63_v53, %v63_v53 }
  0x42   :  { %v113_v6 = vadd.f32 %v112_v2, %v49_v61  ;;  %v248_v8 = vadd.f32 %v247_v4, %v185_v63  ;;  %v65_v61 = vld [vmem:[%s523_s0 + $0x188] sm:$0xff]  ;;  %v201_v63 = vmul.f32 %v64_v57, %v64_v57 }
  0x44   :  { %v114_v10 = vadd.f32 %v113_v6, %v50_v1  ;;  %v249_v12 = vadd.f32 %v248_v8, %v186_v3  ;;  %v66_v1 = vld [vmem:[%s523_s0 + $0x190] sm:$0xff]  ;;  %v202_v3 = vmul.f32 %v65_v61, %v65_v61 }
  0x46   :  { %v115_v14 = vadd.f32 %v114_v10, %v51_v5  ;;  %v250_v16 = vadd.f32 %v249_v12, %v187_v7  ;;  %v67_v5 = vld [vmem:[%s523_s0 + $0x198] sm:$0xff]  ;;  %v203_v7 = vmul.f32 %v66_v1, %v66_v1 }
  0x48   :  { %v116_v18 = vadd.f32 %v115_v14, %v52_v9  ;;  %v251_v20 = vadd.f32 %v250_v16, %v188_v11  ;;  %v68_v9 = vld [vmem:[%s523_s0 + $0x1a0] sm:$0xff]  ;;  %v204_v11 = vmul.f32 %v67_v5, %v67_v5 }
  0x4a   :  { %v117_v22 = vadd.f32 %v116_v18, %v53_v13  ;;  %v252_v24 = vadd.f32 %v251_v20, %v189_v15  ;;  %v69_v13 = vld [vmem:[%s523_s0 + $0x1a8] sm:$0xff]  ;;  %v205_v15 = vmul.f32 %v68_v9, %v68_v9 }
  0x4c   :  { %v118_v26 = vadd.f32 %v117_v22, %v54_v17  ;;  %v253_v28 = vadd.f32 %v252_v24, %v190_v19  ;;  %v70_v17 = vld [vmem:[%s523_s0 + $0x1b0] sm:$0xff]  ;;  %v206_v19 = vmul.f32 %v69_v13, %v69_v13 }
  0x4e   :  { %v119_v30 = vadd.f32 %v118_v26, %v55_v21  ;;  %v254_v32 = vadd.f32 %v253_v28, %v191_v23  ;;  %v71_v21 = vld [vmem:[%s523_s0 + $0x1b8] sm:$0xff]  ;;  %v207_v23 = vmul.f32 %v70_v17, %v70_v17 }
  0x50   :  { %v120_v34 = vadd.f32 %v119_v30, %v56_v25  ;;  %v255_v36 = vadd.f32 %v254_v32, %v192_v27  ;;  %v72_v25 = vld [vmem:[%s523_s0 + $0x1c0] sm:$0xff]  ;;  %v208_v27 = vmul.f32 %v71_v21, %v71_v21 }
  0x52   :  { %v121_v38 = vadd.f32 %v120_v34, %v57_v29  ;;  %v256_v40 = vadd.f32 %v255_v36, %v193_v31  ;;  %v73_v29 = vld [vmem:[%s523_s0 + $0x1c8] sm:$0xff]  ;;  %v209_v31 = vmul.f32 %v72_v25, %v72_v25 }
  0x54   :  { %v122_v42 = vadd.f32 %v121_v38, %v58_v33  ;;  %v257_v44 = vadd.f32 %v256_v40, %v194_v35  ;;  %v74_v33 = vld [vmem:[%s523_s0 + $0x1d0] sm:$0xff]  ;;  %v210_v35 = vmul.f32 %v73_v29, %v73_v29 }
  0x56   :  { %v123_v46 = vadd.f32 %v122_v42, %v59_v37  ;;  %v258_v48 = vadd.f32 %v257_v44, %v195_v39  ;;  %v75_v37 = vld [vmem:[%s523_s0 + $0x1d8] sm:$0xff]  ;;  %v211_v39 = vmul.f32 %v74_v33, %v74_v33 }
  0x58   :  { %v124_v50 = vadd.f32 %v123_v46, %v60_v41  ;;  %v259_v52 = vadd.f32 %v258_v48, %v196_v43  ;;  %v76_v41 = vld [vmem:[%s523_s0 + $0x1e0] sm:$0xff]  ;;  %v212_v43 = vmul.f32 %v75_v37, %v75_v37 }
  0x5a   :  { %v125_v54 = vadd.f32 %v124_v50, %v61_v45  ;;  %v260_v56 = vadd.f32 %v259_v52, %v197_v47  ;;  %v77_v45 = vld [vmem:[%s523_s0 + $0x1e8] sm:$0xff]  ;;  %v213_v47 = vmul.f32 %v76_v41, %v76_v41 }
  0x5c   :  { %v126_v58 = vadd.f32 %v125_v54, %v62_v49  ;;  %v261_v60 = vadd.f32 %v260_v56, %v198_v51  ;;  %v78_v49 = vld [vmem:[%s523_s0 + $0x1f0] sm:$0xff]  ;;  %v214_v51 = vmul.f32 %v77_v45, %v77_v45 }
  0x5e   :  { %v127_v62 = vadd.f32 %v126_v58, %v63_v53  ;;  %v262_v0 = vadd.f32 %v261_v60, %v199_v55  ;;  %v79_v53 = vld [vmem:[%s523_s0 + $0x1f8] sm:$0xff]  ;;  %v215_v55 = vmul.f32 %v78_v49, %v78_v49 }
  0x5f   :  { %v216_v58 = vmul.f32 %v79_v53, %v79_v53 }
  0x60   :  { %v128_v2 = vadd.f32 %v127_v62, %v64_v57  ;;  %v263_v4 = vadd.f32 %v262_v0, %v200_v59 }
  0x62   :  { %v129_v6 = vadd.f32 %v128_v2, %v65_v61  ;;  %v264_v8 = vadd.f32 %v263_v4, %v201_v63 }
  0x64   :  { %v130_v10 = vadd.f32 %v129_v6, %v66_v1  ;;  %v265_v12 = vadd.f32 %v264_v8, %v202_v3 }
  0x66   :  { %v131_v14 = vadd.f32 %v130_v10, %v67_v5  ;;  %v266_v16 = vadd.f32 %v265_v12, %v203_v7  ;;  %v80_v7 = vld [vmem:[%s524_s1] sm:$0x1] }
  0x67   :  { %v152_v12 = vld [vmem:[%s525_s2] sm:$0x1] }
  0x68   :  { %v132_v18 = vadd.f32 %v131_v14, %v68_v9  ;;  %v267_v20 = vadd.f32 %v266_v16, %v204_v11 }
  0x6a   :  { %v133_v22 = vadd.f32 %v132_v18, %v69_v13  ;;  %v268_v24 = vadd.f32 %v267_v20, %v205_v15 }
  0x6c   :  { %v134_v26 = vadd.f32 %v133_v22, %v70_v17  ;;  %v269_v28 = vadd.f32 %v268_v24, %v206_v19 }
  0x6e   :  { %v135_v30 = vadd.f32 %v134_v26, %v71_v21  ;;  %v270_v32 = vadd.f32 %v269_v28, %v207_v23 }
  0x70   :  { %v136_v34 = vadd.f32 %v135_v30, %v72_v25  ;;  %v271_v36 = vadd.f32 %v270_v32, %v208_v27 }
  0x72   :  { %v137_v38 = vadd.f32 %v136_v34, %v73_v29  ;;  %v272_v40 = vadd.f32 %v271_v36, %v209_v31 }
  0x74   :  { %v138_v42 = vadd.f32 %v137_v38, %v74_v33  ;;  %v273_v44 = vadd.f32 %v272_v40, %v210_v35 }
  0x76   :  { %v139_v46 = vadd.f32 %v138_v42, %v75_v37  ;;  %v274_v48 = vadd.f32 %v273_v44, %v211_v39 }
  0x78   :  { %v140_v50 = vadd.f32 %v139_v46, %v76_v41  ;;  %v275_v52 = vadd.f32 %v274_v48, %v212_v43 }
  0x7a   :  { %v141_v54 = vadd.f32 %v140_v50, %v77_v45  ;;  %v276_v56 = vadd.f32 %v275_v52, %v213_v47 }
  0x7c   :  { %v142_v57 = vadd.f32 %v141_v54, %v78_v49  ;;  %v277_v59 = vadd.f32 %v276_v56, %v214_v51 }
  0x7e   :  { %v143_v60 = vadd.f32 %v142_v57, %v79_v53  ;;  %v278_v61 = vadd.f32 %v277_v59, %v215_v55 }
  0x80   :  { %v144_v62 = vrot.slane %v143_v60, 4  ;;  %v279_v63 = vadd.f32 %v278_v61, %v216_v58 }
  0x82   :  { %v145_v0 = vadd.f32 %v144_v62, %v143_v60  ;;  %v280_v1 = vrot.slane %v279_v63, 4 }
  0x84   :  { %v146_v2 = vrot.slane %v145_v0, 2  ;;  %v281_v3 = vadd.f32 %v280_v1, %v279_v63 }
  0x86   :  { %v147_v4 = vadd.f32 %v146_v2, %v145_v0  ;;  %v282_v5 = vrot.slane %v281_v3, 2 }
  0x88   :  { %v148_v6 = vrot.slane %v147_v4, 1  ;;  %v283_v8 = vadd.f32 %v282_v5, %v281_v3 }
  0x8a   :  { %v149_v9 = vadd.f32 %v148_v6, %v147_v4  ;;  %v284_v10 = vrot.slane %v283_v8, 1 }
  0x8c   :  { %v150_v11 = vadd.f32 %v149_v9, %v80_v7  ;;  %v285_v13 = vadd.f32 %v284_v10, %v283_v8 }
  0x8e   :  { %151 = vst [vmem:[%s524_s1] sm:$0x1] %v150_v11  ;;  %v286_v14 = vadd.f32 %v285_v13, %v152_v12 }
  0x90   :  { %287 = vst [vmem:[%s525_s2] sm:$0x1] %v286_v14 }

// kernel: fwd.44
= control target key start
LH: loop header
LB: loop body
LE: loop exit
PB: predicated region body
PF: predicated region fallthrough
CT: control target
= control target key end

     0   :  { %v2534_v0 = vmov 0   ;;  %s3339_s1 = inlined_call_operand.vmem [shape: bf16[512,128], index: 1, kind: input, shape index: {}]   ;;  %s3340_s0 = inlined_call_operand.vmem [shape: bf16[512,512], index: 0, kind: input, shape index: {}]   ;;  %s3341_s2 = inlined_call_operand.vmem [shape: f32[1,128], index: 2, kind: input, shape index: {}]   ;;  %s3342_s3 = inlined_call_operand.vmem [shape: f32[512,128], index: 3, kind: output, shape index: {}]  }
   0x1   :  { %1427 = vmatprep.subr.bf16.mxu0 %v2534_v0  ;;  %1716 = vmatprep.subr.bf16.mxu1 %v2534_v0  ;;  %v2501_v1 = vld [vmem:[%s3339_s1 + $0x38] sm:$0xff]   ;;  %v2503_v3 = vld [vmem:[%s3339_s1 + $0x30] sm:$0xff]   ;;  %v2505_v5 = vld [vmem:[%s3339_s1 + $0x28] sm:$0xff]  }
   0x2   :  { %v2502_v2 = vld [vmem:[%s3339_s1 + $0xb8] sm:$0xff]   ;;  %1428 = vmatpush1.bf16.msra.mxu0 %v2501_v1  ;;  %v2504_v4 = vld [vmem:[%s3339_s1 + $0xb0] sm:$0xff]   ;;  %v2506_v6 = vld [vmem:[%s3339_s1 + $0xa8] sm:$0xff]  }
   0x3   :  { %1717 = vmatpush1.bf16.msra.mxu1 %v2502_v2  ;;  %1429 = vmatprep.subr.bf16.mxu0 %v2534_v0  ;;  %v2507_v7 = vld [vmem:[%s3339_s1 + $0x20] sm:$0xff]   ;;  %v2509_v9 = vld [vmem:[%s3339_s1 + $0x18] sm:$0xff]   ;;  %v2511_v11 = vld [vmem:[%s3339_s1 + $0x10] sm:$0xff]  }
   0x4   :  { %1718 = vmatprep.subr.bf16.mxu1 %v2534_v0  ;;  %v2508_v8 = vld [vmem:[%s3339_s1 + $0xa0] sm:$0xff]   ;;  %v2510_v10 = vld [vmem:[%s3339_s1 + $0x98] sm:$0xff]   ;;  %v2512_v12 = vld [vmem:[%s3339_s1 + $0x90] sm:$0xff]  }
   0x5   :  { %v2513_v13 = vld [vmem:[%s3339_s1 + $0x8] sm:$0xff]   ;;  %v2515_v15 = vld [vmem:[%s3339_s1] sm:$0xff]   ;;  %v2517_v17 = vld [vmem:[%s3339_s1 + $0x78] sm:$0xff]  }
   0x6   :  { %1430 = vmatpush1.bf16.msra.mxu0 %v2503_v3  ;;  %v2514_v14 = vld [vmem:[%s3339_s1 + $0x88] sm:$0xff]   ;;  %v2516_v16 = vld [vmem:[%s3339_s1 + $0x80] sm:$0xff]   ;;  %v2518_v18 = vld [vmem:[%s3339_s1 + $0xf8] sm:$0xff]  }
   0x7   :  { %1719 = vmatpush1.bf16.msra.mxu1 %v2504_v4  ;;  %1431 = vmatprep.subr.bf16.mxu0 %v2534_v0  ;;  %v83_v19 = vld [vmem:[%s3340_s0] sm:$0xff]  ;;  %v85_v20 = vld [vmem:[%s3340_s0 + $0x10] sm:$0xff]  ;;  %v84_v21 = vld [vmem:[%s3340_s0 + $0x8] sm:$0xff] }
   0x8   :  { %1720 = vmatprep.subr.bf16.mxu1 %v2534_v0  ;;  %vm211_vm0 = vcmp.gt.bf16.partialorder %v83_v19, 0  ;;  %vm213_vm1 = vcmp.gt.bf16.partialorder %v85_v20, 0  ;;  %v86_v22 = vld [vmem:[%s3340_s0 + $0x18] sm:$0xff]  ;;  %vm212_vm2 = vcmp.gt.bf16.partialorder %v84_v21, 0  ;;  %v2519_v23 = vld [vmem:[%s3339_s1 + $0x70] sm:$0xff]   ;;  %v2521_v31 = vld [vmem:[%s3339_s1 + $0x68] sm:$0xff]  }
   0x9   :  { %v2642_v24 = vsel %vm211_vm0, %v83_v19, 0  ;;  %v2644_v25 = vsel %vm213_vm1, %v85_v20, 0  ;;  %vm214_vm3 = vcmp.gt.bf16.partialorder %v86_v22, 0  ;;  %v2646_v26 = vsel %vm212_vm2, %v84_v21, 0  ;;  %v2520_v27 = vld [vmem:[%s3339_s1 + $0xf0] sm:$0xff]   ;;  %v2522_v32 = vld [vmem:[%s3339_s1 + $0xe8] sm:$0xff]  }
   0xa   :  { %1432 = vmatpush1.bf16.msra.mxu0 %v2505_v5  ;;  %v2340_v28 = vcombine.high %v2642_v24, %v2644_v25  ;;  %v2654_v29 = vsel %vm214_vm3, %v86_v22, 0  ;;  %v2523_v33 = vld [vmem:[%s3339_s1 + $0x60] sm:$0xff]   ;;  %v2525_v35 = vld [vmem:[%s3339_s1 + $0x58] sm:$0xff]   ;;  %v2527_v37 = vld [vmem:[%s3339_s1 + $0x50] sm:$0xff]   ;;  %v2339_v51 = vcombine.low %v2642_v24, %v2644_v25 }
   0xb   :  { %1721 = vmatpush1.bf16.msra.mxu1 %v2506_v6  ;;  %1433 = vmatprep.subr.bf16.mxu0 %v2534_v0  ;;  %v2342_v30 = vcombine.high %v2646_v26, %v2654_v29  ;;  %v2524_v34 = vld [vmem:[%s3339_s1 + $0xe0] sm:$0xff]   ;;  %v2526_v36 = vld [vmem:[%s3339_s1 + $0xd8] sm:$0xff]   ;;  %v2528_v38 = vld [vmem:[%s3339_s1 + $0xd0] sm:$0xff]   ;;  %v2341_v54 = vcombine.low %v2646_v26, %v2654_v29 }
   0xc   :  { %1722 = vmatprep.subr.bf16.mxu1 %v2534_v0  ;;  %1459 = vmatprep.mubr.bf16.mxu0 %v2340_v28  ;;  %v87_v39 = vld [vmem:[%s3340_s0 + $0x20] sm:$0xff]  ;;  %v89_v40 = vld [vmem:[%s3340_s0 + $0x30] sm:$0xff]  ;;  %v2529_v41 = vld [vmem:[%s3339_s1 + $0x48] sm:$0xff]  }
   0xd   :  { %1748 = vmatprep.mubr.bf16.mxu1 %v2342_v30  ;;  %v88_v42 = vld [vmem:[%s3340_s0 + $0x28] sm:$0xff]  ;;  %v90_v43 = vld [vmem:[%s3340_s0 + $0x38] sm:$0xff]  ;;  %vm215_vm4 = vcmp.gt.bf16.partialorder %v87_v39, 0  ;;  %vm217_vm5 = vcmp.gt.bf16.partialorder %v89_v40, 0  ;;  %v2531_v45 = vld [vmem:[%s3339_s1 + $0x40] sm:$0xff]  }
   0xe   :  { %1434 = vmatpush1.bf16.msra.mxu0 %v2507_v7  ;;  %v2530_v44 = vld [vmem:[%s3339_s1 + $0xc8] sm:$0xff]   ;;  %vm216_vm6 = vcmp.gt.bf16.partialorder %v88_v42, 0  ;;  %vm218_vm7 = vcmp.gt.bf16.partialorder %v90_v43, 0  ;;  %v2532_v46 = vld [vmem:[%s3339_s1 + $0xc0] sm:$0xff]   ;;  %v343_v47 = vsel %vm215_vm4, %v87_v39, 0  ;;  %v345_v48 = vsel %vm217_vm5, %v89_v40, 0 }
   0xf   :  { %1723 = vmatpush1.bf16.msra.mxu1 %v2508_v8  ;;  %1435 = vmatprep.subr.bf16.mxu0 %v2534_v0  ;;  %v344_v49 = vsel %vm216_vm6, %v88_v42, 0  ;;  %v346_v50 = vsel %vm218_vm7, %v90_v43, 0  ;;  %v91_v52 = vld [vmem:[%s3340_s0 + $0x40] sm:$0xff]  ;;  %v93_v53 = vld [vmem:[%s3340_s0 + $0x50] sm:$0xff]  ;;  %v2344_v55 = vcombine.high %v343_v47, %v345_v48  ;;  %v92_v56 = vld [vmem:[%s3340_s0 + $0x48] sm:$0xff]  ;;  %v2343_v63 = vcombine.low %v343_v47, %v345_v48 }
  0x10   :  { %1724 = vmatprep.subr.bf16.mxu1 %v2534_v0  ;;  %v94_v57 = vld [vmem:[%s3340_s0 + $0x58] sm:$0xff]  ;;  %v2346_v58 = vcombine.high %v344_v49, %v346_v50  ;;  %vm219_vm8 = vcmp.gt.bf16.partialorder %v91_v52, 0  ;;  %vm221_vm9 = vcmp.gt.bf16.partialorder %v93_v53, 0  ;;  %vm220_vm10 = vcmp.gt.bf16.partialorder %v92_v56, 0  ;;  %v97_v1 = vld [vmem:[%s3340_s0 + $0x70] sm:$0xff]  ;;  %v96_v4 = vld [vmem:[%s3340_s0 + $0x68] sm:$0xff] }
  0x11   :  { %vm222_vm11 = vcmp.gt.bf16.partialorder %v94_v57, 0  ;;  %v347_v59 = vsel %vm219_vm8, %v91_v52, 0  ;;  %v349_v60 = vsel %vm221_vm9, %v93_v53, 0  ;;  %v348_v61 = vsel %vm220_vm10, %v92_v56, 0  ;;  %v98_v5 = vld [vmem:[%s3340_s0 + $0x78] sm:$0xff]  ;;  %v103_v24 = vld [vmem:[%s3340_s0 + $0xa0] sm:$0xff] }
  0x12   :  { %1436 = vmatpush1.bf16.msra.mxu0 %v2509_v9  ;;  %v350_v62 = vsel %vm222_vm11, %v94_v57, 0  ;;  %v2345_v2 = vcombine.low %v344_v49, %v346_v50  ;;  %v2348_v3 = vcombine.high %v347_v59, %v349_v60  ;;  %vm225_vm13 = vcmp.gt.bf16.partialorder %v97_v1, 0  ;;  %v105_v25 = vld [vmem:[%s3340_s0 + $0xb0] sm:$0xff]  ;;  %v104_v28 = vld [vmem:[%s3340_s0 + $0xa8] sm:$0xff]  ;;  %v106_v29 = vld [vmem:[%s3340_s0 + $0xb8] sm:$0xff] }
  0x13   :  { %1725 = vmatpush1.bf16.msra.mxu1 %v2510_v10  ;;  %1437 = vmatprep.subr.bf16.mxu0 %v2534_v0  ;;  %v2350_v6 = vcombine.high %v348_v61, %v350_v62  ;;  %vm224_vm14 = vcmp.gt.bf16.partialorder %v96_v4, 0  ;;  %vm226_vm15 = vcmp.gt.bf16.partialorder %v98_v5, 0  ;;  %v353_v8 = vsel %vm225_vm13, %v97_v1, 0  ;;  %v108_v40 = vld [vmem:[%s3340_s0 + $0xc8] sm:$0xff]  ;;  %v111_v48 = vld [vmem:[%s3340_s0 + $0xe0] sm:$0xff]  ;;  %v113_v49 = vld [vmem:[%s3340_s0 + $0xf0] sm:$0xff] }
  0x14   :  { %1726 = vmatprep.subr.bf16.mxu1 %v2534_v0  ;;  %v352_v9 = vsel %vm224_vm14, %v96_v4, 0  ;;  %v354_v10 = vsel %vm226_vm15, %v98_v5, 0  ;;  %vm231_vm4 = vcmp.gt.bf16.partialorder %v103_v24, 0  ;;  %vm233_vm5 = vcmp.gt.bf16.partialorder %v105_v25, 0  ;;  %v112_v52 = vld [vmem:[%s3340_s0 + $0xe8] sm:$0xff]  ;;  %v114_v53 = vld [vmem:[%s3340_s0 + $0xf8] sm:$0xff] }
  0x15   :  { %v2353_v26 = vcombine.low %v352_v9, %v354_v10  ;;  %vm232_vm6 = vcmp.gt.bf16.partialorder %v104_v28, 0  ;;  %vm234_vm7 = vcmp.gt.bf16.partialorder %v106_v29, 0  ;;  %vm236_vm10 = vcmp.gt.bf16.partialorder %v108_v40, 0  ;;  %v118_v1 = vld [vmem:[%s3340_s0 + $0x118] sm:$0xff] }
  0x16   :  { %1438 = vmatpush1.bf16.msra.mxu0 %v2511_v11  ;;  %v2347_v11 = vcombine.low %v347_v59, %v349_v60  ;;  %vm241_vm13 = vcmp.gt.bf16.partialorder %v113_v49, 0  ;;  %vm240_vm14 = vcmp.gt.bf16.partialorder %v112_v52, 0  ;;  %vm242_vm15 = vcmp.gt.bf16.partialorder %v114_v53, 0  ;;  %v115_v60 = vld [vmem:[%s3340_s0 + $0x100] sm:$0xff] }
  0x17   :  { %1727 = vmatpush1.bf16.msra.mxu1 %v2512_v12  ;;  %1439 = vmatprep.subr.bf16.mxu0 %v2534_v0  ;;  %v99_v12 = vld [vmem:[%s3340_s0 + $0x80] sm:$0xff]  ;;  %v369_v56 = vsel %vm241_vm13, %v113_v49, 0  ;;  %v368_v57 = vsel %vm240_vm14, %v112_v52, 0  ;;  %v134_v49 = vld [vmem:[%s3340_s0 + $0x198] sm:$0xff] }
  0x18   :  { %1728 = vmatprep.subr.bf16.mxu1 %v2534_v0  ;;  %vm227_vm0 = vcmp.gt.bf16.partialorder %v99_v12, 0 }
  0x19   :  { %v355_v19 = vsel %vm227_vm0, %v99_v12, 0  ;;  %vm243_vm0 = vcmp.gt.bf16.partialorder %v115_v60, 0  ;;  %v120_v12 = vld [vmem:[%s3340_s0 + $0x128] sm:$0xff] }
  0x1a   :  { %1440 = vmatpush1.bf16.msra.mxu0 %v2513_v13  ;;  %v101_v13 = vld [vmem:[%s3340_s0 + $0x90] sm:$0xff] }
  0x1b   :  { %1729 = vmatpush1.bf16.msra.mxu1 %v2514_v14  ;;  %1441 = vmatprep.subr.bf16.mxu0 %v2534_v0  ;;  %v2349_v14 = vcombine.low %v348_v61, %v350_v62  ;;  %vm229_vm1 = vcmp.gt.bf16.partialorder %v101_v13, 0  ;;  %v117_v61 = vld [vmem:[%s3340_s0 + $0x110] sm:$0xff] }
  0x1c   :  { %1730 = vmatprep.subr.bf16.mxu1 %v2534_v0  ;;  %v357_v20 = vsel %vm229_vm1, %v101_v13, 0  ;;  %vm245_vm1 = vcmp.gt.bf16.partialorder %v117_v61, 0  ;;  %v122_v13 = vld [vmem:[%s3340_s0 + $0x138] sm:$0xff] }
  0x1d   :  { %v373_v4 = vsel %vm245_vm1, %v117_v61, 0  ;;  %v138_v61 = vld [vmem:[%s3340_s0 + $0x1b8] sm:$0xff] }
  0x1e   :  { %1442 = vmatpush1.bf16.msra.mxu0 %v2515_v15 }
  0x1f   :  { %1731 = vmatpush1.bf16.msra.mxu1 %v2516_v16  ;;  %1443 = vmatprep.subr.bf16.mxu0 %v2534_v0  ;;  %v100_v16 = vld [vmem:[%s3340_s0 + $0x88] sm:$0xff] }
  0x20   :  { %1732 = vmatprep.subr.bf16.mxu1 %v2534_v0  ;;  %vm228_vm2 = vcmp.gt.bf16.partialorder %v100_v16, 0 }
  0x21   :  { %v356_v21 = vsel %vm228_vm2, %v100_v16, 0 }
  0x22   :  { %1444 = vmatpush2.bf16.msra.mxu0 %v2517_v17  ;;  %v102_v17 = vld [vmem:[%s3340_s0 + $0x98] sm:$0xff] }
  0x23   :  { %1733 = vmatpush2.bf16.msra.mxu1 %v2518_v18  ;;  %1445 = vmatprep.subr.bf16.mxu0 %v2534_v0  ;;  %v2354_v18 = vcombine.high %v352_v9, %v354_v10  ;;  %vm230_vm3 = vcmp.gt.bf16.partialorder %v102_v17, 0  ;;  %v121_v9 = vld [vmem:[%s3340_s0 + $0x130] sm:$0xff] }
  0x24   :  { %1734 = vmatprep.subr.bf16.mxu1 %v2534_v0  ;;  %v358_v22 = vsel %vm230_vm3, %v102_v17, 0  ;;  %vm246_vm3 = vcmp.gt.bf16.partialorder %v118_v1, 0 }
  0x25   :  { %v2358_v30 = vcombine.high %v356_v21, %v358_v22 }
  0x26   :  { %1446 = vmatpush2.bf16.msra.mxu0 %v2519_v23 }
  0x27   :  { %1735 = vmatpush2.bf16.msra.mxu1 %v2520_v27  ;;  %1447 = vmatprep.subr.bf16.mxu0 %v2534_v0  ;;  %v2356_v27 = vcombine.high %v355_v19, %v357_v20 }
  0x28   :  { %1736 = vmatprep.subr.bf16.mxu1 %v2534_v0 }
  0x2a   :  { %1448 = vmatpush2.bf16.msra.mxu0 %v2521_v31  ;;  %v359_v31 = vsel %vm231_vm4, %v103_v24, 0  ;;  %v124_v24 = vld [vmem:[%s3340_s0 + $0x148] sm:$0xff] }
  0x2b   :  { %1737 = vmatpush2.bf16.msra.mxu1 %v2522_v32  ;;  %1449 = vmatprep.subr.bf16.mxu0 %v2534_v0  ;;  %v361_v32 = vsel %vm233_vm5, %v105_v25, 0  ;;  %vm249_vm5 = vcmp.gt.bf16.partialorder %v121_v9, 0  ;;  %v126_v25 = vld [vmem:[%s3340_s0 + $0x158] sm:$0xff] }
  0x2c   :  { %1738 = vmatprep.subr.bf16.mxu1 %v2534_v0  ;;  %v2360_v39 = vcombine.high %v359_v31, %v361_v32  ;;  %v2359_v47 = vcombine.low %v359_v31, %v361_v32  ;;  %v377_v16 = vsel %vm249_vm5, %v121_v9, 0  ;;  %v127_v32 = vld [vmem:[%s3340_s0 + $0x160] sm:$0xff]  ;;  %v142_v9 = vld [vmem:[%s3340_s0 + $0x1d8] sm:$0xff] }
  0x2e   :  { %1450 = vmatpush2.bf16.msra.mxu0 %v2523_v33  ;;  %v360_v33 = vsel %vm232_vm6, %v104_v28, 0  ;;  %vm248_vm6 = vcmp.gt.bf16.partialorder %v120_v12, 0 }
  0x2f   :  { %1739 = vmatpush2.bf16.msra.mxu1 %v2524_v34  ;;  %1451 = vmatprep.subr.bf16.mxu0 %v2534_v0  ;;  %v362_v34 = vsel %vm234_vm7, %v106_v29, 0  ;;  %vm250_vm7 = vcmp.gt.bf16.partialorder %v122_v13, 0  ;;  %v376_v17 = vsel %vm248_vm6, %v120_v12, 0 }
  0x30   :  { %1740 = vmatprep.subr.bf16.mxu1 %v2534_v0  ;;  %v2362_v42 = vcombine.high %v360_v33, %v362_v34  ;;  %v2361_v50 = vcombine.low %v360_v33, %v362_v34  ;;  %v129_v33 = vld [vmem:[%s3340_s0 + $0x170] sm:$0xff] }
  0x31   :  { %vm257_vm13 = vcmp.gt.bf16.partialorder %v129_v33, 0 }
  0x32   :  { %1452 = vmatpush2.bf16.msra.mxu0 %v2525_v35  ;;  %v2355_v35 = vcombine.low %v355_v19, %v357_v20  ;;  %v123_v20 = vld [vmem:[%s3340_s0 + $0x140] sm:$0xff] }
  0x33   :  { %1741 = vmatpush2.bf16.msra.mxu1 %v2526_v36  ;;  %1453 = vmatprep.subr.bf16.mxu0 %v2534_v0  ;;  %v107_v36 = vld [vmem:[%s3340_s0 + $0xc0] sm:$0xff] }
  0x34   :  { %1742 = vmatprep.subr.bf16.mxu1 %v2534_v0  ;;  %vm235_vm8 = vcmp.gt.bf16.partialorder %v107_v36, 0 }
  0x35   :  { %v363_v43 = vsel %vm235_vm8, %v107_v36, 0  ;;  %vm251_vm8 = vcmp.gt.bf16.partialorder %v123_v20, 0  ;;  %v128_v36 = vld [vmem:[%s3340_s0 + $0x168] sm:$0xff] }
  0x36   :  { %1454 = vmatpush2.bf16.msra.mxu0 %v2527_v37  ;;  %v109_v37 = vld [vmem:[%s3340_s0 + $0xd0] sm:$0xff]  ;;  %vm256_vm14 = vcmp.gt.bf16.partialorder %v128_v36, 0 }
  0x37   :  { %1743 = vmatpush2.bf16.msra.mxu1 %v2528_v38  ;;  %1455 = vmatprep.subr.bf16.mxu0 %v2534_v0  ;;  %v2357_v38 = vcombine.low %v356_v21, %v358_v22  ;;  %vm237_vm9 = vcmp.gt.bf16.partialorder %v109_v37, 0  ;;  %v125_v21 = vld [vmem:[%s3340_s0 + $0x150] sm:$0xff] }
  0x38   :  { %1744 = vmatprep.subr.bf16.mxu1 %v2534_v0 }
  0x3a   :  { %1456 = vmatpush2.bf16.msra.mxu0 %v2529_v41  ;;  %v110_v41 = vld [vmem:[%s3340_s0 + $0xd8] sm:$0xff] }
  0x3b   :  { %1745 = vmatpush2.bf16.msra.mxu1 %v2530_v44  ;;  %1457 = vmatprep.subr.bf16.mxu0 %v2534_v0  ;;  %vm238_vm11 = vcmp.gt.bf16.partialorder %v110_v41, 0  ;;  %v365_v44 = vsel %vm237_vm9, %v109_v37, 0  ;;  %vm253_vm9 = vcmp.gt.bf16.partialorder %v125_v21, 0  ;;  %v130_v37 = vld [vmem:[%s3340_s0 + $0x178] sm:$0xff] }
  0x3c   :  { %1746 = vmatprep.subr.bf16.mxu1 %v2534_v0  ;;  %v95_v0 = vld [vmem:[%s3340_s0 + $0x60] sm:$0xff]  ;;  %v2363_v59 = vcombine.low %v363_v43, %v365_v44  ;;  %v381_v28 = vsel %vm253_vm9, %v125_v21, 0  ;;  %v146_v21 = vld [vmem:[%s3340_s0 + $0x1f8] sm:$0xff] }
  0x3d   :  { %vm223_vm12 = vcmp.gt.bf16.partialorder %v95_v0, 0 }
  0x3e   :  { %1458 = vmatpush2.bf16.msra.mxu0 %v2531_v45  ;;  %v351_v7 = vsel %vm223_vm12, %v95_v0, 0  ;;  %v364_v45 = vsel %vm236_vm10, %v108_v40, 0  ;;  %vm239_vm12 = vcmp.gt.bf16.partialorder %v111_v48, 0  ;;  %v116_v0 = vld [vmem:[%s3340_s0 + $0x108] sm:$0xff]  ;;  %vm252_vm10 = vcmp.gt.bf16.partialorder %v124_v24, 0 }
  0x3f   :  { %1747 = vmatpush2.bf16.msra.mxu1 %v2532_v46  ;;  %v2352_v15 = vcombine.high %v351_v7, %v353_v8  ;;  %v2351_v23 = vcombine.low %v351_v7, %v353_v8  ;;  %v366_v46 = vsel %vm238_vm11, %v110_v41, 0  ;;  %vm244_vm2 = vcmp.gt.bf16.partialorder %v116_v0, 0  ;;  %v119_v8 = vld [vmem:[%s3340_s0 + $0x120] sm:$0xff] }
  0x40   :  { %v2365_v62 = vcombine.low %v364_v45, %v366_v46  ;;  %v372_v5 = vsel %vm244_vm2, %v116_v0, 0  ;;  %vm247_vm4 = vcmp.gt.bf16.partialorder %v119_v8, 0  ;;  %vm254_vm11 = vcmp.gt.bf16.partialorder %v126_v25, 0 }
  0x41   :  { %1460 = vmatmul.mubr.bf16.vlgmr.msra.gmra.mxu0 %v2339_v51  ;;  %v2364_v51 = vcombine.high %v363_v43, %v365_v44  ;;  %v380_v29 = vsel %vm252_vm10, %v124_v24, 0  ;;  %v385_v40 = vsel %vm257_vm13, %v129_v33, 0  ;;  %v384_v41 = vsel %vm256_vm14, %v128_v36, 0  ;;  %v131_v44 = vld [vmem:[%s3340_s0 + $0x180] sm:$0xff]  ;;  %v150_v33 = vld [vmem:[%s3340_s0 + $0x218] sm:$0xff] }
  0x42   :  { %1749 = vmatmul.mubr.bf16.vlgmr.msra.gmra.mxu1 %v2341_v54  ;;  %1467 = vmatprep.mubr.bf16.mxu0 %v2344_v55  ;;  %v2366_v54 = vcombine.high %v364_v45, %v366_v46  ;;  %v367_v55 = vsel %vm239_vm12, %v111_v48, 0  ;;  %vm255_vm12 = vcmp.gt.bf16.partialorder %v127_v32, 0  ;;  %v133_v45 = vld [vmem:[%s3340_s0 + $0x190] sm:$0xff]  ;;  %v132_v48 = vld [vmem:[%s3340_s0 + $0x188] sm:$0xff] }
  0x43   :  { %1756 = vmatprep.mubr.bf16.mxu1 %v2346_v58  ;;  %v370_v58 = vsel %vm242_vm15, %v114_v53, 0  ;;  %v2367_v7 = vcombine.low %v367_v55, %v369_v56  ;;  %vm258_vm15 = vcmp.gt.bf16.partialorder %v130_v37, 0  ;;  %vm261_vm1 = vcmp.gt.bf16.partialorder %v133_v45, 0 }
  0x44   :  { %v2369_v10 = vcombine.low %v368_v57, %v370_v58  ;;  %vm260_vm2 = vcmp.gt.bf16.partialorder %v132_v48, 0  ;;  %v389_v52 = vsel %vm261_vm1, %v133_v45, 0  ;;  %v154_v45 = vld [vmem:[%s3340_s0 + $0x238] sm:$0xff] }
  0x45   :  { %v388_v53 = vsel %vm260_vm2, %v132_v48, 0 }
  0x49   :  { %1468 = vmatmul.mubr.bf16.gmra.mxu0 %v2343_v63  ;;  %v2368_v63 = vcombine.high %v367_v55, %v369_v56  ;;  %v135_v56 = vld [vmem:[%s3340_s0 + $0x1a0] sm:$0xff] }
  0x4a   :  { %1757 = vmatmul.mubr.bf16.gmra.mxu1 %v2345_v2  ;;  %1475 = vmatprep.mubr.bf16.mxu0 %v2348_v3  ;;  %v2370_v2 = vcombine.high %v368_v57, %v370_v58  ;;  %v371_v3 = vsel %vm243_vm0, %v115_v60, 0  ;;  %vm259_vm0 = vcmp.gt.bf16.partialorder %v131_v44, 0  ;;  %v137_v57 = vld [vmem:[%s3340_s0 + $0x1b0] sm:$0xff]  ;;  %v136_v60 = vld [vmem:[%s3340_s0 + $0x1a8] sm:$0xff] }
  0x4b   :  { %1764 = vmatprep.mubr.bf16.mxu1 %v2350_v6  ;;  %v374_v6 = vsel %vm246_vm3, %v118_v1, 0  ;;  %v2371_v19 = vcombine.low %v371_v3, %v373_v4  ;;  %vm262_vm3 = vcmp.gt.bf16.partialorder %v134_v49, 0  ;;  %vm265_vm5 = vcmp.gt.bf16.partialorder %v137_v57, 0 }
  0x4c   :  { %v2373_v22 = vcombine.low %v372_v5, %v374_v6  ;;  %vm264_vm6 = vcmp.gt.bf16.partialorder %v136_v60, 0  ;;  %v393_v0 = vsel %vm265_vm5, %v137_v57, 0  ;;  %v158_v57 = vld [vmem:[%s3340_s0 + $0x258] sm:$0xff] }
  0x4d   :  { %v392_v1 = vsel %vm264_vm6, %v136_v60, 0 }
  0x51   :  { %1476 = vmatmul.mubr.bf16.gmra.mxu0 %v2347_v11  ;;  %v2372_v11 = vcombine.high %v371_v3, %v373_v4  ;;  %v139_v4 = vld [vmem:[%s3340_s0 + $0x1c0] sm:$0xff] }
  0x52   :  { %1765 = vmatmul.mubr.bf16.gmra.mxu1 %v2349_v14  ;;  %1483 = vmatprep.mubr.bf16.mxu0 %v2352_v15  ;;  %v2374_v14 = vcombine.high %v372_v5, %v374_v6  ;;  %v375_v15 = vsel %vm247_vm4, %v119_v8, 0  ;;  %vm263_vm4 = vcmp.gt.bf16.partialorder %v135_v56, 0  ;;  %v141_v5 = vld [vmem:[%s3340_s0 + $0x1d0] sm:$0xff]  ;;  %v140_v8 = vld [vmem:[%s3340_s0 + $0x1c8] sm:$0xff] }
  0x53   :  { %1772 = vmatprep.mubr.bf16.mxu1 %v2354_v18  ;;  %v378_v18 = vsel %vm250_vm7, %v122_v13, 0  ;;  %v2375_v31 = vcombine.low %v375_v15, %v377_v16  ;;  %vm266_vm7 = vcmp.gt.bf16.partialorder %v138_v61, 0  ;;  %vm269_vm9 = vcmp.gt.bf16.partialorder %v141_v5, 0 }
  0x54   :  { %v2377_v34 = vcombine.low %v376_v17, %v378_v18  ;;  %vm268_vm10 = vcmp.gt.bf16.partialorder %v140_v8, 0  ;;  %v397_v12 = vsel %vm269_vm9, %v141_v5, 0  ;;  %v162_v5 = vld [vmem:[%s3340_s0 + $0x278] sm:$0xff] }
  0x55   :  { %v396_v13 = vsel %vm268_vm10, %v140_v8, 0 }
  0x59   :  { %1484 = vmatmul.mubr.bf16.gmra.mxu0 %v2351_v23  ;;  %v2376_v23 = vcombine.high %v375_v15, %v377_v16  ;;  %v143_v16 = vld [vmem:[%s3340_s0 + $0x1e0] sm:$0xff] }
  0x5a   :  { %1773 = vmatmul.mubr.bf16.gmra.mxu1 %v2353_v26  ;;  %1491 = vmatprep.mubr.bf16.mxu0 %v2356_v27  ;;  %v2378_v26 = vcombine.high %v376_v17, %v378_v18  ;;  %v379_v27 = vsel %vm251_vm8, %v123_v20, 0  ;;  %vm267_vm8 = vcmp.gt.bf16.partialorder %v139_v4, 0  ;;  %v145_v17 = vld [vmem:[%s3340_s0 + $0x1f0] sm:$0xff]  ;;  %v144_v20 = vld [vmem:[%s3340_s0 + $0x1e8] sm:$0xff] }
  0x5b   :  { %1780 = vmatprep.mubr.bf16.mxu1 %v2358_v30  ;;  %v382_v30 = vsel %vm254_vm11, %v126_v25, 0  ;;  %v2379_v43 = vcombine.low %v379_v27, %v381_v28  ;;  %vm270_vm11 = vcmp.gt.bf16.partialorder %v142_v9, 0  ;;  %vm273_vm13 = vcmp.gt.bf16.partialorder %v145_v17, 0 }
  0x5c   :  { %v2381_v46 = vcombine.low %v380_v29, %v382_v30  ;;  %vm272_vm14 = vcmp.gt.bf16.partialorder %v144_v20, 0  ;;  %v401_v24 = vsel %vm273_vm13, %v145_v17, 0  ;;  %v166_v17 = vld [vmem:[%s3340_s0 + $0x298] sm:$0xff] }
  0x5d   :  { %v400_v25 = vsel %vm272_vm14, %v144_v20, 0 }
  0x61   :  { %1492 = vmatmul.mubr.bf16.gmra.mxu0 %v2355_v35  ;;  %v2380_v35 = vcombine.high %v379_v27, %v381_v28  ;;  %v147_v28 = vld [vmem:[%s3340_s0 + $0x200] sm:$0xff] }
  0x62   :  { %1781 = vmatmul.mubr.bf16.gmra.mxu1 %v2357_v38  ;;  %1499 = vmatprep.mubr.bf16.mxu0 %v2360_v39  ;;  %v2382_v38 = vcombine.high %v380_v29, %v382_v30  ;;  %v383_v39 = vsel %vm255_vm12, %v127_v32, 0  ;;  %vm271_vm12 = vcmp.gt.bf16.partialorder %v143_v16, 0  ;;  %v149_v29 = vld [vmem:[%s3340_s0 + $0x210] sm:$0xff]  ;;  %v148_v32 = vld [vmem:[%s3340_s0 + $0x208] sm:$0xff] }
  0x63   :  { %1788 = vmatprep.mubr.bf16.mxu1 %v2362_v42  ;;  %v386_v42 = vsel %vm258_vm15, %v130_v37, 0  ;;  %v2383_v55 = vcombine.low %v383_v39, %v385_v40  ;;  %vm274_vm15 = vcmp.gt.bf16.partialorder %v146_v21, 0  ;;  %vm277_vm1 = vcmp.gt.bf16.partialorder %v149_v29, 0 }
  0x64   :  { %v2385_v58 = vcombine.low %v384_v41, %v386_v42  ;;  %vm276_vm2 = vcmp.gt.bf16.partialorder %v148_v32, 0  ;;  %v405_v36 = vsel %vm277_vm1, %v149_v29, 0  ;;  %v170_v29 = vld [vmem:[%s3340_s0 + $0x2b8] sm:$0xff] }
  0x65   :  { %v404_v37 = vsel %vm276_vm2, %v148_v32, 0 }
  0x69   :  { %1500 = vmatmul.mubr.bf16.gmra.mxu0 %v2359_v47  ;;  %v2384_v47 = vcombine.high %v383_v39, %v385_v40  ;;  %v151_v40 = vld [vmem:[%s3340_s0 + $0x220] sm:$0xff] }
  0x6a   :  { %1789 = vmatmul.mubr.bf16.gmra.mxu1 %v2361_v50  ;;  %1507 = vmatprep.mubr.bf16.mxu0 %v2364_v51  ;;  %v2386_v50 = vcombine.high %v384_v41, %v386_v42  ;;  %v387_v51 = vsel %vm259_vm0, %v131_v44, 0  ;;  %vm275_vm0 = vcmp.gt.bf16.partialorder %v147_v28, 0  ;;  %v153_v41 = vld [vmem:[%s3340_s0 + $0x230] sm:$0xff]  ;;  %v152_v44 = vld [vmem:[%s3340_s0 + $0x228] sm:$0xff] }
  0x6b   :  { %1796 = vmatprep.mubr.bf16.mxu1 %v2366_v54  ;;  %v390_v54 = vsel %vm262_vm3, %v134_v49, 0  ;;  %v2387_v3 = vcombine.low %v387_v51, %v389_v52  ;;  %vm278_vm3 = vcmp.gt.bf16.partialorder %v150_v33, 0  ;;  %vm281_vm5 = vcmp.gt.bf16.partialorder %v153_v41, 0 }
  0x6c   :  { %v2389_v6 = vcombine.low %v388_v53, %v390_v54  ;;  %vm280_vm6 = vcmp.gt.bf16.partialorder %v152_v44, 0  ;;  %v409_v48 = vsel %vm281_vm5, %v153_v41, 0  ;;  %v174_v41 = vld [vmem:[%s3340_s0 + $0x2d8] sm:$0xff] }
  0x6d   :  { %v408_v49 = vsel %vm280_vm6, %v152_v44, 0 }
  0x71   :  { %1508 = vmatmul.mubr.bf16.gmra.mxu0 %v2363_v59  ;;  %v2388_v59 = vcombine.high %v387_v51, %v389_v52  ;;  %v155_v52 = vld [vmem:[%s3340_s0 + $0x240] sm:$0xff] }
  0x72   :  { %1797 = vmatmul.mubr.bf16.gmra.mxu1 %v2365_v62  ;;  %1515 = vmatprep.mubr.bf16.mxu0 %v2368_v63  ;;  %v2390_v62 = vcombine.high %v388_v53, %v390_v54  ;;  %v391_v63 = vsel %vm263_vm4, %v135_v56, 0  ;;  %vm279_vm4 = vcmp.gt.bf16.partialorder %v151_v40, 0  ;;  %v157_v53 = vld [vmem:[%s3340_s0 + $0x250] sm:$0xff]  ;;  %v156_v56 = vld [vmem:[%s3340_s0 + $0x248] sm:$0xff] }
  0x73   :  { %1804 = vmatprep.mubr.bf16.mxu1 %v2370_v2  ;;  %v394_v2 = vsel %vm266_vm7, %v138_v61, 0  ;;  %v2391_v15 = vcombine.low %v391_v63, %v393_v0  ;;  %vm282_vm7 = vcmp.gt.bf16.partialorder %v154_v45, 0  ;;  %vm285_vm9 = vcmp.gt.bf16.partialorder %v157_v53, 0 }
  0x74   :  { %v2393_v18 = vcombine.low %v392_v1, %v394_v2  ;;  %vm284_vm10 = vcmp.gt.bf16.partialorder %v156_v56, 0  ;;  %v413_v60 = vsel %vm285_vm9, %v157_v53, 0  ;;  %v178_v53 = vld [vmem:[%s3340_s0 + $0x2f8] sm:$0xff] }
  0x75   :  { %v412_v61 = vsel %vm284_vm10, %v156_v56, 0 }
  0x79   :  { %1516 = vmatmul.mubr.bf16.gmra.mxu0 %v2367_v7  ;;  %v2392_v7 = vcombine.high %v391_v63, %v393_v0  ;;  %v159_v0 = vld [vmem:[%s3340_s0 + $0x260] sm:$0xff] }
  0x7a   :  { %1805 = vmatmul.mubr.bf16.gmra.mxu1 %v2369_v10  ;;  %1523 = vmatprep.mubr.bf16.mxu0 %v2372_v11  ;;  %v2394_v10 = vcombine.high %v392_v1, %v394_v2  ;;  %v395_v11 = vsel %vm267_vm8, %v139_v4, 0  ;;  %vm283_vm8 = vcmp.gt.bf16.partialorder %v155_v52, 0  ;;  %v161_v1 = vld [vmem:[%s3340_s0 + $0x270] sm:$0xff]  ;;  %v160_v4 = vld [vmem:[%s3340_s0 + $0x268] sm:$0xff] }
  0x7b   :  { %1812 = vmatprep.mubr.bf16.mxu1 %v2374_v14  ;;  %v398_v14 = vsel %vm270_vm11, %v142_v9, 0  ;;  %v2395_v27 = vcombine.low %v395_v11, %v397_v12  ;;  %vm286_vm11 = vcmp.gt.bf16.partialorder %v158_v57, 0  ;;  %vm289_vm13 = vcmp.gt.bf16.partialorder %v161_v1, 0 }
  0x7c   :  { %v2397_v30 = vcombine.low %v396_v13, %v398_v14  ;;  %vm288_vm14 = vcmp.gt.bf16.partialorder %v160_v4, 0  ;;  %v417_v8 = vsel %vm289_vm13, %v161_v1, 0  ;;  %v182_v1 = vld [vmem:[%s3340_s0 + $0x318] sm:$0xff] }
  0x7d   :  { %v416_v9 = vsel %vm288_vm14, %v160_v4, 0 }
  0x81   :  { %1524 = vmatmul.mubr.bf16.gmra.mxu0 %v2371_v19  ;;  %v2396_v19 = vcombine.high %v395_v11, %v397_v12  ;;  %v163_v12 = vld [vmem:[%s3340_s0 + $0x280] sm:$0xff] }
  0x82   :  { %1813 = vmatmul.mubr.bf16.gmra.mxu1 %v2373_v22  ;;  %1531 = vmatprep.mubr.bf16.mxu0 %v2376_v23  ;;  %v2398_v22 = vcombine.high %v396_v13, %v398_v14  ;;  %v399_v23 = vsel %vm271_vm12, %v143_v16, 0  ;;  %vm287_vm12 = vcmp.gt.bf16.partialorder %v159_v0, 0  ;;  %v165_v13 = vld [vmem:[%s3340_s0 + $0x290] sm:$0xff]  ;;  %v164_v16 = vld [vmem:[%s3340_s0 + $0x288] sm:$0xff] }
  0x83   :  { %1820 = vmatprep.mubr.bf16.mxu1 %v2378_v26  ;;  %v402_v26 = vsel %vm274_vm15, %v146_v21, 0  ;;  %v2399_v39 = vcombine.low %v399_v23, %v401_v24  ;;  %vm290_vm15 = vcmp.gt.bf16.partialorder %v162_v5, 0  ;;  %vm293_vm1 = vcmp.gt.bf16.partialorder %v165_v13, 0 }
  0x84   :  { %v2401_v42 = vcombine.low %v400_v25, %v402_v26  ;;  %vm292_vm2 = vcmp.gt.bf16.partialorder %v164_v16, 0  ;;  %v421_v20 = vsel %vm293_vm1, %v165_v13, 0  ;;  %v186_v13 = vld [vmem:[%s3340_s0 + $0x338] sm:$0xff] }
  0x85   :  { %v420_v21 = vsel %vm292_vm2, %v164_v16, 0 }
  0x89   :  { %1532 = vmatmul.mubr.bf16.gmra.mxu0 %v2375_v31  ;;  %v2400_v31 = vcombine.high %v399_v23, %v401_v24  ;;  %v167_v24 = vld [vmem:[%s3340_s0 + $0x2a0] sm:$0xff] }
  0x8a   :  { %1821 = vmatmul.mubr.bf16.gmra.mxu1 %v2377_v34  ;;  %1539 = vmatprep.mubr.bf16.mxu0 %v2380_v35  ;;  %v2402_v34 = vcombine.high %v400_v25, %v402_v26  ;;  %v403_v35 = vsel %vm275_vm0, %v147_v28, 0  ;;  %vm291_vm0 = vcmp.gt.bf16.partialorder %v163_v12, 0  ;;  %v169_v25 = vld [vmem:[%s3340_s0 + $0x2b0] sm:$0xff]  ;;  %v168_v28 = vld [vmem:[%s3340_s0 + $0x2a8] sm:$0xff] }
  0x8b   :  { %1828 = vmatprep.mubr.bf16.mxu1 %v2382_v38  ;;  %v406_v38 = vsel %vm278_vm3, %v150_v33, 0  ;;  %v2403_v51 = vcombine.low %v403_v35, %v405_v36  ;;  %vm294_vm3 = vcmp.gt.bf16.partialorder %v166_v17, 0  ;;  %vm297_vm5 = vcmp.gt.bf16.partialorder %v169_v25, 0 }
  0x8c   :  { %v2405_v54 = vcombine.low %v404_v37, %v406_v38  ;;  %vm296_vm6 = vcmp.gt.bf16.partialorder %v168_v28, 0  ;;  %v425_v32 = vsel %vm297_vm5, %v169_v25, 0  ;;  %v190_v25 = vld [vmem:[%s3340_s0 + $0x358] sm:$0xff] }
  0x8d   :  { %v424_v33 = vsel %vm296_vm6, %v168_v28, 0 }
  0x91   :  { %1540 = vmatmul.mubr.bf16.gmra.mxu0 %v2379_v43  ;;  %v2404_v43 = vcombine.high %v403_v35, %v405_v36  ;;  %v171_v36 = vld [vmem:[%s3340_s0 + $0x2c0] sm:$0xff] }
  0x92   :  { %1829 = vmatmul.mubr.bf16.gmra.mxu1 %v2381_v46  ;;  %1547 = vmatprep.mubr.bf16.mxu0 %v2384_v47  ;;  %v2406_v46 = vcombine.high %v404_v37, %v406_v38  ;;  %v407_v47 = vsel %vm279_vm4, %v151_v40, 0  ;;  %vm295_vm4 = vcmp.gt.bf16.partialorder %v167_v24, 0  ;;  %v173_v37 = vld [vmem:[%s3340_s0 + $0x2d0] sm:$0xff]  ;;  %v172_v40 = vld [vmem:[%s3340_s0 + $0x2c8] sm:$0xff] }
  0x93   :  { %1836 = vmatprep.mubr.bf16.mxu1 %v2386_v50  ;;  %v410_v50 = vsel %vm282_vm7, %v154_v45, 0  ;;  %v2407_v63 = vcombine.low %v407_v47, %v409_v48  ;;  %vm298_vm7 = vcmp.gt.bf16.partialorder %v170_v29, 0  ;;  %vm301_vm9 = vcmp.gt.bf16.partialorder %v173_v37, 0 }
  0x94   :  { %v2409_v2 = vcombine.low %v408_v49, %v410_v50  ;;  %vm300_vm10 = vcmp.gt.bf16.partialorder %v172_v40, 0  ;;  %v429_v44 = vsel %vm301_vm9, %v173_v37, 0 }
  0x95   :  { %v428_v45 = vsel %vm300_vm10, %v172_v40, 0  ;;  %v191_v40 = vld [vmem:[%s3340_s0 + $0x360] sm:$0xff] }
  0x99   :  { %1548 = vmatmul.mubr.bf16.gmra.mxu0 %v2383_v55  ;;  %v2408_v55 = vcombine.high %v407_v47, %v409_v48  ;;  %v175_v48 = vld [vmem:[%s3340_s0 + $0x2e0] sm:$0xff] }
  0x9a   :  { %1837 = vmatmul.mubr.bf16.gmra.mxu1 %v2385_v58  ;;  %1555 = vmatprep.mubr.bf16.mxu0 %v2388_v59  ;;  %v2410_v58 = vcombine.high %v408_v49, %v410_v50  ;;  %v411_v59 = vsel %vm283_vm8, %v155_v52, 0  ;;  %vm299_vm8 = vcmp.gt.bf16.partialorder %v171_v36, 0  ;;  %v177_v49 = vld [vmem:[%s3340_s0 + $0x2f0] sm:$0xff]  ;;  %v176_v52 = vld [vmem:[%s3340_s0 + $0x2e8] sm:$0xff] }
  0x9b   :  { %1844 = vmatprep.mubr.bf16.mxu1 %v2390_v62  ;;  %v414_v62 = vsel %vm286_vm11, %v158_v57, 0  ;;  %v2411_v11 = vcombine.low %v411_v59, %v413_v60  ;;  %vm302_vm11 = vcmp.gt.bf16.partialorder %v174_v41, 0  ;;  %vm305_vm13 = vcmp.gt.bf16.partialorder %v177_v49, 0 }
  0x9c   :  { %v2413_v14 = vcombine.low %v412_v61, %v414_v62  ;;  %vm304_vm14 = vcmp.gt.bf16.partialorder %v176_v52, 0  ;;  %v433_v56 = vsel %vm305_vm13, %v177_v49, 0 }
  0x9d   :  { %v432_v57 = vsel %vm304_vm14, %v176_v52, 0 }
  0xa1   :  { %1556 = vmatmul.mubr.bf16.gmra.mxu0 %v2387_v3  ;;  %v2412_v3 = vcombine.high %v411_v59, %v413_v60  ;;  %v179_v60 = vld [vmem:[%s3340_s0 + $0x300] sm:$0xff] }
  0xa2   :  { %1845 = vmatmul.mubr.bf16.gmra.mxu1 %v2389_v6  ;;  %1563 = vmatprep.mubr.bf16.mxu0 %v2392_v7  ;;  %v2414_v6 = vcombine.high %v412_v61, %v414_v62  ;;  %v415_v7 = vsel %vm287_vm12, %v159_v0, 0  ;;  %vm303_vm12 = vcmp.gt.bf16.partialorder %v175_v48, 0  ;;  %v181_v61 = vld [vmem:[%s3340_s0 + $0x310] sm:$0xff]  ;;  %v180_v0 = vld [vmem:[%s3340_s0 + $0x308] sm:$0xff] }
  0xa3   :  { %1852 = vmatprep.mubr.bf16.mxu1 %v2394_v10  ;;  %v418_v10 = vsel %vm290_vm15, %v162_v5, 0  ;;  %v2415_v23 = vcombine.low %v415_v7, %v417_v8  ;;  %vm306_vm15 = vcmp.gt.bf16.partialorder %v178_v53, 0  ;;  %vm309_vm1 = vcmp.gt.bf16.partialorder %v181_v61, 0 }
  0xa4   :  { %v2417_v26 = vcombine.low %v416_v9, %v418_v10  ;;  %vm308_vm2 = vcmp.gt.bf16.partialorder %v180_v0, 0  ;;  %v437_v4 = vsel %vm309_vm1, %v181_v61, 0 }
  0xa5   :  { %v436_v5 = vsel %vm308_vm2, %v180_v0, 0  ;;  %v195_v0 = vld [vmem:[%s3340_s0 + $0x380] sm:$0xff] }
  0xa9   :  { %1564 = vmatmul.mubr.bf16.gmra.mxu0 %v2391_v15  ;;  %v2416_v15 = vcombine.high %v415_v7, %v417_v8  ;;  %v183_v8 = vld [vmem:[%s3340_s0 + $0x320] sm:$0xff] }
  0xaa   :  { %1853 = vmatmul.mubr.bf16.gmra.mxu1 %v2393_v18  ;;  %1571 = vmatprep.mubr.bf16.mxu0 %v2396_v19  ;;  %v2418_v18 = vcombine.high %v416_v9, %v418_v10  ;;  %v419_v19 = vsel %vm291_vm0, %v163_v12, 0  ;;  %vm307_vm0 = vcmp.gt.bf16.partialorder %v179_v60, 0  ;;  %v185_v9 = vld [vmem:[%s3340_s0 + $0x330] sm:$0xff]  ;;  %v184_v12 = vld [vmem:[%s3340_s0 + $0x328] sm:$0xff] }
  0xab   :  { %1860 = vmatprep.mubr.bf16.mxu1 %v2398_v22  ;;  %v422_v22 = vsel %vm294_vm3, %v166_v17, 0  ;;  %v2419_v35 = vcombine.low %v419_v19, %v421_v20  ;;  %vm310_vm3 = vcmp.gt.bf16.partialorder %v182_v1, 0  ;;  %vm313_vm5 = vcmp.gt.bf16.partialorder %v185_v9, 0 }
  0xac   :  { %v2421_v38 = vcombine.low %v420_v21, %v422_v22  ;;  %vm312_vm6 = vcmp.gt.bf16.partialorder %v184_v12, 0  ;;  %v441_v16 = vsel %vm313_vm5, %v185_v9, 0 }
  0xad   :  { %v440_v17 = vsel %vm312_vm6, %v184_v12, 0 }
  0xb1   :  { %1572 = vmatmul.mubr.bf16.gmra.mxu0 %v2395_v27  ;;  %v2420_v27 = vcombine.high %v419_v19, %v421_v20  ;;  %v187_v20 = vld [vmem:[%s3340_s0 + $0x340] sm:$0xff] }
  0xb2   :  { %1861 = vmatmul.mubr.bf16.gmra.mxu1 %v2397_v30  ;;  %1579 = vmatprep.mubr.bf16.mxu0 %v2400_v31  ;;  %v2422_v30 = vcombine.high %v420_v21, %v422_v22  ;;  %v423_v31 = vsel %vm295_vm4, %v167_v24, 0  ;;  %vm311_vm4 = vcmp.gt.bf16.partialorder %v183_v8, 0  ;;  %v189_v21 = vld [vmem:[%s3340_s0 + $0x350] sm:$0xff]  ;;  %v188_v24 = vld [vmem:[%s3340_s0 + $0x348] sm:$0xff] }
  0xb3   :  { %1868 = vmatprep.mubr.bf16.mxu1 %v2402_v34  ;;  %v426_v34 = vsel %vm298_vm7, %v170_v29, 0  ;;  %v2423_v47 = vcombine.low %v423_v31, %v425_v32  ;;  %vm314_vm7 = vcmp.gt.bf16.partialorder %v186_v13, 0  ;;  %vm317_vm9 = vcmp.gt.bf16.partialorder %v189_v21, 0  ;;  %v3026_v29 = vld [vmem:[%s3341_s2] ss:$0 sm:$0xff] }
  0xb4   :  { %v2425_v50 = vcombine.low %v424_v33, %v426_v34  ;;  %vm316_vm10 = vcmp.gt.bf16.partialorder %v188_v24, 0 }
  0xb9   :  { %1580 = vmatmul.mubr.bf16.gmra.mxu0 %v2399_v39  ;;  %v2424_v39 = vcombine.high %v423_v31, %v425_v32 }
  0xba   :  { %1869 = vmatmul.mubr.bf16.gmra.mxu1 %v2401_v42  ;;  %1587 = vmatprep.mubr.bf16.mxu0 %v2404_v43  ;;  %v2426_v42 = vcombine.high %v424_v33, %v426_v34  ;;  %v427_v43 = vsel %vm299_vm8, %v171_v36, 0  ;;  %vm315_vm8 = vcmp.gt.bf16.partialorder %v187_v20, 0  ;;  %v445_v33 = vsel %vm317_vm9, %v189_v21, 0 }
  0xbb   :  { %1876 = vmatprep.mubr.bf16.mxu1 %v2406_v46  ;;  %v430_v46 = vsel %vm302_vm11, %v174_v41, 0  ;;  %v2427_v59 = vcombine.low %v427_v43, %v429_v44  ;;  %vm318_vm11 = vcmp.gt.bf16.partialorder %v190_v25, 0  ;;  %v443_v32 = vsel %vm315_vm8, %v187_v20, 0  ;;  %v193_v41 = vld [vmem:[%s3340_s0 + $0x370] sm:$0xff] }
  0xbc   :  { %v2429_v62 = vcombine.low %v428_v45, %v430_v46  ;;  %v446_v36 = vsel %vm318_vm11, %v190_v25, 0  ;;  %vm321_vm13 = vcmp.gt.bf16.partialorder %v193_v41, 0  ;;  %v201_v25 = vld [vmem:[%s3340_s0 + $0x3b0] sm:$0xff] }
  0xbd   :  { %vm329_vm5 = vcmp.gt.bf16.partialorder %v201_v25, 0 }
  0xc1   :  { %1588 = vmatmul.mubr.bf16.gmra.mxu0 %v2403_v51  ;;  %v2428_v51 = vcombine.high %v427_v43, %v429_v44  ;;  %v2444_v44 = vcombine.high %v443_v32, %v445_v33 }
  0xc2   :  { %1877 = vmatmul.mubr.bf16.gmra.mxu1 %v2405_v54  ;;  %1595 = vmatprep.mubr.bf16.mxu0 %v2408_v55  ;;  %v2430_v54 = vcombine.high %v428_v45, %v430_v46  ;;  %v431_v55 = vsel %vm303_vm12, %v175_v48, 0  ;;  %v192_v45 = vld [vmem:[%s3340_s0 + $0x368] sm:$0xff]  ;;  %v194_v46 = vld [vmem:[%s3340_s0 + $0x378] sm:$0xff]  ;;  %vm319_vm12 = vcmp.gt.bf16.partialorder %v191_v40, 0 }
  0xc3   :  { %1884 = vmatprep.mubr.bf16.mxu1 %v2410_v58  ;;  %v434_v58 = vsel %vm306_vm15, %v178_v53, 0  ;;  %v2431_v7 = vcombine.low %v431_v55, %v433_v56  ;;  %vm320_vm14 = vcmp.gt.bf16.partialorder %v192_v45, 0  ;;  %vm322_vm15 = vcmp.gt.bf16.partialorder %v194_v46, 0 }
  0xc4   :  { %v2433_v10 = vcombine.low %v432_v57, %v434_v58 }
  0xc9   :  { %1596 = vmatmul.mubr.bf16.gmra.mxu0 %v2407_v63  ;;  %v2432_v63 = vcombine.high %v431_v55, %v433_v56  ;;  %v447_v56 = vsel %vm319_vm12, %v191_v40, 0 }
  0xca   :  { %1885 = vmatmul.mubr.bf16.gmra.mxu1 %v2409_v2  ;;  %1603 = vmatprep.mubr.bf16.mxu0 %v2412_v3  ;;  %v2434_v2 = vcombine.high %v432_v57, %v434_v58  ;;  %v435_v3 = vsel %vm307_vm0, %v179_v60, 0  ;;  %v449_v57 = vsel %vm321_vm13, %v193_v41, 0  ;;  %v450_v60 = vsel %vm322_vm15, %v194_v46, 0 }
  0xcb   :  { %1892 = vmatprep.mubr.bf16.mxu1 %v2414_v6  ;;  %v438_v6 = vsel %vm310_vm3, %v182_v1, 0  ;;  %v2435_v19 = vcombine.low %v435_v3, %v437_v4  ;;  %v197_v1 = vld [vmem:[%s3340_s0 + $0x390] sm:$0xff]  ;;  %vm323_vm0 = vcmp.gt.bf16.partialorder %v195_v0, 0 }
  0xcc   :  { %v2437_v22 = vcombine.low %v436_v5, %v438_v6  ;;  %vm325_vm1 = vcmp.gt.bf16.partialorder %v197_v1, 0 }
  0xd1   :  { %1604 = vmatmul.mubr.bf16.gmra.mxu0 %v2411_v11  ;;  %v2436_v11 = vcombine.high %v435_v3, %v437_v4  ;;  %v2448_v4 = vcombine.high %v447_v56, %v449_v57 }
  0xd2   :  { %1893 = vmatmul.mubr.bf16.gmra.mxu1 %v2413_v14  ;;  %1611 = vmatprep.mubr.bf16.mxu0 %v2416_v15  ;;  %v2438_v14 = vcombine.high %v436_v5, %v438_v6  ;;  %v439_v15 = vsel %vm311_vm4, %v183_v8, 0  ;;  %v196_v5 = vld [vmem:[%s3340_s0 + $0x388] sm:$0xff]  ;;  %v198_v6 = vld [vmem:[%s3340_s0 + $0x398] sm:$0xff] }
  0xd3   :  { %1900 = vmatprep.mubr.bf16.mxu1 %v2418_v18  ;;  %v442_v18 = vsel %vm314_vm7, %v186_v13, 0  ;;  %vm324_vm2 = vcmp.gt.bf16.partialorder %v196_v5, 0  ;;  %vm326_vm3 = vcmp.gt.bf16.partialorder %v198_v6, 0 }
  0xd4   :  { %v2441_v43 = vcombine.low %v440_v17, %v442_v18  ;;  %v454_v20 = vsel %vm326_vm3, %v198_v6, 0 }
  0xd9   :  { %1612 = vmatmul.mubr.bf16.gmra.mxu0 %v2415_v23  ;;  %v2440_v23 = vcombine.high %v439_v15, %v441_v16 }
  0xda   :  { %1901 = vmatmul.mubr.bf16.gmra.mxu1 %v2417_v26  ;;  %1619 = vmatprep.mubr.bf16.mxu0 %v2420_v27  ;;  %v2442_v26 = vcombine.high %v440_v17, %v442_v18  ;;  %v453_v17 = vsel %vm325_vm1, %v197_v1, 0 }
  0xdb   :  { %1908 = vmatprep.mubr.bf16.mxu1 %v2422_v30 }
  0xe1   :  { %1620 = vmatmul.mubr.bf16.gmra.mxu0 %v2419_v35  ;;  %v444_v35 = vsel %vm316_vm10, %v188_v24, 0  ;;  %v199_v24 = vld [vmem:[%s3340_s0 + $0x3a0] sm:$0xff] }
  0xe2   :  { %1909 = vmatmul.mubr.bf16.gmra.mxu1 %v2421_v38  ;;  %1627 = vmatprep.mubr.bf16.mxu0 %v2424_v39  ;;  %v2439_v39 = vcombine.low %v439_v15, %v441_v16  ;;  %v2446_v49 = vcombine.high %v444_v35, %v446_v36  ;;  %v2445_v3 = vcombine.low %v444_v35, %v446_v36  ;;  %v451_v16 = vsel %vm323_vm0, %v195_v0, 0 }
  0xe3   :  { %1916 = vmatprep.mubr.bf16.mxu1 %v2426_v42  ;;  %vm327_vm4 = vcmp.gt.bf16.partialorder %v199_v24, 0 }
  0xe4   :  { %v455_v41 = vsel %vm327_vm4, %v199_v24, 0 }
  0xe9   :  { %1628 = vmatmul.mubr.bf16.gmra.mxu0 %v2423_v47 }
  0xea   :  { %1917 = vmatmul.mubr.bf16.gmra.mxu1 %v2425_v50  ;;  %1635 = vmatprep.mubr.bf16.mxu0 %v2428_v51 }
  0xeb   :  { %1924 = vmatprep.mubr.bf16.mxu1 %v2430_v54 }
  0xf1   :  { %1636 = vmatmul.mubr.bf16.gmra.mxu0 %v2427_v59  ;;  %v448_v59 = vsel %vm320_vm14, %v192_v45, 0 }
  0xf2   :  { %1925 = vmatmul.mubr.bf16.gmra.mxu1 %v2429_v62  ;;  %1643 = vmatprep.mubr.bf16.mxu0 %v2432_v63  ;;  %v2443_v63 = vcombine.low %v443_v32, %v445_v33  ;;  %v2450_v9 = vcombine.high %v448_v59, %v450_v60 }
  0xf3   :  { %1932 = vmatprep.mubr.bf16.mxu1 %v2434_v2 }
  0xf9   :  { %1644 = vmatmul.mubr.bf16.gmra.mxu0 %v2431_v7 }
  0xfa   :  { %1933 = vmatmul.mubr.bf16.gmra.mxu1 %v2433_v10  ;;  %1651 = vmatprep.mubr.bf16.mxu0 %v2436_v11 }
  0xfb   :  { %1940 = vmatprep.mubr.bf16.mxu1 %v2438_v14 }
 0x101   :  { %v1461_v27 = vpop.f32.mrf.mxu0  ;;  %1652 = vmatmul.mubr.bf16.gmra.mxu0 %v2435_v19  ;;  %v452_v19 = vsel %vm324_vm2, %v196_v5, 0 }
 0x102   :  { %v1750_v28 = vpop.f32.mrf.mxu1  ;;  %1941 = vmatmul.mubr.bf16.gmra.mxu1 %v2437_v22  ;;  %1659 = vmatprep.mubr.bf16.mxu0 %v2440_v23  ;;  %v2447_v23 = vcombine.low %v447_v56, %v449_v57 }
 0x103   :  { %v1751_v30 = vadd.f32 %v1750_v28, %v1461_v27  ;;  %v1463_v31 = vpop.f32.mrf.mxu0  ;;  %1948 = vmatprep.mubr.bf16.mxu1 %v2442_v26  ;;  %v2449_v27 = vcombine.low %v448_v59, %v450_v60  ;;  %v2452_v28 = vcombine.high %v451_v16, %v453_v17 }
 0x104   :  { %v1752_v34 = vpop.f32.mrf.mxu1  ;;  %v202_v31 = vld [vmem:[%s3340_s0 + $0x3b8] sm:$0xff] }
 0x105   :  { %v2207_v37 = vadd.f32 %v3026_v29, %v1751_v30  ;;  %v1464_v38 = vpop.f32.mrf.mxu0  ;;  %v200_v30 = vld [vmem:[%s3340_s0 + $0x3a8] sm:$0xff]  ;;  %v2454_v34 = vcombine.high %v452_v19, %v454_v20  ;;  %vm330_vm7 = vcmp.gt.bf16.partialorder %v202_v31, 0 }
 0x106   :  { %v1753_v42 = vpop.f32.mrf.mxu1  ;;  %vm328_vm6 = vcmp.gt.bf16.partialorder %v200_v30, 0  ;;  %v458_v45 = vsel %vm330_vm7, %v202_v31, 0 }
 0x107   :  { %2271 = vst [vmem:[%s3342_s3] sm:$0xff] %v2207_v37  ;;  %v1754_v47 = vadd.f32 %v1753_v42, %v1464_v38  ;;  %v1466_v48 = vpop.f32.mrf.mxu0  ;;  %v457_v42 = vsel %vm329_vm5, %v201_v25, 0 }
 0x108   :  { %v1755_v50 = vpop.f32.mrf.mxu1  ;;  %v2451_v48 = vcombine.low %v451_v16, %v453_v17 }
 0x109   :  { %v2208_v51 = vadd.f32 %v3026_v29, %v1754_v47  ;;  %v1469_v52 = vpop.f32.mrf.mxu0  ;;  %1660 = vmatmul.mubr.bf16.gmra.mxu0 %v2439_v39  ;;  %v205_v50 = vld [vmem:[%s3340_s0 + $0x3d0] sm:$0xff] }
 0x10a   :  { %v1758_v53 = vpop.f32.mrf.mxu1  ;;  %1949 = vmatmul.mubr.bf16.gmra.mxu1 %v2441_v43  ;;  %1667 = vmatprep.mubr.bf16.mxu0 %v2444_v44  ;;  %v456_v44 = vsel %vm328_vm6, %v200_v30, 0  ;;  %vm333_vm9 = vcmp.gt.bf16.partialorder %v205_v50, 0 }
 0x10b   :  { %2272 = vst [vmem:[%s3342_s3 + $0x8] sm:$0xff] %v2208_v51  ;;  %v1759_v54 = vadd.f32 %v1758_v53, %v1469_v52  ;;  %v1471_v55 = vpop.f32.mrf.mxu0  ;;  %1956 = vmatprep.mubr.bf16.mxu1 %v2446_v49  ;;  %v203_v49 = vld [vmem:[%s3340_s0 + $0x3c0] sm:$0xff]  ;;  %v2453_v52 = vcombine.low %v452_v19, %v454_v20  ;;  %v2456_v53 = vcombine.high %v455_v41, %v457_v42 }
 0x10c   :  { %v1760_v58 = vpop.f32.mrf.mxu1  ;;  %v206_v55 = vld [vmem:[%s3340_s0 + $0x3d8] sm:$0xff]  ;;  %vm331_vm8 = vcmp.gt.bf16.partialorder %v203_v49, 0 }
 0x10d   :  { %v2209_v61 = vadd.f32 %v3026_v29, %v1759_v54  ;;  %v1472_v62 = vpop.f32.mrf.mxu0  ;;  %v204_v54 = vld [vmem:[%s3340_s0 + $0x3c8] sm:$0xff]  ;;  %v2458_v58 = vcombine.high %v456_v44, %v458_v45  ;;  %vm334_vm11 = vcmp.gt.bf16.partialorder %v206_v55, 0  ;;  %v459_v1 = vsel %vm331_vm8, %v203_v49, 0 }
 0x10e   :  { %v1761_v2 = vpop.f32.mrf.mxu1  ;;  %vm332_vm10 = vcmp.gt.bf16.partialorder %v204_v54, 0  ;;  %v462_v5 = vsel %vm334_vm11, %v206_v55, 0 }
 0x10f   :  { %2273 = vst [vmem:[%s3342_s3 + $0x10] sm:$0xff] %v2209_v61  ;;  %v1762_v7 = vadd.f32 %v1761_v2, %v1472_v62  ;;  %v1474_v8 = vpop.f32.mrf.mxu0  ;;  %v461_v2 = vsel %vm333_vm9, %v205_v50, 0 }
 0x110   :  { %v1763_v10 = vpop.f32.mrf.mxu1  ;;  %v2455_v8 = vcombine.low %v455_v41, %v457_v42 }
 0x111   :  { %v2210_v11 = vadd.f32 %v3026_v29, %v1762_v7  ;;  %v1477_v12 = vpop.f32.mrf.mxu0  ;;  %1668 = vmatmul.mubr.bf16.gmra.mxu0 %v2443_v63  ;;  %v209_v10 = vld [vmem:[%s3340_s0 + $0x3f0] sm:$0xff] }
 0x112   :  { %v1766_v13 = vpop.f32.mrf.mxu1  ;;  %1957 = vmatmul.mubr.bf16.gmra.mxu1 %v2445_v3  ;;  %1675 = vmatprep.mubr.bf16.mxu0 %v2448_v4  ;;  %v460_v4 = vsel %vm332_vm10, %v204_v54, 0  ;;  %vm337_vm13 = vcmp.gt.bf16.partialorder %v209_v10, 0 }
 0x113   :  { %2274 = vst [vmem:[%s3342_s3 + $0x18] sm:$0xff] %v2210_v11  ;;  %v1767_v14 = vadd.f32 %v1766_v13, %v1477_v12  ;;  %v1479_v15 = vpop.f32.mrf.mxu0  ;;  %1964 = vmatprep.mubr.bf16.mxu1 %v2450_v9  ;;  %v207_v9 = vld [vmem:[%s3340_s0 + $0x3e0] sm:$0xff]  ;;  %v2457_v12 = vcombine.low %v456_v44, %v458_v45  ;;  %v2460_v13 = vcombine.high %v459_v1, %v461_v2 }
 0x114   :  { %v1768_v18 = vpop.f32.mrf.mxu1  ;;  %v210_v15 = vld [vmem:[%s3340_s0 + $0x3f8] sm:$0xff]  ;;  %vm335_vm12 = vcmp.gt.bf16.partialorder %v207_v9, 0 }
 0x115   :  { %v2211_v21 = vadd.f32 %v3026_v29, %v1767_v14  ;;  %v1480_v22 = vpop.f32.mrf.mxu0  ;;  %v208_v14 = vld [vmem:[%s3340_s0 + $0x3e8] sm:$0xff]  ;;  %v2462_v18 = vcombine.high %v460_v4, %v462_v5  ;;  %vm338_vm15 = vcmp.gt.bf16.partialorder %v210_v15, 0  ;;  %v463_v25 = vsel %vm335_vm12, %v207_v9, 0 }
 0x116   :  { %v1769_v26 = vpop.f32.mrf.mxu1  ;;  %vm336_vm14 = vcmp.gt.bf16.partialorder %v208_v14, 0  ;;  %v466_v30 = vsel %vm338_vm15, %v210_v15, 0 }
 0x117   :  { %2275 = vst [vmem:[%s3342_s3 + $0x20] sm:$0xff] %v2211_v21  ;;  %v1770_v32 = vadd.f32 %v1769_v26, %v1480_v22  ;;  %v1482_v33 = vpop.f32.mrf.mxu0  ;;  %v465_v26 = vsel %vm337_vm13, %v209_v10, 0 }
 0x118   :  { %v1771_v35 = vpop.f32.mrf.mxu1  ;;  %v2459_v33 = vcombine.low %v459_v1, %v461_v2  ;;  %v2463_v49 = vcombine.low %v463_v25, %v465_v26 }
 0x119   :  { %v2212_v36 = vadd.f32 %v3026_v29, %v1770_v32  ;;  %v1485_v37 = vpop.f32.mrf.mxu0  ;;  %1676 = vmatmul.mubr.bf16.gmra.mxu0 %v2447_v23  ;;  %v2461_v35 = vcombine.low %v460_v4, %v462_v5 }
 0x11a   :  { %v1774_v38 = vpop.f32.mrf.mxu1  ;;  %1965 = vmatmul.mubr.bf16.gmra.mxu1 %v2449_v27  ;;  %1683 = vmatprep.mubr.bf16.mxu0 %v2452_v28  ;;  %v464_v28 = vsel %vm336_vm14, %v208_v14, 0 }
 0x11b   :  { %2276 = vst [vmem:[%s3342_s3 + $0x28] sm:$0xff] %v2212_v36  ;;  %v1775_v39 = vadd.f32 %v1774_v38, %v1485_v37  ;;  %v1487_v40 = vpop.f32.mrf.mxu0  ;;  %1972 = vmatprep.mubr.bf16.mxu1 %v2454_v34  ;;  %v2464_v36 = vcombine.high %v463_v25, %v465_v26 }
 0x11c   :  { %v1776_v43 = vpop.f32.mrf.mxu1 }
 0x11d   :  { %v2213_v46 = vadd.f32 %v3026_v29, %v1775_v39  ;;  %v1488_v47 = vpop.f32.mrf.mxu0  ;;  %v2466_v39 = vcombine.high %v464_v28, %v466_v30 }
 0x11e   :  { %v1777_v51 = vpop.f32.mrf.mxu1 }
 0x11f   :  { %2277 = vst [vmem:[%s3342_s3 + $0x30] sm:$0xff] %v2213_v46  ;;  %v1778_v56 = vadd.f32 %v1777_v51, %v1488_v47  ;;  %v1490_v57 = vpop.f32.mrf.mxu0  ;;  %v2465_v51 = vcombine.low %v464_v28, %v466_v30 }
 0x120   :  { %v1779_v59 = vpop.f32.mrf.mxu1 }
 0x121   :  { %v2214_v60 = vadd.f32 %v3026_v29, %v1778_v56  ;;  %v1493_v61 = vpop.f32.mrf.mxu0  ;;  %1684 = vmatmul.mubr.bf16.gmra.mxu0 %v2451_v48 }
 0x122   :  { %v1782_v62 = vpop.f32.mrf.mxu1  ;;  %1973 = vmatmul.mubr.bf16.gmra.mxu1 %v2453_v52  ;;  %1691 = vmatprep.mubr.bf16.mxu0 %v2456_v53 }
 0x123   :  { %2278 = vst [vmem:[%s3342_s3 + $0x38] sm:$0xff] %v2214_v60  ;;  %v1783_v63 = vadd.f32 %v1782_v62, %v1493_v61  ;;  %v1495_v0 = vpop.f32.mrf.mxu0  ;;  %1980 = vmatprep.mubr.bf16.mxu1 %v2458_v58 }
 0x124   :  { %v1784_v3 = vpop.f32.mrf.mxu1 }
 0x125   :  { %v2215_v6 = vadd.f32 %v3026_v29, %v1783_v63  ;;  %v1496_v7 = vpop.f32.mrf.mxu0 }
 0x126   :  { %v1785_v11 = vpop.f32.mrf.mxu1 }
 0x127   :  { %2279 = vst [vmem:[%s3342_s3 + $0x40] sm:$0xff] %v2215_v6  ;;  %v1786_v16 = vadd.f32 %v1785_v11, %v1496_v7  ;;  %v1498_v17 = vpop.f32.mrf.mxu0 }
 0x128   :  { %v1787_v19 = vpop.f32.mrf.mxu1 }
 0x129   :  { %v2216_v20 = vadd.f32 %v3026_v29, %v1786_v16  ;;  %v1501_v21 = vpop.f32.mrf.mxu0  ;;  %1692 = vmatmul.mubr.bf16.gmra.mxu0 %v2455_v8 }
 0x12a   :  { %v1790_v22 = vpop.f32.mrf.mxu1  ;;  %1981 = vmatmul.mubr.bf16.gmra.mxu1 %v2457_v12  ;;  %1699 = vmatprep.mubr.bf16.mxu0 %v2460_v13 }
 0x12b   :  { %2280 = vst [vmem:[%s3342_s3 + $0x48] sm:$0xff] %v2216_v20  ;;  %v1791_v23 = vadd.f32 %v1790_v22, %v1501_v21  ;;  %v1503_v24 = vpop.f32.mrf.mxu0  ;;  %1988 = vmatprep.mubr.bf16.mxu1 %v2462_v18 }
 0x12c   :  { %v1792_v27 = vpop.f32.mrf.mxu1 }
 0x12d   :  { %v2217_v31 = vadd.f32 %v3026_v29, %v1791_v23  ;;  %v1504_v32 = vpop.f32.mrf.mxu0 }
 0x12e   :  { %v1793_v34 = vpop.f32.mrf.mxu1 }
 0x12f   :  { %2281 = vst [vmem:[%s3342_s3 + $0x50] sm:$0xff] %v2217_v31  ;;  %v1794_v37 = vadd.f32 %v1793_v34, %v1504_v32  ;;  %v1506_v38 = vpop.f32.mrf.mxu0 }
 0x130   :  { %v1795_v40 = vpop.f32.mrf.mxu1 }
 0x131   :  { %v2218_v41 = vadd.f32 %v3026_v29, %v1794_v37  ;;  %v1509_v42 = vpop.f32.mrf.mxu0  ;;  %1700 = vmatmul.mubr.bf16.gmra.mxu0 %v2459_v33 }
 0x132   :  { %v1798_v43 = vpop.f32.mrf.mxu1  ;;  %1989 = vmatmul.mubr.bf16.gmra.mxu1 %v2461_v35  ;;  %1707 = vmatprep.mubr.bf16.mxu0 %v2464_v36 }
 0x133   :  { %2282 = vst [vmem:[%s3342_s3 + $0x58] sm:$0xff] %v2218_v41  ;;  %v1799_v44 = vadd.f32 %v1798_v43, %v1509_v42  ;;  %v1511_v45 = vpop.f32.mrf.mxu0  ;;  %1996 = vmatprep.mubr.bf16.mxu1 %v2466_v39 }
 0x134   :  { %v1800_v46 = vpop.f32.mrf.mxu1 }
 0x135   :  { %v2219_v47 = vadd.f32 %v3026_v29, %v1799_v44  ;;  %v1512_v48 = vpop.f32.mrf.mxu0 }
 0x136   :  { %v1801_v50 = vpop.f32.mrf.mxu1 }
 0x137   :  { %2283 = vst [vmem:[%s3342_s3 + $0x60] sm:$0xff] %v2219_v47  ;;  %v1802_v52 = vadd.f32 %v1801_v50, %v1512_v48  ;;  %v1514_v53 = vpop.f32.mrf.mxu0 }
 0x138   :  { %v1803_v54 = vpop.f32.mrf.mxu1 }
 0x139   :  { %v2220_v55 = vadd.f32 %v3026_v29, %v1802_v52  ;;  %v1517_v56 = vpop.f32.mrf.mxu0  ;;  %1708 = vmatmul.mubr.bf16.gmra.mxu0 %v2463_v49 }
 0x13a   :  { %v1806_v57 = vpop.f32.mrf.mxu1  ;;  %1997 = vmatmul.mubr.bf16.gmra.mxu1 %v2465_v51 }
 0x13b   :  { %2284 = vst [vmem:[%s3342_s3 + $0x68] sm:$0xff] %v2220_v55  ;;  %v1807_v58 = vadd.f32 %v1806_v57, %v1517_v56  ;;  %v1519_v59 = vpop.f32.mrf.mxu0 }
 0x13c   :  { %v1808_v60 = vpop.f32.mrf.mxu1 }
 0x13d   :  { %v2221_v61 = vadd.f32 %v3026_v29, %v1807_v58  ;;  %v1520_v62 = vpop.f32.mrf.mxu0 }
 0x13e   :  { %v1809_v63 = vpop.f32.mrf.mxu1 }
 0x13f   :  { %2285 = vst [vmem:[%s3342_s3 + $0x70] sm:$0xff] %v2221_v61  ;;  %v1810_v0 = vadd.f32 %v1809_v63, %v1520_v62  ;;  %v1522_v1 = vpop.f32.mrf.mxu0 }
 0x140   :  { %v1811_v2 = vpop.f32.mrf.mxu1 }
 0x141   :  { %v2222_v3 = vadd.f32 %v3026_v29, %v1810_v0  ;;  %v1525_v4 = vpop.f32.mrf.mxu0 }
 0x142   :  { %v1814_v5 = vpop.f32.mrf.mxu1 }
 0x143   :  { %2286 = vst [vmem:[%s3342_s3 + $0x78] sm:$0xff] %v2222_v3  ;;  %v1815_v6 = vadd.f32 %v1814_v5, %v1525_v4  ;;  %v1527_v7 = vpop.f32.mrf.mxu0 }
 0x144   :  { %v1816_v8 = vpop.f32.mrf.mxu1 }
 0x145   :  { %v2223_v9 = vadd.f32 %v3026_v29, %v1815_v6  ;;  %v1528_v10 = vpop.f32.mrf.mxu0 }
 0x146   :  { %v1817_v11 = vpop.f32.mrf.mxu1 }
 0x147   :  { %2287 = vst [vmem:[%s3342_s3 + $0x80] sm:$0xff] %v2223_v9  ;;  %v1818_v12 = vadd.f32 %v1817_v11, %v1528_v10  ;;  %v1530_v13 = vpop.f32.mrf.mxu0 }
 0x148   :  { %v1819_v14 = vpop.f32.mrf.mxu1 }
 0x149   :  { %v2224_v15 = vadd.f32 %v3026_v29, %v1818_v12  ;;  %v1533_v16 = vpop.f32.mrf.mxu0 }
 0x14a   :  { %v1822_v17 = vpop.f32.mrf.mxu1 }
 0x14b   :  { %2288 = vst [vmem:[%s3342_s3 + $0x88] sm:$0xff] %v2224_v15  ;;  %v1823_v18 = vadd.f32 %v1822_v17, %v1533_v16  ;;  %v1535_v19 = vpop.f32.mrf.mxu0 }
 0x14c   :  { %v1824_v20 = vpop.f32.mrf.mxu1 }
 0x14d   :  { %v2225_v21 = vadd.f32 %v3026_v29, %v1823_v18  ;;  %v1536_v22 = vpop.f32.mrf.mxu0 }
 0x14e   :  { %v1825_v23 = vpop.f32.mrf.mxu1 }
 0x14f   :  { %2289 = vst [vmem:[%s3342_s3 + $0x90] sm:$0xff] %v2225_v21  ;;  %v1826_v24 = vadd.f32 %v1825_v23, %v1536_v22  ;;  %v1538_v25 = vpop.f32.mrf.mxu0 }
 0x150   :  { %v1827_v26 = vpop.f32.mrf.mxu1 }
 0x151   :  { %v2226_v27 = vadd.f32 %v3026_v29, %v1826_v24  ;;  %v1541_v28 = vpop.f32.mrf.mxu0 }
 0x152   :  { %v1830_v30 = vpop.f32.mrf.mxu1 }
 0x153   :  { %2290 = vst [vmem:[%s3342_s3 + $0x98] sm:$0xff] %v2226_v27  ;;  %v1831_v31 = vadd.f32 %v1830_v30, %v1541_v28  ;;  %v1543_v32 = vpop.f32.mrf.mxu0 }
 0x154   :  { %v1832_v33 = vpop.f32.mrf.mxu1 }
 0x155   :  { %v2227_v34 = vadd.f32 %v3026_v29, %v1831_v31  ;;  %v1544_v35 = vpop.f32.mrf.mxu0 }
 0x156   :  { %v1833_v36 = vpop.f32.mrf.mxu1 }
 0x157   :  { %2291 = vst [vmem:[%s3342_s3 + $0xa0] sm:$0xff] %v2227_v34  ;;  %v1834_v37 = vadd.f32 %v1833_v36, %v1544_v35  ;;  %v1546_v38 = vpop.f32.mrf.mxu0 }
 0x158   :  { %v1835_v39 = vpop.f32.mrf.mxu1 }
 0x159   :  { %v2228_v40 = vadd.f32 %v3026_v29, %v1834_v37  ;;  %v1549_v41 = vpop.f32.mrf.mxu0 }
 0x15a   :  { %v1838_v42 = vpop.f32.mrf.mxu1 }
 0x15b   :  { %2292 = vst [vmem:[%s3342_s3 + $0xa8] sm:$0xff] %v2228_v40  ;;  %v1839_v43 = vadd.f32 %v1838_v42, %v1549_v41  ;;  %v1551_v44 = vpop.f32.mrf.mxu0 }
 0x15c   :  { %v1840_v45 = vpop.f32.mrf.mxu1 }
 0x15d   :  { %v2229_v46 = vadd.f32 %v3026_v29, %v1839_v43  ;;  %v1552_v47 = vpop.f32.mrf.mxu0 }
 0x15e   :  { %v1841_v48 = vpop.f32.mrf.mxu1 }
 0x15f   :  { %2293 = vst [vmem:[%s3342_s3 + $0xb0] sm:$0xff] %v2229_v46  ;;  %v1842_v49 = vadd.f32 %v1841_v48, %v1552_v47  ;;  %v1554_v50 = vpop.f32.mrf.mxu0 }
 0x160   :  { %v1843_v51 = vpop.f32.mrf.mxu1 }
 0x161   :  { %v2230_v52 = vadd.f32 %v3026_v29, %v1842_v49  ;;  %v1557_v53 = vpop.f32.mrf.mxu0 }
 0x162   :  { %v1846_v54 = vpop.f32.mrf.mxu1 }
 0x163   :  { %2294 = vst [vmem:[%s3342_s3 + $0xb8] sm:$0xff] %v2230_v52  ;;  %v1847_v55 = vadd.f32 %v1846_v54, %v1557_v53  ;;  %v1559_v56 = vpop.f32.mrf.mxu0 }
 0x164   :  { %v1848_v57 = vpop.f32.mrf.mxu1 }
 0x165   :  { %v2231_v58 = vadd.f32 %v3026_v29, %v1847_v55  ;;  %v1560_v59 = vpop.f32.mrf.mxu0 }
 0x166   :  { %v1849_v60 = vpop.f32.mrf.mxu1 }
 0x167   :  { %2295 = vst [vmem:[%s3342_s3 + $0xc0] sm:$0xff] %v2231_v58  ;;  %v1850_v61 = vadd.f32 %v1849_v60, %v1560_v59  ;;  %v1562_v62 = vpop.f32.mrf.mxu0 }
 0x168   :  { %v1851_v63 = vpop.f32.mrf.mxu1 }
 0x169   :  { %v2232_v0 = vadd.f32 %v3026_v29, %v1850_v61  ;;  %v1565_v1 = vpop.f32.mrf.mxu0 }
 0x16a   :  { %v1854_v2 = vpop.f32.mrf.mxu1 }
 0x16b   :  { %2296 = vst [vmem:[%s3342_s3 + $0xc8] sm:$0xff] %v2232_v0  ;;  %v1855_v3 = vadd.f32 %v1854_v2, %v1565_v1  ;;  %v1567_v4 = vpop.f32.mrf.mxu0 }
 0x16c   :  { %v1856_v5 = vpop.f32.mrf.mxu1 }
 0x16d   :  { %v2233_v6 = vadd.f32 %v3026_v29, %v1855_v3  ;;  %v1568_v7 = vpop.f32.mrf.mxu0 }
 0x16e   :  { %v1857_v8 = vpop.f32.mrf.mxu1 }
 0x16f   :  { %2297 = vst [vmem:[%s3342_s3 + $0xd0] sm:$0xff] %v2233_v6  ;;  %v1858_v9 = vadd.f32 %v1857_v8, %v1568_v7  ;;  %v1570_v10 = vpop.f32.mrf.mxu0 }
 0x170   :  { %v1859_v11 = vpop.f32.mrf.mxu1 }
 0x171   :  { %v2234_v12 = vadd.f32 %v3026_v29, %v1858_v9  ;;  %v1573_v13 = vpop.f32.mrf.mxu0 }
 0x172   :  { %v1862_v14 = vpop.f32.mrf.mxu1 }
 0x173   :  { %2298 = vst [vmem:[%s3342_s3 + $0xd8] sm:$0xff] %v2234_v12  ;;  %v1863_v15 = vadd.f32 %v1862_v14, %v1573_v13  ;;  %v1575_v16 = vpop.f32.mrf.mxu0 }
 0x174   :  { %v1864_v17 = vpop.f32.mrf.mxu1 }
 0x175   :  { %v2235_v18 = vadd.f32 %v3026_v29, %v1863_v15  ;;  %v1576_v19 = vpop.f32.mrf.mxu0 }
 0x176   :  { %v1865_v20 = vpop.f32.mrf.mxu1 }
 0x177   :  { %2299 = vst [vmem:[%s3342_s3 + $0xe0] sm:$0xff] %v2235_v18  ;;  %v1866_v21 = vadd.f32 %v1865_v20, %v1576_v19  ;;  %v1578_v22 = vpop.f32.mrf.mxu0 }
 0x178   :  { %v1867_v23 = vpop.f32.mrf.mxu1 }
 0x179   :  { %v2236_v24 = vadd.f32 %v3026_v29, %v1866_v21  ;;  %v1581_v25 = vpop.f32.mrf.mxu0 }
 0x17a   :  { %v1870_v26 = vpop.f32.mrf.mxu1 }
 0x17b   :  { %2300 = vst [vmem:[%s3342_s3 + $0xe8] sm:$0xff] %v2236_v24  ;;  %v1871_v27 = vadd.f32 %v1870_v26, %v1581_v25  ;;  %v1583_v28 = vpop.f32.mrf.mxu0 }
 0x17c   :  { %v1872_v30 = vpop.f32.mrf.mxu1 }
 0x17d   :  { %v2237_v31 = vadd.f32 %v3026_v29, %v1871_v27  ;;  %v1584_v32 = vpop.f32.mrf.mxu0 }
 0x17e   :  { %v1873_v33 = vpop.f32.mrf.mxu1 }
 0x17f   :  { %2301 = vst [vmem:[%s3342_s3 + $0xf0] sm:$0xff] %v2237_v31  ;;  %v1874_v34 = vadd.f32 %v1873_v33, %v1584_v32  ;;  %v1586_v35 = vpop.f32.mrf.mxu0 }
 0x180   :  { %v1875_v36 = vpop.f32.mrf.mxu1 }
 0x181   :  { %v2238_v37 = vadd.f32 %v3026_v29, %v1874_v34  ;;  %v1589_v38 = vpop.f32.mrf.mxu0 }
 0x182   :  { %v1878_v39 = vpop.f32.mrf.mxu1 }
 0x183   :  { %2302 = vst [vmem:[%s3342_s3 + $0xf8] sm:$0xff] %v2238_v37  ;;  %v1879_v40 = vadd.f32 %v1878_v39, %v1589_v38  ;;  %v1591_v41 = vpop.f32.mrf.mxu0 }
 0x184   :  { %v1880_v42 = vpop.f32.mrf.mxu1 }
 0x185   :  { %v2239_v43 = vadd.f32 %v3026_v29, %v1879_v40  ;;  %v1592_v44 = vpop.f32.mrf.mxu0 }
 0x186   :  { %v1881_v45 = vpop.f32.mrf.mxu1 }
 0x187   :  { %2303 = vst [vmem:[%s3342_s3 + $0x100] sm:$0xff] %v2239_v43  ;;  %v1882_v46 = vadd.f32 %v1881_v45, %v1592_v44  ;;  %v1594_v47 = vpop.f32.mrf.mxu0 }
 0x188   :  { %v1883_v48 = vpop.f32.mrf.mxu1 }
 0x189   :  { %v2240_v49 = vadd.f32 %v3026_v29, %v1882_v46  ;;  %v1597_v50 = vpop.f32.mrf.mxu0 }
 0x18a   :  { %v1886_v51 = vpop.f32.mrf.mxu1 }
 0x18b   :  { %2304 = vst [vmem:[%s3342_s3 + $0x108] sm:$0xff] %v2240_v49  ;;  %v1887_v52 = vadd.f32 %v1886_v51, %v1597_v50  ;;  %v1599_v53 = vpop.f32.mrf.mxu0 }
 0x18c   :  { %v1888_v54 = vpop.f32.mrf.mxu1 }
 0x18d   :  { %v2241_v55 = vadd.f32 %v3026_v29, %v1887_v52  ;;  %v1600_v56 = vpop.f32.mrf.mxu0 }
 0x18e   :  { %v1889_v57 = vpop.f32.mrf.mxu1 }
 0x18f   :  { %2305 = vst [vmem:[%s3342_s3 + $0x110] sm:$0xff] %v2241_v55  ;;  %v1890_v58 = vadd.f32 %v1889_v57, %v1600_v56  ;;  %v1602_v59 = vpop.f32.mrf.mxu0 }
 0x190   :  { %v1891_v60 = vpop.f32.mrf.mxu1 }
 0x191   :  { %v2242_v61 = vadd.f32 %v3026_v29, %v1890_v58  ;;  %v1605_v62 = vpop.f32.mrf.mxu0 }
 0x192   :  { %v1894_v63 = vpop.f32.mrf.mxu1 }
 0x193   :  { %2306 = vst [vmem:[%s3342_s3 + $0x118] sm:$0xff] %v2242_v61  ;;  %v1895_v0 = vadd.f32 %v1894_v63, %v1605_v62  ;;  %v1607_v1 = vpop.f32.mrf.mxu0 }
 0x194   :  { %v1896_v2 = vpop.f32.mrf.mxu1 }
 0x195   :  { %v2243_v3 = vadd.f32 %v3026_v29, %v1895_v0  ;;  %v1608_v4 = vpop.f32.mrf.mxu0 }
 0x196   :  { %v1897_v5 = vpop.f32.mrf.mxu1 }
 0x197   :  { %2307 = vst [vmem:[%s3342_s3 + $0x120] sm:$0xff] %v2243_v3  ;;  %v1898_v6 = vadd.f32 %v1897_v5, %v1608_v4  ;;  %v1610_v7 = vpop.f32.mrf.mxu0 }
 0x198   :  { %v1899_v8 = vpop.f32.mrf.mxu1 }
 0x199   :  { %v2244_v9 = vadd.f32 %v3026_v29, %v1898_v6  ;;  %v1613_v10 = vpop.f32.mrf.mxu0 }
 0x19a   :  { %v1902_v11 = vpop.f32.mrf.mxu1 }
 0x19b   :  { %2308 = vst [vmem:[%s3342_s3 + $0x128] sm:$0xff] %v2244_v9  ;;  %v1903_v12 = vadd.f32 %v1902_v11, %v1613_v10  ;;  %v1615_v13 = vpop.f32.mrf.mxu0 }
 0x19c   :  { %v1904_v14 = vpop.f32.mrf.mxu1 }
 0x19d   :  { %v2245_v15 = vadd.f32 %v3026_v29, %v1903_v12  ;;  %v1616_v16 = vpop.f32.mrf.mxu0 }
 0x19e   :  { %v1905_v17 = vpop.f32.mrf.mxu1 }
 0x19f   :  { %2309 = vst [vmem:[%s3342_s3 + $0x130] sm:$0xff] %v2245_v15  ;;  %v1906_v18 = vadd.f32 %v1905_v17, %v1616_v16  ;;  %v1618_v19 = vpop.f32.mrf.mxu0 }
 0x1a0   :  { %v1907_v20 = vpop.f32.mrf.mxu1 }
 0x1a1   :  { %v2246_v21 = vadd.f32 %v3026_v29, %v1906_v18  ;;  %v1621_v22 = vpop.f32.mrf.mxu0 }
 0x1a2   :  { %v1910_v23 = vpop.f32.mrf.mxu1 }
 0x1a3   :  { %2310 = vst [vmem:[%s3342_s3 + $0x138] sm:$0xff] %v2246_v21  ;;  %v1911_v24 = vadd.f32 %v1910_v23, %v1621_v22  ;;  %v1623_v25 = vpop.f32.mrf.mxu0 }
 0x1a4   :  { %v1912_v26 = vpop.f32.mrf.mxu1 }
 0x1a5   :  { %v2247_v27 = vadd.f32 %v3026_v29, %v1911_v24  ;;  %v1624_v28 = vpop.f32.mrf.mxu0 }
 0x1a6   :  { %v1913_v30 = vpop.f32.mrf.mxu1 }
 0x1a7   :  { %2311 = vst [vmem:[%s3342_s3 + $0x140] sm:$0xff] %v2247_v27  ;;  %v1914_v31 = vadd.f32 %v1913_v30, %v1624_v28  ;;  %v1626_v32 = vpop.f32.mrf.mxu0 }
 0x1a8   :  { %v1915_v33 = vpop.f32.mrf.mxu1 }
 0x1a9   :  { %v2248_v34 = vadd.f32 %v3026_v29, %v1914_v31  ;;  %v1629_v35 = vpop.f32.mrf.mxu0 }
 0x1aa   :  { %v1918_v36 = vpop.f32.mrf.mxu1 }
 0x1ab   :  { %2312 = vst [vmem:[%s3342_s3 + $0x148] sm:$0xff] %v2248_v34  ;;  %v1919_v37 = vadd.f32 %v1918_v36, %v1629_v35  ;;  %v1631_v38 = vpop.f32.mrf.mxu0 }
 0x1ac   :  { %v1920_v39 = vpop.f32.mrf.mxu1 }
 0x1ad   :  { %v2249_v40 = vadd.f32 %v3026_v29, %v1919_v37  ;;  %v1632_v41 = vpop.f32.mrf.mxu0 }
 0x1ae   :  { %v1921_v42 = vpop.f32.mrf.mxu1 }
 0x1af   :  { %2313 = vst [vmem:[%s3342_s3 + $0x150] sm:$0xff] %v2249_v40  ;;  %v1922_v43 = vadd.f32 %v1921_v42, %v1632_v41  ;;  %v1634_v44 = vpop.f32.mrf.mxu0 }
 0x1b0   :  { %v1923_v45 = vpop.f32.mrf.mxu1 }
 0x1b1   :  { %v2250_v46 = vadd.f32 %v3026_v29, %v1922_v43  ;;  %v1637_v47 = vpop.f32.mrf.mxu0 }
 0x1b2   :  { %v1926_v48 = vpop.f32.mrf.mxu1 }
 0x1b3   :  { %2314 = vst [vmem:[%s3342_s3 + $0x158] sm:$0xff] %v2250_v46  ;;  %v1927_v49 = vadd.f32 %v1926_v48, %v1637_v47  ;;  %v1639_v50 = vpop.f32.mrf.mxu0 }
 0x1b4   :  { %v1928_v51 = vpop.f32.mrf.mxu1 }
 0x1b5   :  { %v2251_v52 = vadd.f32 %v3026_v29, %v1927_v49  ;;  %v1640_v53 = vpop.f32.mrf.mxu0 }
 0x1b6   :  { %v1929_v54 = vpop.f32.mrf.mxu1 }
 0x1b7   :  { %2315 = vst [vmem:[%s3342_s3 + $0x160] sm:$0xff] %v2251_v52  ;;  %v1930_v55 = vadd.f32 %v1929_v54, %v1640_v53  ;;  %v1642_v56 = vpop.f32.mrf.mxu0 }
 0x1b8   :  { %v1931_v57 = vpop.f32.mrf.mxu1 }
 0x1b9   :  { %v2252_v58 = vadd.f32 %v3026_v29, %v1930_v55  ;;  %v1645_v59 = vpop.f32.mrf.mxu0 }
 0x1ba   :  { %v1934_v60 = vpop.f32.mrf.mxu1 }
 0x1bb   :  { %2316 = vst [vmem:[%s3342_s3 + $0x168] sm:$0xff] %v2252_v58  ;;  %v1935_v61 = vadd.f32 %v1934_v60, %v1645_v59  ;;  %v1647_v62 = vpop.f32.mrf.mxu0 }
 0x1bc   :  { %v1936_v63 = vpop.f32.mrf.mxu1 }
 0x1bd   :  { %v2253_v0 = vadd.f32 %v3026_v29, %v1935_v61  ;;  %v1648_v1 = vpop.f32.mrf.mxu0  ;;  %v2533_v61 = vld [vmem:[%s3341_s2] ss:$0 sm:$0xff] }
 0x1be   :  { %v1937_v2 = vpop.f32.mrf.mxu1 }
 0x1bf   :  { %2317 = vst [vmem:[%s3342_s3 + $0x170] sm:$0xff] %v2253_v0  ;;  %v1938_v3 = vadd.f32 %v1937_v2, %v1648_v1  ;;  %v1650_v4 = vpop.f32.mrf.mxu0 }
 0x1c0   :  { %v1939_v5 = vpop.f32.mrf.mxu1 }
 0x1c1   :  { %v2254_v6 = vadd.f32 %v3026_v29, %v1938_v3  ;;  %v1653_v7 = vpop.f32.mrf.mxu0 }
 0x1c2   :  { %v1942_v8 = vpop.f32.mrf.mxu1 }
 0x1c3   :  { %2318 = vst [vmem:[%s3342_s3 + $0x178] sm:$0xff] %v2254_v6  ;;  %v1943_v9 = vadd.f32 %v1942_v8, %v1653_v7  ;;  %v1655_v10 = vpop.f32.mrf.mxu0 }
 0x1c4   :  { %v1944_v11 = vpop.f32.mrf.mxu1 }
 0x1c5   :  { %v2255_v12 = vadd.f32 %v3026_v29, %v1943_v9  ;;  %v1656_v13 = vpop.f32.mrf.mxu0 }
 0x1c6   :  { %v1945_v14 = vpop.f32.mrf.mxu1 }
 0x1c7   :  { %2319 = vst [vmem:[%s3342_s3 + $0x180] sm:$0xff] %v2255_v12  ;;  %v1946_v15 = vadd.f32 %v1945_v14, %v1656_v13  ;;  %v1658_v16 = vpop.f32.mrf.mxu0 }
 0x1c8   :  { %v1947_v17 = vpop.f32.mrf.mxu1 }
 0x1c9   :  { %v2256_v18 = vadd.f32 %v3026_v29, %v1946_v15  ;;  %v1661_v19 = vpop.f32.mrf.mxu0 }
 0x1ca   :  { %v1950_v20 = vpop.f32.mrf.mxu1 }
 0x1cb   :  { %2320 = vst [vmem:[%s3342_s3 + $0x188] sm:$0xff] %v2256_v18  ;;  %v1951_v21 = vadd.f32 %v1950_v20, %v1661_v19  ;;  %v1663_v22 = vpop.f32.mrf.mxu0 }
 0x1cc   :  { %v1952_v23 = vpop.f32.mrf.mxu1 }
 0x1cd   :  { %v2257_v24 = vadd.f32 %v3026_v29, %v1951_v21  ;;  %v1664_v25 = vpop.f32.mrf.mxu0 }
 0x1ce   :  { %v1953_v26 = vpop.f32.mrf.mxu1 }
 0x1cf   :  { %2321 = vst [vmem:[%s3342_s3 + $0x190] sm:$0xff] %v2257_v24  ;;  %v1954_v27 = vadd.f32 %v1953_v26, %v1664_v25  ;;  %v1666_v28 = vpop.f32.mrf.mxu0 }
 0x1d0   :  { %v1955_v30 = vpop.f32.mrf.mxu1 }
 0x1d1   :  { %v2258_v31 = vadd.f32 %v3026_v29, %v1954_v27  ;;  %v1669_v32 = vpop.f32.mrf.mxu0 }
 0x1d2   :  { %v1958_v33 = vpop.f32.mrf.mxu1 }
 0x1d3   :  { %2322 = vst [vmem:[%s3342_s3 + $0x198] sm:$0xff] %v2258_v31  ;;  %v1959_v34 = vadd.f32 %v1958_v33, %v1669_v32  ;;  %v1671_v35 = vpop.f32.mrf.mxu0 }
 0x1d4   :  { %v1960_v36 = vpop.f32.mrf.mxu1 }
 0x1d5   :  { %v2259_v37 = vadd.f32 %v3026_v29, %v1959_v34  ;;  %v1672_v38 = vpop.f32.mrf.mxu0 }
 0x1d6   :  { %v1961_v39 = vpop.f32.mrf.mxu1 }
 0x1d7   :  { %2323 = vst [vmem:[%s3342_s3 + $0x1a0] sm:$0xff] %v2259_v37  ;;  %v1962_v40 = vadd.f32 %v1961_v39, %v1672_v38  ;;  %v1674_v41 = vpop.f32.mrf.mxu0 }
 0x1d8   :  { %v1963_v42 = vpop.f32.mrf.mxu1 }
 0x1d9   :  { %v2260_v43 = vadd.f32 %v3026_v29, %v1962_v40  ;;  %v1677_v44 = vpop.f32.mrf.mxu0 }
 0x1da   :  { %v1966_v45 = vpop.f32.mrf.mxu1 }
 0x1db   :  { %2324 = vst [vmem:[%s3342_s3 + $0x1a8] sm:$0xff] %v2260_v43  ;;  %v1967_v46 = vadd.f32 %v1966_v45, %v1677_v44  ;;  %v1679_v47 = vpop.f32.mrf.mxu0 }
 0x1dc   :  { %v1968_v48 = vpop.f32.mrf.mxu1 }
 0x1dd   :  { %v2261_v49 = vadd.f32 %v3026_v29, %v1967_v46  ;;  %v1680_v50 = vpop.f32.mrf.mxu0 }
 0x1de   :  { %v1969_v51 = vpop.f32.mrf.mxu1 }
 0x1df   :  { %2325 = vst [vmem:[%s3342_s3 + $0x1b0] sm:$0xff] %v2261_v49  ;;  %v1970_v52 = vadd.f32 %v1969_v51, %v1680_v50  ;;  %v1682_v53 = vpop.f32.mrf.mxu0 }
 0x1e0   :  { %v1971_v54 = vpop.f32.mrf.mxu1 }
 0x1e1   :  { %v2262_v55 = vadd.f32 %v3026_v29, %v1970_v52  ;;  %v1685_v56 = vpop.f32.mrf.mxu0 }
 0x1e2   :  { %v1974_v57 = vpop.f32.mrf.mxu1 }
 0x1e3   :  { %2326 = vst [vmem:[%s3342_s3 + $0x1b8] sm:$0xff] %v2262_v55  ;;  %v1975_v58 = vadd.f32 %v1974_v57, %v1685_v56  ;;  %v1687_v59 = vpop.f32.mrf.mxu0 }
 0x1e4   :  { %v1976_v60 = vpop.f32.mrf.mxu1 }
 0x1e5   :  { %v2263_v62 = vadd.f32 %v2533_v61, %v1975_v58  ;;  %v1688_v63 = vpop.f32.mrf.mxu0 }
 0x1e6   :  { %v1977_v0 = vpop.f32.mrf.mxu1 }
 0x1e7   :  { %2327 = vst [vmem:[%s3342_s3 + $0x1c0] sm:$0xff] %v2263_v62  ;;  %v1978_v29 = vadd.f32 %v1977_v0, %v1688_v63  ;;  %v1690_v1 = vpop.f32.mrf.mxu0 }
 0x1e8   :  { %v1979_v2 = vpop.f32.mrf.mxu1 }
 0x1e9   :  { %v2264_v3 = vadd.f32 %v2533_v61, %v1978_v29  ;;  %v1693_v4 = vpop.f32.mrf.mxu0 }
 0x1ea   :  { %v1982_v5 = vpop.f32.mrf.mxu1 }
 0x1eb   :  { %2328 = vst [vmem:[%s3342_s3 + $0x1c8] sm:$0xff] %v2264_v3  ;;  %v1983_v6 = vadd.f32 %v1982_v5, %v1693_v4  ;;  %v1695_v7 = vpop.f32.mrf.mxu0 }
 0x1ec   :  { %v1984_v8 = vpop.f32.mrf.mxu1 }
 0x1ed   :  { %v2265_v9 = vadd.f32 %v2533_v61, %v1983_v6  ;;  %v1696_v10 = vpop.f32.mrf.mxu0 }
 0x1ee   :  { %v1985_v11 = vpop.f32.mrf.mxu1 }
 0x1ef   :  { %2329 = vst [vmem:[%s3342_s3 + $0x1d0] sm:$0xff] %v2265_v9  ;;  %v1986_v12 = vadd.f32 %v1985_v11, %v1696_v10  ;;  %v1698_v13 = vpop.f32.mrf.mxu0 }
 0x1f0   :  { %v1987_v14 = vpop.f32.mrf.mxu1 }
 0x1f1   :  { %v2266_v15 = vadd.f32 %v2533_v61, %v1986_v12  ;;  %v1701_v16 = vpop.f32.mrf.mxu0 }
 0x1f2   :  { %v1990_v17 = vpop.f32.mrf.mxu1 }
 0x1f3   :  { %2330 = vst [vmem:[%s3342_s3 + $0x1d8] sm:$0xff] %v2266_v15  ;;  %v1991_v18 = vadd.f32 %v1990_v17, %v1701_v16  ;;  %v1703_v19 = vpop.f32.mrf.mxu0 }
 0x1f4   :  { %v1992_v20 = vpop.f32.mrf.mxu1 }
 0x1f5   :  { %v2267_v21 = vadd.f32 %v2533_v61, %v1991_v18  ;;  %v1704_v22 = vpop.f32.mrf.mxu0 }
 0x1f6   :  { %v1993_v23 = vpop.f32.mrf.mxu1 }
 0x1f7   :  { %2331 = vst [vmem:[%s3342_s3 + $0x1e0] sm:$0xff] %v2267_v21  ;;  %v1994_v24 = vadd.f32 %v1993_v23, %v1704_v22  ;;  %v1706_v25 = vpop.f32.mrf.mxu0 }
 0x1f8   :  { %v1995_v26 = vpop.f32.mrf.mxu1 }
 0x1f9   :  { %v2268_v27 = vadd.f32 %v2533_v61, %v1994_v24  ;;  %v1709_v28 = vpop.f32.mrf.mxu0 }
 0x1fa   :  { %v1998_v30 = vpop.f32.mrf.mxu1 }
 0x1fb   :  { %2332 = vst [vmem:[%s3342_s3 + $0x1e8] sm:$0xff] %v2268_v27  ;;  %v1999_v31 = vadd.f32 %v1998_v30, %v1709_v28  ;;  %v1711_v32 = vpop.f32.mrf.mxu0 }
 0x1fc   :  { %v2000_v33 = vpop.f32.mrf.mxu1 }
 0x1fd   :  { %v2269_v34 = vadd.f32 %v2533_v61, %v1999_v31  ;;  %v1712_v35 = vpop.f32.mrf.mxu0 }
 0x1fe   :  { %v2001_v36 = vpop.f32.mrf.mxu1 }
 0x1ff   :  { %2333 = vst [vmem:[%s3342_s3 + $0x1f0] sm:$0xff] %v2269_v34  ;;  %v2002_v37 = vadd.f32 %v2001_v36, %v1712_v35  ;;  %v1714_v38 = vpop.f32.mrf.mxu0 }
 0x200   :  { %v2003_v39 = vpop.f32.mrf.mxu1 }
 0x201   :  { %v2270_v40 = vadd.f32 %v2533_v61, %v2002_v37 }
 0x203   :  { %2334 = vst [vmem:[%s3342_s3 + $0x1f8] sm:$0xff] %v2270_v40 }

// kernel: fwd.46
= control target key start
LH: loop header
LB: loop body
LE: loop exit
PB: predicated region body
PF: predicated region fallthrough
CT: control target
= control target key end

     0   :  { %v98_v7 = vlaneseq  ;;  %s865_s1 = inlined_call_operand.vmem [shape: f32[1,128], index: 1, kind: input, shape index: {}]   ;;  %s866_s2 = inlined_call_operand.vmem [shape: f32[1,128], index: 2, kind: input, shape index: {}]   ;;  %s867_s3 = inlined_call_operand.vmem [shape: f32[1,128], index: 3, kind: input, shape index: {}]   ;;  %s868_s0 = inlined_call_operand.vmem [shape: f32[512,128], index: 0, kind: input, shape index: {}]   ;;  %s869_s4 = inlined_call_operand.vmem [shape: f32[1,128], index: 4, kind: input, shape index: {}]   ;;  %s870_s5 = inlined_call_operand.vmem [shape: f32[512,128], index: 5, kind: output, shape index: {}]  }
   0x1   :  { %v20_v0 = vld [vmem:[%s865_s1] sm:$0x1]  ;;  %v34_v15 = vld [vmem:[%s868_s0 + $0x8] sm:$0xff]  ;;  %v35_v16 = vld [vmem:[%s868_s0 + $0x10] sm:$0xff] }
   0x2   :  { %v22_v1 = vld [vmem:[%s866_s2] sm:$0x1]  ;;  %v21_v2 = vmul.f32 0.001953125, %v20_v0  ;;  %v99_v8 = vshrl.u32 %v98_v7, 7  ;;  %v36_v17 = vld [vmem:[%s868_s0 + $0x18] sm:$0xff]  ;;  %v38_v21 = vld [vmem:[%s868_s0 + $0x28] sm:$0xff] }
   0x3   :  { %v23_v3 = vmul.f32 0.001953125, %v22_v1  ;;  %v26_v9 = vld [vmem:[%s867_s3] sm:$0x1]  ;;  %v39_v22 = vld [vmem:[%s868_s0 + $0x30] sm:$0xff]  ;;  %v40_v23 = vld [vmem:[%s868_s0 + $0x38] sm:$0xff] }
   0x4   :  { %v24_v4 = vmul.f32 %v21_v2, %v21_v2  ;;  %v100_v10 = vsub.s32 0, %v99_v8  ;;  %v30_v13 = vld [vmem:[%s869_s4] sm:$0x1]  ;;  %v42_v25 = vld [vmem:[%s868_s0 + $0x48] sm:$0xff]  ;;  %v43_v26 = vld [vmem:[%s868_s0 + $0x50] sm:$0xff] }
   0x5   :  { %v33_v14 = vld [vmem:[%s868_s0] sm:$0xff]  ;;  %v44_v31 = vld [vmem:[%s868_s0 + $0x58] sm:$0xff]  ;;  %v46_v33 = vld [vmem:[%s868_s0 + $0x68] sm:$0xff] }
   0x6   :  { %v25_v5 = vsub.f32 %v23_v3, %v24_v4  ;;  %v37_v18 = vld [vmem:[%s868_s0 + $0x20] sm:$0xff]  ;;  %v47_v50 = vld [vmem:[%s868_s0 + $0x70] sm:$0xff]  ;;  %v48_v51 = vld [vmem:[%s868_s0 + $0x78] sm:$0xff] }
   0x7   :  { %v41_v24 = vld [vmem:[%s868_s0 + $0x40] sm:$0xff]  ;;  %v50_v57 = vld [vmem:[%s868_s0 + $0x88] sm:$0xff]  ;;  %v51_v58 = vld [vmem:[%s868_s0 + $0x90] sm:$0xff] }
   0x8   :  { %v27_v6 = vadd.f32 1e-05, %v25_v5  ;;  %v45_v32 = vld [vmem:[%s868_s0 + $0x60] sm:$0xff]  ;;  %v52_v59 = vld [vmem:[%s868_s0 + $0x98] sm:$0xff]  ;;  %v54_v1 = vld [vmem:[%s868_s0 + $0xa8] sm:$0xff] }
   0x9   :  { %v49_v52 = vld [vmem:[%s868_s0 + $0x80] sm:$0xff] }
   0xa   :  { %305 = vrsqrt.f32 %v27_v6  ;;  %v53_v0 = vld [vmem:[%s868_s0 + $0xa0] sm:$0xff] }
  0x17   :  { %v306_v11 = vpop.eup %305 }
  0x18   :  { %v29_v12 = vmul.f32 %v306_v11, %v26_v9  ;;  %v56_v11 = vld [vmem:[%s868_s0 + $0xb8] sm:$0xff] }
  0x1a   :  { %v31_v19 = vmul.f32 %v29_v12, %v21_v2  ;;  %v364_v20 = vrot.slane %v29_v12, %v100_v10  ;;  %v57_v12 = vld [vmem:[%s868_s0 + $0xc0] sm:$0xff] }
  0x1c   :  { %v32_v27 = vsub.f32 %v30_v13, %v31_v19  ;;  %v103_v28 = vmul.f32 %v364_v20, %v33_v14  ;;  %v104_v29 = vmul.f32 %v364_v20, %v34_v15  ;;  %v105_v30 = vmul.f32 %v364_v20, %v35_v16  ;;  %v60_v19 = vld [vmem:[%s868_s0 + $0xd8] sm:$0xff] }
  0x1d   :  { %v106_v34 = vmul.f32 %v364_v20, %v36_v17  ;;  %v107_v35 = vmul.f32 %v364_v20, %v37_v18  ;;  %v108_v36 = vmul.f32 %v364_v20, %v38_v21  ;;  %v109_v37 = vmul.f32 %v364_v20, %v39_v22  ;;  %v58_v17 = vld [vmem:[%s868_s0 + $0xc8] sm:$0xff]  ;;  %v59_v18 = vld [vmem:[%s868_s0 + $0xd0] sm:$0xff] }
  0x1e   :  { %v400_v38 = vrot.slane %v32_v27, %v100_v10  ;;  %v110_v39 = vmul.f32 %v364_v20, %v40_v23  ;;  %v111_v40 = vmul.f32 %v364_v20, %v41_v24  ;;  %v112_v41 = vmul.f32 %v364_v20, %v42_v25  ;;  %v55_v10 = vld [vmem:[%s868_s0 + $0xb0] sm:$0xff]  ;;  %v61_v25 = vld [vmem:[%s868_s0 + $0xe0] sm:$0xff] }
  0x1f   :  { %v113_v42 = vmul.f32 %v364_v20, %v43_v26  ;;  %v114_v43 = vmul.f32 %v364_v20, %v44_v31  ;;  %v115_v44 = vmul.f32 %v364_v20, %v45_v32  ;;  %v116_v45 = vmul.f32 %v364_v20, %v46_v33  ;;  %v62_v26 = vld [vmem:[%s868_s0 + $0xe8] sm:$0xff] }
  0x20   :  { %v173_v46 = vadd.f32 %v400_v38, %v103_v28  ;;  %v174_v47 = vadd.f32 %v400_v38, %v104_v29  ;;  %v175_v48 = vadd.f32 %v400_v38, %v105_v30  ;;  %v176_v49 = vadd.f32 %v400_v38, %v106_v34 }
  0x21   :  { %v177_v53 = vadd.f32 %v400_v38, %v107_v35  ;;  %v178_v54 = vadd.f32 %v400_v38, %v108_v36  ;;  %v179_v55 = vadd.f32 %v400_v38, %v109_v37  ;;  %v180_v56 = vadd.f32 %v400_v38, %v110_v39  ;;  %v63_v35 = vld [vmem:[%s868_s0 + $0xf0] sm:$0xff]  ;;  %v64_v36 = vld [vmem:[%s868_s0 + $0xf8] sm:$0xff]  ;;  %v65_v37 = vld [vmem:[%s868_s0 + $0x100] sm:$0xff] }
  0x22   :  { %237 = vst [vmem:[%s870_s5] sm:$0xff] %v173_v46  ;;  %238 = vst [vmem:[%s870_s5 + $0x8] sm:$0xff] %v174_v47  ;;  %v181_v60 = vadd.f32 %v400_v38, %v111_v40  ;;  %v182_v61 = vadd.f32 %v400_v38, %v112_v41  ;;  %v183_v62 = vadd.f32 %v400_v38, %v113_v42 }
  0x23   :  { %239 = vst [vmem:[%s870_s5 + $0x10] sm:$0xff] %v175_v48  ;;  %240 = vst [vmem:[%s870_s5 + $0x18] sm:$0xff] %v176_v49  ;;  %v184_v63 = vadd.f32 %v400_v38, %v114_v43  ;;  %v185_v2 = vadd.f32 %v400_v38, %v115_v44  ;;  %v186_v3 = vadd.f32 %v400_v38, %v116_v45  ;;  %v66_v43 = vld [vmem:[%s868_s0 + $0x108] sm:$0xff]  ;;  %v67_v44 = vld [vmem:[%s868_s0 + $0x110] sm:$0xff] }
  0x24   :  { %241 = vst [vmem:[%s870_s5 + $0x20] sm:$0xff] %v177_v53  ;;  %242 = vst [vmem:[%s870_s5 + $0x28] sm:$0xff] %v178_v54  ;;  %v117_v4 = vmul.f32 %v364_v20, %v47_v50  ;;  %v118_v5 = vmul.f32 %v364_v20, %v48_v51  ;;  %v119_v6 = vmul.f32 %v364_v20, %v49_v52  ;;  %v68_v45 = vld [vmem:[%s868_s0 + $0x118] sm:$0xff]  ;;  %v69_v50 = vld [vmem:[%s868_s0 + $0x120] sm:$0xff] }
  0x25   :  { %243 = vst [vmem:[%s870_s5 + $0x30] sm:$0xff] %v179_v55  ;;  %244 = vst [vmem:[%s870_s5 + $0x38] sm:$0xff] %v180_v56  ;;  %v120_v7 = vmul.f32 %v364_v20, %v50_v57  ;;  %v121_v8 = vmul.f32 %v364_v20, %v51_v58  ;;  %v122_v9 = vmul.f32 %v364_v20, %v52_v59  ;;  %v70_v51 = vld [vmem:[%s868_s0 + $0x128] sm:$0xff] }
  0x26   :  { %245 = vst [vmem:[%s870_s5 + $0x40] sm:$0xff] %v181_v60  ;;  %246 = vst [vmem:[%s870_s5 + $0x48] sm:$0xff] %v182_v61  ;;  %v187_v13 = vadd.f32 %v400_v38, %v117_v4  ;;  %v188_v14 = vadd.f32 %v400_v38, %v118_v5  ;;  %v123_v15 = vmul.f32 %v364_v20, %v53_v0  ;;  %v71_v60 = vld [vmem:[%s868_s0 + $0x130] sm:$0xff]  ;;  %v72_v61 = vld [vmem:[%s868_s0 + $0x138] sm:$0xff] }
  0x27   :  { %247 = vst [vmem:[%s870_s5 + $0x50] sm:$0xff] %v183_v62  ;;  %248 = vst [vmem:[%s870_s5 + $0x58] sm:$0xff] %v184_v63  ;;  %v124_v16 = vmul.f32 %v364_v20, %v54_v1  ;;  %v189_v21 = vadd.f32 %v400_v38, %v119_v6  ;;  %v190_v22 = vadd.f32 %v400_v38, %v120_v7  ;;  %v73_v62 = vld [vmem:[%s868_s0 + $0x140] sm:$0xff]  ;;  %v75_v4 = vld [vmem:[%s868_s0 + $0x150] sm:$0xff] }
  0x28   :  { %249 = vst [vmem:[%s870_s5 + $0x60] sm:$0xff] %v185_v2  ;;  %250 = vst [vmem:[%s870_s5 + $0x68] sm:$0xff] %v186_v3  ;;  %v191_v23 = vadd.f32 %v400_v38, %v121_v8  ;;  %v192_v24 = vadd.f32 %v400_v38, %v122_v9  ;;  %v193_v27 = vadd.f32 %v400_v38, %v123_v15  ;;  %v74_v3 = vld [vmem:[%s868_s0 + $0x148] sm:$0xff]  ;;  %v76_v5 = vld [vmem:[%s868_s0 + $0x158] sm:$0xff] }
  0x29   :  { %251 = vst [vmem:[%s870_s5 + $0x70] sm:$0xff] %v187_v13  ;;  %252 = vst [vmem:[%s870_s5 + $0x78] sm:$0xff] %v188_v14  ;;  %v194_v28 = vadd.f32 %v400_v38, %v124_v16  ;;  %v125_v29 = vmul.f32 %v364_v20, %v55_v10  ;;  %v126_v30 = vmul.f32 %v364_v20, %v56_v11  ;;  %v77_v10 = vld [vmem:[%s868_s0 + $0x160] sm:$0xff]  ;;  %v78_v11 = vld [vmem:[%s868_s0 + $0x168] sm:$0xff] }
  0x2a   :  { %253 = vst [vmem:[%s870_s5 + $0x80] sm:$0xff] %v189_v21  ;;  %254 = vst [vmem:[%s870_s5 + $0x88] sm:$0xff] %v190_v22  ;;  %v127_v31 = vmul.f32 %v364_v20, %v57_v12  ;;  %v128_v32 = vmul.f32 %v364_v20, %v58_v17  ;;  %v129_v33 = vmul.f32 %v364_v20, %v59_v18  ;;  %v79_v21 = vld [vmem:[%s868_s0 + $0x170] sm:$0xff]  ;;  %v80_v22 = vld [vmem:[%s868_s0 + $0x178] sm:$0xff] }
  0x2b   :  { %255 = vst [vmem:[%s870_s5 + $0x90] sm:$0xff] %v191_v23  ;;  %256 = vst [vmem:[%s870_s5 + $0x98] sm:$0xff] %v192_v24  ;;  %v130_v34 = vmul.f32 %v364_v20, %v60_v19  ;;  %v195_v39 = vadd.f32 %v400_v38, %v125_v29  ;;  %v196_v40 = vadd.f32 %v400_v38, %v126_v30  ;;  %v81_v23 = vld [vmem:[%s868_s0 + $0x180] sm:$0xff]  ;;  %v83_v29 = vld [vmem:[%s868_s0 + $0x190] sm:$0xff] }
  0x2c   :  { %257 = vst [vmem:[%s870_s5 + $0xa0] sm:$0xff] %v193_v27  ;;  %258 = vst [vmem:[%s870_s5 + $0xa8] sm:$0xff] %v194_v28  ;;  %v131_v41 = vmul.f32 %v364_v20, %v61_v25  ;;  %v132_v42 = vmul.f32 %v364_v20, %v62_v26  ;;  %v197_v46 = vadd.f32 %v400_v38, %v127_v31  ;;  %v82_v28 = vld [vmem:[%s868_s0 + $0x188] sm:$0xff]  ;;  %v84_v30 = vld [vmem:[%s868_s0 + $0x198] sm:$0xff] }
  0x2d   :  { %v198_v47 = vadd.f32 %v400_v38, %v128_v32  ;;  %v199_v48 = vadd.f32 %v400_v38, %v129_v33  ;;  %v200_v49 = vadd.f32 %v400_v38, %v130_v34  ;;  %259 = vst [vmem:[%s870_s5 + $0xb0] sm:$0xff] %v195_v39  ;;  %260 = vst [vmem:[%s870_s5 + $0xb8] sm:$0xff] %v196_v40 }
  0x2e   :  { %v201_v52 = vadd.f32 %v400_v38, %v131_v41  ;;  %v202_v53 = vadd.f32 %v400_v38, %v132_v42  ;;  %v133_v54 = vmul.f32 %v364_v20, %v63_v35  ;;  %v134_v55 = vmul.f32 %v364_v20, %v64_v36  ;;  %261 = vst [vmem:[%s870_s5 + $0xc0] sm:$0xff] %v197_v46  ;;  %v85_v35 = vld [vmem:[%s868_s0 + $0x1a0] sm:$0xff]  ;;  %v86_v36 = vld [vmem:[%s868_s0 + $0x1a8] sm:$0xff]  ;;  %v87_v46 = vld [vmem:[%s868_s0 + $0x1b0] sm:$0xff] }
  0x2f   :  { %262 = vst [vmem:[%s870_s5 + $0xc8] sm:$0xff] %v198_v47  ;;  %263 = vst [vmem:[%s870_s5 + $0xd0] sm:$0xff] %v199_v48  ;;  %v135_v56 = vmul.f32 %v364_v20, %v65_v37  ;;  %v136_v57 = vmul.f32 %v364_v20, %v66_v43  ;;  %v137_v58 = vmul.f32 %v364_v20, %v67_v44  ;;  %v88_v47 = vld [vmem:[%s868_s0 + $0x1b8] sm:$0xff]  ;;  %v89_v48 = vld [vmem:[%s868_s0 + $0x1c0] sm:$0xff] }
  0x30   :  { %264 = vst [vmem:[%s870_s5 + $0xd8] sm:$0xff] %v200_v49  ;;  %v138_v59 = vmul.f32 %v364_v20, %v68_v45  ;;  %265 = vst [vmem:[%s870_s5 + $0xe0] sm:$0xff] %v201_v52  ;;  %v203_v63 = vadd.f32 %v400_v38, %v133_v54  ;;  %v204_v0 = vadd.f32 %v400_v38, %v134_v55  ;;  %v91_v54 = vld [vmem:[%s868_s0 + $0x1d0] sm:$0xff]  ;;  %v92_v55 = vld [vmem:[%s868_s0 + $0x1d8] sm:$0xff] }
  0x31   :  { %266 = vst [vmem:[%s870_s5 + $0xe8] sm:$0xff] %v202_v53  ;;  %v139_v1 = vmul.f32 %v364_v20, %v69_v50  ;;  %v140_v2 = vmul.f32 %v364_v20, %v70_v51  ;;  %v205_v6 = vadd.f32 %v400_v38, %v135_v56  ;;  %v206_v7 = vadd.f32 %v400_v38, %v136_v57  ;;  %v90_v53 = vld [vmem:[%s868_s0 + $0x1c8] sm:$0xff] }
  0x32   :  { %v207_v8 = vadd.f32 %v400_v38, %v137_v58  ;;  %v208_v9 = vadd.f32 %v400_v38, %v138_v59  ;;  %267 = vst [vmem:[%s870_s5 + $0xf0] sm:$0xff] %v203_v63  ;;  %268 = vst [vmem:[%s870_s5 + $0xf8] sm:$0xff] %v204_v0  ;;  %v141_v14 = vmul.f32 %v364_v20, %v71_v60  ;;  %v93_v60 = vld [vmem:[%s868_s0 + $0x1e0] sm:$0xff] }
  0x33   :  { %v209_v12 = vadd.f32 %v400_v38, %v139_v1  ;;  %v210_v13 = vadd.f32 %v400_v38, %v140_v2  ;;  %v142_v15 = vmul.f32 %v364_v20, %v72_v61  ;;  %269 = vst [vmem:[%s870_s5 + $0x100] sm:$0xff] %v205_v6  ;;  %270 = vst [vmem:[%s870_s5 + $0x108] sm:$0xff] %v206_v7  ;;  %v94_v61 = vld [vmem:[%s868_s0 + $0x1e8] sm:$0xff]  ;;  %v95_v6 = vld [vmem:[%s868_s0 + $0x1f0] sm:$0xff] }
  0x34   :  { %271 = vst [vmem:[%s870_s5 + $0x110] sm:$0xff] %v207_v8  ;;  %272 = vst [vmem:[%s870_s5 + $0x118] sm:$0xff] %v208_v9  ;;  %v143_v16 = vmul.f32 %v364_v20, %v73_v62  ;;  %v144_v17 = vmul.f32 %v364_v20, %v74_v3  ;;  %v145_v18 = vmul.f32 %v364_v20, %v75_v4  ;;  %v96_v7 = vld [vmem:[%s868_s0 + $0x1f8] sm:$0xff] }
  0x35   :  { %v146_v19 = vmul.f32 %v364_v20, %v76_v5  ;;  %273 = vst [vmem:[%s870_s5 + $0x120] sm:$0xff] %v209_v12  ;;  %274 = vst [vmem:[%s870_s5 + $0x128] sm:$0xff] %v210_v13  ;;  %v211_v24 = vadd.f32 %v400_v38, %v141_v14  ;;  %v212_v25 = vadd.f32 %v400_v38, %v142_v15 }
  0x36   :  { %v147_v26 = vmul.f32 %v364_v20, %v77_v10  ;;  %v148_v27 = vmul.f32 %v364_v20, %v78_v11  ;;  %v213_v31 = vadd.f32 %v400_v38, %v143_v16  ;;  %v214_v32 = vadd.f32 %v400_v38, %v144_v17 }
  0x37   :  { %v215_v33 = vadd.f32 %v400_v38, %v145_v18  ;;  %v216_v34 = vadd.f32 %v400_v38, %v146_v19  ;;  %275 = vst [vmem:[%s870_s5 + $0x130] sm:$0xff] %v211_v24  ;;  %276 = vst [vmem:[%s870_s5 + $0x138] sm:$0xff] %v212_v25  ;;  %v149_v40 = vmul.f32 %v364_v20, %v79_v21 }
  0x38   :  { %v217_v37 = vadd.f32 %v400_v38, %v147_v26  ;;  %v218_v39 = vadd.f32 %v400_v38, %v148_v27  ;;  %v150_v41 = vmul.f32 %v364_v20, %v80_v22  ;;  %277 = vst [vmem:[%s870_s5 + $0x140] sm:$0xff] %v213_v31  ;;  %278 = vst [vmem:[%s870_s5 + $0x148] sm:$0xff] %v214_v32 }
  0x39   :  { %279 = vst [vmem:[%s870_s5 + $0x150] sm:$0xff] %v215_v33  ;;  %280 = vst [vmem:[%s870_s5 + $0x158] sm:$0xff] %v216_v34  ;;  %v151_v42 = vmul.f32 %v364_v20, %v81_v23  ;;  %v152_v43 = vmul.f32 %v364_v20, %v82_v28  ;;  %v153_v44 = vmul.f32 %v364_v20, %v83_v29 }
  0x3a   :  { %v154_v45 = vmul.f32 %v364_v20, %v84_v30  ;;  %281 = vst [vmem:[%s870_s5 + $0x160] sm:$0xff] %v217_v37  ;;  %282 = vst [vmem:[%s870_s5 + $0x168] sm:$0xff] %v218_v39  ;;  %v219_v49 = vadd.f32 %v400_v38, %v149_v40  ;;  %v220_v50 = vadd.f32 %v400_v38, %v150_v41 }
  0x3b   :  { %v155_v51 = vmul.f32 %v364_v20, %v85_v35  ;;  %v156_v52 = vmul.f32 %v364_v20, %v86_v36  ;;  %v221_v56 = vadd.f32 %v400_v38, %v151_v42  ;;  %v222_v57 = vadd.f32 %v400_v38, %v152_v43 }
  0x3c   :  { %v223_v58 = vadd.f32 %v400_v38, %v153_v44  ;;  %v224_v59 = vadd.f32 %v400_v38, %v154_v45  ;;  %283 = vst [vmem:[%s870_s5 + $0x170] sm:$0xff] %v219_v49  ;;  %284 = vst [vmem:[%s870_s5 + $0x178] sm:$0xff] %v220_v50  ;;  %v157_v0 = vmul.f32 %v364_v20, %v87_v46 }
  0x3d   :  { %v225_v62 = vadd.f32 %v400_v38, %v155_v51  ;;  %v226_v63 = vadd.f32 %v400_v38, %v156_v52  ;;  %v158_v1 = vmul.f32 %v364_v20, %v88_v47  ;;  %285 = vst [vmem:[%s870_s5 + $0x180] sm:$0xff] %v221_v56  ;;  %286 = vst [vmem:[%s870_s5 + $0x188] sm:$0xff] %v222_v57 }
  0x3e   :  { %287 = vst [vmem:[%s870_s5 + $0x190] sm:$0xff] %v223_v58  ;;  %288 = vst [vmem:[%s870_s5 + $0x198] sm:$0xff] %v224_v59  ;;  %v159_v2 = vmul.f32 %v364_v20, %v89_v48  ;;  %v160_v3 = vmul.f32 %v364_v20, %v90_v53  ;;  %v161_v4 = vmul.f32 %v364_v20, %v91_v54 }
  0x3f   :  { %v162_v5 = vmul.f32 %v364_v20, %v92_v55  ;;  %289 = vst [vmem:[%s870_s5 + $0x1a0] sm:$0xff] %v225_v62  ;;  %290 = vst [vmem:[%s870_s5 + $0x1a8] sm:$0xff] %v226_v63  ;;  %v227_v8 = vadd.f32 %v400_v38, %v157_v0  ;;  %v228_v9 = vadd.f32 %v400_v38, %v158_v1 }
  0x40   :  { %v163_v10 = vmul.f32 %v364_v20, %v93_v60  ;;  %v164_v11 = vmul.f32 %v364_v20, %v94_v61  ;;  %v229_v12 = vadd.f32 %v400_v38, %v159_v2  ;;  %v230_v13 = vadd.f32 %v400_v38, %v160_v3 }
  0x41   :  { %v231_v14 = vadd.f32 %v400_v38, %v161_v4  ;;  %v232_v15 = vadd.f32 %v400_v38, %v162_v5  ;;  %291 = vst [vmem:[%s870_s5 + $0x1b0] sm:$0xff] %v227_v8  ;;  %292 = vst [vmem:[%s870_s5 + $0x1b8] sm:$0xff] %v228_v9  ;;  %v165_v18 = vmul.f32 %v364_v20, %v95_v6 }
  0x42   :  { %v233_v16 = vadd.f32 %v400_v38, %v163_v10  ;;  %v234_v17 = vadd.f32 %v400_v38, %v164_v11  ;;  %v166_v19 = vmul.f32 %v364_v20, %v96_v7  ;;  %293 = vst [vmem:[%s870_s5 + $0x1c0] sm:$0xff] %v229_v12  ;;  %294 = vst [vmem:[%s870_s5 + $0x1c8] sm:$0xff] %v230_v13 }
  0x43   :  { %295 = vst [vmem:[%s870_s5 + $0x1d0] sm:$0xff] %v231_v14  ;;  %296 = vst [vmem:[%s870_s5 + $0x1d8] sm:$0xff] %v232_v15  ;;  %v235_v20 = vadd.f32 %v400_v38, %v165_v18 }
  0x44   :  { %297 = vst [vmem:[%s870_s5 + $0x1e0] sm:$0xff] %v233_v16  ;;  %298 = vst [vmem:[%s870_s5 + $0x1e8] sm:$0xff] %v234_v17  ;;  %v236_v21 = vadd.f32 %v400_v38, %v166_v19 }
  0x45   :  { %299 = vst [vmem:[%s870_s5 + $0x1f0] sm:$0xff] %v235_v20 }
  0x46   :  { %300 = vst [vmem:[%s870_s5 + $0x1f8] sm:$0xff] %v236_v21 }

// kernel: fwd.47
= control target key start
LH: loop header
LB: loop body
LE: loop exit
PB: predicated region body
PF: predicated region fallthrough
CT: control target
= control target key end

     0   :  { %s2110_s12 = smov 0   ;;  %s2112_s13 = smov 0   ;;  %s2447_s0 = inlined_call_operand.vmem [shape: bf16[2048,256], index: 0, kind: input, shape index: {}]   ;;  %s2448_s1 = inlined_call_operand.vmem [shape: bf16[256,128], index: 1, kind: input, shape index: {}]   ;;  %s2449_s2 = inlined_call_operand.vmem [shape: f32[1,128], index: 2, kind: input, shape index: {}]   ;;  %s2450_s3 = inlined_call_operand.vmem [shape: f32[2048,128], index: 3, kind: output, shape index: {}]  }
   0x1   :  { %s2114_s14 = smov 0  }
   0x2 LB: > { %s25_s15 = sadd.s32 1, %s2083_s13  ;;  %p1774_p0 = scmp.ge.s32.totalorder %s2087_s14, 1  ;;  %s2087_s14 = sphi %s2114_s14, %s13_s14   ;;  %s2083_s13 = sphi %s2112_s13, %s2452_s13   ;;  %s2079_s12 = sphi %s2110_s12, %s2451_s12  }
   0x3   : > { %p27_p1 = scmp.ge.s32.totalorder %s25_s15, 4  ;;  %p169_p2 = scmp.lt.s32.totalorder %s2087_s14, 5 }
   0x5   : > { %s2454_s15 = smov (%p27_p1, %s25_s15), 0  ;;  %p170_p3 = pnand %p1774_p0, %p169_p2 }
   0x6   : > { %s1775_s18 = sshll.u32 (!%p170_p3), %s2079_s12, 6 }
   0x7   : > { %173 = sbr.rel (%p170_p3) target bundleno = 412 (0x19c), region = 32  ;;  %p205_p4 = scmp.lt.s32.totalorder (!%p170_p3), %s1775_s18, 255 }
   0xc   : > { %v1921_v0 = vld [vmem:[%s2448_s1 + $0x38] sm:$0xff]   ;;  %v2089_v1 = vmov 0   ;;  %v1922_v2 = vld [vmem:[%s2448_s1 + $0x30] sm:$0xff]   ;;  %v1923_v3 = vld [vmem:[%s2448_s1 + $0x28] sm:$0xff]   ;;  %s2456_s18 = smov (!%p205_p4, %s1775_s18), 255 }
   0xd   : > { %1000 = vmatprep.subr.bf16.mxu0 %v2089_v1  ;;  %1864 = vmatprep.subr.bf16.mxu1 %v2089_v1  ;;  %v1924_v4 = vld [vmem:[%s2448_s1 + $0x20] sm:$0xff]   ;;  %s1863_s25 = sshll.u32 %s2456_s18, 3  ;;  %v1925_v5 = vld [vmem:[%s2448_s1 + $0x18] sm:$0xff]   ;;  %v1926_v10 = vld [vmem:[%s2448_s1 + $0x10] sm:$0xff]  }
   0xe   : > { %1001 = vmatpush1.bf16.msra.mxu0 %v1921_v0  ;;  %1880 = vmatpush1.bf16.msra.mxu1 %v1921_v0  ;;  %s2156_s28 = scalar_lea.vmem %s2447_s0, %s1863_s25  ;;  %v1927_v17 = vld [vmem:[%s2448_s1 + $0x8] sm:$0xff]   ;;  %v1928_v18 = vld [vmem:[%s2448_s1] sm:$0xff]   ;;  %v1929_v19 = vld [vmem:[%s2448_s1 + $0x78] sm:$0xff]   ;;  %s2316_s8 = scalar_lea.vmem %s2450_s3, %s1863_s25 }
   0xf   : > { %1002 = vmatprep.subr.bf16.mxu0 %v2089_v1  ;;  %1865 = vmatprep.subr.bf16.mxu1 %v2089_v1  ;;  %v296_v6 = vld [vmem:[%s2156_s28] sm:$0xff]  ;;  %v297_v7 = vld [vmem:[%s2156_s28 + $0x8] sm:$0xff]  ;;  %v1930_v20 = vld [vmem:[%s2448_s1 + $0x70] sm:$0xff]  }
  0x10   : > { %v328_v8 = vld [vmem:[%s2156_s28 + $0x100] sm:$0xff]  ;;  %vm360_vm0 = vcmp.gt.bf16.partialorder %v296_v6, 0  ;;  %vm361_vm1 = vcmp.gt.bf16.partialorder %v297_v7, 0  ;;  %v329_v9 = vld [vmem:[%s2156_s28 + $0x108] sm:$0xff]  ;;  %v1933_v23 = vld [vmem:[%s2448_s1 + $0x58] sm:$0xff]  }
  0x11   : > { %vm392_vm2 = vcmp.gt.bf16.partialorder %v328_v8, 0  ;;  %v2170_v11 = vsel %vm360_vm0, %v296_v6, 0  ;;  %v2172_v12 = vsel %vm361_vm1, %v297_v7, 0  ;;  %vm393_vm3 = vcmp.gt.bf16.partialorder %v329_v9, 0  ;;  %v1931_v21 = vld [vmem:[%s2448_s1 + $0x68] sm:$0xff]   ;;  %v1932_v22 = vld [vmem:[%s2448_s1 + $0x60] sm:$0xff]  }
  0x12   : > { %1003 = vmatpush1.bf16.msra.mxu0 %v1922_v2  ;;  %1881 = vmatpush1.bf16.msra.mxu1 %v1922_v2  ;;  %v2174_v13 = vsel %vm392_vm2, %v328_v8, 0  ;;  %v1781_v14 = vcombine.high %v2170_v11, %v2172_v12  ;;  %v2180_v15 = vsel %vm393_vm3, %v329_v9, 0  ;;  %v1934_v24 = vld [vmem:[%s2448_s1 + $0x50] sm:$0xff]   ;;  %v299_v26 = vld [vmem:[%s2156_s28 + $0x18] sm:$0xff]  ;;  %v1935_v29 = vld [vmem:[%s2448_s1 + $0x48] sm:$0xff]   ;;  %v1780_v36 = vcombine.low %v2170_v11, %v2172_v12 }
  0x13   : > { %1004 = vmatprep.subr.bf16.mxu0 %v2089_v1  ;;  %1866 = vmatprep.subr.bf16.mxu1 %v2089_v1  ;;  %v1813_v16 = vcombine.high %v2174_v13, %v2180_v15  ;;  %v298_v25 = vld [vmem:[%s2156_s28 + $0x10] sm:$0xff]  ;;  %v331_v28 = vld [vmem:[%s2156_s28 + $0x118] sm:$0xff]  ;;  %vm363_vm5 = vcmp.gt.bf16.partialorder %v299_v26, 0  ;;  %v1936_v30 = vld [vmem:[%s2448_s1 + $0x40] sm:$0xff]   ;;  %v1812_v37 = vcombine.low %v2174_v13, %v2180_v15 }
  0x14   : > { %1032 = vmatprep.mubr.bf16.mxu0 %v1781_v14  ;;  %v330_v27 = vld [vmem:[%s2156_s28 + $0x110] sm:$0xff]  ;;  %vm362_vm4 = vcmp.gt.bf16.partialorder %v298_v25, 0  ;;  %vm395_vm7 = vcmp.gt.bf16.partialorder %v331_v28, 0  ;;  %v427_v32 = vsel %vm363_vm5, %v299_v26, 0  ;;  %v300_v35 = vld [vmem:[%s2156_s28 + $0x20] sm:$0xff]  ;;  %v301_v38 = vld [vmem:[%s2156_s28 + $0x28] sm:$0xff] }
  0x15   : > { %1160 = vmatprep.mubr.bf16.mxu1 %v1813_v16  ;;  %vm394_vm6 = vcmp.gt.bf16.partialorder %v330_v27, 0  ;;  %v426_v31 = vsel %vm362_vm4, %v298_v25, 0  ;;  %v459_v34 = vsel %vm395_vm7, %v331_v28, 0  ;;  %v332_v39 = vld [vmem:[%s2156_s28 + $0x120] sm:$0xff]  ;;  %v333_v40 = vld [vmem:[%s2156_s28 + $0x128] sm:$0xff]  ;;  %vm364_vm8 = vcmp.gt.bf16.partialorder %v300_v35, 0 }
  0x16   : > { %1005 = vmatpush1.bf16.msra.mxu0 %v1923_v3  ;;  %1882 = vmatpush1.bf16.msra.mxu1 %v1923_v3  ;;  %v458_v33 = vsel %vm394_vm6, %v330_v27, 0  ;;  %v1783_v41 = vcombine.high %v426_v31, %v427_v32  ;;  %vm365_vm9 = vcmp.gt.bf16.partialorder %v301_v38, 0  ;;  %vm396_vm10 = vcmp.gt.bf16.partialorder %v332_v39, 0  ;;  %v302_v47 = vld [vmem:[%s2156_s28 + $0x30] sm:$0xff]  ;;  %v303_v50 = vld [vmem:[%s2156_s28 + $0x38] sm:$0xff]  ;;  %v304_v59 = vld [vmem:[%s2156_s28 + $0x40] sm:$0xff] }
  0x17   : > { %1006 = vmatprep.subr.bf16.mxu0 %v2089_v1  ;;  %1867 = vmatprep.subr.bf16.mxu1 %v2089_v1  ;;  %v1815_v42 = vcombine.high %v458_v33, %v459_v34  ;;  %vm397_vm11 = vcmp.gt.bf16.partialorder %v333_v40, 0  ;;  %v428_v43 = vsel %vm364_vm8, %v300_v35, 0  ;;  %v429_v44 = vsel %vm365_vm9, %v301_v38, 0  ;;  %v334_v51 = vld [vmem:[%s2156_s28 + $0x130] sm:$0xff]  ;;  %v335_v52 = vld [vmem:[%s2156_s28 + $0x138] sm:$0xff]  ;;  %v305_v62 = vld [vmem:[%s2156_s28 + $0x48] sm:$0xff] }
  0x18   : > { %v460_v45 = vsel %vm396_vm10, %v332_v39, 0  ;;  %v461_v46 = vsel %vm397_vm11, %v333_v40, 0  ;;  %v1782_v48 = vcombine.low %v426_v31, %v427_v32  ;;  %v1814_v49 = vcombine.low %v458_v33, %v459_v34  ;;  %v336_v63 = vld [vmem:[%s2156_s28 + $0x140] sm:$0xff]  ;;  %v337_v0 = vld [vmem:[%s2156_s28 + $0x148] sm:$0xff]  ;;  %v306_v7 = vld [vmem:[%s2156_s28 + $0x50] sm:$0xff] }
  0x19   : > { %v1785_v53 = vcombine.high %v428_v43, %v429_v44  ;;  %v1817_v54 = vcombine.high %v460_v45, %v461_v46  ;;  %vm366_vm12 = vcmp.gt.bf16.partialorder %v302_v47, 0  ;;  %vm367_vm13 = vcmp.gt.bf16.partialorder %v303_v50, 0  ;;  %v338_v11 = vld [vmem:[%s2156_s28 + $0x150] sm:$0xff]  ;;  %v339_v12 = vld [vmem:[%s2156_s28 + $0x158] sm:$0xff] }
  0x1a   : > { %1007 = vmatpush1.bf16.msra.mxu0 %v1924_v4  ;;  %1883 = vmatpush1.bf16.msra.mxu1 %v1924_v4  ;;  %vm398_vm14 = vcmp.gt.bf16.partialorder %v334_v51, 0  ;;  %vm399_vm15 = vcmp.gt.bf16.partialorder %v335_v52, 0  ;;  %v430_v55 = vsel %vm366_vm12, %v302_v47, 0  ;;  %v431_v56 = vsel %vm367_vm13, %v303_v50, 0  ;;  %v310_v31 = vld [vmem:[%s2156_s28 + $0x70] sm:$0xff]  ;;  %v311_v34 = vld [vmem:[%s2156_s28 + $0x78] sm:$0xff] }
  0x1b   : > { %1008 = vmatprep.subr.bf16.mxu0 %v2089_v1  ;;  %1868 = vmatprep.subr.bf16.mxu1 %v2089_v1  ;;  %v462_v57 = vsel %vm398_vm14, %v334_v51, 0  ;;  %v463_v58 = vsel %vm399_vm15, %v335_v52, 0  ;;  %v1784_v60 = vcombine.low %v428_v43, %v429_v44  ;;  %v1816_v61 = vcombine.low %v460_v45, %v461_v46  ;;  %v342_v35 = vld [vmem:[%s2156_s28 + $0x170] sm:$0xff]  ;;  %v312_v43 = vld [vmem:[%s2156_s28 + $0x80] sm:$0xff]  ;;  %v313_v46 = vld [vmem:[%s2156_s28 + $0x88] sm:$0xff] }
  0x1c   : > { %v1819_v2 = vcombine.high %v462_v57, %v463_v58  ;;  %vm368_vm0 = vcmp.gt.bf16.partialorder %v304_v59, 0  ;;  %vm369_vm1 = vcmp.gt.bf16.partialorder %v305_v62, 0  ;;  %vm400_vm2 = vcmp.gt.bf16.partialorder %v336_v63, 0  ;;  %v344_v47 = vld [vmem:[%s2156_s28 + $0x180] sm:$0xff] }
  0x1d   : > { %vm401_vm3 = vcmp.gt.bf16.partialorder %v337_v0, 0  ;;  %v432_v3 = vsel %vm368_vm0, %v304_v59, 0  ;;  %v433_v4 = vsel %vm369_vm1, %v305_v62, 0  ;;  %v1786_v8 = vcombine.low %v430_v55, %v431_v56  ;;  %v346_v59 = vld [vmem:[%s2156_s28 + $0x190] sm:$0xff] }
  0x1e   : > { %1009 = vmatpush1.bf16.msra.mxu0 %v1925_v5  ;;  %1884 = vmatpush1.bf16.msra.mxu1 %v1925_v5  ;;  %v464_v5 = vsel %vm400_vm2, %v336_v63, 0  ;;  %v465_v6 = vsel %vm401_vm3, %v337_v0, 0  ;;  %v1818_v9 = vcombine.low %v462_v57, %v463_v58  ;;  %v1789_v13 = vcombine.high %v432_v3, %v433_v4  ;;  %v315_v58 = vld [vmem:[%s2156_s28 + $0x98] sm:$0xff] }
  0x1f   : > { %1010 = vmatprep.subr.bf16.mxu0 %v2089_v1  ;;  %1869 = vmatprep.subr.bf16.mxu1 %v2089_v1  ;;  %v1821_v14 = vcombine.high %v464_v5, %v465_v6  ;;  %vm370_vm4 = vcmp.gt.bf16.partialorder %v306_v7, 0  ;;  %vm402_vm6 = vcmp.gt.bf16.partialorder %v338_v11, 0  ;;  %vm403_vm7 = vcmp.gt.bf16.partialorder %v339_v12, 0 }
  0x20   : > { %v434_v15 = vsel %vm370_vm4, %v306_v7, 0  ;;  %vm374_vm12 = vcmp.gt.bf16.partialorder %v310_v31, 0  ;;  %vm375_vm13 = vcmp.gt.bf16.partialorder %v311_v34, 0  ;;  %vm406_vm14 = vcmp.gt.bf16.partialorder %v342_v35, 0  ;;  %v348_v7 = vld [vmem:[%s2156_s28 + $0x1a0] sm:$0xff] }
  0x21   : > { %v438_v39 = vsel %vm374_vm12, %v310_v31, 0  ;;  %v439_v40 = vsel %vm375_vm13, %v311_v34, 0  ;;  %vm376_vm0 = vcmp.gt.bf16.partialorder %v312_v43, 0  ;;  %vm377_vm1 = vcmp.gt.bf16.partialorder %v313_v46, 0  ;;  %v352_v31 = vld [vmem:[%s2156_s28 + $0x1c0] sm:$0xff] }
  0x22   : > { %1011 = vmatpush1.bf16.msra.mxu0 %v1926_v10  ;;  %1885 = vmatpush1.bf16.msra.mxu1 %v1926_v10  ;;  %v307_v10 = vld [vmem:[%s2156_s28 + $0x58] sm:$0xff]  ;;  %vm408_vm2 = vcmp.gt.bf16.partialorder %v344_v47, 0  ;;  %v440_v51 = vsel %vm376_vm0, %v312_v43, 0  ;;  %v441_v52 = vsel %vm377_vm1, %v313_v46, 0  ;;  %v354_v43 = vld [vmem:[%s2156_s28 + $0x1d0] sm:$0xff] }
  0x23   : > { %1012 = vmatprep.subr.bf16.mxu0 %v2089_v1  ;;  %1870 = vmatprep.subr.bf16.mxu1 %v2089_v1  ;;  %vm371_vm5 = vcmp.gt.bf16.partialorder %v307_v10, 0 }
  0x24   : > { %v435_v16 = vsel %vm371_vm5, %v307_v10, 0  ;;  %vm379_vm5 = vcmp.gt.bf16.partialorder %v315_v58, 0 }
  0x25   : > { %v1791_v25 = vcombine.high %v434_v15, %v435_v16  ;;  %v1790_v32 = vcombine.low %v434_v15, %v435_v16  ;;  %v443_v0 = vsel %vm379_vm5, %v315_v58, 0  ;;  %v318_v15 = vld [vmem:[%s2156_s28 + $0xb0] sm:$0xff] }
  0x26   : > { %1013 = vmatpush1.bf16.msra.mxu0 %v1927_v17  ;;  %1886 = vmatpush1.bf16.msra.mxu1 %v1927_v17  ;;  %v466_v17 = vsel %vm402_vm6, %v338_v11, 0  ;;  %vm410_vm6 = vcmp.gt.bf16.partialorder %v346_v59, 0  ;;  %vm382_vm12 = vcmp.gt.bf16.partialorder %v318_v15, 0 }
  0x27   : > { %1014 = vmatprep.subr.bf16.mxu0 %v2089_v1  ;;  %1871 = vmatprep.subr.bf16.mxu1 %v2089_v1 }
  0x2a   : > { %1015 = vmatpush1.bf16.msra.mxu0 %v1928_v18  ;;  %1887 = vmatpush1.bf16.msra.mxu1 %v1928_v18  ;;  %v467_v18 = vsel %vm403_vm7, %v339_v12, 0 }
  0x2b   : > { %1016 = vmatprep.subr.bf16.mxu0 %v2089_v1  ;;  %1872 = vmatprep.subr.bf16.mxu1 %v2089_v1  ;;  %v1823_v26 = vcombine.high %v466_v17, %v467_v18  ;;  %v1822_v33 = vcombine.low %v466_v17, %v467_v18  ;;  %v319_v18 = vld [vmem:[%s2156_s28 + $0xb8] sm:$0xff] }
  0x2c   : > { %vm383_vm13 = vcmp.gt.bf16.partialorder %v319_v18, 0 }
  0x2e   : > { %1017 = vmatpush2.bf16.msra.mxu0 %v1929_v19  ;;  %1888 = vmatpush2.bf16.msra.mxu1 %v1929_v19  ;;  %v308_v19 = vld [vmem:[%s2156_s28 + $0x60] sm:$0xff] }
  0x2f   : > { %1018 = vmatprep.subr.bf16.mxu0 %v2089_v1  ;;  %1873 = vmatprep.subr.bf16.mxu1 %v2089_v1  ;;  %vm372_vm8 = vcmp.gt.bf16.partialorder %v308_v19, 0 }
  0x30   : > { %v436_v27 = vsel %vm372_vm8, %v308_v19, 0  ;;  %v350_v19 = vld [vmem:[%s2156_s28 + $0x1b0] sm:$0xff] }
  0x32   : > { %1019 = vmatpush2.bf16.msra.mxu0 %v1930_v20  ;;  %1889 = vmatpush2.bf16.msra.mxu1 %v1930_v20  ;;  %v1788_v20 = vcombine.low %v432_v3, %v433_v4  ;;  %v316_v3 = vld [vmem:[%s2156_s28 + $0xa0] sm:$0xff]  ;;  %v1796_v4 = vcombine.low %v440_v51, %v441_v52 }
  0x33   : > { %1020 = vmatprep.subr.bf16.mxu0 %v2089_v1  ;;  %1874 = vmatprep.subr.bf16.mxu1 %v2089_v1  ;;  %vm380_vm8 = vcmp.gt.bf16.partialorder %v316_v3, 0 }
  0x34   : > { %v444_v11 = vsel %vm380_vm8, %v316_v3, 0  ;;  %v358_v3 = vld [vmem:[%s2156_s28 + $0x1f0] sm:$0xff] }
  0x36   : > { %1021 = vmatpush2.bf16.msra.mxu0 %v1931_v21  ;;  %1890 = vmatpush2.bf16.msra.mxu1 %v1931_v21  ;;  %v1820_v21 = vcombine.low %v464_v5, %v465_v6  ;;  %v317_v6 = vld [vmem:[%s2156_s28 + $0xa8] sm:$0xff] }
  0x37   : > { %1022 = vmatprep.subr.bf16.mxu0 %v2089_v1  ;;  %1875 = vmatprep.subr.bf16.mxu1 %v2089_v1 }
  0x3a   : > { %1023 = vmatpush2.bf16.msra.mxu0 %v1932_v22  ;;  %1891 = vmatpush2.bf16.msra.mxu1 %v1932_v22  ;;  %v309_v22 = vld [vmem:[%s2156_s28 + $0x68] sm:$0xff] }
  0x3b   : > { %1024 = vmatprep.subr.bf16.mxu0 %v2089_v1  ;;  %1876 = vmatprep.subr.bf16.mxu1 %v2089_v1  ;;  %vm373_vm9 = vcmp.gt.bf16.partialorder %v309_v22, 0 }
  0x3c   : > { %v437_v28 = vsel %vm373_vm9, %v309_v22, 0  ;;  %vm381_vm9 = vcmp.gt.bf16.partialorder %v317_v6, 0 }
  0x3d   : > { %v1792_v44 = vcombine.low %v436_v27, %v437_v28  ;;  %v445_v12 = vsel %vm381_vm9, %v317_v6, 0 }
  0x3e   : > { %1025 = vmatpush2.bf16.msra.mxu0 %v1933_v23  ;;  %1892 = vmatpush2.bf16.msra.mxu1 %v1933_v23  ;;  %v340_v23 = vld [vmem:[%s2156_s28 + $0x160] sm:$0xff] }
  0x3f   : > { %1026 = vmatprep.subr.bf16.mxu0 %v2089_v1  ;;  %1877 = vmatprep.subr.bf16.mxu1 %v2089_v1  ;;  %vm404_vm10 = vcmp.gt.bf16.partialorder %v340_v23, 0 }
  0x42   : > { %1027 = vmatpush2.bf16.msra.mxu0 %v1934_v24  ;;  %1893 = vmatpush2.bf16.msra.mxu1 %v1934_v24  ;;  %v341_v24 = vld [vmem:[%s2156_s28 + $0x168] sm:$0xff] }
  0x43   : > { %1028 = vmatprep.subr.bf16.mxu0 %v2089_v1  ;;  %1878 = vmatprep.subr.bf16.mxu1 %v2089_v1  ;;  %vm405_vm11 = vcmp.gt.bf16.partialorder %v341_v24, 0 }
  0x46   : > { %1029 = vmatpush2.bf16.msra.mxu0 %v1935_v29  ;;  %1894 = vmatpush2.bf16.msra.mxu1 %v1935_v29  ;;  %v468_v29 = vsel %vm404_vm10, %v340_v23, 0  ;;  %vm412_vm10 = vcmp.gt.bf16.partialorder %v348_v7, 0  ;;  %v446_v23 = vsel %vm382_vm12, %v318_v15, 0 }
  0x47   : > { %1030 = vmatprep.subr.bf16.mxu0 %v2089_v1  ;;  %1879 = vmatprep.subr.bf16.mxu1 %v2089_v1  ;;  %v1787_v1 = vcombine.high %v430_v55, %v431_v56  ;;  %v314_v55 = vld [vmem:[%s2156_s28 + $0x90] sm:$0xff]  ;;  %v1794_v56 = vcombine.low %v438_v39, %v439_v40 }
  0x48   : > { %vm378_vm4 = vcmp.gt.bf16.partialorder %v314_v55, 0 }
  0x49   : > { %v442_v63 = vsel %vm378_vm4, %v314_v55, 0  ;;  %v356_v55 = vld [vmem:[%s2156_s28 + $0x1e0] sm:$0xff] }
  0x4a   : > { %1031 = vmatpush2.bf16.msra.mxu0 %v1936_v30  ;;  %1895 = vmatpush2.bf16.msra.mxu1 %v1936_v30  ;;  %v469_v30 = vsel %vm405_vm11, %v341_v24, 0  ;;  %v1798_v16 = vcombine.low %v442_v63, %v443_v0  ;;  %v447_v24 = vsel %vm383_vm13, %v319_v18, 0 }
  0x4b   : > { %v1825_v38 = vcombine.high %v468_v29, %v469_v30  ;;  %v1824_v45 = vcombine.low %v468_v29, %v469_v30  ;;  %v321_v30 = vld [vmem:[%s2156_s28 + $0xc8] sm:$0xff] }
  0x4c   : > { %vm385_vm1 = vcmp.gt.bf16.partialorder %v321_v30, 0 }
  0x4d   : > { %1033 = vmatmul.mubr.bf16.vlgmr.msra.gmra.mxu0 %v1780_v36  ;;  %1161 = vmatmul.mubr.bf16.vlgmr.msra.gmra.mxu1 %v1812_v37  ;;  %v343_v36 = vld [vmem:[%s2156_s28 + $0x178] sm:$0xff]  ;;  %v1793_v37 = vcombine.high %v436_v27, %v437_v28  ;;  %v320_v27 = vld [vmem:[%s2156_s28 + $0xc0] sm:$0xff]  ;;  %v1800_v28 = vcombine.low %v444_v11, %v445_v12 }
  0x4e   : > { %1040 = vmatprep.mubr.bf16.mxu0 %v1783_v41  ;;  %1168 = vmatprep.mubr.bf16.mxu1 %v1815_v42  ;;  %vm407_vm15 = vcmp.gt.bf16.partialorder %v343_v36, 0  ;;  %v470_v41 = vsel %vm406_vm14, %v342_v35, 0  ;;  %vm414_vm14 = vcmp.gt.bf16.partialorder %v350_v19, 0  ;;  %vm384_vm0 = vcmp.gt.bf16.partialorder %v320_v27, 0 }
  0x4f   : > { %v471_v42 = vsel %vm407_vm15, %v343_v36, 0  ;;  %v448_v35 = vsel %vm384_vm0, %v320_v27, 0  ;;  %v449_v36 = vsel %vm385_vm1, %v321_v30, 0 }
  0x50   : > { %v1827_v50 = vcombine.high %v470_v41, %v471_v42  ;;  %v1826_v57 = vcombine.low %v470_v41, %v471_v42  ;;  %v323_v42 = vld [vmem:[%s2156_s28 + $0xd8] sm:$0xff] }
  0x51   : > { %vm387_vm5 = vcmp.gt.bf16.partialorder %v323_v42, 0 }
  0x55   : > { %1041 = vmatmul.mubr.bf16.gmra.mxu0 %v1782_v48  ;;  %1169 = vmatmul.mubr.bf16.gmra.mxu1 %v1814_v49  ;;  %v345_v48 = vld [vmem:[%s2156_s28 + $0x188] sm:$0xff]  ;;  %v1795_v49 = vcombine.high %v438_v39, %v439_v40  ;;  %v322_v39 = vld [vmem:[%s2156_s28 + $0xd0] sm:$0xff]  ;;  %v1802_v40 = vcombine.low %v446_v23, %v447_v24 }
  0x56   : > { %1048 = vmatprep.mubr.bf16.mxu0 %v1785_v53  ;;  %1176 = vmatprep.mubr.bf16.mxu1 %v1817_v54  ;;  %vm409_vm3 = vcmp.gt.bf16.partialorder %v345_v48, 0  ;;  %v472_v53 = vsel %vm408_vm2, %v344_v47, 0  ;;  %vm416_vm2 = vcmp.gt.bf16.partialorder %v352_v31, 0  ;;  %vm386_vm4 = vcmp.gt.bf16.partialorder %v322_v39, 0 }
  0x57   : > { %v473_v54 = vsel %vm409_vm3, %v345_v48, 0  ;;  %v450_v47 = vsel %vm386_vm4, %v322_v39, 0  ;;  %v451_v48 = vsel %vm387_vm5, %v323_v42, 0 }
  0x58   : > { %v1829_v62 = vcombine.high %v472_v53, %v473_v54  ;;  %v1828_v5 = vcombine.low %v472_v53, %v473_v54  ;;  %v325_v54 = vld [vmem:[%s2156_s28 + $0xe8] sm:$0xff] }
  0x59   : > { %vm389_vm9 = vcmp.gt.bf16.partialorder %v325_v54, 0 }
  0x5d   : > { %1049 = vmatmul.mubr.bf16.gmra.mxu0 %v1784_v60  ;;  %1177 = vmatmul.mubr.bf16.gmra.mxu1 %v1816_v61  ;;  %v347_v60 = vld [vmem:[%s2156_s28 + $0x198] sm:$0xff]  ;;  %v1797_v61 = vcombine.high %v440_v51, %v441_v52  ;;  %v324_v51 = vld [vmem:[%s2156_s28 + $0xe0] sm:$0xff]  ;;  %v1804_v52 = vcombine.low %v448_v35, %v449_v36 }
  0x5e   : > { %1056 = vmatprep.mubr.bf16.mxu0 %v1787_v1  ;;  %1184 = vmatprep.mubr.bf16.mxu1 %v1819_v2  ;;  %vm411_vm7 = vcmp.gt.bf16.partialorder %v347_v60, 0  ;;  %v474_v1 = vsel %vm410_vm6, %v346_v59, 0  ;;  %vm418_vm6 = vcmp.gt.bf16.partialorder %v354_v43, 0  ;;  %vm388_vm8 = vcmp.gt.bf16.partialorder %v324_v51, 0 }
  0x5f   : > { %v475_v2 = vsel %vm411_vm7, %v347_v60, 0  ;;  %v452_v59 = vsel %vm388_vm8, %v324_v51, 0  ;;  %v453_v60 = vsel %vm389_vm9, %v325_v54, 0 }
  0x60   : > { %v1831_v10 = vcombine.high %v474_v1, %v475_v2  ;;  %v1830_v17 = vcombine.low %v474_v1, %v475_v2  ;;  %v327_v2 = vld [vmem:[%s2156_s28 + $0xf8] sm:$0xff] }
  0x61   : > { %vm391_vm13 = vcmp.gt.bf16.partialorder %v327_v2, 0 }
  0x65   : > { %1057 = vmatmul.mubr.bf16.gmra.mxu0 %v1786_v8  ;;  %1185 = vmatmul.mubr.bf16.gmra.mxu1 %v1818_v9  ;;  %v349_v8 = vld [vmem:[%s2156_s28 + $0x1a8] sm:$0xff]  ;;  %v1799_v9 = vcombine.high %v442_v63, %v443_v0  ;;  %v326_v63 = vld [vmem:[%s2156_s28 + $0xf0] sm:$0xff]  ;;  %v1806_v0 = vcombine.low %v450_v47, %v451_v48 }
  0x66   : > { %1064 = vmatprep.mubr.bf16.mxu0 %v1789_v13  ;;  %1192 = vmatprep.mubr.bf16.mxu1 %v1821_v14  ;;  %vm413_vm11 = vcmp.gt.bf16.partialorder %v349_v8, 0  ;;  %v476_v13 = vsel %vm412_vm10, %v348_v7, 0  ;;  %vm420_vm10 = vcmp.gt.bf16.partialorder %v356_v55, 0  ;;  %vm390_vm12 = vcmp.gt.bf16.partialorder %v326_v63, 0 }
  0x67   : > { %v477_v14 = vsel %vm413_vm11, %v349_v8, 0  ;;  %v454_v7 = vsel %vm390_vm12, %v326_v63, 0  ;;  %v455_v8 = vsel %vm391_vm13, %v327_v2, 0 }
  0x68   : > { %v1833_v22 = vcombine.high %v476_v13, %v477_v14  ;;  %v1832_v29 = vcombine.low %v476_v13, %v477_v14  ;;  %v1811_v13 = vcombine.high %v454_v7, %v455_v8  ;;  %v1810_v15 = vcombine.low %v454_v7, %v455_v8 }
  0x6d   : > { %1065 = vmatmul.mubr.bf16.gmra.mxu0 %v1788_v20  ;;  %1193 = vmatmul.mubr.bf16.gmra.mxu1 %v1820_v21  ;;  %v351_v20 = vld [vmem:[%s2156_s28 + $0x1b8] sm:$0xff]  ;;  %v1801_v21 = vcombine.high %v444_v11, %v445_v12  ;;  %v1808_v11 = vcombine.low %v452_v59, %v453_v60 }
  0x6e   : > { %1072 = vmatprep.mubr.bf16.mxu0 %v1791_v25  ;;  %1200 = vmatprep.mubr.bf16.mxu1 %v1823_v26  ;;  %vm415_vm15 = vcmp.gt.bf16.partialorder %v351_v20, 0  ;;  %v478_v25 = vsel %vm414_vm14, %v350_v19, 0  ;;  %vm422_vm14 = vcmp.gt.bf16.partialorder %v358_v3, 0 }
  0x6f   : > { %v479_v26 = vsel %vm415_vm15, %v351_v20, 0 }
  0x70   : > { %v1835_v34 = vcombine.high %v478_v25, %v479_v26  ;;  %v1834_v41 = vcombine.low %v478_v25, %v479_v26 }
  0x75   : > { %1073 = vmatmul.mubr.bf16.gmra.mxu0 %v1790_v32  ;;  %1201 = vmatmul.mubr.bf16.gmra.mxu1 %v1822_v33  ;;  %v353_v32 = vld [vmem:[%s2156_s28 + $0x1c8] sm:$0xff]  ;;  %v1803_v33 = vcombine.high %v446_v23, %v447_v24 }
  0x76   : > { %1080 = vmatprep.mubr.bf16.mxu0 %v1793_v37  ;;  %1208 = vmatprep.mubr.bf16.mxu1 %v1825_v38  ;;  %vm417_vm3 = vcmp.gt.bf16.partialorder %v353_v32, 0  ;;  %v480_v37 = vsel %vm416_vm2, %v352_v31, 0 }
  0x77   : > { %v481_v38 = vsel %vm417_vm3, %v353_v32, 0 }
  0x78   : > { %v1837_v46 = vcombine.high %v480_v37, %v481_v38  ;;  %v1836_v53 = vcombine.low %v480_v37, %v481_v38 }
  0x7d   : > { %1081 = vmatmul.mubr.bf16.gmra.mxu0 %v1792_v44  ;;  %1209 = vmatmul.mubr.bf16.gmra.mxu1 %v1824_v45  ;;  %v355_v44 = vld [vmem:[%s2156_s28 + $0x1d8] sm:$0xff]  ;;  %v1805_v45 = vcombine.high %v448_v35, %v449_v36 }
  0x7e   : > { %1088 = vmatprep.mubr.bf16.mxu0 %v1795_v49  ;;  %1216 = vmatprep.mubr.bf16.mxu1 %v1827_v50  ;;  %vm419_vm7 = vcmp.gt.bf16.partialorder %v355_v44, 0  ;;  %v482_v49 = vsel %vm418_vm6, %v354_v43, 0 }
  0x7f   : > { %v483_v50 = vsel %vm419_vm7, %v355_v44, 0 }
  0x80   : > { %v1839_v58 = vcombine.high %v482_v49, %v483_v50  ;;  %v1838_v1 = vcombine.low %v482_v49, %v483_v50 }
  0x85   : > { %1089 = vmatmul.mubr.bf16.gmra.mxu0 %v1794_v56  ;;  %1217 = vmatmul.mubr.bf16.gmra.mxu1 %v1826_v57  ;;  %v357_v56 = vld [vmem:[%s2156_s28 + $0x1e8] sm:$0xff]  ;;  %v1807_v57 = vcombine.high %v450_v47, %v451_v48 }
  0x86   : > { %1096 = vmatprep.mubr.bf16.mxu0 %v1797_v61  ;;  %1224 = vmatprep.mubr.bf16.mxu1 %v1829_v62  ;;  %vm421_vm11 = vcmp.gt.bf16.partialorder %v357_v56, 0  ;;  %v484_v61 = vsel %vm420_vm10, %v356_v55, 0 }
  0x87   : > { %v485_v62 = vsel %vm421_vm11, %v357_v56, 0 }
  0x88   : > { %v1841_v6 = vcombine.high %v484_v61, %v485_v62  ;;  %v1840_v12 = vcombine.low %v484_v61, %v485_v62 }
  0x8d   : > { %1097 = vmatmul.mubr.bf16.gmra.mxu0 %v1796_v4  ;;  %1225 = vmatmul.mubr.bf16.gmra.mxu1 %v1828_v5  ;;  %v359_v4 = vld [vmem:[%s2156_s28 + $0x1f8] sm:$0xff]  ;;  %v1809_v5 = vcombine.high %v452_v59, %v453_v60 }
  0x8e   : > { %1104 = vmatprep.mubr.bf16.mxu0 %v1799_v9  ;;  %1232 = vmatprep.mubr.bf16.mxu1 %v1831_v10  ;;  %vm423_vm15 = vcmp.gt.bf16.partialorder %v359_v4, 0  ;;  %v486_v9 = vsel %vm422_vm14, %v358_v3, 0 }
  0x8f   : > { %v487_v10 = vsel %vm423_vm15, %v359_v4, 0 }
  0x90   : > { %v1843_v14 = vcombine.high %v486_v9, %v487_v10 }
  0x95   : > { %1105 = vmatmul.mubr.bf16.gmra.mxu0 %v1798_v16  ;;  %1233 = vmatmul.mubr.bf16.gmra.mxu1 %v1830_v17  ;;  %v1842_v16 = vcombine.low %v486_v9, %v487_v10  ;;  %v2301_v17 = vld [vmem:[%s2449_s2] ss:$0 sm:$0xff] }
  0x96   : > { %1112 = vmatprep.mubr.bf16.mxu0 %v1801_v21  ;;  %1240 = vmatprep.mubr.bf16.mxu1 %v1833_v22 }
  0x9d   : > { %1113 = vmatmul.mubr.bf16.gmra.mxu0 %v1800_v28  ;;  %1241 = vmatmul.mubr.bf16.gmra.mxu1 %v1832_v29 }
  0x9e   : > { %1120 = vmatprep.mubr.bf16.mxu0 %v1803_v33  ;;  %1248 = vmatprep.mubr.bf16.mxu1 %v1835_v34 }
  0xa5   : > { %1121 = vmatmul.mubr.bf16.gmra.mxu0 %v1802_v40  ;;  %1249 = vmatmul.mubr.bf16.gmra.mxu1 %v1834_v41 }
  0xa6   : > { %1128 = vmatprep.mubr.bf16.mxu0 %v1805_v45  ;;  %1256 = vmatprep.mubr.bf16.mxu1 %v1837_v46 }
  0xad   : > { %1129 = vmatmul.mubr.bf16.gmra.mxu0 %v1804_v52  ;;  %1257 = vmatmul.mubr.bf16.gmra.mxu1 %v1836_v53 }
  0xae   : > { %1136 = vmatprep.mubr.bf16.mxu0 %v1807_v57  ;;  %1264 = vmatprep.mubr.bf16.mxu1 %v1839_v58 }
  0xb5   : > { %1137 = vmatmul.mubr.bf16.gmra.mxu0 %v1806_v0  ;;  %1265 = vmatmul.mubr.bf16.gmra.mxu1 %v1838_v1 }
  0xb6   : > { %1144 = vmatprep.mubr.bf16.mxu0 %v1809_v5  ;;  %1272 = vmatprep.mubr.bf16.mxu1 %v1841_v6 }
  0xbd   : > { %1145 = vmatmul.mubr.bf16.gmra.mxu0 %v1808_v11  ;;  %1273 = vmatmul.mubr.bf16.gmra.mxu1 %v1840_v12 }
  0xbe   : > { %1152 = vmatprep.mubr.bf16.mxu0 %v1811_v13  ;;  %1280 = vmatprep.mubr.bf16.mxu1 %v1843_v14 }
  0xc5   : > { %1153 = vmatmul.mubr.bf16.gmra.mxu0 %v1810_v15  ;;  %1281 = vmatmul.mubr.bf16.gmra.mxu1 %v1842_v16 }
 0x10d   : > { %v1034_v18 = vpop.f32.mrf.mxu0  ;;  %v1162_v19 = vpop.f32.mrf.mxu1 }
 0x10e   : > { %v1491_v20 = vadd.f32 %v2301_v17, %v1034_v18  ;;  %v1523_v21 = vadd.f32 %v2301_v17, %v1162_v19 }
 0x10f   : > { %v1036_v22 = vpop.f32.mrf.mxu0  ;;  %v1164_v23 = vpop.f32.mrf.mxu1 }
 0x110   : > { %1937 = vtanh.f32 %v1491_v20 }
 0x111   : > { %1939 = vtanh.f32 %v1523_v21  ;;  %v1037_v24 = vpop.f32.mrf.mxu0  ;;  %v1165_v25 = vpop.f32.mrf.mxu1 }
 0x112   : > { %v1492_v26 = vadd.f32 %v2301_v17, %v1037_v24  ;;  %v1524_v27 = vadd.f32 %v2301_v17, %v1165_v25 }
 0x113   : > { %v1039_v28 = vpop.f32.mrf.mxu0  ;;  %v1167_v29 = vpop.f32.mrf.mxu1 }
 0x114   : > { %1941 = vtanh.f32 %v1492_v26 }
 0x115   : > { %1943 = vtanh.f32 %v1524_v27  ;;  %v1042_v30 = vpop.f32.mrf.mxu0  ;;  %v1170_v31 = vpop.f32.mrf.mxu1 }
 0x116   : > { %v1493_v32 = vadd.f32 %v2301_v17, %v1042_v30  ;;  %v1525_v33 = vadd.f32 %v2301_v17, %v1170_v31 }
 0x117   : > { %v1044_v34 = vpop.f32.mrf.mxu0  ;;  %v1172_v35 = vpop.f32.mrf.mxu1 }
 0x118   : > { %1945 = vtanh.f32 %v1493_v32 }
 0x119   : > { %1947 = vtanh.f32 %v1525_v33  ;;  %v1045_v36 = vpop.f32.mrf.mxu0  ;;  %v1173_v37 = vpop.f32.mrf.mxu1 }
 0x11a   : > { %v1494_v38 = vadd.f32 %v2301_v17, %v1045_v36  ;;  %v1526_v39 = vadd.f32 %v2301_v17, %v1173_v37 }
 0x11b   : > { %v1047_v40 = vpop.f32.mrf.mxu0  ;;  %v1175_v41 = vpop.f32.mrf.mxu1 }
 0x11c   : > { %1949 = vtanh.f32 %v1494_v38 }
 0x11d   : > { %v1938_v42 = vpop.eup %1937  ;;  %1951 = vtanh.f32 %v1526_v39  ;;  %v1050_v43 = vpop.f32.mrf.mxu0 }
 0x11e   : > { %v1178_v44 = vpop.f32.mrf.mxu1  ;;  %v1940_v45 = vpop.eup %1939  ;;  %1619 = vst [vmem:[%s2316_s8] sm:$0xff] %v1938_v42  ;;  %v1495_v46 = vadd.f32 %v2301_v17, %v1050_v43 }
 0x11f   : > { %v1527_v47 = vadd.f32 %v2301_v17, %v1178_v44  ;;  %1651 = vst [vmem:[%s2316_s8 + $0x100] sm:$0xff] %v1940_v45  ;;  %v1052_v48 = vpop.f32.mrf.mxu0 }
 0x120   : > { %v1180_v49 = vpop.f32.mrf.mxu1  ;;  %1953 = vtanh.f32 %v1495_v46 }
 0x121   : > { %v1942_v50 = vpop.eup %1941  ;;  %1955 = vtanh.f32 %v1527_v47  ;;  %v1053_v51 = vpop.f32.mrf.mxu0 }
 0x122   : > { %v1181_v52 = vpop.f32.mrf.mxu1  ;;  %v1944_v53 = vpop.eup %1943  ;;  %1620 = vst [vmem:[%s2316_s8 + $0x8] sm:$0xff] %v1942_v50  ;;  %v1496_v54 = vadd.f32 %v2301_v17, %v1053_v51 }
 0x123   : > { %v1528_v55 = vadd.f32 %v2301_v17, %v1181_v52  ;;  %1652 = vst [vmem:[%s2316_s8 + $0x108] sm:$0xff] %v1944_v53  ;;  %v1055_v56 = vpop.f32.mrf.mxu0 }
 0x124   : > { %v1183_v57 = vpop.f32.mrf.mxu1  ;;  %1957 = vtanh.f32 %v1496_v54 }
 0x125   : > { %v1946_v58 = vpop.eup %1945  ;;  %1959 = vtanh.f32 %v1528_v55  ;;  %v1058_v59 = vpop.f32.mrf.mxu0 }
 0x126   : > { %v1186_v60 = vpop.f32.mrf.mxu1  ;;  %v1948_v61 = vpop.eup %1947  ;;  %1621 = vst [vmem:[%s2316_s8 + $0x10] sm:$0xff] %v1946_v58  ;;  %v1497_v62 = vadd.f32 %v2301_v17, %v1058_v59 }
 0x127   : > { %v1529_v63 = vadd.f32 %v2301_v17, %v1186_v60  ;;  %1653 = vst [vmem:[%s2316_s8 + $0x110] sm:$0xff] %v1948_v61  ;;  %v1060_v0 = vpop.f32.mrf.mxu0 }
 0x128   : > { %v1188_v1 = vpop.f32.mrf.mxu1  ;;  %1961 = vtanh.f32 %v1497_v62 }
 0x129   : > { %v1950_v2 = vpop.eup %1949  ;;  %1963 = vtanh.f32 %v1529_v63  ;;  %v1061_v3 = vpop.f32.mrf.mxu0 }
 0x12a   : > { %v1189_v4 = vpop.f32.mrf.mxu1  ;;  %v1952_v5 = vpop.eup %1951  ;;  %1622 = vst [vmem:[%s2316_s8 + $0x18] sm:$0xff] %v1950_v2  ;;  %v1498_v6 = vadd.f32 %v2301_v17, %v1061_v3 }
 0x12b   : > { %v1530_v7 = vadd.f32 %v2301_v17, %v1189_v4  ;;  %1654 = vst [vmem:[%s2316_s8 + $0x118] sm:$0xff] %v1952_v5  ;;  %v1063_v8 = vpop.f32.mrf.mxu0 }
 0x12c   : > { %v1191_v9 = vpop.f32.mrf.mxu1  ;;  %1965 = vtanh.f32 %v1498_v6 }
 0x12d   : > { %v1954_v10 = vpop.eup %1953  ;;  %1967 = vtanh.f32 %v1530_v7  ;;  %v1066_v11 = vpop.f32.mrf.mxu0 }
 0x12e   : > { %v1194_v12 = vpop.f32.mrf.mxu1  ;;  %v1956_v13 = vpop.eup %1955  ;;  %1623 = vst [vmem:[%s2316_s8 + $0x20] sm:$0xff] %v1954_v10  ;;  %v1499_v14 = vadd.f32 %v2301_v17, %v1066_v11 }
 0x12f   : > { %v1531_v15 = vadd.f32 %v2301_v17, %v1194_v12  ;;  %1655 = vst [vmem:[%s2316_s8 + $0x120] sm:$0xff] %v1956_v13  ;;  %v1068_v16 = vpop.f32.mrf.mxu0 }
 0x130   : > { %v1196_v18 = vpop.f32.mrf.mxu1  ;;  %1969 = vtanh.f32 %v1499_v14 }
 0x131   : > { %v1958_v19 = vpop.eup %1957  ;;  %1971 = vtanh.f32 %v1531_v15  ;;  %v1069_v20 = vpop.f32.mrf.mxu0 }
 0x132   : > { %v1197_v21 = vpop.f32.mrf.mxu1  ;;  %v1960_v22 = vpop.eup %1959  ;;  %1624 = vst [vmem:[%s2316_s8 + $0x28] sm:$0xff] %v1958_v19  ;;  %v1500_v23 = vadd.f32 %v2301_v17, %v1069_v20 }
 0x133   : > { %v1532_v24 = vadd.f32 %v2301_v17, %v1197_v21  ;;  %1656 = vst [vmem:[%s2316_s8 + $0x128] sm:$0xff] %v1960_v22  ;;  %v1071_v25 = vpop.f32.mrf.mxu0 }
 0x134   : > { %v1199_v26 = vpop.f32.mrf.mxu1  ;;  %1973 = vtanh.f32 %v1500_v23 }
 0x135   : > { %v1962_v27 = vpop.eup %1961  ;;  %1975 = vtanh.f32 %v1532_v24  ;;  %v1074_v28 = vpop.f32.mrf.mxu0 }
 0x136   : > { %v1202_v29 = vpop.f32.mrf.mxu1  ;;  %v1964_v30 = vpop.eup %1963  ;;  %1625 = vst [vmem:[%s2316_s8 + $0x30] sm:$0xff] %v1962_v27  ;;  %v1501_v31 = vadd.f32 %v2301_v17, %v1074_v28 }
 0x137   : > { %v1533_v32 = vadd.f32 %v2301_v17, %v1202_v29  ;;  %1657 = vst [vmem:[%s2316_s8 + $0x130] sm:$0xff] %v1964_v30  ;;  %v1076_v33 = vpop.f32.mrf.mxu0 }
 0x138   : > { %v1204_v34 = vpop.f32.mrf.mxu1  ;;  %1977 = vtanh.f32 %v1501_v31 }
 0x139   : > { %v1966_v35 = vpop.eup %1965  ;;  %1979 = vtanh.f32 %v1533_v32  ;;  %v1077_v36 = vpop.f32.mrf.mxu0 }
 0x13a   : > { %v1205_v37 = vpop.f32.mrf.mxu1  ;;  %v1968_v38 = vpop.eup %1967  ;;  %1626 = vst [vmem:[%s2316_s8 + $0x38] sm:$0xff] %v1966_v35  ;;  %v1502_v39 = vadd.f32 %v2301_v17, %v1077_v36 }
 0x13b   : > { %v1534_v40 = vadd.f32 %v2301_v17, %v1205_v37  ;;  %1658 = vst [vmem:[%s2316_s8 + $0x138] sm:$0xff] %v1968_v38  ;;  %v1079_v41 = vpop.f32.mrf.mxu0 }
 0x13c   : > { %v1207_v42 = vpop.f32.mrf.mxu1  ;;  %1981 = vtanh.f32 %v1502_v39 }
 0x13d   : > { %v1970_v43 = vpop.eup %1969  ;;  %1983 = vtanh.f32 %v1534_v40  ;;  %v1082_v44 = vpop.f32.mrf.mxu0 }
 0x13e   : > { %v1210_v45 = vpop.f32.mrf.mxu1  ;;  %v1972_v46 = vpop.eup %1971  ;;  %1627 = vst [vmem:[%s2316_s8 + $0x40] sm:$0xff] %v1970_v43  ;;  %v1503_v47 = vadd.f32 %v2301_v17, %v1082_v44 }
 0x13f   : > { %v1535_v48 = vadd.f32 %v2301_v17, %v1210_v45  ;;  %1659 = vst [vmem:[%s2316_s8 + $0x140] sm:$0xff] %v1972_v46  ;;  %v1084_v49 = vpop.f32.mrf.mxu0 }
 0x140   : > { %v1212_v50 = vpop.f32.mrf.mxu1  ;;  %1985 = vtanh.f32 %v1503_v47 }
 0x141   : > { %v1974_v51 = vpop.eup %1973  ;;  %1987 = vtanh.f32 %v1535_v48  ;;  %v1085_v52 = vpop.f32.mrf.mxu0 }
 0x142   : > { %v1213_v53 = vpop.f32.mrf.mxu1  ;;  %v1976_v54 = vpop.eup %1975  ;;  %1628 = vst [vmem:[%s2316_s8 + $0x48] sm:$0xff] %v1974_v51  ;;  %v1504_v55 = vadd.f32 %v2301_v17, %v1085_v52 }
 0x143   : > { %v1536_v56 = vadd.f32 %v2301_v17, %v1213_v53  ;;  %1660 = vst [vmem:[%s2316_s8 + $0x148] sm:$0xff] %v1976_v54  ;;  %v1087_v57 = vpop.f32.mrf.mxu0 }
 0x144   : > { %v1215_v58 = vpop.f32.mrf.mxu1  ;;  %1989 = vtanh.f32 %v1504_v55 }
 0x145   : > { %v1978_v59 = vpop.eup %1977  ;;  %1991 = vtanh.f32 %v1536_v56  ;;  %v1090_v60 = vpop.f32.mrf.mxu0 }
 0x146   : > { %v1218_v61 = vpop.f32.mrf.mxu1  ;;  %v1980_v62 = vpop.eup %1979  ;;  %1629 = vst [vmem:[%s2316_s8 + $0x50] sm:$0xff] %v1978_v59  ;;  %v1505_v63 = vadd.f32 %v2301_v17, %v1090_v60 }
 0x147   : > { %v1537_v0 = vadd.f32 %v2301_v17, %v1218_v61  ;;  %1661 = vst [vmem:[%s2316_s8 + $0x150] sm:$0xff] %v1980_v62  ;;  %v1092_v1 = vpop.f32.mrf.mxu0 }
 0x148   : > { %v1220_v2 = vpop.f32.mrf.mxu1  ;;  %1993 = vtanh.f32 %v1505_v63 }
 0x149   : > { %v1982_v3 = vpop.eup %1981  ;;  %1995 = vtanh.f32 %v1537_v0  ;;  %v1093_v4 = vpop.f32.mrf.mxu0 }
 0x14a   : > { %v1221_v5 = vpop.f32.mrf.mxu1  ;;  %v1984_v6 = vpop.eup %1983  ;;  %1630 = vst [vmem:[%s2316_s8 + $0x58] sm:$0xff] %v1982_v3  ;;  %v1506_v7 = vadd.f32 %v2301_v17, %v1093_v4 }
 0x14b   : > { %v1538_v8 = vadd.f32 %v2301_v17, %v1221_v5  ;;  %1662 = vst [vmem:[%s2316_s8 + $0x158] sm:$0xff] %v1984_v6  ;;  %v1095_v9 = vpop.f32.mrf.mxu0 }
 0x14c   : > { %v1223_v10 = vpop.f32.mrf.mxu1  ;;  %1997 = vtanh.f32 %v1506_v7 }
 0x14d   : > { %v1986_v11 = vpop.eup %1985  ;;  %1999 = vtanh.f32 %v1538_v8  ;;  %v1098_v12 = vpop.f32.mrf.mxu0 }
 0x14e   : > { %v1226_v13 = vpop.f32.mrf.mxu1  ;;  %v1988_v14 = vpop.eup %1987  ;;  %1631 = vst [vmem:[%s2316_s8 + $0x60] sm:$0xff] %v1986_v11  ;;  %v1507_v15 = vadd.f32 %v2301_v17, %v1098_v12 }
 0x14f   : > { %v1539_v16 = vadd.f32 %v2301_v17, %v1226_v13  ;;  %1663 = vst [vmem:[%s2316_s8 + $0x160] sm:$0xff] %v1988_v14  ;;  %v1100_v18 = vpop.f32.mrf.mxu0 }
 0x150   : > { %v1228_v19 = vpop.f32.mrf.mxu1  ;;  %2001 = vtanh.f32 %v1507_v15 }
 0x151   : > { %v1990_v20 = vpop.eup %1989  ;;  %2003 = vtanh.f32 %v1539_v16  ;;  %v1101_v21 = vpop.f32.mrf.mxu0 }
 0x152   : > { %v1229_v22 = vpop.f32.mrf.mxu1  ;;  %v1992_v23 = vpop.eup %1991  ;;  %1632 = vst [vmem:[%s2316_s8 + $0x68] sm:$0xff] %v1990_v20  ;;  %v1508_v24 = vadd.f32 %v2301_v17, %v1101_v21 }
 0x153   : > { %v1540_v25 = vadd.f32 %v2301_v17, %v1229_v22  ;;  %1664 = vst [vmem:[%s2316_s8 + $0x168] sm:$0xff] %v1992_v23  ;;  %v1103_v26 = vpop.f32.mrf.mxu0 }
 0x154   : > { %v1231_v27 = vpop.f32.mrf.mxu1  ;;  %2005 = vtanh.f32 %v1508_v24 }
 0x155   : > { %v1994_v28 = vpop.eup %1993  ;;  %2007 = vtanh.f32 %v1540_v25  ;;  %v1106_v29 = vpop.f32.mrf.mxu0 }
 0x156   : > { %v1234_v30 = vpop.f32.mrf.mxu1  ;;  %v1996_v31 = vpop.eup %1995  ;;  %1633 = vst [vmem:[%s2316_s8 + $0x70] sm:$0xff] %v1994_v28  ;;  %v1509_v32 = vadd.f32 %v2301_v17, %v1106_v29 }
 0x157   : > { %v1541_v33 = vadd.f32 %v2301_v17, %v1234_v30  ;;  %1665 = vst [vmem:[%s2316_s8 + $0x170] sm:$0xff] %v1996_v31  ;;  %v1108_v34 = vpop.f32.mrf.mxu0 }
 0x158   : > { %v1236_v35 = vpop.f32.mrf.mxu1  ;;  %2009 = vtanh.f32 %v1509_v32 }
 0x159   : > { %v1998_v36 = vpop.eup %1997  ;;  %2011 = vtanh.f32 %v1541_v33  ;;  %v1109_v37 = vpop.f32.mrf.mxu0 }
 0x15a   : > { %v1237_v38 = vpop.f32.mrf.mxu1  ;;  %v2000_v39 = vpop.eup %1999  ;;  %1634 = vst [vmem:[%s2316_s8 + $0x78] sm:$0xff] %v1998_v36  ;;  %v1510_v40 = vadd.f32 %v2301_v17, %v1109_v37 }
 0x15b   : > { %v1542_v41 = vadd.f32 %v2301_v17, %v1237_v38  ;;  %1666 = vst [vmem:[%s2316_s8 + $0x178] sm:$0xff] %v2000_v39  ;;  %v1111_v42 = vpop.f32.mrf.mxu0 }
 0x15c   : > { %v1239_v43 = vpop.f32.mrf.mxu1  ;;  %2013 = vtanh.f32 %v1510_v40 }
 0x15d   : > { %v2002_v44 = vpop.eup %2001  ;;  %2015 = vtanh.f32 %v1542_v41  ;;  %v1114_v45 = vpop.f32.mrf.mxu0 }
 0x15e   : > { %v1242_v46 = vpop.f32.mrf.mxu1  ;;  %v2004_v47 = vpop.eup %2003  ;;  %1635 = vst [vmem:[%s2316_s8 + $0x80] sm:$0xff] %v2002_v44  ;;  %v1511_v48 = vadd.f32 %v2301_v17, %v1114_v45 }
 0x15f   : > { %v1543_v49 = vadd.f32 %v2301_v17, %v1242_v46  ;;  %1667 = vst [vmem:[%s2316_s8 + $0x180] sm:$0xff] %v2004_v47  ;;  %v1116_v50 = vpop.f32.mrf.mxu0 }
 0x160   : > { %v1244_v51 = vpop.f32.mrf.mxu1  ;;  %2017 = vtanh.f32 %v1511_v48 }
 0x161   : > { %v2006_v52 = vpop.eup %2005  ;;  %2019 = vtanh.f32 %v1543_v49  ;;  %v1117_v53 = vpop.f32.mrf.mxu0 }
 0x162   : > { %v1245_v54 = vpop.f32.mrf.mxu1  ;;  %v2008_v55 = vpop.eup %2007  ;;  %1636 = vst [vmem:[%s2316_s8 + $0x88] sm:$0xff] %v2006_v52  ;;  %v1512_v56 = vadd.f32 %v2301_v17, %v1117_v53 }
 0x163   : > { %v1544_v57 = vadd.f32 %v2301_v17, %v1245_v54  ;;  %1668 = vst [vmem:[%s2316_s8 + $0x188] sm:$0xff] %v2008_v55  ;;  %v1119_v58 = vpop.f32.mrf.mxu0 }
 0x164   : > { %v1247_v59 = vpop.f32.mrf.mxu1  ;;  %2021 = vtanh.f32 %v1512_v56 }
 0x165   : > { %v2010_v60 = vpop.eup %2009  ;;  %2023 = vtanh.f32 %v1544_v57  ;;  %v1122_v61 = vpop.f32.mrf.mxu0 }
 0x166   : > { %v1250_v62 = vpop.f32.mrf.mxu1  ;;  %v2012_v63 = vpop.eup %2011  ;;  %1637 = vst [vmem:[%s2316_s8 + $0x90] sm:$0xff] %v2010_v60  ;;  %v1513_v0 = vadd.f32 %v2301_v17, %v1122_v61 }
 0x167   : > { %v1545_v1 = vadd.f32 %v2301_v17, %v1250_v62  ;;  %1669 = vst [vmem:[%s2316_s8 + $0x190] sm:$0xff] %v2012_v63  ;;  %v1124_v2 = vpop.f32.mrf.mxu0 }
 0x168   : > { %v1252_v3 = vpop.f32.mrf.mxu1  ;;  %2025 = vtanh.f32 %v1513_v0 }
 0x169   : > { %v2014_v4 = vpop.eup %2013  ;;  %2027 = vtanh.f32 %v1545_v1  ;;  %v1125_v5 = vpop.f32.mrf.mxu0 }
 0x16a   : > { %v1253_v6 = vpop.f32.mrf.mxu1  ;;  %v2016_v7 = vpop.eup %2015  ;;  %1638 = vst [vmem:[%s2316_s8 + $0x98] sm:$0xff] %v2014_v4  ;;  %v1514_v8 = vadd.f32 %v2301_v17, %v1125_v5 }
 0x16b   : > { %v1546_v9 = vadd.f32 %v2301_v17, %v1253_v6  ;;  %1670 = vst [vmem:[%s2316_s8 + $0x198] sm:$0xff] %v2016_v7  ;;  %v1127_v10 = vpop.f32.mrf.mxu0 }
 0x16c   : > { %v1255_v11 = vpop.f32.mrf.mxu1  ;;  %2029 = vtanh.f32 %v1514_v8 }
 0x16d   : > { %v2018_v12 = vpop.eup %2017  ;;  %2031 = vtanh.f32 %v1546_v9  ;;  %v1130_v13 = vpop.f32.mrf.mxu0 }
 0x16e   : > { %v1258_v14 = vpop.f32.mrf.mxu1  ;;  %v2020_v15 = vpop.eup %2019  ;;  %1639 = vst [vmem:[%s2316_s8 + $0xa0] sm:$0xff] %v2018_v12  ;;  %v1515_v16 = vadd.f32 %v2301_v17, %v1130_v13 }
 0x16f   : > { %v1547_v18 = vadd.f32 %v2301_v17, %v1258_v14  ;;  %1671 = vst [vmem:[%s2316_s8 + $0x1a0] sm:$0xff] %v2020_v15  ;;  %v1132_v19 = vpop.f32.mrf.mxu0 }
 0x170   : > { %v1260_v20 = vpop.f32.mrf.mxu1  ;;  %2033 = vtanh.f32 %v1515_v16 }
 0x171   : > { %v2022_v21 = vpop.eup %2021  ;;  %2035 = vtanh.f32 %v1547_v18  ;;  %v1133_v22 = vpop.f32.mrf.mxu0 }
 0x172   : > { %v1261_v23 = vpop.f32.mrf.mxu1  ;;  %v2024_v24 = vpop.eup %2023  ;;  %1640 = vst [vmem:[%s2316_s8 + $0xa8] sm:$0xff] %v2022_v21  ;;  %v1516_v25 = vadd.f32 %v2301_v17, %v1133_v22 }
 0x173   : > { %v1548_v26 = vadd.f32 %v2301_v17, %v1261_v23  ;;  %1672 = vst [vmem:[%s2316_s8 + $0x1a8] sm:$0xff] %v2024_v24  ;;  %v1135_v27 = vpop.f32.mrf.mxu0 }
 0x174   : > { %v1263_v28 = vpop.f32.mrf.mxu1  ;;  %2037 = vtanh.f32 %v1516_v25 }
 0x175   : > { %v2026_v29 = vpop.eup %2025  ;;  %2039 = vtanh.f32 %v1548_v26  ;;  %v1138_v30 = vpop.f32.mrf.mxu0 }
 0x176   : > { %v1266_v31 = vpop.f32.mrf.mxu1  ;;  %v2028_v32 = vpop.eup %2027  ;;  %1641 = vst [vmem:[%s2316_s8 + $0xb0] sm:$0xff] %v2026_v29  ;;  %v1517_v33 = vadd.f32 %v2301_v17, %v1138_v30 }
 0x177   : > { %v1549_v34 = vadd.f32 %v2301_v17, %v1266_v31  ;;  %1673 = vst [vmem:[%s2316_s8 + $0x1b0] sm:$0xff] %v2028_v32  ;;  %v1140_v35 = vpop.f32.mrf.mxu0 }
 0x178   : > { %v1268_v36 = vpop.f32.mrf.mxu1  ;;  %2041 = vtanh.f32 %v1517_v33 }
 0x179   : > { %v2030_v37 = vpop.eup %2029  ;;  %2043 = vtanh.f32 %v1549_v34  ;;  %v1141_v38 = vpop.f32.mrf.mxu0 }
 0x17a   : > { %v1269_v39 = vpop.f32.mrf.mxu1  ;;  %v2032_v40 = vpop.eup %2031  ;;  %1642 = vst [vmem:[%s2316_s8 + $0xb8] sm:$0xff] %v2030_v37  ;;  %v1518_v41 = vadd.f32 %v2301_v17, %v1141_v38 }
 0x17b   : > { %v1550_v42 = vadd.f32 %v2301_v17, %v1269_v39  ;;  %1674 = vst [vmem:[%s2316_s8 + $0x1b8] sm:$0xff] %v2032_v40  ;;  %v1143_v43 = vpop.f32.mrf.mxu0 }
 0x17c   : > { %v1271_v44 = vpop.f32.mrf.mxu1  ;;  %2045 = vtanh.f32 %v1518_v41 }
 0x17d   : > { %v2034_v45 = vpop.eup %2033  ;;  %2047 = vtanh.f32 %v1550_v42  ;;  %v1146_v46 = vpop.f32.mrf.mxu0 }
 0x17e   : > { %v1274_v47 = vpop.f32.mrf.mxu1  ;;  %v2036_v48 = vpop.eup %2035  ;;  %1643 = vst [vmem:[%s2316_s8 + $0xc0] sm:$0xff] %v2034_v45  ;;  %v1519_v49 = vadd.f32 %v2301_v17, %v1146_v46 }
 0x17f   : > { %v1551_v50 = vadd.f32 %v2301_v17, %v1274_v47  ;;  %1675 = vst [vmem:[%s2316_s8 + $0x1c0] sm:$0xff] %v2036_v48  ;;  %v1148_v51 = vpop.f32.mrf.mxu0 }
 0x180   : > { %v1276_v52 = vpop.f32.mrf.mxu1  ;;  %2049 = vtanh.f32 %v1519_v49 }
 0x181   : > { %v2038_v53 = vpop.eup %2037  ;;  %2051 = vtanh.f32 %v1551_v50  ;;  %v1149_v54 = vpop.f32.mrf.mxu0 }
 0x182   : > { %v1277_v55 = vpop.f32.mrf.mxu1  ;;  %v2040_v56 = vpop.eup %2039  ;;  %1644 = vst [vmem:[%s2316_s8 + $0xc8] sm:$0xff] %v2038_v53  ;;  %v1520_v57 = vadd.f32 %v2301_v17, %v1149_v54 }
 0x183   : > { %v1552_v58 = vadd.f32 %v2301_v17, %v1277_v55  ;;  %1676 = vst [vmem:[%s2316_s8 + $0x1c8] sm:$0xff] %v2040_v56  ;;  %v1151_v59 = vpop.f32.mrf.mxu0 }
 0x184   : > { %v1279_v60 = vpop.f32.mrf.mxu1  ;;  %2053 = vtanh.f32 %v1520_v57 }
 0x185   : > { %v2042_v61 = vpop.eup %2041  ;;  %2055 = vtanh.f32 %v1552_v58  ;;  %v1154_v62 = vpop.f32.mrf.mxu0 }
 0x186   : > { %v1282_v63 = vpop.f32.mrf.mxu1  ;;  %v2044_v0 = vpop.eup %2043  ;;  %1645 = vst [vmem:[%s2316_s8 + $0xd0] sm:$0xff] %v2042_v61  ;;  %v1521_v1 = vadd.f32 %v2301_v17, %v1154_v62 }
 0x187   : > { %v1553_v2 = vadd.f32 %v2301_v17, %v1282_v63  ;;  %1677 = vst [vmem:[%s2316_s8 + $0x1d0] sm:$0xff] %v2044_v0  ;;  %v1156_v3 = vpop.f32.mrf.mxu0 }
 0x188   : > { %v1284_v4 = vpop.f32.mrf.mxu1  ;;  %2057 = vtanh.f32 %v1521_v1 }
 0x189   : > { %v2046_v5 = vpop.eup %2045  ;;  %2059 = vtanh.f32 %v1553_v2  ;;  %v1157_v6 = vpop.f32.mrf.mxu0 }
 0x18a   : > { %v1285_v7 = vpop.f32.mrf.mxu1  ;;  %v2048_v8 = vpop.eup %2047  ;;  %1646 = vst [vmem:[%s2316_s8 + $0xd8] sm:$0xff] %v2046_v5  ;;  %v1522_v9 = vadd.f32 %v2301_v17, %v1157_v6 }
 0x18b   : > { %v1554_v10 = vadd.f32 %v2301_v17, %v1285_v7  ;;  %1678 = vst [vmem:[%s2316_s8 + $0x1d8] sm:$0xff] %v2048_v8  ;;  %v1159_v11 = vpop.f32.mrf.mxu0 }
 0x18c   : > { %v1287_v12 = vpop.f32.mrf.mxu1  ;;  %2061 = vtanh.f32 %v1522_v9 }
 0x18d   : > { %v2050_v13 = vpop.eup %2049  ;;  %2063 = vtanh.f32 %v1554_v10 }
 0x18e   : > { %v2052_v14 = vpop.eup %2051  ;;  %1647 = vst [vmem:[%s2316_s8 + $0xe0] sm:$0xff] %v2050_v13 }
 0x18f   : > { %1679 = vst [vmem:[%s2316_s8 + $0x1e0] sm:$0xff] %v2052_v14 }
 0x191   : > { %v2054_v15 = vpop.eup %2053 }
 0x192   : > { %v2056_v16 = vpop.eup %2055  ;;  %1648 = vst [vmem:[%s2316_s8 + $0xe8] sm:$0xff] %v2054_v15 }
 0x193   : > { %1680 = vst [vmem:[%s2316_s8 + $0x1e8] sm:$0xff] %v2056_v16 }
 0x195   : > { %v2058_v18 = vpop.eup %2057 }
 0x196   : > { %v2060_v19 = vpop.eup %2059  ;;  %1649 = vst [vmem:[%s2316_s8 + $0xf0] sm:$0xff] %v2058_v18 }
 0x197   : > { %1681 = vst [vmem:[%s2316_s8 + $0x1f0] sm:$0xff] %v2060_v19 }
 0x199   : > { %v2062_v17 = vpop.eup %2061 }
 0x19a   : > { %v2064_v20 = vpop.eup %2063  ;;  %1650 = vst [vmem:[%s2316_s8 + $0xf8] sm:$0xff] %v2062_v17 }
 0x19b   : > { %1682 = vst [vmem:[%s2316_s8 + $0x1f8] sm:$0xff] %v2064_v20 }
 0x19c PF: > { %s13_s14 = sadd.s32 1, %s2087_s14   ;;  %s2451_s12 = smov %s2083_s13 }
 0x19d   : > { %p10_p5 = scmp.ge.s32.totalorder %s13_s14, 6   ;;  %s2452_s13 = smov %s2454_s15 }
 0x19f   :  { %12 = sbr.rel (!%p10_p5) target bundleno = 2 (0x2), region = 73 }

</bundles_post_ra>
